<compile_context>
chip_gen: v6e
topology: v6e:2x2x1
jax: 0.10.0
libtpu: 0.0.40
codegen_flags: <defaults>
</compile_context>

<pallas_src>
import math

import jax
import jax.numpy as jnp
from jax.experimental import pallas as pl
from jax.experimental.pallas import tpu as pltpu


def _rup(x, m):
    return ((x + m - 1) // m) * m


def decoder_kernel(
    feat_ref,                     # (TB, Pp, E)   zero-padded features
    wa_proj_ref,                  # (TB, Pp, H)   hoisted features @ W_a + b_a
    favg_ref,                     # (TB, E)       mean over the *valid* P pixels
    embp_ref,                     # (1, TB, 4H)   hoisted emb_t @ W_ih_emb
    winit_ref, binit_ref,         # (E, 2H), (1, 2H)    [W_h | W_c], [b_h | b_c]
    whf_ref, bhf_ref,             # (H, Ha+Ea+4H), (1, Ha+Ea+4H)  fused h-LHS weights
    va_ref, bvp_ref,              # (1, H), (1, Pp)  attention V row, masked b_v
    wic_ref,                      # (E, 4H)      W_ih for the gated context
    wo_ref, bo_ref,               # (H, Vp), (1, Vp)
    pred_ref,                     # out: (1, TB, Vp)
    alpha_ref,                    # out: (1, TB, Pp)
    h_sc, c_sc,                   # scratch: (TB, H) each
):
    t = pl.program_id(1)
    TB, H = h_sc.shape
    E = favg_ref.shape[1]
    Ha = _rup(H, 128)             # aligned segment offsets inside the fused h matmul
    Ea = _rup(E, 128)

    # ---- initial hidden / cell state (first T-step of each batch tile) ----
    @pl.when(t == 0)
    def _():
        hc0 = jnp.tanh(
            jnp.dot(favg_ref[...], winit_ref[...],
                    preferred_element_type=jnp.float32) + binit_ref[...])
        h_sc[...] = hc0[:, :H]
        c_sc[...] = hc0[:, H:]

    h = h_sc[...]                                          # (TB, H)
    c = c_sc[...]                                          # (TB, H)

    # ---- single fused matmul for everything with LHS == h ----
    #   columns [0:H)      -> U_a h + b_u        (attention)
    #   columns [Ha:Ha+E)  -> W_f h + b_f        (context gate)
    #   columns [Ha+Ea: )  -> W_hh h + b_lstm    (LSTM recurrent term)
    hproj = jnp.dot(h, whf_ref[...],
                    preferred_element_type=jnp.float32) + bhf_ref[...]
    ua = hproj[:, :H]                                      # (TB, H)
    gate = jax.nn.sigmoid(hproj[:, Ha:Ha + E])             # (TB, E)
    whh_b = hproj[:, Ha + Ea:]                             # (TB, 4H)

    # ---- attention (pre-projection hoisted; padded P masked via bvp) ----
    att = jnp.tanh(wa_proj_ref[...] + ua[:, None, :])      # (TB, Pp, H)
    e = jnp.sum(att * va_ref[...], axis=-1) + bvp_ref[...]  # (TB, Pp)
    e = e - jnp.max(e, axis=1, keepdims=True)
    ex = jnp.exp(e)
    denom = jnp.sum(ex, axis=1, keepdims=True)             # (TB, 1)
    inv = pl.reciprocal(denom, approx=True)                # EUP slot
    inv = inv * (2.0 - denom * inv)                        # one Newton step -> f32 accuracy
    alpha = ex * inv                                        # softmax over P
    context = jnp.sum(feat_ref[...] * alpha[:, :, None], axis=1)   # (TB, E)

    gated = gate * context                                  # (TB, E)

    # ---- LSTM cell (gate order i, f, g, o — PyTorch convention) ----
    gates = (embp_ref[0]
             + jnp.dot(gated, wic_ref[...], preferred_element_type=jnp.float32)
             + whh_b)                                       # (TB, 4H)
    i_g = jax.nn.sigmoid(gates[:, 0 * H:1 * H])
    f_g = jax.nn.sigmoid(gates[:, 1 * H:2 * H])
    g_g = jnp.tanh(gates[:, 2 * H:3 * H])
    o_g = jax.nn.sigmoid(gates[:, 3 * H:4 * H])
    c_new = f_g * c + i_g * g_g
    h_new = o_g * jnp.tanh(c_new)
    h_sc[...] = h_new
    c_sc[...] = c_new

    # ---- output projection (lane-dense Vp) ----
    pred_ref[0] = jax.nn.sigmoid(
        jnp.dot(h_new, wo_ref[...], preferred_element_type=jnp.float32) + bo_ref[...])
    alpha_ref[0] = alpha


def make_params(key, E, V, H):
    ks = jax.random.split(key, 20)

    def unif(k, shape, lim):
        return jax.random.uniform(k, shape, jnp.float32, -lim, lim)

    rH, rE, rHE, rV = 1.0 / math.sqrt(H), 1.0 / math.sqrt(E), 1.0 / math.sqrt(H + E), 1.0 / math.sqrt(V)
    return dict(
        emb=unif(ks[0], (V, H), 0.003),
        wh=unif(ks[1], (E, H), rH), bh=unif(ks[2], (1, H), rE),
        wc=unif(ks[3], (E, H), rH), bc=unif(ks[4], (1, H), rE),
        wa=unif(ks[5], (E, H), rH), ba=unif(ks[6], (1, H), rE),
        ua=unif(ks[7], (H, H), rH), bu=unif(ks[8], (1, H), rH),
        va=unif(ks[9], (1, H), 0.003), bv=unif(ks[10], (1, 1), rH),
        wf=unif(ks[11], (H, E), rE), bf=unif(ks[12], (1, E), rH),
        wih_e=unif(ks[13], (H, 4 * H), rHE), wih_c=unif(ks[14], (E, 4 * H), rHE),
        whh=unif(ks[15], (H, 4 * H), rHE), bl=unif(ks[16], (1, 4 * H), rHE),
        wo=unif(ks[17], (H, V), rV), bo=unif(ks[18], (1, V), rH),
    )


def decoder_forward(params, features, captions):
    B, P, E = features.shape
    T = captions.shape[1]
    H = params["wh"].shape[1]
    V = params["wo"].shape[1]
    f32 = jnp.float32

    # ---------- padding for sublane/lane density ----------
    TB = 8                                   # batch tile (sublane multiple, megacore unit)
    B_pad = _rup(B, TB)
    P_pad = _rup(P, 128)                     # alpha output lane dim
    V_pad = _rup(V, 128)                     # prediction output lane dim
    Ha, Ea = _rup(H, 128), _rup(E, 128)      # aligned segments of the fused h matmul

    featp = jnp.zeros((B_pad, P_pad, E), f32).at[:B, :P, :].set(features)
    favg = jnp.zeros((B_pad, E), f32).at[:B].set(features.mean(axis=1))

    # Hoisted, loop-invariant attention pre-projection: features @ W_a + b_a.
    wa_proj = jnp.einsum("bpe,eh->bph", featp, params["wa"]) + params["ba"]     # (B_pad, P_pad, H)

    # Teacher-forcing embedding sequence (glue): step 0 uses token 0, step t>=1 uses
    # captions[:, t-1]; its W_ih projection is hoisted as one batched matmul.
    prev = jnp.concatenate(
        [jnp.zeros((B, 1), jnp.int32), captions[:, :T - 1].astype(jnp.int32)], axis=1)
    prevp = jnp.zeros((B_pad, T), jnp.int32).at[:B].set(prev)
    emb_seq = params["emb"][prevp]                                              # (B_pad, T, H)
    emb_proj = jnp.einsum("bth,hg->tbg", emb_seq, params["wih_e"])              # (T, B_pad, 4H)

    # Fused weights.
    w_init = jnp.concatenate([params["wh"], params["wc"]], axis=1)              # (E, 2H)
    b_init = jnp.concatenate([params["bh"], params["bc"]], axis=1)              # (1, 2H)

    W = Ha + Ea + 4 * H
    w_hfused = jnp.zeros((H, W), f32)
    w_hfused = (w_hfused.at[:, :H].set(params["ua"])
                        .at[:, Ha:Ha + E].set(params["wf"])
                        .at[:, Ha + Ea:].set(params["whh"]))
    b_hfused = jnp.zeros((1, W), f32)
    b_hfused = (b_hfused.at[:, :H].set(params["bu"])
                        .at[:, Ha:Ha + E].set(params["bf"])
                        .at[:, Ha + Ea:].set(params["bl"]))

    va = params["va"]                                                           # (1, H)
    bvp = jnp.full((1, P_pad), -1e30, f32).at[:, :P].set(params["bv"][0, 0])    # masked b_v
    wih_c = params["wih_c"]                                                     # (E, 4H)
    wo_pad = jnp.zeros((H, V_pad), f32).at[:, :V].set(params["wo"])
    bo_pad = jnp.zeros((1, V_pad), f32).at[:, :V].set(params["bo"])

    # ---------- BlockSpecs ----------
    def const_spec(shape):
        nd = len(shape)
        return pl.BlockSpec(shape, lambda b, t, _nd=nd: (0,) * _nd)

    in_specs = [
        pl.BlockSpec((TB, P_pad, E), lambda b, t: (b, 0, 0)),     # featp
        pl.BlockSpec((TB, P_pad, H), lambda b, t: (b, 0, 0)),     # wa_proj
        pl.BlockSpec((TB, E), lambda b, t: (b, 0)),               # favg
        pl.BlockSpec((1, TB, 4 * H), lambda b, t: (t, b, 0)),     # emb_proj
        const_spec(w_init.shape), const_spec(b_init.shape),
        const_spec(w_hfused.shape), const_spec(b_hfused.shape),
        const_spec(va.shape), const_spec(bvp.shape),
        const_spec(wih_c.shape),
        const_spec(wo_pad.shape), const_spec(bo_pad.shape),
    ]
    out_specs = [
        pl.BlockSpec((1, TB, V_pad), lambda b, t: (t, b, 0)),
        pl.BlockSpec((1, TB, P_pad), lambda b, t: (t, b, 0)),
    ]

    call = pl.pallas_call(
        decoder_kernel,
        out_shape=(jax.ShapeDtypeStruct((T, B_pad, V_pad), f32),
                   jax.ShapeDtypeStruct((T, B_pad, P_pad), f32)),
        grid_spec=pltpu.PrefetchScalarGridSpec(
            num_scalar_prefetch=0,
            grid=(B_pad // TB, T),                 # (parallel batch tiles, sequential T)
            in_specs=in_specs,
            out_specs=out_specs,
            scratch_shapes=[pltpu.VMEM((TB, H), f32),
                            pltpu.VMEM((TB, H), f32)],
        ),
        compiler_params=pltpu.CompilerParams(
            dimension_semantics=("parallel", "arbitrary"),
            vmem_limit_bytes=32 * 1024 * 1024,
        ),
    )
    preds_tbv, alphas_tbp = call(featp, wa_proj, favg, emb_proj,
                                 w_init, b_init, w_hfused, b_hfused,
                                 va, bvp, wih_c, wo_pad, bo_pad)
    preds = jnp.transpose(preds_tbv, (1, 0, 2))[:B, :, :V]
    alphas = jnp.transpose(alphas_tbp, (1, 0, 2))[:B, :, :P]
    return preds, alphas


def decoder_reference(p, features, captions):
    # Pure-JAX reference matching the PyTorch forward (training mode).
    B, P, E = features.shape
    T = captions.shape[1]
    H = p["wh"].shape[1]
    prev = jnp.concatenate(
        [jnp.zeros((B, 1), jnp.int32), captions[:, :T - 1].astype(jnp.int32)], axis=1)
    emb_seq = p["emb"][prev]                               # (B, T, H)

    favg = features.mean(axis=1)
    h = jnp.tanh(favg @ p["wh"] + p["bh"])
    c = jnp.tanh(favg @ p["wc"] + p["bc"])
    preds, alphas = [], []
    for t in range(T):
        wa = jnp.einsum("bpe,eh->bph", features, p["wa"]) + p["ba"]
        ua = h @ p["ua"] + p["bu"]
        att = jnp.tanh(wa + ua[:, None, :])
        e = jnp.sum(att * p["va"], axis=-1) + p["bv"]
        alpha = jax.nn.softmax(e, axis=1)
        context = jnp.sum(features * alpha[:, :, None], axis=1)
        gate = jax.nn.sigmoid(h @ p["wf"] + p["bf"])
        gated = gate * context
        emb = emb_seq[:, t]
        gates = emb @ p["wih_e"] + gated @ p["wih_c"] + h @ p["whh"] + p["bl"]
        i = jax.nn.sigmoid(gates[:, :H]); f = jax.nn.sigmoid(gates[:, H:2 * H])
        g = jnp.tanh(gates[:, 2 * H:3 * H]); o = jax.nn.sigmoid(gates[:, 3 * H:])
        c = f * c + i * g
        h = o * jnp.tanh(c)
        preds.append(jax.nn.sigmoid(h @ p["wo"] + p["bo"]))
        alphas.append(alpha)
    return jnp.stack(preds, axis=1), jnp.stack(alphas, axis=1)


if __name__ == "__main__":
    B, P, E, H, V, T = 2, 8, 16, 32, 32, 8   # batch, num_pixels, encoder_dim, hidden, vocab, seq
    key = jax.random.PRNGKey(0)
    k_par, k_feat, k_cap = jax.random.split(key, 3)
    params = make_params(k_par, E, V, H)
    features = jax.random.normal(k_feat, (B, P, E), jnp.float32)
    captions = jax.random.randint(k_cap, (B, T), 0, V, jnp.int32)

    pred_k, alpha_k = jax.jit(decoder_forward)(params, features, captions)
    pred_k = jax.block_until_ready(pred_k)
    alpha_k = jax.block_until_ready(alpha_k)

    pred_r, alpha_r = decoder_reference(params, features, captions)
    assert pred_k.shape == (B, T, V) and alpha_k.shape == (B, T, P)
    # Slightly relaxed tolerance: EUP approx reciprocal (+Newton step) in the softmax
    # and fused-matmul reassociation vs. the reference.
    assert jnp.allclose(pred_k, pred_r, atol=1e-3, rtol=1e-3), "pred mismatch"
    assert jnp.allclose(alpha_k, alpha_r, atol=1e-3, rtol=1e-3), "alpha mismatch"
    print("KERNEL_OK")
</pallas_src>

<mosaic_0001>
module attributes {stable_mosaic.version = 11 : i64} {
  func.func @decoder_kernel(%arg0: i32, %arg1: i32, %arg2: memref<8x128x16xf32, #tpu.memory_space<vmem>>, %arg3: memref<8x128x32xf32, #tpu.memory_space<vmem>>, %arg4: memref<8x16xf32, #tpu.memory_space<vmem>>, %arg5: memref<1x8x128xf32, #tpu.memory_space<vmem>>, %arg6: memref<16x64xf32, #tpu.memory_space<vmem>>, %arg7: memref<1x64xf32, #tpu.memory_space<vmem>>, %arg8: memref<32x384xf32, #tpu.memory_space<vmem>>, %arg9: memref<1x384xf32, #tpu.memory_space<vmem>>, %arg10: memref<1x32xf32, #tpu.memory_space<vmem>>, %arg11: memref<1x128xf32, #tpu.memory_space<vmem>>, %arg12: memref<16x128xf32, #tpu.memory_space<vmem>>, %arg13: memref<32x128xf32, #tpu.memory_space<vmem>>, %arg14: memref<1x128xf32, #tpu.memory_space<vmem>>, %arg15: memref<1x8x128xf32, #tpu.memory_space<vmem>>, %arg16: memref<1x8x128xf32, #tpu.memory_space<vmem>>, %arg17: memref<8x32xf32, #tpu.memory_space<vmem>>, %arg18: memref<8x32xf32, #tpu.memory_space<vmem>>) attributes {dimension_semantics = [#tpu.dimension_semantics<parallel>, #tpu.dimension_semantics<arbitrary>], iteration_bounds = array<i64: 1, 8>, scalar_prefetch = 0 : i64, scratch_operands = 2 : i64, tpu.core_type = #tpu.core_type<tc>, window_params = [{transform_indices = @transform_0, window_bounds = array<i64: 8, 128, 16>}, {transform_indices = @transform_1, window_bounds = array<i64: 8, 128, 32>}, {transform_indices = @transform_2, window_bounds = array<i64: 8, 16>}, {transform_indices = @transform_3, window_bounds = array<i64: 1, 8, 128>}, {pipeline_mode = #tpu.pipeline_mode<synchronous>, transform_indices = @transform_4, window_bounds = array<i64: 16, 64>}, {pipeline_mode = #tpu.pipeline_mode<synchronous>, transform_indices = @transform_5, window_bounds = array<i64: 1, 64>}, {pipeline_mode = #tpu.pipeline_mode<synchronous>, transform_indices = @transform_6, window_bounds = array<i64: 32, 384>}, {pipeline_mode = #tpu.pipeline_mode<synchronous>, transform_indices = @transform_7, window_bounds = array<i64: 1, 384>}, {pipeline_mode = #tpu.pipeline_mode<synchronous>, transform_indices = @transform_8, window_bounds = array<i64: 1, 32>}, {pipeline_mode = #tpu.pipeline_mode<synchronous>, transform_indices = @transform_9, window_bounds = array<i64: 1, 128>}, {pipeline_mode = #tpu.pipeline_mode<synchronous>, transform_indices = @transform_10, window_bounds = array<i64: 16, 128>}, {pipeline_mode = #tpu.pipeline_mode<synchronous>, transform_indices = @transform_11, window_bounds = array<i64: 32, 128>}, {pipeline_mode = #tpu.pipeline_mode<synchronous>, transform_indices = @transform_12, window_bounds = array<i64: 1, 128>}, {transform_indices = @transform_13, window_bounds = array<i64: 1, 8, 128>}, {transform_indices = @transform_14, window_bounds = array<i64: 1, 8, 128>}]} {
    %c0_i32 = arith.constant 0 : i32
    %0 = arith.cmpi eq, %arg1, %c0_i32 : i32
    %1 = arith.extui %0 : i1 to i32
    %c0_i32_0 = arith.constant 0 : i32
    %2 = arith.cmpi ne, %1, %c0_i32_0 : i32
    scf.if %2 {
      %c0_49 = arith.constant 0 : index
      %c0_50 = arith.constant 0 : index
      %100 = vector.load %arg4[%c0_49, %c0_50] : memref<8x16xf32, #tpu.memory_space<vmem>>, vector<8x16xf32>
      %c0_51 = arith.constant 0 : index
      %c0_52 = arith.constant 0 : index
      %101 = vector.load %arg6[%c0_51, %c0_52] : memref<16x64xf32, #tpu.memory_space<vmem>>, vector<16x64xf32>
      %cst_53 = arith.constant dense<0.000000e+00> : vector<8x64xf32>
      %102 = tpu.matmul %100, %101, %cst_53 {dimension_numbers = #tpu.dot_dimension_numbers<[1], [0], [0], [1], [0, 0, 1, 1], [], []>} : vector<8x16xf32>, vector<16x64xf32>, vector<8x64xf32> -> vector<8x64xf32>
      %c0_54 = arith.constant 0 : index
      %c0_55 = arith.constant 0 : index
      %103 = vector.load %arg7[%c0_54, %c0_55] : memref<1x64xf32, #tpu.memory_space<vmem>>, vector<1x64xf32>
      %104 = vector.broadcast %103 : vector<1x64xf32> to vector<8x64xf32>
      %105 = arith.addf %102, %104 : vector<8x64xf32>
      %106 = math.tanh %105 : vector<8x64xf32>
      %107 = vector.extract_strided_slice %106 {offsets = [0, 0], sizes = [8, 32], strides = [1, 1]} : vector<8x64xf32> to vector<8x32xf32>
      %c0_56 = arith.constant 0 : index
      %c0_57 = arith.constant 0 : index
      %108 = vector.load %arg17[%c0_56, %c0_57] : memref<8x32xf32, #tpu.memory_space<vmem>>, vector<8x32xf32>
      tpu.vector_store %arg17[%c0_56, %c0_57], %107 {strides = array<i32>} : memref<8x32xf32, #tpu.memory_space<vmem>>, vector<8x32xf32>,
      %109 = vector.extract_strided_slice %106 {offsets = [0, 32], sizes = [8, 32], strides = [1, 1]} : vector<8x64xf32> to vector<8x32xf32>
      %c0_58 = arith.constant 0 : index
      %c0_59 = arith.constant 0 : index
      %110 = vector.load %arg18[%c0_58, %c0_59] : memref<8x32xf32, #tpu.memory_space<vmem>>, vector<8x32xf32>
      tpu.vector_store %arg18[%c0_58, %c0_59], %109 {strides = array<i32>} : memref<8x32xf32, #tpu.memory_space<vmem>>, vector<8x32xf32>,
    } else {
    }
    %c0 = arith.constant 0 : index
    %c0_1 = arith.constant 0 : index
    %3 = vector.load %arg17[%c0, %c0_1] : memref<8x32xf32, #tpu.memory_space<vmem>>, vector<8x32xf32>
    %c0_2 = arith.constant 0 : index
    %c0_3 = arith.constant 0 : index
    %4 = vector.load %arg18[%c0_2, %c0_3] : memref<8x32xf32, #tpu.memory_space<vmem>>, vector<8x32xf32>
    %c0_4 = arith.constant 0 : index
    %c0_5 = arith.constant 0 : index
    %5 = vector.load %arg8[%c0_4, %c0_5] : memref<32x384xf32, #tpu.memory_space<vmem>>, vector<32x384xf32>
    %cst = arith.constant dense<0.000000e+00> : vector<8x384xf32>
    %6 = tpu.matmul %3, %5, %cst {dimension_numbers = #tpu.dot_dimension_numbers<[1], [0], [0], [1], [0, 0, 1, 1], [], []>} : vector<8x32xf32>, vector<32x384xf32>, vector<8x384xf32> -> vector<8x384xf32>
    %c0_6 = arith.constant 0 : index
    %c0_7 = arith.constant 0 : index
    %7 = vector.load %arg9[%c0_6, %c0_7] : memref<1x384xf32, #tpu.memory_space<vmem>>, vector<1x384xf32>
    %8 = vector.broadcast %7 : vector<1x384xf32> to vector<8x384xf32>
    %9 = arith.addf %6, %8 : vector<8x384xf32>
    %10 = vector.extract_strided_slice %9 {offsets = [0, 0], sizes = [8, 32], strides = [1, 1]} : vector<8x384xf32> to vector<8x32xf32>
    %11 = vector.extract_strided_slice %9 {offsets = [0, 128], sizes = [8, 16], strides = [1, 1]} : vector<8x384xf32> to vector<8x16xf32>
    %12 = arith.negf %11 : vector<8x16xf32>
    %13 = math.exp %12 : vector<8x16xf32>
    %cst_8 = arith.constant 1.000000e+00 : f32
    %14 = vector.broadcast %cst_8 : f32 to vector<8x16xf32>
    %15 = arith.addf %14, %13 : vector<8x16xf32>
    %16 = arith.divf %14, %15 : vector<8x16xf32>
    %17 = vector.extract_strided_slice %9 {offsets = [0, 256], sizes = [8, 128], strides = [1, 1]} : vector<8x384xf32> to vector<8x128xf32>
    %c0_9 = arith.constant 0 : index
    %c0_10 = arith.constant 0 : index
    %c0_11 = arith.constant 0 : index
    %18 = vector.load %arg3[%c0_9, %c0_10, %c0_11] : memref<8x128x32xf32, #tpu.memory_space<vmem>>, vector<8x128x32xf32>
    %19 = vector.shape_cast %10 : vector<8x32xf32> to vector<8x1x32xf32>
    %20 = vector.broadcast %19 : vector<8x1x32xf32> to vector<8x128x32xf32>
    %21 = arith.addf %18, %20 : vector<8x128x32xf32>
    %22 = math.tanh %21 : vector<8x128x32xf32>
    %c0_12 = arith.constant 0 : index
    %c0_13 = arith.constant 0 : index
    %23 = vector.load %arg10[%c0_12, %c0_13] : memref<1x32xf32, #tpu.memory_space<vmem>>, vector<1x32xf32>
    %24 = vector.shape_cast %23 : vector<1x32xf32> to vector<1x1x32xf32>
    %25 = vector.broadcast %24 : vector<1x1x32xf32> to vector<8x128x32xf32>
    %26 = arith.mulf %22, %25 : vector<8x128x32xf32>
    %cst_14 = arith.constant dense<0.000000e+00> : vector<8x128xf32>
    %27 = vector.multi_reduction <add>, %26, %cst_14 [2] : vector<8x128x32xf32> to vector<8x128xf32>
    %c0_15 = arith.constant 0 : index
    %c0_16 = arith.constant 0 : index
    %28 = vector.load %arg11[%c0_15, %c0_16] : memref<1x128xf32, #tpu.memory_space<vmem>>, vector<1x128xf32>
    %29 = vector.broadcast %28 : vector<1x128xf32> to vector<8x128xf32>
    %30 = arith.addf %27, %29 : vector<8x128xf32>
    %cst_17 = arith.constant dense<0xFF800000> : vector<8xf32>
    %31 = vector.multi_reduction <maximumf>, %30, %cst_17 [1] : vector<8x128xf32> to vector<8xf32>
    %32 = vector.shape_cast %31 : vector<8xf32> to vector<8x1xf32>
    %33 = vector.broadcast %32 : vector<8x1xf32> to vector<8x128xf32>
    %34 = arith.subf %30, %33 : vector<8x128xf32>
    %35 = math.exp %34 : vector<8x128xf32>
    %cst_18 = arith.constant dense<0.000000e+00> : vector<8xf32>
    %36 = vector.multi_reduction <add>, %35, %cst_18 [1] : vector<8x128xf32> to vector<8xf32>
    %37 = vector.shape_cast %36 : vector<8xf32> to vector<8x1xf32>
    %38 = tpu.reciprocal %37 {approx = true} : vector<8x1xf32> -> vector<8x1xf32>
    %39 = arith.mulf %37, %38 : vector<8x1xf32>
    %cst_19 = arith.constant 2.000000e+00 : f32
    %40 = vector.broadcast %cst_19 : f32 to vector<8x1xf32>
    %41 = arith.subf %40, %39 : vector<8x1xf32>
    %42 = arith.mulf %38, %41 : vector<8x1xf32>
    %43 = vector.broadcast %42 : vector<8x1xf32> to vector<8x128xf32>
    %44 = arith.mulf %35, %43 : vector<8x128xf32>
    %c0_20 = arith.constant 0 : index
    %c0_21 = arith.constant 0 : index
    %c0_22 = arith.constant 0 : index
    %45 = vector.load %arg2[%c0_20, %c0_21, %c0_22] : memref<8x128x16xf32, #tpu.memory_space<vmem>>, vector<8x128x16xf32>
    %46 = vector.shape_cast %44 : vector<8x128xf32> to vector<8x128x1xf32>
    %47 = vector.broadcast %46 : vector<8x128x1xf32> to vector<8x128x16xf32>
    %48 = arith.mulf %45, %47 : vector<8x128x16xf32>
    %cst_23 = arith.constant dense<0.000000e+00> : vector<8x16xf32>
    %49 = vector.multi_reduction <add>, %48, %cst_23 [1] : vector<8x128x16xf32> to vector<8x16xf32>
    %50 = arith.mulf %16, %49 : vector<8x16xf32>
    %c0_24 = arith.constant 0 : index
    %c0_25 = arith.constant 0 : index
    %c0_26 = arith.constant 0 : index
    %51 = vector.load %arg5[%c0_24, %c0_25, %c0_26] : memref<1x8x128xf32, #tpu.memory_space<vmem>>, vector<1x8x128xf32>
    %52 = vector.shape_cast %51 : vector<1x8x128xf32> to vector<8x128xf32>
    %c0_27 = arith.constant 0 : index
    %c0_28 = arith.constant 0 : index
    %53 = vector.load %arg12[%c0_27, %c0_28] : memref<16x128xf32, #tpu.memory_space<vmem>>, vector<16x128xf32>
    %cst_29 = arith.constant dense<0.000000e+00> : vector<8x128xf32>
    %54 = tpu.matmul %50, %53, %cst_29 {dimension_numbers = #tpu.dot_dimension_numbers<[1], [0], [0], [1], [0, 0, 1, 1], [], []>} : vector<8x16xf32>, vector<16x128xf32>, vector<8x128xf32> -> vector<8x128xf32>
    %55 = arith.addf %52, %54 : vector<8x128xf32>
    %56 = arith.addf %55, %17 : vector<8x128xf32>
    %57 = vector.extract_strided_slice %56 {offsets = [0, 0], sizes = [8, 32], strides = [1, 1]} : vector<8x128xf32> to vector<8x32xf32>
    %58 = arith.negf %57 : vector<8x32xf32>
    %59 = math.exp %58 : vector<8x32xf32>
    %cst_30 = arith.constant 1.000000e+00 : f32
    %60 = vector.broadcast %cst_30 : f32 to vector<8x32xf32>
    %61 = arith.addf %60, %59 : vector<8x32xf32>
    %62 = arith.divf %60, %61 : vector<8x32xf32>
    %63 = vector.extract_strided_slice %56 {offsets = [0, 32], sizes = [8, 32], strides = [1, 1]} : vector<8x128xf32> to vector<8x32xf32>
    %64 = arith.negf %63 : vector<8x32xf32>
    %65 = math.exp %64 : vector<8x32xf32>
    %cst_31 = arith.constant 1.000000e+00 : f32
    %66 = vector.broadcast %cst_31 : f32 to vector<8x32xf32>
    %67 = arith.addf %66, %65 : vector<8x32xf32>
    %68 = arith.divf %66, %67 : vector<8x32xf32>
    %69 = vector.extract_strided_slice %56 {offsets = [0, 64], sizes = [8, 32], strides = [1, 1]} : vector<8x128xf32> to vector<8x32xf32>
    %70 = math.tanh %69 : vector<8x32xf32>
    %71 = vector.extract_strided_slice %56 {offsets = [0, 96], sizes = [8, 32], strides = [1, 1]} : vector<8x128xf32> to vector<8x32xf32>
    %72 = arith.negf %71 : vector<8x32xf32>
    %73 = math.exp %72 : vector<8x32xf32>
    %cst_32 = arith.constant 1.000000e+00 : f32
    %74 = vector.broadcast %cst_32 : f32 to vector<8x32xf32>
    %75 = arith.addf %74, %73 : vector<8x32xf32>
    %76 = arith.divf %74, %75 : vector<8x32xf32>
    %77 = arith.mulf %68, %4 : vector<8x32xf32>
    %78 = arith.mulf %62, %70 : vector<8x32xf32>
    %79 = arith.addf %77, %78 : vector<8x32xf32>
    %80 = math.tanh %79 : vector<8x32xf32>
    %81 = arith.mulf %76, %80 : vector<8x32xf32>
    %c0_33 = arith.constant 0 : index
    %c0_34 = arith.constant 0 : index
    %82 = vector.load %arg17[%c0_33, %c0_34] : memref<8x32xf32, #tpu.memory_space<vmem>>, vector<8x32xf32>
    tpu.vector_store %arg17[%c0_33, %c0_34], %81 {strides = array<i32>} : memref<8x32xf32, #tpu.memory_space<vmem>>, vector<8x32xf32>,
    %c0_35 = arith.constant 0 : index
    %c0_36 = arith.constant 0 : index
    %83 = vector.load %arg18[%c0_35, %c0_36] : memref<8x32xf32, #tpu.memory_space<vmem>>, vector<8x32xf32>
    tpu.vector_store %arg18[%c0_35, %c0_36], %79 {strides = array<i32>} : memref<8x32xf32, #tpu.memory_space<vmem>>, vector<8x32xf32>,
    %c0_37 = arith.constant 0 : index
    %c0_38 = arith.constant 0 : index
    %84 = vector.load %arg13[%c0_37, %c0_38] : memref<32x128xf32, #tpu.memory_space<vmem>>, vector<32x128xf32>
    %cst_39 = arith.constant dense<0.000000e+00> : vector<8x128xf32>
    %85 = tpu.matmul %81, %84, %cst_39 {dimension_numbers = #tpu.dot_dimension_numbers<[1], [0], [0], [1], [0, 0, 1, 1], [], []>} : vector<8x32xf32>, vector<32x128xf32>, vector<8x128xf32> -> vector<8x128xf32>
    %c0_40 = arith.constant 0 : index
    %c0_41 = arith.constant 0 : index
    %86 = vector.load %arg14[%c0_40, %c0_41] : memref<1x128xf32, #tpu.memory_space<vmem>>, vector<1x128xf32>
    %87 = vector.broadcast %86 : vector<1x128xf32> to vector<8x128xf32>
    %88 = arith.addf %85, %87 : vector<8x128xf32>
    %89 = arith.negf %88 : vector<8x128xf32>
    %90 = math.exp %89 : vector<8x128xf32>
    %cst_42 = arith.constant 1.000000e+00 : f32
    %91 = vector.broadcast %cst_42 : f32 to vector<8x128xf32>
    %92 = arith.addf %91, %90 : vector<8x128xf32>
    %93 = arith.divf %91, %92 : vector<8x128xf32>
    %c0_43 = arith.constant 0 : index
    %c0_44 = arith.constant 0 : index
    %c0_45 = arith.constant 0 : index
    %94 = vector.load %arg15[%c0_43, %c0_44, %c0_45] : memref<1x8x128xf32, #tpu.memory_space<vmem>>, vector<1x8x128xf32>
    %95 = vector.shape_cast %94 : vector<1x8x128xf32> to vector<8x128xf32>
    %96 = vector.shape_cast %93 : vector<8x128xf32> to vector<1x8x128xf32>
    tpu.vector_store %arg15[%c0_43, %c0_44, %c0_45], %96 {strides = array<i32>} : memref<1x8x128xf32, #tpu.memory_space<vmem>>, vector<1x8x128xf32>,
    %c0_46 = arith.constant 0 : index
    %c0_47 = arith.constant 0 : index
    %c0_48 = arith.constant 0 : index
    %97 = vector.load %arg16[%c0_46, %c0_47, %c0_48] : memref<1x8x128xf32, #tpu.memory_space<vmem>>, vector<1x8x128xf32>
    %98 = vector.shape_cast %97 : vector<1x8x128xf32> to vector<8x128xf32>
    %99 = vector.shape_cast %44 : vector<8x128xf32> to vector<1x8x128xf32>
    tpu.vector_store %arg16[%c0_46, %c0_47, %c0_48], %99 {strides = array<i32>} : memref<1x8x128xf32, #tpu.memory_space<vmem>>, vector<1x8x128xf32>,
    return
  }
  func.func @transform_0(%arg0: i32, %arg1: i32) -> (i32, i32, i32) {
    %c0_i32 = arith.constant 0 : i32
    %c0_i32_0 = arith.constant 0 : i32
    %c0_i32_1 = arith.constant 0 : i32
    return %arg0, %c0_i32, %c0_i32_0 : i32, i32, i32
  }
  func.func @transform_1(%arg0: i32, %arg1: i32) -> (i32, i32, i32) {
    %c0_i32 = arith.constant 0 : i32
    %c0_i32_0 = arith.constant 0 : i32
    %c0_i32_1 = arith.constant 0 : i32
    return %arg0, %c0_i32, %c0_i32_0 : i32, i32, i32
  }
  func.func @transform_2(%arg0: i32, %arg1: i32) -> (i32, i32) {
    %c0_i32 = arith.constant 0 : i32
    %c0_i32_0 = arith.constant 0 : i32
    return %arg0, %c0_i32 : i32, i32
  }
  func.func @transform_3(%arg0: i32, %arg1: i32) -> (i32, i32, i32) {
    %c0_i32 = arith.constant 0 : i32
    %c0_i32_0 = arith.constant 0 : i32
    return %arg1, %arg0, %c0_i32 : i32, i32, i32
  }
  func.func @transform_4(%arg0: i32, %arg1: i32) -> (i32, i32) {
    %c0_i32 = arith.constant 0 : i32
    %c0_i32_0 = arith.constant 0 : i32
    %c0_i32_1 = arith.constant 0 : i32
    return %c0_i32, %c0_i32_0 : i32, i32
  }
  func.func @transform_5(%arg0: i32, %arg1: i32) -> (i32, i32) {
    %c0_i32 = arith.constant 0 : i32
    %c0_i32_0 = arith.constant 0 : i32
    %c0_i32_1 = arith.constant 0 : i32
    return %c0_i32, %c0_i32_0 : i32, i32
  }
  func.func @transform_6(%arg0: i32, %arg1: i32) -> (i32, i32) {
    %c0_i32 = arith.constant 0 : i32
    %c0_i32_0 = arith.constant 0 : i32
    %c0_i32_1 = arith.constant 0 : i32
    return %c0_i32, %c0_i32_0 : i32, i32
  }
  func.func @transform_7(%arg0: i32, %arg1: i32) -> (i32, i32) {
    %c0_i32 = arith.constant 0 : i32
    %c0_i32_0 = arith.constant 0 : i32
    %c0_i32_1 = arith.constant 0 : i32
    return %c0_i32, %c0_i32_0 : i32, i32
  }
  func.func @transform_8(%arg0: i32, %arg1: i32) -> (i32, i32) {
    %c0_i32 = arith.constant 0 : i32
    %c0_i32_0 = arith.constant 0 : i32
    %c0_i32_1 = arith.constant 0 : i32
    return %c0_i32, %c0_i32_0 : i32, i32
  }
  func.func @transform_9(%arg0: i32, %arg1: i32) -> (i32, i32) {
    %c0_i32 = arith.constant 0 : i32
    %c0_i32_0 = arith.constant 0 : i32
    %c0_i32_1 = arith.constant 0 : i32
    return %c0_i32, %c0_i32_0 : i32, i32
  }
  func.func @transform_10(%arg0: i32, %arg1: i32) -> (i32, i32) {
    %c0_i32 = arith.constant 0 : i32
    %c0_i32_0 = arith.constant 0 : i32
    %c0_i32_1 = arith.constant 0 : i32
    return %c0_i32, %c0_i32_0 : i32, i32
  }
  func.func @transform_11(%arg0: i32, %arg1: i32) -> (i32, i32) {
    %c0_i32 = arith.constant 0 : i32
    %c0_i32_0 = arith.constant 0 : i32
    %c0_i32_1 = arith.constant 0 : i32
    return %c0_i32, %c0_i32_0 : i32, i32
  }
  func.func @transform_12(%arg0: i32, %arg1: i32) -> (i32, i32) {
    %c0_i32 = arith.constant 0 : i32
    %c0_i32_0 = arith.constant 0 : i32
    %c0_i32_1 = arith.constant 0 : i32
    return %c0_i32, %c0_i32_0 : i32, i32
  }
  func.func @transform_13(%arg0: i32, %arg1: i32) -> (i32, i32, i32) {
    %c0_i32 = arith.constant 0 : i32
    %c0_i32_0 = arith.constant 0 : i32
    return %arg1, %arg0, %c0_i32 : i32, i32, i32
  }
  func.func @transform_14(%arg0: i32, %arg1: i32) -> (i32, i32, i32) {
    %c0_i32 = arith.constant 0 : i32
    %c0_i32_0 = arith.constant 0 : i32
    return %arg1, %arg0, %c0_i32 : i32, i32, i32
  }
}

</mosaic_0001>

<bundles_post_ra>
// kernel: decoder_forward.1
= control target key start
LH: loop header
LB: loop body
LE: loop exit
PB: predicated region body
PF: predicated region fallthrough
CT: control target
= control target key end

     0   :  { %s7985_s29 = smov 0   ;;  %s7987_s30 = smov 0   ;;  %s13599_s0 = inlined_call_operand.vmem [shape: f32[8,128,16], index: 0, kind: input, shape index: {}]   ;;  %s13600_s1 = inlined_call_operand.vmem [shape: f32[8,128,32], index: 1, kind: input, shape index: {}]   ;;  %s13601_s2 = inlined_call_operand.vmem [shape: f32[8,16], index: 2, kind: input, shape index: {}]   ;;  %s13602_s3 = inlined_call_operand.vmem [shape: f32[8,8,128], index: 3, kind: input, shape index: {}]   ;;  %s13603_s4 = inlined_call_operand.vmem [shape: f32[16,64], index: 4, kind: input, shape index: {}]   ;;  %s13604_s5 = inlined_call_operand.vmem [shape: f32[1,64], index: 5, kind: input, shape index: {}]   ;;  %s13605_s6 = inlined_call_operand.vmem [shape: f32[32,384], index: 6, kind: input, shape index: {}]   ;;  %s13606_s7 = inlined_call_operand.vmem [shape: f32[1,384], index: 7, kind: input, shape index: {}]   ;;  %s13607_s8 = inlined_call_operand.vmem [shape: f32[1,32], index: 8, kind: input, shape index: {}]   ;;  %s13608_s9 = inlined_call_operand.vmem [shape: f32[1,128], index: 9, kind: input, shape index: {}]   ;;  %s13609_s10 = inlined_call_operand.vmem [shape: f32[16,128], index: 10, kind: input, shape index: {}]   ;;  %s13610_s11 = inlined_call_operand.vmem [shape: f32[32,128], index: 11, kind: input, shape index: {}]   ;;  %s13611_s12 = inlined_call_operand.vmem [shape: f32[1,128], index: 12, kind: input, shape index: {}]   ;;  %s13612_s13 = inlined_call_operand.vmem [shape: f32[8,8,128], index: 13, kind: output, shape index: {0}]   ;;  %s13613_s14 = inlined_call_operand.vmem [shape: f32[8,8,128], index: 14, kind: output, shape index: {1}]  }
   0x1   :  { %s7989_s15 = smov 0  }
   0x2 LB: > { %s34_s16 = sadd.s32 1, %s7894_s30  ;;  %p7234_p0 = scmp.ge.s32.totalorder %s7898_s15, 1  ;;  %s7898_s15 = sphi %s7989_s15, %s25_s15   ;;  %s7894_s30 = sphi %s7987_s30, %s15014_s30   ;;  %s7890_s29 = sphi %s7985_s29, %s15013_s29  }
   0x3   : > { %p35_p1 = scmp.ge.s32.totalorder %s34_s16, 8  ;;  %p468_p2 = scmp.lt.s32.totalorder %s7898_s15, 9 }
   0x5   : > { %s15016_s16 = smov (%p35_p1, %s34_s16), 0  ;;  %p469_p3 = pnand %p7234_p0, %p468_p2 }
   0x7   : > { %472 = sbr.rel (%p469_p3) target bundleno = 3429 (0xd65), region = 72 }
   0xc   : > { %p559_p4 = scmp.lt.s32.totalorder %s7890_s29, 7  ;;  %p7238_p5 = scmp.ne.s32.totalorder %s7890_s29, 0 }
   0xd   : > { %s7902_s26 = smov (!%p7238_p5), 96  }
   0xe   : > { %s560_s17 = scalar_select %p559_p4, %s7890_s29, 7 }
   0xf   : > { %583 = sbr.rel (%p7238_p5) target bundleno = 350 (0x15e), region = 76 }
  0x10   : > { %s8003_s18 = sshll.u32 %s560_s17, 3 }
  0x11   : > { %s565_s21 = scalar_lea.vmem %s13602_s3, %s8003_s18  ;;  %s572_s24 = scalar_lea.vmem %s13612_s13, %s8003_s18 }
  0x12   : > { %s579_s27 = scalar_lea.vmem %s13613_s14, %s8003_s18 }
  0x14   : > { %v586_v0 = vld [vmem:[%s13603_s4 + $0x8] sm:$0xff]  ;;  %v7900_v1 = vmov 0.0   ;;  %v585_v2 = vld [vmem:[%s13603_s4] sm:$0xff]  ;;  %vm7901_vm0 = vmmov 0   ;;  %vm594_vm1 = vcmask 130048   ;;  %vm669_vm2 = vcmask 261120  }
  0x15   : > { %7269 = vmatprep.subr.mxu0 %v7900_v1  ;;  %7273 = vmatprep.mubr.msk.f32.mxu0 %vm7901_vm0, %v7900_v1  ;;  %v584_v3 = vld [vmem:[%s13601_s2] sm:$0xff] }
  0x16   : > { %7270 = vmatpush3.msra.mxu0 %v586_v0  ;;  %v7239_v4 = vld [vmem:[%s13604_s5] ss:$0 sm:$0xff] }
  0x17   : > { %7271 = vmatprep.subr.mxu0 %v7900_v1 }
  0x18   : > { %7272 = vmatpush3.msra.mxu0 %v585_v2 }
  0x19   : > { %7274 = vmatmul.mubr.msk.f32.vlgmr.msra.gmra.mxu0 %vm594_vm1, %v584_v3 }
  0xd9   : > { %v664_v5 = vpop.f32.mrf.mxu0 }
  0xda   : > { %v665_v6 = vadd.f32 %v7239_v4, %v664_v5 }
  0xdb   : > { %v7275_v7 = vpop.f32.mrf.mxu0 }
  0xdc   : > { %7339 = vtanh.f32 %v665_v6 }
  0xe9   : > { %v7340_v8 = vpop.eup %7339 }
  0xea   : > { %672 = vrot.lane.b32.xlu0 %v7340_v8, %s7902_s26  ;;  %670 = vst.msk [vmem:[#allocation2] sm:$0xff] %vm669_vm2, %v7340_v8 }
 0x15c   : > { %v673_v9 = vpop.permute.xlu0 %672 }
 0x15d   : > { %675 = vst.msk [vmem:[#allocation3] sm:$0xff] %vm669_vm2, %v673_v9 }
 0x15e PF: > { %v688_v10 = vld [vmem:[%s13605_s6 + $0x50] sm:$0xff]  ;;  %v687_v11 = vld [vmem:[%s13605_s6 + $0x48] sm:$0xff]  ;;  %v685_v12 = vld [vmem:[%s13605_s6 + $0x38] sm:$0xff]  ;;  %v13614_v14 = vmov 0.0   ;;  %vm13750_vm3 = vcmask 261120   ;;  %v13616_v20 = vlaneseq  ;;  %vm2587_vm4 = vcmask 130112  }
 0x15f   : > { %735 = vmatprep.subr.mxu0 %v688_v10  ;;  %v684_v13 = vld [vmem:[%s13605_s6 + $0x30] sm:$0xff]  ;;  %775 = vmatprep.mubr.f32.mxu0 %v13614_v14  ;;  %v682_v15 = vld [vmem:[%s13605_s6 + $0x20] sm:$0xff]  ;;  %v681_v16 = vld [vmem:[%s13605_s6 + $0x18] sm:$0xff]  ;;  %v7904_v22 = vmov 1966171168   ;;  %vm2594_vm5 = vcmask 195712  }
 0x160   : > { %736 = vmatpush1.msra.mxu0 %v687_v11  ;;  %7276 = vmatprep.subr.mxu1 %v13614_v14  ;;  %v679_v17 = vld [vmem:[%s13605_s6 + $0x8] sm:$0xff]  ;;  %v678_v18 = vld [vmem:[%s13605_s6] sm:$0xff]  ;;  %v8058_v21 = vshrl.u32 %v13616_v20, 7  ;;  %v989_v23 = vunpack.c.l.s4 %v7904_v22  ;;  %v860_v37 = vld [vmem:[%s13600_s1 + $0x10] sm:$0xff]  ;;  %vm13909_vm6 = vcmask 261312   ;;  %vm2608_vm7 = vcmask 326912  }
 0x161   : > { %737 = vmatprep.subr.mxu0 %v685_v12  ;;  %v676_v19 = vld [vmem:[#allocation2] sm:$0xff]  ;;  %v861_v41 = vld [vmem:[%s13600_s1 + $0x18] sm:$0xff]  ;;  %v859_v42 = vld [vmem:[%s13600_s1 + $0x8] sm:$0xff]  ;;  %vm2615_vm8 = vcmask 392512   ;;  %vm13752_vm9 = vcmask 458112   ;;  %vm2629_vm10 = vcmask 523712  }
 0x162   : > { %738 = vmatpush1.msra.mxu0 %v684_v13  ;;  %13940 = vst [vmem:[#allocation4_spill] sm:$0xff] %v8058_v21  ;;  %v8061_v24 = vsub.s32 0, %v8058_v21  ;;  %v690_v25 = vld [vmem:[%s13606_s7] sm:$0x7]  ;;  %v990_v26 = vunpack.c.0.s8 %v989_v23  ;;  %v863_v43 = vld [vmem:[%s13600_s1 + $0x28] sm:$0xff]  ;;  %v865_v51 = vld [vmem:[%s13600_s1 + $0x38] sm:$0xff] }
 0x163   : > { %739 = vmatprep.subr.mxu0 %v682_v15  ;;  %v858_v38 = vld [vmem:[%s13600_s1] sm:$0xff]  ;;  %v864_v52 = vld [vmem:[%s13600_s1 + $0x30] sm:$0xff]  ;;  %v867_v55 = vld [vmem:[%s13600_s1 + $0x48] sm:$0xff]  ;;  %vm13910_vm11 = vcmask 589312   ;;  %vm13756_vm12 = vcmask 654912   ;;  %vm13755_vm13 = vcmask 720512  }
 0x164   : > { %740 = vmatpush1.msra.mxu0 %v681_v16  ;;  %13941 = vst [vmem:[#allocation5_spill] sm:$0xff] %v8061_v24  ;;  %v695_v27 = vrot.slane %v690_v25, %v8061_v24  ;;  %v993_v28 = vsub.s32 %v990_v26, %v8058_v21  ;;  %v862_v46 = vld [vmem:[%s13600_s1 + $0x20] sm:$0xff]  ;;  %v869_v59 = vld [vmem:[%s13600_s1 + $0x58] sm:$0xff]  ;;  %v868_v60 = vld [vmem:[%s13600_s1 + $0x50] sm:$0xff]  ;;  %vm13753_vm14 = vcmask 786112   ;;  %vm2664_vm15 = vcmask 851712  }
 0x165   : > { %741 = vmatprep.subr.mxu0 %v679_v17  ;;  %v866_v56 = vld [vmem:[%s13600_s1 + $0x40] sm:$0xff]  ;;  %v871_v2 = vld [vmem:[%s13600_s1 + $0x68] sm:$0xff]  ;;  %v872_v22 = vld [vmem:[%s13600_s1 + $0x70] sm:$0xff]  ;;  %vm2671_vm0 = vcmask 917312   ;;  %vm2678_vm1 = vcmask 982912   ;;  %vm2685_vm2 = vcmask 1048512  }
 0x166   : > { %742 = vmatpush1.msra.mxu0 %v678_v18  ;;  %v8127_v62 = vld [vmem:[%s13607_s8] ss:$0 sm:$0xff]  ;;  %v873_v18 = vld [vmem:[%s13600_s1 + $0x78] sm:$0xff]  ;;  %s7907_s26 = smov 32   ;;  %s7908_s25 = smov 64  }
 0x167   : > { %7241 = vmatmul.mubr.msk.f32.vlgmr.msra.gmra.mxu0 %vm13750_vm3, %v676_v19  ;;  %7287 = vmatprep.subr.mxu0 %v13614_v14  ;;  %v870_v5 = vld [vmem:[%s13600_s1 + $0x60] sm:$0xff]  ;;  %v985_v20 = vld [vmem:[%s13600_s1 + $0x3f8] sm:$0xff]  ;;  %s7909_s29 = smov 96  }
 0x227   : > { %v777_v29 = vpop.f32.mrf.mxu0 }
 0x228   : > { %v778_v30 = vadd.f32 %v777_v29, %v695_v27 }
 0x22a   : > { %v987_v31 = vcombine.high %v778_v30, %v778_v30  ;;  %v994_v32 = vrot.slane %v778_v30, %v993_v28 }
 0x22c   : > { %v1001_v33 = vrot.slane %v987_v31, %v993_v28  ;;  %v8068_v34 = vrot.slane %v994_v32, %v993_v28  ;;  %v1002_v61 = vcombine.high %v994_v32, %v994_v32  ;;  %v875_v32 = vld [vmem:[%s13600_s1 + $0x88] sm:$0xff] }
 0x22e   : > { %v1003_v35 = vcombine.high %v1001_v33, %v1001_v33  ;;  %v8070_v36 = vrot.slane %v1001_v33, %v993_v28  ;;  %v8080_v39 = vrot.slane %v8068_v34, %v8061_v24  ;;  %v8138_v7 = vrot.slane %v1002_v61, %v993_v28 }
 0x230   : > { %v8082_v40 = vrot.slane %v1003_v35, %v993_v28  ;;  %v1078_v44 = vadd.f32 %v8080_v39, %v860_v37  ;;  %v1076_v45 = vadd.f32 %v8080_v39, %v858_v38  ;;  %v1079_v47 = vadd.f32 %v8080_v39, %v861_v41  ;;  %v874_v35 = vld [vmem:[%s13600_s1 + $0x80] sm:$0xff] }
 0x231   : > { %v1077_v48 = vadd.f32 %v8080_v39, %v859_v42  ;;  %v1081_v49 = vadd.f32 %v8080_v39, %v863_v43  ;;  %v1080_v50 = vadd.f32 %v8080_v39, %v862_v46  ;;  %v1083_v53 = vadd.f32 %v8080_v39, %v865_v51 }
 0x232   : > { %7343 = vtanh.f32 %v1078_v44  ;;  %v1082_v54 = vadd.f32 %v8080_v39, %v864_v52  ;;  %v1085_v57 = vadd.f32 %v8080_v39, %v867_v55  ;;  %v1084_v58 = vadd.f32 %v8080_v39, %v866_v56  ;;  %v879_v55 = vld [vmem:[%s13600_s1 + $0xa8] sm:$0xff] }
 0x233   : > { %7345 = vtanh.f32 %v1076_v45  ;;  %v1087_v63 = vadd.f32 %v8080_v39, %v869_v59  ;;  %v1086_v1 = vadd.f32 %v8080_v39, %v868_v60  ;;  %v1089_v12 = vadd.f32 %v8080_v39, %v871_v2  ;;  %v877_v45 = vld [vmem:[%s13600_s1 + $0x98] sm:$0xff] }
 0x234   : > { %7347 = vtanh.f32 %v1079_v47  ;;  %v1088_v17 = vadd.f32 %v8080_v39, %v870_v5  ;;  %v8155_v23 = vrot.slane %v8138_v7, %v8061_v24  ;;  %v1091_v27 = vadd.f32 %v8080_v39, %v873_v18  ;;  %v876_v47 = vld [vmem:[%s13600_s1 + $0x90] sm:$0xff]  ;;  %v881_v2 = vld [vmem:[%s13600_s1 + $0xb8] sm:$0xff] }
 0x235   : > { %7349 = vtanh.f32 %v1077_v48  ;;  %v1090_v31 = vadd.f32 %v8080_v39, %v872_v22 }
 0x236   : > { %7351 = vtanh.f32 %v1081_v49  ;;  %v1093_v41 = vadd.f32 %v8155_v23, %v875_v32  ;;  %v1092_v44 = vadd.f32 %v8155_v23, %v874_v35  ;;  %v1097_v60 = vadd.f32 %v8155_v23, %v879_v55 }
 0x237   : > { %7353 = vtanh.f32 %v1080_v50  ;;  %v1095_v50 = vadd.f32 %v8155_v23, %v877_v45 }
 0x238   : > { %7355 = vtanh.f32 %v1083_v53 }
 0x239   : > { %7357 = vtanh.f32 %v1082_v54  ;;  %v1094_v54 = vadd.f32 %v8155_v23, %v876_v47 }
 0x23a   : > { %7359 = vtanh.f32 %v1085_v57  ;;  %v878_v57 = vld [vmem:[%s13600_s1 + $0xa0] sm:$0xff] }
 0x23b   : > { %7361 = vtanh.f32 %v1084_v58 }
 0x23c   : > { %7363 = vtanh.f32 %v1087_v63 }
 0x23d   : > { %7365 = vtanh.f32 %v1086_v1  ;;  %v1096_v1 = vadd.f32 %v8155_v23, %v878_v57 }
 0x23e   : > { %7367 = vtanh.f32 %v1089_v12 }
 0x23f   : > { %v7344_v0 = vpop.eup %7343  ;;  %7369 = vtanh.f32 %v1088_v17 }
 0x240   : > { %v7346_v3 = vpop.eup %7345  ;;  %v1341_v4 = vmul.f32 %v7344_v0, %v8127_v62  ;;  %7371 = vtanh.f32 %v1091_v27 }
 0x241   : > { %v7348_v6 = vpop.eup %7347  ;;  %v1339_v8 = vmul.f32 %v7346_v3, %v8127_v62  ;;  %7373 = vtanh.f32 %v1090_v31 }
 0x242   : > { %v7350_v9 = vpop.eup %7349  ;;  %v1473_v10 = vsel %vm13750_vm3, %v1341_v4, 0.0  ;;  %v1342_v11 = vmul.f32 %v7348_v6, %v8127_v62  ;;  %7375 = vtanh.f32 %v1093_v41  ;;  %v880_v4 = vld [vmem:[%s13600_s1 + $0xb0] sm:$0xff] }
 0x243   : > { %v7352_v13 = vpop.eup %7351  ;;  %1474 = vadd.xlane.f32.xlu1 %v1473_v10  ;;  %v1467_v15 = vsel %vm13750_vm3, %v1339_v8, 0.0  ;;  %v1340_v16 = vmul.f32 %v7350_v9, %v8127_v62  ;;  %7377 = vtanh.f32 %v1092_v44  ;;  %v1099_v8 = vadd.f32 %v8155_v23, %v881_v2 }
 0x244   : > { %v7354_v19 = vpop.eup %7353  ;;  %1468 = vadd.xlane.f32.xlu0 %v1467_v15  ;;  %v1476_v25 = vsel %vm13750_vm3, %v1342_v11, 0.0  ;;  %v1344_v26 = vmul.f32 %v7352_v13, %v8127_v62  ;;  %7379 = vtanh.f32 %v1095_v50  ;;  %v1098_v12 = vadd.f32 %v8155_v23, %v880_v4  ;;  %v883_v13 = vld [vmem:[%s13600_s1 + $0xc8] sm:$0xff] }
 0x245   : > { %v7356_v28 = vpop.eup %7355  ;;  %v1470_v29 = vsel %vm13750_vm3, %v1340_v16, 0.0  ;;  %v1343_v30 = vmul.f32 %v7354_v19, %v8127_v62  ;;  %7381 = vtanh.f32 %v1094_v54  ;;  %v882_v16 = vld [vmem:[%s13600_s1 + $0xc0] sm:$0xff]  ;;  %v1101_v19 = vadd.f32 %v8155_v23, %v883_v13 }
 0x246   : > { %v7358_v33 = vpop.eup %7357  ;;  %v1482_v37 = vsel %vm13750_vm3, %v1344_v26, 0.0  ;;  %v1346_v38 = vmul.f32 %v7356_v28, %v8127_v62  ;;  %7383 = vtanh.f32 %v1097_v60  ;;  %v1100_v27 = vadd.f32 %v8155_v23, %v882_v16  ;;  %v885_v28 = vld [vmem:[%s13600_s1 + $0xd8] sm:$0xff] }
 0x247   : > { %1477 = vadd.xlane.f32.xlu1 %v1476_v25  ;;  %v7360_v42 = vpop.eup %7359  ;;  %v1479_v39 = vsel %vm13750_vm3, %v1343_v30, 0.0  ;;  %v1345_v43 = vmul.f32 %v7358_v33, %v8127_v62  ;;  %7385 = vtanh.f32 %v1096_v1  ;;  %v884_v30 = vld [vmem:[%s13600_s1 + $0xd0] sm:$0xff]  ;;  %v1103_v33 = vadd.f32 %v8155_v23, %v885_v28  ;;  %v890_v1 = vld [vmem:[%s13600_s1 + $0x100] sm:$0xff] }
 0x248   : > { %1471 = vadd.xlane.f32.xlu0 %v1470_v29  ;;  %v7362_v46 = vpop.eup %7361  ;;  %v1488_v48 = vsel %vm13750_vm3, %v1346_v38, 0.0  ;;  %v1348_v49 = vmul.f32 %v7360_v42, %v8127_v62  ;;  %7387 = vtanh.f32 %v1099_v8  ;;  %v1102_v41 = vadd.f32 %v8155_v23, %v884_v30  ;;  %v887_v42 = vld [vmem:[%s13600_s1 + $0xe8] sm:$0xff] }
 0x249   : > { %v7364_v51 = vpop.eup %7363  ;;  %v1485_v52 = vsel %vm13750_vm3, %v1345_v43, 0.0  ;;  %v1347_v53 = vmul.f32 %v7362_v46, %v8127_v62  ;;  %7389 = vtanh.f32 %v1098_v12  ;;  %v886_v43 = vld [vmem:[%s13600_s1 + $0xe0] sm:$0xff]  ;;  %v1032_v44 = vcombine.high %v8068_v34, %v8068_v34  ;;  %v889_v34 = vld [vmem:[%s13600_s1 + $0xf8] sm:$0xff] }
 0x24a   : > { %v7366_v56 = vpop.eup %7365  ;;  %v1494_v58 = vsel %vm13750_vm3, %v1348_v49, 0.0  ;;  %v1350_v59 = vmul.f32 %v7364_v51, %v8127_v62  ;;  %7391 = vtanh.f32 %v1101_v19  ;;  %v1105_v47 = vadd.f32 %v8155_v23, %v887_v42 }
 0x24b   : > { %1483 = vadd.xlane.f32.xlu1 %v1482_v37  ;;  %v7368_v61 = vpop.eup %7367  ;;  %v1491_v63 = vsel %vm13750_vm3, %v1347_v53, 0.0  ;;  %v1349_v0 = vmul.f32 %v7366_v56, %v8127_v62  ;;  %7393 = vtanh.f32 %v1100_v27  ;;  %v1104_v51 = vadd.f32 %v8155_v23, %v886_v43  ;;  %v888_v53 = vld [vmem:[%s13600_s1 + $0xf0] sm:$0xff] }
 0x24c   : > { %1480 = vadd.xlane.f32.xlu0 %v1479_v39  ;;  %v7370_v3 = vpop.eup %7369  ;;  %v1500_v5 = vsel %vm13750_vm3, %v1350_v59, 0.0  ;;  %v1352_v6 = vmul.f32 %v7368_v61, %v8127_v62  ;;  %7395 = vtanh.f32 %v1103_v33  ;;  %v8256_v54 = vrot.slane %v1032_v44, %v8061_v24 }
 0x24d   : > { %v7372_v9 = vpop.eup %7371  ;;  %v1497_v10 = vsel %vm13750_vm3, %v1349_v0, 0.0  ;;  %v1351_v11 = vmul.f32 %v7370_v3, %v8127_v62  ;;  %7397 = vtanh.f32 %v1102_v41  ;;  %v1107_v57 = vadd.f32 %v8155_v23, %v889_v34 }
 0x24e   : > { %v7374_v15 = vpop.eup %7373  ;;  %v1506_v17 = vsel %vm13750_vm3, %v1352_v6, 0.0  ;;  %v1354_v18 = vmul.f32 %v7372_v9, %v8127_v62  ;;  %7399 = vtanh.f32 %v1105_v47  ;;  %v1106_v61 = vadd.f32 %v8155_v23, %v888_v53  ;;  %v893_v9 = vld [vmem:[%s13600_s1 + $0x118] sm:$0xff]  ;;  %v899_v47 = vld [vmem:[%s13600_s1 + $0x148] sm:$0xff] }
 0x24f   : > { %1489 = vadd.xlane.f32.xlu1 %v1488_v48  ;;  %v7376_v22 = vpop.eup %7375  ;;  %v1503_v25 = vsel %vm13750_vm3, %v1351_v11, 0.0  ;;  %v1353_v26 = vmul.f32 %v7374_v15, %v8127_v62  ;;  %7401 = vtanh.f32 %v1104_v51  ;;  %v1108_v8 = vadd.f32 %v8256_v54, %v890_v1  ;;  %v892_v11 = vld [vmem:[%s13600_s1 + $0x110] sm:$0xff] }
 0x250   : > { %1486 = vadd.xlane.f32.xlu0 %v1485_v52  ;;  %v7378_v29 = vpop.eup %7377  ;;  %v1512_v31 = vsel %vm13750_vm3, %v1354_v18, 0.0  ;;  %v1356_v32 = vmul.f32 %v7376_v22, %v8127_v62  ;;  %7403 = vtanh.f32 %v1107_v57  ;;  %v1111_v15 = vadd.f32 %v8256_v54, %v893_v9  ;;  %v895_v22 = vld [vmem:[%s13600_s1 + $0x128] sm:$0xff]  ;;  %v901_v57 = vld [vmem:[%s13600_s1 + $0x158] sm:$0xff] }
 0x251   : > { %v7380_v35 = vpop.eup %7379  ;;  %v1509_v37 = vsel %vm13750_vm3, %v1353_v26, 0.0  ;;  %v1355_v38 = vmul.f32 %v7378_v29, %v8127_v62  ;;  %7405 = vtanh.f32 %v1106_v61  ;;  %v1110_v19 = vadd.f32 %v8256_v54, %v892_v11  ;;  %v894_v26 = vld [vmem:[%s13600_s1 + $0x120] sm:$0xff] }
 0x252   : > { %v7382_v39 = vpop.eup %7381  ;;  %v1518_v45 = vsel %vm13750_vm3, %v1356_v32, 0.0  ;;  %v1358_v46 = vmul.f32 %v7380_v35, %v8127_v62  ;;  %v1113_v29 = vadd.f32 %v8256_v54, %v895_v22  ;;  %v1112_v33 = vadd.f32 %v8256_v54, %v894_v26  ;;  %v897_v35 = vld [vmem:[%s13600_s1 + $0x138] sm:$0xff] }
 0x253   : > { %1495 = vadd.xlane.f32.xlu1 %v1494_v58  ;;  %v7384_v48 = vpop.eup %7383  ;;  %v1515_v49 = vsel %vm13750_vm3, %v1355_v38, 0.0  ;;  %v1357_v50 = vmul.f32 %v7382_v39, %v8127_v62  ;;  %v896_v38 = vld [vmem:[%s13600_s1 + $0x130] sm:$0xff]  ;;  %v1115_v39 = vadd.f32 %v8256_v54, %v897_v35  ;;  %v1117_v34 = vadd.f32 %v8256_v54, %v899_v47 }
 0x254   : > { %1492 = vadd.xlane.f32.xlu0 %v1491_v63  ;;  %v7386_v52 = vpop.eup %7385  ;;  %v1524_v55 = vsel %vm13750_vm3, %v1358_v46, 0.0  ;;  %v1360_v56 = vmul.f32 %v7384_v48, %v8127_v62  ;;  %v891_v63 = vld [vmem:[%s13600_s1 + $0x108] sm:$0xff]  ;;  %v1114_v46 = vadd.f32 %v8256_v54, %v896_v38 }
 0x255   : > { %v7388_v58 = vpop.eup %7387  ;;  %v1521_v59 = vsel %vm13750_vm3, %v1357_v50, 0.0  ;;  %v1359_v60 = vmul.f32 %v7386_v52, %v8127_v62  ;;  %v1109_v4 = vadd.f32 %v8256_v54, %v891_v63  ;;  %v1119_v63 = vadd.f32 %v8256_v54, %v901_v57 }
 0x256   : > { %v7390_v0 = vpop.eup %7389  ;;  %v1530_v2 = vsel %vm13750_vm3, %v1360_v56, 0.0  ;;  %v1362_v3 = vmul.f32 %v7388_v58, %v8127_v62 }
 0x257   : > { %1501 = vadd.xlane.f32.xlu1 %v1500_v5  ;;  %v7392_v5 = vpop.eup %7391  ;;  %v1527_v23 = vsel %vm13750_vm3, %v1359_v60, 0.0  ;;  %v1361_v6 = vmul.f32 %v7390_v0, %v8127_v62  ;;  %7407 = vtanh.f32 %v1109_v4  ;;  %v903_v4 = vld [vmem:[%s13600_s1 + $0x168] sm:$0xff] }
 0x258   : > { %1498 = vadd.xlane.f32.xlu0 %v1497_v10  ;;  %v7394_v10 = vpop.eup %7393  ;;  %v1536_v12 = vsel %vm13750_vm3, %v1362_v3, 0.0  ;;  %v1364_v13 = vmul.f32 %v7392_v5, %v8127_v62  ;;  %7409 = vtanh.f32 %v1108_v8  ;;  %v1121_v9 = vadd.f32 %v8256_v54, %v903_v4 }
 0x259   : > { %v7396_v16 = vpop.eup %7395  ;;  %v1363_v18 = vmul.f32 %v7394_v10, %v8127_v62  ;;  %7411 = vtanh.f32 %v1111_v15  ;;  %v905_v15 = vld [vmem:[%s13600_s1 + $0x178] sm:$0xff] }
 0x25a   : > { %v1542_v27 = vsel %vm13750_vm3, %v1364_v13, 0.0  ;;  %v1366_v28 = vmul.f32 %v7396_v16, %v8127_v62  ;;  %7413 = vtanh.f32 %v1110_v19 }
 0x25b   : > { %1507 = vadd.xlane.f32.xlu1 %v1506_v17  ;;  %v1533_v17 = vsel %vm13750_vm3, %v1361_v6, 0.0  ;;  %7415 = vtanh.f32 %v1113_v29 }
 0x25c   : > { %1504 = vadd.xlane.f32.xlu0 %v1503_v25  ;;  %v7398_v25 = vpop.eup %7397  ;;  %v1548_v41 = vsel %vm13750_vm3, %v1366_v28, 0.0  ;;  %7417 = vtanh.f32 %v1112_v33 }
 0x25d   : > { %v7400_v30 = vpop.eup %7399  ;;  %v1365_v32 = vmul.f32 %v7398_v25, %v8127_v62  ;;  %7419 = vtanh.f32 %v1115_v39  ;;  %v1123_v25 = vadd.f32 %v8256_v54, %v905_v15  ;;  %v925_v39 = vld [vmem:[%s13600_s1 + $0x218] sm:$0xff] }
 0x25e   : > { %v1368_v42 = vmul.f32 %v7400_v30, %v8127_v62  ;;  %7421 = vtanh.f32 %v1114_v46  ;;  %v923_v30 = vld [vmem:[%s13600_s1 + $0x208] sm:$0xff] }
 0x25f   : > { %1513 = vadd.xlane.f32.xlu1 %v1512_v31  ;;  %v1539_v31 = vsel %vm13750_vm3, %v1363_v18, 0.0  ;;  %v1545_v44 = vsel %vm13750_vm3, %v1365_v32, 0.0  ;;  %7423 = vtanh.f32 %v1117_v34  ;;  %v8356_v18 = vrot.slane %v8070_v36, %v8061_v24  ;;  %v922_v32 = vld [vmem:[%s13600_s1 + $0x200] sm:$0xff]  ;;  %v927_v34 = vld [vmem:[%s13600_s1 + $0x228] sm:$0xff] }
 0x260   : > { %1510 = vadd.xlane.f32.xlu0 %v1509_v37  ;;  %v7402_v37 = vpop.eup %7401  ;;  %v1554_v50 = vsel %vm13750_vm3, %v1368_v42, 0.0 }
 0x261   : > { %v7404_v43 = vpop.eup %7403  ;;  %v1140_v42 = vadd.f32 %v8356_v18, %v922_v32  ;;  %v1143_v47 = vadd.f32 %v8356_v18, %v925_v39  ;;  %v1145_v57 = vadd.f32 %v8356_v18, %v927_v34 }
 0x262   : > { %v7406_v48 = vpop.eup %7405  ;;  %v1370_v51 = vmul.f32 %v7404_v43, %v8127_v62 }
 0x263   : > { %1519 = vadd.xlane.f32.xlu1 %v1518_v45  ;;  %v1367_v45 = vmul.f32 %v7402_v37, %v8127_v62  ;;  %v1141_v37 = vadd.f32 %v8356_v18, %v923_v30 }
 0x264   : > { %1516 = vadd.xlane.f32.xlu0 %v1515_v49  ;;  %v898_v49 = vld [vmem:[%s13600_s1 + $0x140] sm:$0xff]  ;;  %v7408_v52 = vpop.eup %7407  ;;  %v1560_v60 = vsel %vm13750_vm3, %v1370_v51, 0.0 }
 0x265   : > { %v1551_v53 = vsel %vm13750_vm3, %v1367_v45, 0.0  ;;  %v1116_v56 = vadd.f32 %v8256_v54, %v898_v49  ;;  %v7410_v58 = vpop.eup %7409  ;;  %v1372_v61 = vmul.f32 %v7408_v52, %v8127_v62 }
 0x266   : > { %v7412_v0 = vpop.eup %7411 }
 0x267   : > { %1525 = vadd.xlane.f32.xlu1 %v1524_v55  ;;  %v1369_v55 = vmul.f32 %v7406_v48, %v8127_v62  ;;  %7425 = vtanh.f32 %v1116_v56  ;;  %v7414_v5 = vpop.eup %7413  ;;  %v1566_v6 = vsel %vm13750_vm3, %v1372_v61, 0.0  ;;  %v1374_v8 = vmul.f32 %v7412_v0, %v8127_v62 }
 0x268   : > { %1522 = vadd.xlane.f32.xlu0 %v1521_v59  ;;  %v900_v59 = vld [vmem:[%s13600_s1 + $0x150] sm:$0xff]  ;;  %7427 = vtanh.f32 %v1119_v63  ;;  %v7416_v10 = vpop.eup %7415  ;;  %v929_v63 = vld [vmem:[%s13600_s1 + $0x238] sm:$0xff] }
 0x269   : > { %v1557_v1 = vsel %vm13750_vm3, %v1369_v55, 0.0  ;;  %v1118_v3 = vadd.f32 %v8256_v54, %v900_v59  ;;  %v7418_v16 = vpop.eup %7417  ;;  %v1572_v19 = vsel %vm13750_vm3, %v1374_v8, 0.0  ;;  %v1376_v22 = vmul.f32 %v7416_v10, %v8127_v62 }
 0x26a   : > { %v7420_v26 = vpop.eup %7419  ;;  %v1375_v28 = vmul.f32 %v7418_v16, %v8127_v62  ;;  %v1147_v4 = vadd.f32 %v8356_v18, %v929_v63 }
 0x26b   : > { %1531 = vadd.xlane.f32.xlu1 %v1530_v2  ;;  %v1371_v2 = vmul.f32 %v7410_v58, %v8127_v62  ;;  %7429 = vtanh.f32 %v1118_v3  ;;  %v1578_v33 = vsel %vm13750_vm3, %v1376_v22, 0.0  ;;  %v1378_v35 = vmul.f32 %v7420_v26, %v8127_v62 }
 0x26c   : > { %1528 = vadd.xlane.f32.xlu0 %v1527_v23  ;;  %v902_v23 = vld [vmem:[%s13600_s1 + $0x160] sm:$0xff]  ;;  %7431 = vtanh.f32 %v1121_v9  ;;  %v931_v9 = vld [vmem:[%s13600_s1 + $0x248] sm:$0xff] }
 0x26d   : > { %v1563_v11 = vsel %vm13750_vm3, %v1371_v2, 0.0  ;;  %v1120_v13 = vadd.f32 %v8256_v54, %v902_v23  ;;  %v1584_v45 = vsel %vm13750_vm3, %v1378_v35, 0.0  ;;  %v1149_v15 = vadd.f32 %v8356_v18, %v931_v9 }
 0x26f   : > { %1537 = vadd.xlane.f32.xlu1 %v1536_v12  ;;  %v1373_v12 = vmul.f32 %v7414_v5, %v8127_v62  ;;  %7433 = vtanh.f32 %v1120_v13 }
 0x270   : > { %1534 = vadd.xlane.f32.xlu0 %v1533_v17  ;;  %v904_v17 = vld [vmem:[%s13600_s1 + $0x170] sm:$0xff]  ;;  %7435 = vtanh.f32 %v1123_v25  ;;  %v933_v25 = vld [vmem:[%s13600_s1 + $0x258] sm:$0xff] }
 0x271   : > { %v1122_v29 = vadd.f32 %v8256_v54, %v904_v17  ;;  %v1575_v54 = vsel %vm13750_vm3, %v1375_v28, 0.0  ;;  %v1151_v30 = vadd.f32 %v8356_v18, %v933_v25 }
 0x273   : > { %1543 = vadd.xlane.f32.xlu1 %v1542_v27  ;;  %v1569_v27 = vsel %vm13750_vm3, %v1373_v12, 0.0  ;;  %7437 = vtanh.f32 %v1122_v29 }
 0x274   : > { %1540 = vadd.xlane.f32.xlu0 %v1539_v31  ;;  %v7422_v31 = vpop.eup %7421  ;;  %7439 = vtanh.f32 %v1141_v37  ;;  %v935_v37 = vld [vmem:[%s13600_s1 + $0x268] sm:$0xff] }
 0x275   : > { %v7424_v38 = vpop.eup %7423  ;;  %7441 = vtanh.f32 %v1140_v42 }
 0x276   : > { %v7426_v43 = vpop.eup %7425  ;;  %v1380_v46 = vmul.f32 %v7424_v38, %v8127_v62  ;;  %7443 = vtanh.f32 %v1143_v47 }
 0x277   : > { %1549 = vadd.xlane.f32.xlu1 %v1548_v41  ;;  %v1377_v41 = vmul.f32 %v7422_v31, %v8127_v62  ;;  %v7428_v48 = vpop.eup %7427 }
 0x278   : > { %1546 = vadd.xlane.f32.xlu0 %v1545_v44  ;;  %v924_v44 = vld [vmem:[%s13600_s1 + $0x210] sm:$0xff]  ;;  %v7430_v52 = vpop.eup %7429  ;;  %v1590_v55 = vsel %vm13750_vm3, %v1380_v46, 0.0  ;;  %v1382_v56 = vmul.f32 %v7428_v48, %v8127_v62 }
 0x279   : > { %v1581_v49 = vsel %vm13750_vm3, %v1377_v41, 0.0  ;;  %v1142_v51 = vadd.f32 %v8356_v18, %v924_v44  ;;  %v7432_v58 = vpop.eup %7431  ;;  %v1034_v41 = vcombine.high %v8138_v7, %v8138_v7  ;;  %v937_v7 = vld [vmem:[%s13600_s1 + $0x278] sm:$0xff] }
 0x27a   : > { %v1596_v2 = vsel %vm13750_vm3, %v1382_v56, 0.0  ;;  %v1384_v3 = vmul.f32 %v7432_v58, %v8127_v62  ;;  %v907_v58 = vld [vmem:[%s13600_s1 + $0x188] sm:$0xff] }
 0x27b   : > { %1555 = vadd.xlane.f32.xlu1 %v1554_v50  ;;  %v1379_v50 = vmul.f32 %v7426_v43, %v8127_v62  ;;  %7445 = vtanh.f32 %v1142_v51  ;;  %v1153_v43 = vadd.f32 %v8356_v18, %v935_v37 }
 0x27c   : > { %1552 = vadd.xlane.f32.xlu0 %v1551_v53  ;;  %v926_v53 = vld [vmem:[%s13600_s1 + $0x220] sm:$0xff]  ;;  %v7434_v0 = vpop.eup %7433  ;;  %7447 = vtanh.f32 %v1145_v57  ;;  %v1602_v12 = vsel %vm13750_vm3, %v1384_v3, 0.0 }
 0x27d   : > { %v1587_v59 = vsel %vm13750_vm3, %v1379_v50, 0.0  ;;  %v1144_v61 = vadd.f32 %v8356_v18, %v926_v53  ;;  %v7436_v5 = vpop.eup %7435  ;;  %v8457_v50 = vrot.slane %v1034_v41, %v8061_v24 }
 0x27e   : > { %v1386_v13 = vmul.f32 %v7436_v5, %v8127_v62 }
 0x27f   : > { %1561 = vadd.xlane.f32.xlu1 %v1560_v60  ;;  %v1381_v60 = vmul.f32 %v7430_v52, %v8127_v62  ;;  %7449 = vtanh.f32 %v1144_v61  ;;  %v1155_v52 = vadd.f32 %v8356_v18, %v937_v7 }
 0x280   : > { %1558 = vadd.xlane.f32.xlu0 %v1557_v1  ;;  %v928_v1 = vld [vmem:[%s13600_s1 + $0x230] sm:$0xff]  ;;  %v7438_v10 = vpop.eup %7437  ;;  %7451 = vtanh.f32 %v1147_v4  ;;  %v1608_v28 = vsel %vm13750_vm3, %v1386_v13, 0.0  ;;  %v909_v4 = vld [vmem:[%s13600_s1 + $0x198] sm:$0xff] }
 0x281   : > { %v1593_v23 = vsel %vm13750_vm3, %v1381_v60, 0.0  ;;  %v1146_v8 = vadd.f32 %v8356_v18, %v928_v1  ;;  %v7440_v16 = vpop.eup %7439  ;;  %v906_v60 = vld [vmem:[%s13600_s1 + $0x180] sm:$0xff]  ;;  %v1127_v9 = vadd.f32 %v8457_v50, %v909_v4 }
 0x282   : > { %v7442_v26 = vpop.eup %7441  ;;  %v1404_v29 = vmul.f32 %v7440_v16, %v8127_v62  ;;  %v1124_v3 = vadd.f32 %v8457_v50, %v906_v60 }
 0x283   : > { %1567 = vadd.xlane.f32.xlu1 %v1566_v6  ;;  %v1383_v6 = vmul.f32 %v7434_v0, %v8127_v62  ;;  %7453 = vtanh.f32 %v1146_v8  ;;  %v7444_v31 = vpop.eup %7443  ;;  %v1125_v0 = vadd.f32 %v8457_v50, %v907_v58 }
 0x284   : > { %1564 = vadd.xlane.f32.xlu0 %v1563_v11  ;;  %v930_v11 = vld [vmem:[%s13600_s1 + $0x240] sm:$0xff]  ;;  %7455 = vtanh.f32 %v1149_v15  ;;  %v1662_v42 = vsel %vm13750_vm3, %v1404_v29, 0.0  ;;  %v1406_v39 = vmul.f32 %v7444_v31, %v8127_v62  ;;  %v911_v15 = vld [vmem:[%s13600_s1 + $0x1a8] sm:$0xff] }
 0x285   : > { %v1599_v17 = vsel %vm13750_vm3, %v1383_v6, 0.0  ;;  %v1148_v22 = vadd.f32 %v8356_v18, %v930_v11  ;;  %v1129_v25 = vadd.f32 %v8457_v50, %v911_v15 }
 0x286   : > { %v1668_v51 = vsel %vm13750_vm3, %v1406_v39, 0.0  ;;  %v915_v39 = vld [vmem:[%s13600_s1 + $0x1c8] sm:$0xff] }
 0x287   : > { %1573 = vadd.xlane.f32.xlu1 %v1572_v19  ;;  %v1385_v19 = vmul.f32 %v7438_v10, %v8127_v62  ;;  %7457 = vtanh.f32 %v1148_v22 }
 0x288   : > { %1570 = vadd.xlane.f32.xlu0 %v1569_v27  ;;  %v932_v27 = vld [vmem:[%s13600_s1 + $0x250] sm:$0xff]  ;;  %v7446_v38 = vpop.eup %7445  ;;  %7459 = vtanh.f32 %v1151_v30  ;;  %v913_v30 = vld [vmem:[%s13600_s1 + $0x1b8] sm:$0xff] }
 0x289   : > { %v1605_v32 = vsel %vm13750_vm3, %v1385_v19, 0.0  ;;  %v1150_v35 = vadd.f32 %v8356_v18, %v932_v27  ;;  %v7448_v44 = vpop.eup %7447  ;;  %v1405_v46 = vmul.f32 %v7446_v38, %v8127_v62  ;;  %v1131_v37 = vadd.f32 %v8457_v50, %v913_v30 }
 0x28a   : > { %v1408_v34 = vmul.f32 %v7448_v44, %v8127_v62  ;;  %v914_v44 = vld [vmem:[%s13600_s1 + $0x1c0] sm:$0xff] }
 0x28b   : > { %1579 = vadd.xlane.f32.xlu1 %v1578_v33  ;;  %v1403_v33 = vmul.f32 %v7442_v26, %v8127_v62  ;;  %7461 = vtanh.f32 %v1150_v35 }
 0x28c   : > { %1576 = vadd.xlane.f32.xlu0 %v1575_v54  ;;  %v934_v54 = vld [vmem:[%s13600_s1 + $0x260] sm:$0xff]  ;;  %v7450_v48 = vpop.eup %7449  ;;  %7463 = vtanh.f32 %v1153_v43  ;;  %v1674_v61 = vsel %vm13750_vm3, %v1408_v34, 0.0  ;;  %v917_v34 = vld [vmem:[%s13600_s1 + $0x1d8] sm:$0xff] }
 0x28d   : > { %v1152_v47 = vadd.f32 %v8356_v18, %v934_v54  ;;  %v7452_v53 = vpop.eup %7451  ;;  %v1407_v56 = vmul.f32 %v7450_v48, %v8127_v62 }
 0x28e   : > { %v1410_v63 = vmul.f32 %v7452_v53, %v8127_v62  ;;  %v916_v53 = vld [vmem:[%s13600_s1 + $0x1d0] sm:$0xff] }
 0x28f   : > { %1585 = vadd.xlane.f32.xlu1 %v1584_v45  ;;  %v1659_v45 = vsel %vm13750_vm3, %v1403_v33, 0.0  ;;  %7465 = vtanh.f32 %v1152_v47  ;;  %v1133_v47 = vadd.f32 %v8457_v50, %v915_v39 }
 0x290   : > { %1582 = vadd.xlane.f32.xlu0 %v1581_v49  ;;  %v936_v49 = vld [vmem:[%s13600_s1 + $0x270] sm:$0xff]  ;;  %7467 = vtanh.f32 %v1155_v52  ;;  %v1680_v6 = vsel %vm13750_vm3, %v1410_v63, 0.0  ;;  %v919_v63 = vld [vmem:[%s13600_s1 + $0x1e8] sm:$0xff] }
 0x291   : > { %v1154_v57 = vadd.f32 %v8356_v18, %v936_v49  ;;  %v1671_v18 = vsel %vm13750_vm3, %v1407_v56, 0.0 }
 0x293   : > { %1591 = vadd.xlane.f32.xlu1 %v1590_v55  ;;  %v1665_v55 = vsel %vm13750_vm3, %v1405_v46, 0.0  ;;  %7469 = vtanh.f32 %v1154_v57  ;;  %v1135_v57 = vadd.f32 %v8457_v50, %v917_v34 }
 0x294   : > { %1588 = vadd.xlane.f32.xlu0 %v1587_v59  ;;  %v7454_v59 = vpop.eup %7453  ;;  %7471 = vtanh.f32 %v1125_v0 }
 0x295   : > { %v7456_v1 = vpop.eup %7455  ;;  %7473 = vtanh.f32 %v1124_v3  ;;  %v1137_v3 = vadd.f32 %v8457_v50, %v919_v63 }
 0x296   : > { %v7458_v5 = vpop.eup %7457  ;;  %v1412_v8 = vmul.f32 %v7456_v1, %v8127_v62  ;;  %7475 = vtanh.f32 %v1127_v9  ;;  %v918_v1 = vld [vmem:[%s13600_s1 + $0x1e0] sm:$0xff] }
 0x297   : > { %1597 = vadd.xlane.f32.xlu1 %v1596_v2  ;;  %v1409_v2 = vmul.f32 %v7454_v59, %v8127_v62  ;;  %v7460_v10 = vpop.eup %7459 }
 0x298   : > { %1594 = vadd.xlane.f32.xlu0 %v1593_v23  ;;  %v908_v23 = vld [vmem:[%s13600_s1 + $0x190] sm:$0xff]  ;;  %v7462_v16 = vpop.eup %7461  ;;  %v1686_v19 = vsel %vm13750_vm3, %v1412_v8, 0.0  ;;  %v1414_v22 = vmul.f32 %v7460_v10, %v8127_v62  ;;  %v921_v8 = vld [vmem:[%s13600_s1 + $0x1f8] sm:$0xff] }
 0x299   : > { %v1677_v11 = vsel %vm13750_vm3, %v1409_v2, 0.0  ;;  %v1126_v13 = vadd.f32 %v8457_v50, %v908_v23  ;;  %v7464_v26 = vpop.eup %7463  ;;  %v920_v10 = vld [vmem:[%s13600_s1 + $0x1f0] sm:$0xff]  ;;  %v1139_v15 = vadd.f32 %v8457_v50, %v921_v8  ;;  %v947_v8 = vld [vmem:[%s13600_s1 + $0x2c8] sm:$0xff] }
 0x29a   : > { %v1692_v33 = vsel %vm13750_vm3, %v1414_v22, 0.0  ;;  %v1416_v35 = vmul.f32 %v7464_v26, %v8127_v62  ;;  %v1138_v22 = vadd.f32 %v8457_v50, %v920_v10 }
 0x29b   : > { %1603 = vadd.xlane.f32.xlu1 %v1602_v12  ;;  %v1411_v12 = vmul.f32 %v7458_v5, %v8127_v62  ;;  %7477 = vtanh.f32 %v1126_v13 }
 0x29c   : > { %1600 = vadd.xlane.f32.xlu0 %v1599_v17  ;;  %v910_v17 = vld [vmem:[%s13600_s1 + $0x1a0] sm:$0xff]  ;;  %v7466_v31 = vpop.eup %7465  ;;  %7479 = vtanh.f32 %v1129_v25  ;;  %v939_v25 = vld [vmem:[%s13600_s1 + $0x288] sm:$0xff] }
 0x29d   : > { %v1683_v27 = vsel %vm13750_vm3, %v1411_v12, 0.0  ;;  %v1128_v29 = vadd.f32 %v8457_v50, %v910_v17  ;;  %v7468_v38 = vpop.eup %7467  ;;  %v1415_v41 = vmul.f32 %v7466_v31, %v8127_v62 }
 0x29e   : > { %v1418_v46 = vmul.f32 %v7468_v38, %v8127_v62 }
 0x29f   : > { %1609 = vadd.xlane.f32.xlu1 %v1608_v28  ;;  %v1413_v28 = vmul.f32 %v7462_v16, %v8127_v62  ;;  %7481 = vtanh.f32 %v1128_v29  ;;  %v1695_v48 = vsel %vm13750_vm3, %v1415_v41, 0.0 }
 0x2a0   : > { %1606 = vadd.xlane.f32.xlu0 %v1605_v32  ;;  %v912_v32 = vld [vmem:[%s13600_s1 + $0x1b0] sm:$0xff]  ;;  %v7470_v43 = vpop.eup %7469  ;;  %7483 = vtanh.f32 %v1131_v37 }
 0x2a1   : > { %v1689_v54 = vsel %vm13750_vm3, %v1413_v28, 0.0  ;;  %v7472_v7 = vpop.eup %7471  ;;  %v1417_v49 = vmul.f32 %v7470_v43, %v8127_v62 }
 0x2a2   : > { %v7474_v52 = vpop.eup %7473  ;;  %v1388_v56 = vmul.f32 %v7472_v7, %v8127_v62  ;;  %v943_v7 = vld [vmem:[%s13600_s1 + $0x2a8] sm:$0xff] }
 0x2a3   : > { %1663 = vadd.xlane.f32.xlu1 %v1662_v42  ;;  %v1130_v42 = vadd.f32 %v8457_v50, %v912_v32  ;;  %v7476_v58 = vpop.eup %7475  ;;  %v1701_v59 = vsel %vm13750_vm3, %v1417_v49, 0.0  ;;  %v1387_v60 = vmul.f32 %v7474_v52, %v8127_v62 }
 0x2a4   : > { %1660 = vadd.xlane.f32.xlu0 %v1659_v45  ;;  %v1698_v45 = vsel %vm13750_vm3, %v1416_v35, 0.0  ;;  %v1390_v2 = vmul.f32 %v7476_v58, %v8127_v62  ;;  %v941_v35 = vld [vmem:[%s13600_s1 + $0x298] sm:$0xff] }
 0x2a5   : > { %7485 = vtanh.f32 %v1130_v42  ;;  %v1611_v5 = vsel %vm13750_vm3, %v1387_v60, 0.0  ;;  %v945_v60 = vld [vmem:[%s13600_s1 + $0x2b8] sm:$0xff] }
 0x2a6   : > { %7487 = vtanh.f32 %v1133_v47  ;;  %v1620_v12 = vsel %vm13750_vm3, %v1390_v2, 0.0 }
 0x2a7   : > { %1669 = vadd.xlane.f32.xlu1 %v1668_v51  ;;  %v1132_v51 = vadd.f32 %v8457_v50, %v914_v44 }
 0x2a8   : > { %1666 = vadd.xlane.f32.xlu0 %v1665_v55  ;;  %v1704_v55 = vsel %vm13750_vm3, %v1418_v46, 0.0  ;;  %v7478_v0 = vpop.eup %7477 }
 0x2a9   : > { %7489 = vtanh.f32 %v1132_v51  ;;  %v7480_v4 = vpop.eup %7479  ;;  %v1389_v23 = vmul.f32 %v7478_v0, %v8127_v62  ;;  %v942_v51 = vld [vmem:[%s13600_s1 + $0x2a0] sm:$0xff]  ;;  %v944_v0 = vld [vmem:[%s13600_s1 + $0x2b0] sm:$0xff] }
 0x2aa   : > { %7491 = vtanh.f32 %v1135_v57  ;;  %v1392_v13 = vmul.f32 %v7480_v4, %v8127_v62 }
 0x2ab   : > { %1675 = vadd.xlane.f32.xlu1 %v1674_v61  ;;  %v1134_v61 = vadd.f32 %v8457_v50, %v916_v53  ;;  %v1617_v17 = vsel %vm13750_vm3, %v1389_v23, 0.0 }
 0x2ac   : > { %1672 = vadd.xlane.f32.xlu0 %v1671_v18  ;;  %v1614_v18 = vsel %vm13750_vm3, %v1388_v56, 0.0  ;;  %v7482_v9 = vpop.eup %7481  ;;  %v1626_v28 = vsel %vm13750_vm3, %v1392_v13, 0.0 }
 0x2ad   : > { %7493 = vtanh.f32 %v1134_v61  ;;  %v7484_v16 = vpop.eup %7483 }
 0x2ae   : > { %7495 = vtanh.f32 %v1137_v3  ;;  %v1394_v29 = vmul.f32 %v7484_v16, %v8127_v62 }
 0x2af   : > { %1681 = vadd.xlane.f32.xlu1 %v1680_v6  ;;  %v1136_v6 = vadd.f32 %v8457_v50, %v918_v1 }
 0x2b0   : > { %1678 = vadd.xlane.f32.xlu0 %v1677_v11  ;;  %v8557_v11 = vrot.slane %v8082_v40, %v8061_v24  ;;  %v1632_v42 = vsel %vm13750_vm3, %v1394_v29, 0.0 }
 0x2b1   : > { %7497 = vtanh.f32 %v1136_v6 }
 0x2b2   : > { %v7486_v26 = vpop.eup %7485  ;;  %7499 = vtanh.f32 %v1139_v15  ;;  %v1157_v30 = vadd.f32 %v8557_v11, %v939_v25  ;;  %v1159_v43 = vadd.f32 %v8557_v11, %v941_v35  ;;  %v1163_v3 = vadd.f32 %v8557_v11, %v945_v60 }
 0x2b3   : > { %1687 = vadd.xlane.f32.xlu1 %v1686_v19  ;;  %v1391_v19 = vmul.f32 %v7482_v9, %v8127_v62  ;;  %v7488_v31 = vpop.eup %7487  ;;  %v1393_v32 = vmul.f32 %v7486_v26, %v8127_v62  ;;  %7501 = vtanh.f32 %v1138_v22  ;;  %v8591_v62 = vld [vmem:[%s13607_s8] ss:$0 sm:$0xff]  ;;  %v1162_v6 = vadd.f32 %v8557_v11, %v944_v0 }
 0x2b4   : > { %1684 = vadd.xlane.f32.xlu0 %v1683_v27  ;;  %v938_v27 = vld [vmem:[%s13600_s1 + $0x280] sm:$0xff]  ;;  %v1396_v39 = vmul.f32 %v8591_v62, %v7488_v31  ;;  %7503 = vtanh.f32 %v1157_v30  ;;  %v948_v30 = vld [vmem:[%s13600_s1 + $0x2d0] sm:$0xff] }
 0x2b5   : > { %v1623_v50 = vsel %vm13750_vm3, %v1391_v19, 0.0 }
 0x2b6   : > { %v7490_v37 = vpop.eup %7489  ;;  %v1638_v52 = vsel %vm13750_vm3, %v1396_v39, 0.0  ;;  %v951_v39 = vld [vmem:[%s13600_s1 + $0x2e8] sm:$0xff] }
 0x2b7   : > { %1693 = vadd.xlane.f32.xlu1 %v1692_v33  ;;  %v1156_v33 = vadd.f32 %v8557_v11, %v938_v27  ;;  %v7492_v44 = vpop.eup %7491  ;;  %v1395_v46 = vmul.f32 %v8591_v62, %v7490_v37  ;;  %v949_v27 = vld [vmem:[%s13600_s1 + $0x2d8] sm:$0xff] }
 0x2b8   : > { %1690 = vadd.xlane.f32.xlu0 %v1689_v54  ;;  %v940_v54 = vld [vmem:[%s13600_s1 + $0x290] sm:$0xff]  ;;  %v1398_v53 = vmul.f32 %v8591_v62, %v7492_v44 }
 0x2b9   : > { %7505 = vtanh.f32 %v1156_v33  ;;  %v1158_v47 = vadd.f32 %v8557_v11, %v940_v54  ;;  %v1635_v57 = vsel %vm13750_vm3, %v1395_v46, 0.0  ;;  %v1167_v33 = vadd.f32 %v8557_v11, %v949_v27  ;;  %v957_v27 = vld [vmem:[%s13600_s1 + $0x318] sm:$0xff] }
 0x2ba   : > { %7507 = vtanh.f32 %v1159_v43  ;;  %v1033_v46 = vcombine.high %v8070_v36, %v8070_v36  ;;  %v953_v36 = vld [vmem:[%s13600_s1 + $0x2f8] sm:$0xff] }
 0x2bb   : > { %1699 = vadd.xlane.f32.xlu1 %v1698_v45  ;;  %v1629_v45 = vsel %vm13750_vm3, %v1393_v32, 0.0  ;;  %7509 = vtanh.f32 %v1158_v47 }
 0x2bc   : > { %1696 = vadd.xlane.f32.xlu0 %v1695_v48  ;;  %v7494_v48 = vpop.eup %7493  ;;  %v8689_v60 = vrot.slane %v1033_v46, %v8061_v24 }
 0x2bd   : > { %v7496_v56 = vpop.eup %7495  ;;  %v1397_v58 = vmul.f32 %v8591_v62, %v7494_v48 }
 0x2be   : > { %v7498_v61 = vpop.eup %7497  ;;  %v1400_v2 = vmul.f32 %v8591_v62, %v7496_v56 }
 0x2bf   : > { %1705 = vadd.xlane.f32.xlu1 %v1704_v55  ;;  %v1161_v55 = vadd.f32 %v8557_v11, %v943_v7  ;;  %v7500_v4 = vpop.eup %7499  ;;  %v1399_v23 = vmul.f32 %v8591_v62, %v7498_v61 }
 0x2c0   : > { %1702 = vadd.xlane.f32.xlu0 %v1701_v59  ;;  %v1160_v59 = vadd.f32 %v8557_v11, %v942_v51  ;;  %v7502_v9 = vpop.eup %7501  ;;  %v1650_v15 = vsel %vm13750_vm3, %v1400_v2, 0.0  ;;  %v1402_v16 = vmul.f32 %v8591_v62, %v7500_v4  ;;  %v1169_v51 = vadd.f32 %v8557_v11, %v951_v39 }
 0x2c1   : > { %7511 = vtanh.f32 %v1161_v55  ;;  %v7504_v19 = vpop.eup %7503  ;;  %v1647_v22 = vsel %vm13750_vm3, %v1399_v23, 0.0  ;;  %v1401_v25 = vmul.f32 %v8591_v62, %v7502_v9  ;;  %v1171_v2 = vadd.f32 %v8557_v11, %v953_v36 }
 0x2c2   : > { %7513 = vtanh.f32 %v1160_v59  ;;  %v1420_v32 = vmul.f32 %v8591_v62, %v7504_v19  ;;  %v952_v59 = vld [vmem:[%s13600_s1 + $0x2f0] sm:$0xff] }
 0x2c3   : > { %1615 = vadd.xlane.f32.xlu1 %v1614_v18  ;;  %v1644_v18 = vsel %vm13750_vm3, %v1398_v53, 0.0  ;;  %7515 = vtanh.f32 %v1163_v3  ;;  %v1653_v37 = vsel %vm13750_vm3, %v1401_v25, 0.0  ;;  %v1170_v23 = vadd.f32 %v8557_v11, %v952_v59 }
 0x2c4   : > { %1612 = vadd.xlane.f32.xlu0 %v1611_v5  ;;  %v1641_v5 = vsel %vm13750_vm3, %v1397_v58, 0.0  ;;  %7517 = vtanh.f32 %v1162_v6  ;;  %v1710_v7 = vsel %vm13750_vm3, %v1420_v32, 0.0  ;;  %v955_v6 = vld [vmem:[%s13600_s1 + $0x308] sm:$0xff] }
 0x2c7   : > { %1621 = vadd.xlane.f32.xlu1 %v1620_v12  ;;  %v946_v12 = vld [vmem:[%s13600_s1 + $0x2c0] sm:$0xff] }
 0x2c8   : > { %1618 = vadd.xlane.f32.xlu0 %v1617_v17  ;;  %v1165_v17 = vadd.f32 %v8557_v11, %v947_v8  ;;  %v1164_v26 = vadd.f32 %v8557_v11, %v946_v12  ;;  %v954_v12 = vld [vmem:[%s13600_s1 + $0x300] sm:$0xff] }
 0x2ca   : > { %7519 = vtanh.f32 %v1165_v17 }
 0x2cb   : > { %1627 = vadd.xlane.f32.xlu1 %v1626_v28  ;;  %v7506_v28 = vpop.eup %7505  ;;  %7521 = vtanh.f32 %v1164_v26  ;;  %v1172_v26 = vadd.f32 %v8689_v60, %v954_v12 }
 0x2cc   : > { %1624 = vadd.xlane.f32.xlu0 %v1623_v50  ;;  %v8580_v38 = vpop.xlane.xlu1 %1474  ;;  %v1656_v50 = vsel %vm13750_vm3, %v1402_v16, 0.0  ;;  %v7508_v35 = vpop.eup %7507  ;;  %v1419_v54 = vmul.f32 %v8591_v62, %v7506_v28  ;;  %7523 = vtanh.f32 %v1167_v33 }
 0x2cd   : > { %v8585_v41 = vpop.xlane.xlu0 %1468  ;;  %v7510_v43 = vpop.eup %7509  ;;  %v1422_v48 = vmul.f32 %v8591_v62, %v7508_v35 }
 0x2ce   : > { %v1707_v53 = vsel %vm13750_vm3, %v1419_v54, 0.0  ;;  %v1421_v55 = vmul.f32 %v8591_v62, %v7510_v43 }
 0x2cf   : > { %1633 = vadd.xlane.f32.xlu1 %v1632_v42  ;;  %v1166_v42 = vadd.f32 %v8557_v11, %v948_v30  ;;  %v1716_v0 = vsel %vm13750_vm3, %v1422_v48, 0.0  ;;  %v958_v48 = vld [vmem:[%s13600_s1 + $0x320] sm:$0xff] }
 0x2d0   : > { %1630 = vadd.xlane.f32.xlu0 %v1629_v45  ;;  %v8601_v49 = vpop.xlane.xlu1 %1477  ;;  %v950_v45 = vld [vmem:[%s13600_s1 + $0x2e0] sm:$0xff]  ;;  %v1713_v4 = vsel %vm13750_vm3, %v1421_v55, 0.0  ;;  %v1176_v59 = vadd.f32 %v8689_v60, %v958_v48 }
 0x2d1   : > { %v8606_v34 = vpop.xlane.xlu0 %1471  ;;  %7525 = vtanh.f32 %v1166_v42  ;;  %v1168_v56 = vadd.f32 %v8557_v11, %v950_v45  ;;  %v1173_v11 = vadd.f32 %v8689_v60, %v955_v6  ;;  %v959_v45 = vld [vmem:[%s13600_s1 + $0x328] sm:$0xff] }
 0x2d2   : > { %7527 = vtanh.f32 %v1169_v51  ;;  %v1177_v55 = vadd.f32 %v8689_v60, %v959_v45  ;;  %v964_v45 = vld [vmem:[%s13600_s1 + $0x350] sm:$0xff] }
 0x2d3   : > { %1639 = vadd.xlane.f32.xlu1 %v1638_v52  ;;  %v7512_v52 = vpop.eup %7511  ;;  %7529 = vtanh.f32 %v1168_v56 }
 0x2d4   : > { %1636 = vadd.xlane.f32.xlu0 %v1635_v57  ;;  %v8617_v63 = vpop.xlane.xlu1 %1483  ;;  %v7514_v57 = vpop.eup %7513  ;;  %7531 = vtanh.f32 %v1171_v2 }
 0x2d5   : > { %v8622_v1 = vpop.xlane.xlu0 %1480  ;;  %v7516_v3 = vpop.eup %7515  ;;  %7533 = vtanh.f32 %v1170_v23 }
 0x2d6   : > { %v7518_v8 = vpop.eup %7517  ;;  %v1426_v17 = vmul.f32 %v8591_v62, %v7516_v3  ;;  %7535 = vtanh.f32 %v1173_v11  ;;  %v960_v3 = vld [vmem:[%s13600_s1 + $0x330] sm:$0xff]  ;;  %v963_v11 = vld [vmem:[%s13600_s1 + $0x348] sm:$0xff] }
 0x2d7   : > { %1645 = vadd.xlane.f32.xlu1 %v1644_v18  ;;  %v1424_v18 = vmul.f32 %v8591_v62, %v7512_v52  ;;  %v7520_v19 = vpop.eup %7519  ;;  %v1425_v25 = vmul.f32 %v8591_v62, %v7518_v8  ;;  %7537 = vtanh.f32 %v1172_v26 }
 0x2d8   : > { %1642 = vadd.xlane.f32.xlu0 %v1641_v5  ;;  %v8633_v10 = vpop.xlane.xlu1 %1489  ;;  %v1423_v5 = vmul.f32 %v8591_v62, %v7514_v57  ;;  %v7522_v28 = vpop.eup %7521  ;;  %v1728_v33 = vsel %vm13750_vm3, %v1426_v17, 0.0  ;;  %v1428_v35 = vmul.f32 %v8591_v62, %v7520_v19  ;;  %v1178_v17 = vadd.f32 %v8689_v60, %v960_v3  ;;  %v966_v3 = vld [vmem:[%s13600_s1 + $0x360] sm:$0xff] }
 0x2d9   : > { %v8638_v13 = vpop.xlane.xlu0 %1486  ;;  %v1722_v16 = vsel %vm13750_vm3, %v1424_v18, 0.0  ;;  %v7524_v54 = vpop.eup %7523  ;;  %v1725_v42 = vsel %vm13750_vm3, %v1425_v25, 0.0  ;;  %v1427_v39 = vmul.f32 %v8591_v62, %v7522_v28  ;;  %v962_v25 = vld [vmem:[%s13600_s1 + $0x340] sm:$0xff] }
 0x2da   : > { %v1734_v52 = vsel %vm13750_vm3, %v1428_v35, 0.0 }
 0x2db   : > { %1651 = vadd.xlane.f32.xlu1 %v1650_v15  ;;  %v1731_v36 = vsel %vm13750_vm3, %v1427_v39, 0.0 }
 0x2dc   : > { %1648 = vadd.xlane.f32.xlu0 %v1647_v22  ;;  %v8649_v29 = vpop.xlane.xlu1 %1495  ;;  %v1719_v22 = vsel %vm13750_vm3, %v1423_v5, 0.0 }
 0x2dd   : > { %v8654_v31 = vpop.xlane.xlu0 %1492 }
 0x2de   : > { %v7526_v46 = vpop.eup %7525 }
 0x2df   : > { %1657 = vadd.xlane.f32.xlu1 %v1656_v50  ;;  %v956_v50 = vld [vmem:[%s13600_s1 + $0x310] sm:$0xff]  ;;  %v7528_v56 = vpop.eup %7527  ;;  %v1429_v57 = vmul.f32 %v8591_v62, %v7526_v46 }
 0x2e0   : > { %1654 = vadd.xlane.f32.xlu0 %v1653_v37  ;;  %v8665_v44 = vpop.xlane.xlu1 %1501  ;;  %v1175_v37 = vadd.f32 %v8689_v60, %v957_v27  ;;  %v1174_v43 = vadd.f32 %v8689_v60, %v956_v50  ;;  %v7530_v18 = vpop.eup %7529  ;;  %v1432_v23 = vmul.f32 %v8591_v62, %v7528_v56  ;;  %v1181_v50 = vadd.f32 %v8689_v60, %v963_v11 }
 0x2e1   : > { %v8672_v47 = vpop.xlane.xlu0 %1498  ;;  %v7532_v8 = vpop.eup %7531  ;;  %v1737_v12 = vsel %vm13750_vm3, %v1429_v57, 0.0  ;;  %v1182_v57 = vadd.f32 %v8689_v60, %v964_v45 }
 0x2e2   : > { %7539 = vtanh.f32 %v1175_v37  ;;  %v7534_v19 = vpop.eup %7533  ;;  %v1746_v27 = vsel %vm13750_vm3, %v1432_v23, 0.0  ;;  %v1434_v28 = vmul.f32 %v8591_v62, %v7532_v8 }
 0x2e3   : > { %1711 = vadd.xlane.f32.xlu1 %v1710_v7  ;;  %7541 = vtanh.f32 %v1174_v43  ;;  %v1433_v37 = vmul.f32 %v8591_v62, %v7534_v19  ;;  %v1184_v19 = vadd.f32 %v8689_v60, %v966_v3 }
 0x2e4   : > { %1708 = vadd.xlane.f32.xlu0 %v1707_v53  ;;  %v8683_v58 = vpop.xlane.xlu1 %1507  ;;  %v1430_v53 = vmul.f32 %v8591_v62, %v7524_v54  ;;  %7543 = vtanh.f32 %v1177_v55  ;;  %v1180_v54 = vadd.f32 %v8689_v60, %v962_v25  ;;  %v1752_v48 = vsel %vm13750_vm3, %v1434_v28, 0.0  ;;  %v968_v28 = vld [vmem:[%s13600_s1 + $0x370] sm:$0xff] }
 0x2e5   : > { %v8691_v61 = vpop.xlane.xlu0 %1504  ;;  %7545 = vtanh.f32 %v1176_v59  ;;  %v1749_v56 = vsel %vm13750_vm3, %v1433_v37, 0.0  ;;  %v967_v59 = vld [vmem:[%s13600_s1 + $0x368] sm:$0xff] }
 0x2e6   : > { %v1740_v5 = vsel %vm13750_vm3, %v1430_v53, 0.0 }
 0x2e7   : > { %1717 = vadd.xlane.f32.xlu1 %v1716_v0  ;;  %v961_v0 = vld [vmem:[%s13600_s1 + $0x338] sm:$0xff] }
 0x2e8   : > { %1714 = vadd.xlane.f32.xlu0 %v1713_v4  ;;  %v8702_v9 = vpop.xlane.xlu1 %1513  ;;  %v1179_v6 = vadd.f32 %v8689_v60, %v961_v0 }
 0x2e9   : > { %v8707_v15 = vpop.xlane.xlu0 %1510 }
 0x2ea   : > { %7547 = vtanh.f32 %v1179_v6 }
 0x2eb   : > { %1723 = vadd.xlane.f32.xlu1 %v1722_v16  ;;  %v1431_v16 = vmul.f32 %v8591_v62, %v7530_v18  ;;  %7549 = vtanh.f32 %v1178_v17 }
 0x2ec   : > { %1720 = vadd.xlane.f32.xlu0 %v1719_v22  ;;  %v8718_v30 = vpop.xlane.xlu1 %1519  ;;  %7551 = vtanh.f32 %v1181_v50 }
 0x2ed   : > { %v8723_v32 = vpop.xlane.xlu0 %1516  ;;  %v1743_v35 = vsel %vm13750_vm3, %v1431_v16, 0.0  ;;  %7553 = vtanh.f32 %v1180_v54 }
 0x2ef   : > { %1729 = vadd.xlane.f32.xlu1 %v1728_v33  ;;  %v7536_v33 = vpop.eup %7535 }
 0x2f0   : > { %1726 = vadd.xlane.f32.xlu0 %v1725_v42  ;;  %v8734_v7 = vpop.xlane.xlu1 %1525  ;;  %v965_v42 = vld [vmem:[%s13600_s1 + $0x358] sm:$0xff]  ;;  %v7538_v39 = vpop.eup %7537 }
 0x2f1   : > { %v8739_v51 = vpop.xlane.xlu0 %1522  ;;  %v1183_v53 = vadd.f32 %v8689_v60, %v965_v42  ;;  %v7540_v55 = vpop.eup %7539 }
 0x2f2   : > { %v7542_v0 = vpop.eup %7541  ;;  %v1438_v8 = vmul.f32 %v8591_v62, %v7540_v55 }
 0x2f3   : > { %1735 = vadd.xlane.f32.xlu1 %v1734_v52  ;;  %v1436_v52 = vmul.f32 %v8591_v62, %v7536_v33  ;;  %7555 = vtanh.f32 %v1183_v53  ;;  %v7544_v16 = vpop.eup %7543  ;;  %v1437_v11 = vmul.f32 %v8591_v62, %v7542_v0 }
 0x2f4   : > { %1732 = vadd.xlane.f32.xlu0 %v1731_v36  ;;  %v8750_v2 = vpop.xlane.xlu1 %1531  ;;  %v1435_v36 = vmul.f32 %v8591_v62, %v7538_v39  ;;  %7557 = vtanh.f32 %v1182_v57  ;;  %v7546_v25 = vpop.eup %7545  ;;  %v1440_v37 = vmul.f32 %v8591_v62, %v7544_v16 }
 0x2f5   : > { %v8755_v4 = vpop.xlane.xlu0 %1528  ;;  %v1758_v6 = vsel %vm13750_vm3, %v1436_v52, 0.0  ;;  %v1761_v39 = vsel %vm13750_vm3, %v1437_v11, 0.0  ;;  %v1439_v45 = vmul.f32 %v8591_v62, %v7546_v25  ;;  %v971_v52 = vld [vmem:[%s13600_s1 + $0x388] sm:$0xff] }
 0x2f6   : > { %v1755_v17 = vsel %vm13750_vm3, %v1435_v36, 0.0  ;;  %v1770_v57 = vsel %vm13750_vm3, %v1440_v37, 0.0 }
 0x2f7   : > { %1741 = vadd.xlane.f32.xlu1 %v1740_v5  ;;  %v1035_v5 = vcombine.high %v8082_v40, %v8082_v40  ;;  %v969_v40 = vld [vmem:[%s13600_s1 + $0x378] sm:$0xff]  ;;  %v7548_v42 = vpop.eup %7547  ;;  %v1767_v3 = vsel %vm13750_vm3, %v1439_v45, 0.0 }
 0x2f8   : > { %1738 = vadd.xlane.f32.xlu0 %v1737_v12  ;;  %v8766_v22 = vpop.xlane.xlu1 %1537  ;;  %v1185_v12 = vadd.f32 %v8689_v60, %v967_v59  ;;  %v1187_v54 = vadd.f32 %v8689_v60, %v969_v40  ;;  %v7550_v53 = vpop.eup %7549  ;;  %v1442_v59 = vmul.f32 %v8591_v62, %v7548_v42  ;;  %v975_v42 = vld [vmem:[%s13600_s1 + $0x3a8] sm:$0xff] }
 0x2f9   : > { %v8771_v26 = vpop.xlane.xlu0 %1534  ;;  %v8822_v50 = vrot.slane %v1035_v5, %v8061_v24  ;;  %v7552_v0 = vpop.eup %7551  ;;  %v1441_v5 = vmul.f32 %v8591_v62, %v7550_v53 }
 0x2fa   : > { %7559 = vtanh.f32 %v1185_v12  ;;  %v7554_v12 = vpop.eup %7553  ;;  %v1444_v40 = vmul.f32 %v8591_v62, %v7552_v0 }
 0x2fb   : > { %1747 = vadd.xlane.f32.xlu1 %v1746_v27  ;;  %7561 = vtanh.f32 %v1184_v19  ;;  %v1776_v19 = vsel %vm13750_vm3, %v1442_v59, 0.0  ;;  %v1443_v37 = vmul.f32 %v8591_v62, %v7554_v12  ;;  %v976_v12 = vld [vmem:[%s13600_s1 + $0x3b0] sm:$0xff] }
 0x2fc   : > { %1744 = vadd.xlane.f32.xlu0 %v1743_v35  ;;  %v8782_v43 = vpop.xlane.xlu1 %1543  ;;  %v1764_v35 = vsel %vm13750_vm3, %v1438_v8, 0.0  ;;  %7563 = vtanh.f32 %v1187_v54  ;;  %v973_v8 = vld [vmem:[%s13600_s1 + $0x398] sm:$0xff]  ;;  %v1782_v53 = vsel %vm13750_vm3, %v1444_v40, 0.0 }
 0x2fd   : > { %v8787_v46 = vpop.xlane.xlu0 %1540  ;;  %v1191_v25 = vadd.f32 %v8822_v50, %v973_v8 }
 0x2ff   : > { %1753 = vadd.xlane.f32.xlu1 %v1752_v48  ;;  %v1186_v48 = vadd.f32 %v8689_v60, %v968_v28  ;;  %v1189_v60 = vadd.f32 %v8822_v50, %v971_v52 }
 0x300   : > { %1750 = vadd.xlane.f32.xlu0 %v1749_v56  ;;  %v8798_v18 = vpop.xlane.xlu1 %1549  ;;  %v970_v56 = vld [vmem:[%s13600_s1 + $0x380] sm:$0xff]  ;;  %v7556_v28 = vpop.eup %7555 }
 0x301   : > { %v8805_v23 = vpop.xlane.xlu0 %1546  ;;  %7565 = vtanh.f32 %v1186_v48  ;;  %v974_v48 = vld [vmem:[%s13600_s1 + $0x3a0] sm:$0xff] }
 0x302   : > { %7567 = vtanh.f32 %v1189_v60  ;;  %v1779_v60 = vsel %vm13750_vm3, %v1443_v37, 0.0 }
 0x303   : > { %1759 = vadd.xlane.f32.xlu1 %v1758_v6  ;;  %v1188_v6 = vadd.f32 %v8822_v50, %v970_v56  ;;  %v1446_v56 = vmul.f32 %v8591_v62, %v7556_v28 }
 0x304   : > { %1756 = vadd.xlane.f32.xlu0 %v1755_v17  ;;  %v8816_v27 = vpop.xlane.xlu1 %1555  ;;  %v972_v17 = vld [vmem:[%s13600_s1 + $0x390] sm:$0xff] }
 0x305   : > { %v8824_v33 = vpop.xlane.xlu0 %1552  ;;  %7569 = vtanh.f32 %v1188_v6  ;;  %v1190_v54 = vadd.f32 %v8822_v50, %v972_v17 }
 0x306   : > { %7571 = vtanh.f32 %v1191_v25 }
 0x307   : > { %1765 = vadd.xlane.f32.xlu1 %v1764_v35  ;;  %v1773_v35 = vsel %vm13750_vm3, %v1441_v5, 0.0  ;;  %7573 = vtanh.f32 %v1190_v54  ;;  %v977_v5 = vld [vmem:[%s13600_s1 + $0x3b8] sm:$0xff]  ;;  %v1194_v54 = vadd.f32 %v8822_v50, %v976_v12 }
 0x308   : > { %1762 = vadd.xlane.f32.xlu0 %v1761_v39  ;;  %v8835_v55 = vpop.xlane.xlu1 %1561  ;;  %v7558_v39 = vpop.eup %7557  ;;  %v1195_v25 = vadd.f32 %v8822_v50, %v977_v5  ;;  %v981_v12 = vld [vmem:[%s13600_s1 + $0x3d8] sm:$0xff] }
 0x309   : > { %v8840_v36 = vpop.xlane.xlu0 %1558  ;;  %v7560_v59 = vpop.eup %7559  ;;  %v1445_v0 = vmul.f32 %v8591_v62, %v7558_v39 }
 0x30a   : > { %v7562_v6 = vpop.eup %7561  ;;  %v1448_v40 = vmul.f32 %v8591_v62, %v7560_v59 }
 0x30b   : > { %1771 = vadd.xlane.f32.xlu1 %v1770_v57  ;;  %v1193_v57 = vadd.f32 %v8822_v50, %v975_v42  ;;  %v7564_v28 = vpop.eup %7563  ;;  %v1447_v37 = vmul.f32 %v8591_v62, %v7562_v6  ;;  %v979_v42 = vld [vmem:[%s13600_s1 + $0x3c8] sm:$0xff] }
 0x30c   : > { %1768 = vadd.xlane.f32.xlu0 %v1767_v3  ;;  %v8851_v16 = vpop.xlane.xlu1 %1567  ;;  %v1192_v3 = vadd.f32 %v8822_v50, %v974_v48  ;;  %v1450_v59 = vmul.f32 %v8591_v62, %v7564_v28 }
 0x30d   : > { %v8856_v11 = vpop.xlane.xlu0 %1564  ;;  %7575 = vtanh.f32 %v1193_v57  ;;  %v1794_v57 = vsel %vm13750_vm3, %v1448_v40, 0.0 }
 0x30e   : > { %7577 = vtanh.f32 %v1192_v3  ;;  %v7566_v39 = vpop.eup %7565  ;;  %v1791_v3 = vsel %vm13750_vm3, %v1447_v37, 0.0 }
 0x30f   : > { %1777 = vadd.xlane.f32.xlu1 %v1776_v19  ;;  %v1788_v19 = vsel %vm13750_vm3, %v1446_v56, 0.0  ;;  %7579 = vtanh.f32 %v1195_v25  ;;  %v1449_v5 = vmul.f32 %v8591_v62, %v7566_v39  ;;  %v980_v25 = vld [vmem:[%s13600_s1 + $0x3d0] sm:$0xff] }
 0x310   : > { %1774 = vadd.xlane.f32.xlu0 %v1773_v35  ;;  %v8867_v45 = vpop.xlane.xlu1 %1573  ;;  %v1785_v35 = vsel %vm13750_vm3, %v1445_v0, 0.0  ;;  %v7568_v0 = vpop.eup %7567  ;;  %7581 = vtanh.f32 %v1194_v54  ;;  %v1199_v54 = vadd.f32 %v8822_v50, %v981_v12 }
 0x311   : > { %v8872_v52 = vpop.xlane.xlu0 %1570  ;;  %v1452_v37 = vmul.f32 %v8591_v62, %v7568_v0  ;;  %v1797_v39 = vsel %vm13750_vm3, %v1449_v5, 0.0 }
 0x313   : > { %1783 = vadd.xlane.f32.xlu1 %v1782_v53  ;;  %v978_v53 = vld [vmem:[%s13600_s1 + $0x3c0] sm:$0xff]  ;;  %v1806_v5 = vsel %vm13750_vm3, %v1452_v37, 0.0 }
 0x314   : > { %1780 = vadd.xlane.f32.xlu0 %v1779_v60  ;;  %v8883_v8 = vpop.xlane.xlu1 %1579  ;;  %v1197_v60 = vadd.f32 %v8822_v50, %v979_v42  ;;  %v1196_v6 = vadd.f32 %v8822_v50, %v978_v53 }
 0x315   : > { %v8888_v17 = vpop.xlane.xlu0 %1576 }
 0x316   : > { %7583 = vtanh.f32 %v1197_v60  ;;  %v982_v60 = vld [vmem:[%s13600_s1 + $0x3e0] sm:$0xff] }
 0x317   : > { %1789 = vadd.xlane.f32.xlu1 %v1788_v19  ;;  %v7570_v19 = vpop.eup %7569  ;;  %7585 = vtanh.f32 %v1196_v6 }
 0x318   : > { %1786 = vadd.xlane.f32.xlu0 %v1785_v35  ;;  %v8899_v48 = vpop.xlane.xlu1 %1585  ;;  %v1800_v35 = vsel %vm13750_vm3, %v1450_v59, 0.0  ;;  %v7572_v42 = vpop.eup %7571  ;;  %v1451_v53 = vmul.f32 %v8591_v62, %v7570_v19  ;;  %7587 = vtanh.f32 %v1199_v54  ;;  %v984_v54 = vld [vmem:[%s13600_s1 + $0x3f0] sm:$0xff] }
 0x319   : > { %v8904_v56 = vpop.xlane.xlu0 %1582  ;;  %v7574_v14 = vpop.eup %7573  ;;  %v1454_v6 = vmul.f32 %v8591_v62, %v7572_v42 }
 0x31a   : > { %v7576_v19 = vpop.eup %7575 }
 0x31b   : > { %1795 = vadd.xlane.f32.xlu1 %v1794_v57  ;;  %v1198_v57 = vadd.f32 %v8822_v50, %v980_v25  ;;  %v1803_v25 = vsel %vm13750_vm3, %v1451_v53, 0.0  ;;  %v7578_v24 = vpop.eup %7577  ;;  %v1812_v53 = vsel %vm13750_vm3, %v1454_v6, 0.0 }
 0x31c   : > { %1792 = vadd.xlane.f32.xlu0 %v1791_v3  ;;  %v8915_v40 = vpop.xlane.xlu1 %1591  ;;  %v983_v3 = vld [vmem:[%s13600_s1 + $0x3e8] sm:$0xff] }
 0x31d   : > { %v8920_v28 = vpop.xlane.xlu0 %1588  ;;  %v1201_v12 = vadd.f32 %v8822_v50, %v983_v3  ;;  %7589 = vtanh.f32 %v1198_v57  ;;  %v1203_v57 = vadd.f32 %v8822_v50, %v985_v20  ;;  %v7580_v3 = vpop.eup %7579 }
 0x31e   : > { %v7582_v21 = vpop.eup %7581 }
 0x31f   : > { %1801 = vadd.xlane.f32.xlu1 %v1800_v35  ;;  %v1453_v35 = vmul.f32 %v8591_v62, %v7574_v14  ;;  %v1456_v14 = vmul.f32 %v8591_v62, %v7576_v19  ;;  %7591 = vtanh.f32 %v1201_v12  ;;  %v1458_v12 = vmul.f32 %v8591_v62, %v7580_v3 }
 0x320   : > { %1798 = vadd.xlane.f32.xlu0 %v1797_v39  ;;  %v8931_v59 = vpop.xlane.xlu1 %1597  ;;  %v1200_v39 = vadd.f32 %v8822_v50, %v982_v60 }
 0x321   : > { %v8936_v0 = vpop.xlane.xlu0 %1594  ;;  %v1809_v60 = vsel %vm13750_vm3, %v1453_v35, 0.0  ;;  %v1818_v6 = vsel %vm13750_vm3, %v1456_v14, 0.0 }
 0x322   : > { %7593 = vtanh.f32 %v1200_v39 }
 0x323   : > { %1807 = vadd.xlane.f32.xlu1 %v1806_v5  ;;  %v1455_v5 = vmul.f32 %v8591_v62, %v7578_v24  ;;  %7595 = vtanh.f32 %v1203_v57  ;;  %v7584_v20 = vpop.eup %7583  ;;  %v1457_v24 = vmul.f32 %v8591_v62, %v7582_v21 }
 0x324   : > { %1804 = vadd.xlane.f32.xlu0 %v1803_v25  ;;  %v8947_v37 = vpop.xlane.xlu1 %1603  ;;  %v1202_v25 = vadd.f32 %v8822_v50, %v984_v54  ;;  %v7586_v35 = vpop.eup %7585  ;;  %v1824_v54 = vsel %vm13750_vm3, %v1458_v12, 0.0 }
 0x325   : > { %13942 = vst [vmem:[#allocation6_spill] sm:$0xff] %v8947_v37  ;;  %v8952_v42 = vpop.xlane.xlu0 %1600  ;;  %v1815_v19 = vsel %vm13750_vm3, %v1455_v5, 0.0  ;;  %v7588_v14 = vpop.eup %7587  ;;  %v1821_v57 = vsel %vm13750_vm3, %v1457_v24, 0.0  ;;  %v1459_v3 = vmul.f32 %v8591_v62, %v7586_v35 }
 0x326   : > { %13943 = vst [vmem:[#allocation7_spill] sm:$0xff] %v8952_v42  ;;  %7597 = vtanh.f32 %v1202_v25 }
 0x327   : > { %1813 = vadd.xlane.f32.xlu1 %v1812_v53  ;;  %v1460_v53 = vmul.f32 %v8591_v62, %v7584_v20  ;;  %v1827_v12 = vsel %vm13750_vm3, %v1459_v3, 0.0 }
 0x328   : > { %1810 = vadd.xlane.f32.xlu0 %v1809_v60  ;;  %v8960_v37 = vpop.xlane.xlu1 %1609 }
 0x329   : > { %v8962_v42 = vpop.xlane.xlu0 %1606  ;;  %v1830_v25 = vsel %vm13750_vm3, %v1460_v53, 0.0 }
 0x32a   : > { %v7590_v60 = vpop.eup %7589 }
 0x32b   : > { %1819 = vadd.xlane.f32.xlu1 %v1818_v6  ;;  %v1462_v6 = vmul.f32 %v8591_v62, %v7588_v14  ;;  %v1461_v20 = vmul.f32 %v8591_v62, %v7590_v60 }
 0x32c   : > { %1816 = vadd.xlane.f32.xlu0 %v1815_v19  ;;  %v8968_v50 = vpop.xlane.xlu1 %1663  ;;  %v7592_v19 = vpop.eup %7591 }
 0x32d   : > { %13944 = vst [vmem:[#allocation8_spill] sm:$0xff] %v8968_v50  ;;  %v8970_v39 = vpop.xlane.xlu0 %1660  ;;  %v1833_v53 = vsel %vm13750_vm3, %v1461_v20, 0.0 }
 0x32e   : > { %13945 = vst [vmem:[#allocation9_spill] sm:$0xff] %v8970_v39 }
 0x32f   : > { %1825 = vadd.xlane.f32.xlu1 %v1824_v54  ;;  %v7594_v54 = vpop.eup %7593 }
 0x330   : > { %1822 = vadd.xlane.f32.xlu0 %v1821_v57  ;;  %v8976_v21 = vpop.xlane.xlu1 %1669  ;;  %v1836_v57 = vsel %vm13750_vm3, %v1462_v6, 0.0  ;;  %v1463_v14 = vmul.f32 %v8591_v62, %v7594_v54 }
 0x331   : > { %13946 = vst [vmem:[#allocation10_spill] sm:$0xff] %v8976_v21  ;;  %v8978_v5 = vpop.xlane.xlu0 %1666  ;;  %v1464_v21 = vmul.f32 %v8591_v62, %v7592_v19 }
 0x332   : > { %13947 = vst [vmem:[#allocation11_spill] sm:$0xff] %v8978_v5  ;;  %v7596_v5 = vpop.eup %7595  ;;  %v1839_v6 = vsel %vm13750_vm3, %v1463_v14, 0.0 }
 0x333   : > { %1831 = vadd.xlane.f32.xlu1 %v1830_v25  ;;  %v7598_v25 = vpop.eup %7597 }
 0x334   : > { %1828 = vadd.xlane.f32.xlu0 %v1827_v12  ;;  %v8984_v24 = vpop.xlane.xlu1 %1675  ;;  %v1842_v12 = vsel %vm13750_vm3, %v1464_v21, 0.0  ;;  %v1465_v19 = vmul.f32 %v8591_v62, %v7598_v25 }
 0x335   : > { %13948 = vst [vmem:[#allocation12_spill] sm:$0xff] %v8984_v24  ;;  %v8986_v35 = vpop.xlane.xlu0 %1672  ;;  %v1466_v24 = vmul.f32 %v8591_v62, %v7596_v5 }
 0x336   : > { %13949 = vst [vmem:[#allocation13_spill] sm:$0xff] %v8986_v35 }
 0x337   : > { %1837 = vadd.xlane.f32.xlu1 %v1836_v57  ;;  %v1848_v54 = vsel %vm13750_vm3, %v1466_v24, 0.0  ;;  %v7245_v24 = vld [vmem:[%s13608_s9] ss:$0 sm:$0xff] }
 0x338   : > { %1834 = vadd.xlane.f32.xlu0 %v1833_v53  ;;  %v8992_v3 = vpop.xlane.xlu1 %1681  ;;  %v1845_v53 = vsel %vm13750_vm3, %v1465_v19, 0.0  ;;  %v7905_v19 = vmov 0   ;;  %vm13751_vm3 = vcmask 1041409  }
 0x339   : > { %13950 = vst [vmem:[#allocation14_spill] sm:$0xff] %v8992_v3  ;;  %v8994_v60 = vpop.xlane.xlu0 %1678  ;;  %7342 = vset.pattern.permute.xlu1 %v7905_v19  ;;  %7341 = vset.pattern.permute.xlu0 %v7905_v19 }
 0x33a   : > { %13951 = vst [vmem:[#allocation15_spill] sm:$0xff] %v8994_v60 }
 0x33b   : > { %1843 = vadd.xlane.f32.xlu1 %v1842_v12 }
 0x33c   : > { %1840 = vadd.xlane.f32.xlu0 %v1839_v6  ;;  %v9000_v57 = vpop.xlane.xlu1 %1687 }
 0x33d   : > { %13952 = vst [vmem:[#allocation16_spill] sm:$0xff] %v9000_v57  ;;  %v9002_v20 = vpop.xlane.xlu0 %1684 }
 0x33e   : > { %13953 = vst [vmem:[#allocation17_spill] sm:$0xff] %v9002_v20 }
 0x33f   : > { %1849 = vadd.xlane.f32.xlu1 %v1848_v54 }
 0x340   : > { %1846 = vadd.xlane.f32.xlu0 %v1845_v53  ;;  %v9006_v3 = vpop.xlane.xlu1 %1693 }
 0x341   : > { %13954 = vst [vmem:[#allocation18_spill] sm:$0xff] %v9006_v3  ;;  %v9008_v21 = vpop.xlane.xlu0 %1690 }
 0x342   : > { %13955 = vst [vmem:[#allocation19_spill] sm:$0xff] %v9008_v21 }
 0x344   : > { %v9010_v5 = vpop.xlane.xlu1 %1699 }
 0x345   : > { %13956 = vst [vmem:[#allocation20_spill] sm:$0xff] %v9010_v5  ;;  %v9012_v14 = vpop.xlane.xlu0 %1696 }
 0x346   : > { %13957 = vst [vmem:[#allocation21_spill] sm:$0xff] %v9012_v14 }
 0x348   : > { %v9014_v62 = vpop.xlane.xlu1 %1705 }
 0x349   : > { %13958 = vst [vmem:[#allocation22_spill] sm:$0xff] %v9014_v62  ;;  %v9016_v25 = vpop.xlane.xlu0 %1702 }
 0x34a   : > { %13959 = vst [vmem:[#allocation23_spill] sm:$0xff] %v9016_v25 }
 0x34c   : > { %v9018_v12 = vpop.xlane.xlu1 %1615 }
 0x34d   : > { %v9020_v6 = vpop.xlane.xlu0 %1612 }
 0x350   : > { %v9025_v54 = vpop.xlane.xlu1 %1621  ;;  %1862 = vbcast.lane.b32.xlu1 %v7245_v24, 264 }
 0x351   : > { %v9027_v53 = vpop.xlane.xlu0 %1618 }
 0x354   : > { %v9029_v5 = vpop.xlane.xlu1 %1627  ;;  %1866 = vbcast.lane.b32.xlu1 %v7245_v24, 272 }
 0x355   : > { %v9031_v62 = vpop.xlane.xlu0 %1624 }
 0x356   : > { %1858 = vbcast.lane.b32.xlu0 %v7245_v24, 256 }
 0x358   : > { %v9033_v25 = vpop.xlane.xlu1 %1633  ;;  %1870 = vbcast.lane.b32.xlu1 %v7245_v24, 280 }
 0x359   : > { %13960 = vst [vmem:[#allocation24_spill] sm:$0xff] %v9033_v25  ;;  %v9035_v14 = vpop.xlane.xlu0 %1630 }
 0x35a   : > { %1874 = vbcast.lane.b32.xlu0 %v7245_v24, 288 }
 0x35c   : > { %v9037_v3 = vpop.xlane.xlu1 %1639  ;;  %1878 = vbcast.lane.b32.xlu1 %v7245_v24, 296 }
 0x35d   : > { %13961 = vst [vmem:[#allocation25_spill] sm:$0xff] %v9037_v3  ;;  %v9039_v19 = vpop.xlane.xlu0 %1636 }
 0x35e   : > { %13962 = vst [vmem:[#allocation26_spill] sm:$0xff] %v9039_v19  ;;  %1882 = vbcast.lane.b32.xlu0 %v7245_v24, 304 }
 0x360   : > { %v9041_v21 = vpop.xlane.xlu1 %1645  ;;  %1886 = vbcast.lane.b32.xlu1 %v7245_v24, 312 }
 0x361   : > { %13963 = vst [vmem:[#allocation27_spill] sm:$0xff] %v9041_v21  ;;  %v9043_v57 = vpop.xlane.xlu0 %1642 }
 0x362   : > { %13964 = vst [vmem:[#allocation28_spill] sm:$0xff] %v9043_v57  ;;  %1890 = vbcast.lane.b32.xlu0 %v7245_v24, 320 }
 0x364   : > { %v9045_v20 = vpop.xlane.xlu1 %1651  ;;  %1894 = vbcast.lane.b32.xlu1 %v7245_v24, 328 }
 0x365   : > { %13965 = vst [vmem:[#allocation29_spill] sm:$0xff] %v9045_v20  ;;  %v9047_v60 = vpop.xlane.xlu0 %1648 }
 0x366   : > { %13966 = vst [vmem:[#allocation30_spill] sm:$0xff] %v9047_v60  ;;  %1898 = vbcast.lane.b32.xlu0 %v7245_v24, 336 }
 0x368   : > { %v9049_v35 = vpop.xlane.xlu1 %1657  ;;  %1902 = vbcast.lane.b32.xlu1 %v7245_v24, 344 }
 0x369   : > { %13967 = vst [vmem:[#allocation31_spill] sm:$0xff] %v9049_v35  ;;  %v9051_v50 = vpop.xlane.xlu0 %1654 }
 0x36a   : > { %13968 = vst [vmem:[#allocation32_spill] sm:$0xff] %v9051_v50  ;;  %1906 = vbcast.lane.b32.xlu0 %v7245_v24, 352 }
 0x36c   : > { %v9053_v39 = vpop.xlane.xlu1 %1711  ;;  %1910 = vbcast.lane.b32.xlu1 %v7245_v24, 360 }
 0x36d   : > { %13969 = vst [vmem:[#allocation33_spill] sm:$0xff] %v9053_v39  ;;  %v9055_v21 = vpop.xlane.xlu0 %1708 }
 0x36e   : > { %13970 = vst [vmem:[#allocation34_spill] sm:$0xff] %v9055_v21  ;;  %1914 = vbcast.lane.b32.xlu0 %v7245_v24, 368 }
 0x370   : > { %v9057_v57 = vpop.xlane.xlu1 %1717  ;;  %1918 = vbcast.lane.b32.xlu1 %v7245_v24, 376 }
 0x371   : > { %13971 = vst [vmem:[#allocation35_spill] sm:$0xff] %v9057_v57  ;;  %v9059_v20 = vpop.xlane.xlu0 %1714 }
 0x372   : > { %13972 = vst [vmem:[#allocation36_spill] sm:$0xff] %v9059_v20 }
 0x374   : > { %v9061_v3 = vpop.xlane.xlu1 %1723 }
 0x375   : > { %13973 = vst [vmem:[#allocation37_spill] sm:$0xff] %v9061_v3  ;;  %v9063_v60 = vpop.xlane.xlu0 %1720 }
 0x376   : > { %13974 = vst [vmem:[#allocation38_spill] sm:$0xff] %v9063_v60 }
 0x378   : > { %v9065_v35 = vpop.xlane.xlu1 %1729 }
 0x379   : > { %13975 = vst [vmem:[#allocation39_spill] sm:$0xff] %v9065_v35  ;;  %v9067_v19 = vpop.xlane.xlu0 %1726 }
 0x37a   : > { %13976 = vst [vmem:[#allocation40_spill] sm:$0xff] %v9067_v19 }
 0x37c   : > { %v9069_v50 = vpop.xlane.xlu1 %1735 }
 0x37d   : > { %13977 = vst [vmem:[#allocation41_spill] sm:$0xff] %v9069_v50  ;;  %v9071_v39 = vpop.xlane.xlu0 %1732 }
 0x37e   : > { %13978 = vst [vmem:[#allocation42_spill] sm:$0xff] %v9071_v39 }
 0x380   : > { %v9073_v25 = vpop.xlane.xlu1 %1741 }
 0x381   : > { %13979 = vst [vmem:[#allocation43_spill] sm:$0xff] %v9073_v25  ;;  %v9075_v21 = vpop.xlane.xlu0 %1738 }
 0x382   : > { %13980 = vst [vmem:[#allocation44_spill] sm:$0xff] %v9075_v21 }
 0x384   : > { %v9077_v57 = vpop.xlane.xlu1 %1747 }
 0x385   : > { %13981 = vst [vmem:[#allocation45_spill] sm:$0xff] %v9077_v57  ;;  %v9079_v24 = vpop.xlane.xlu0 %1744 }
 0x386   : > { %13982 = vst [vmem:[#allocation46_spill] sm:$0xff] %v9079_v24 }
 0x388   : > { %v9081_v20 = vpop.xlane.xlu1 %1753 }
 0x389   : > { %13983 = vst [vmem:[#allocation47_spill] sm:$0xff] %v9081_v20  ;;  %v9083_v3 = vpop.xlane.xlu0 %1750 }
 0x38a   : > { %13984 = vst [vmem:[#allocation48_spill] sm:$0xff] %v9083_v3 }
 0x38c   : > { %v9085_v60 = vpop.xlane.xlu1 %1759 }
 0x38d   : > { %13985 = vst [vmem:[#allocation49_spill] sm:$0xff] %v9085_v60  ;;  %v9087_v35 = vpop.xlane.xlu0 %1756 }
 0x38e   : > { %13986 = vst [vmem:[#allocation50_spill] sm:$0xff] %v9087_v35 }
 0x390   : > { %v9089_v19 = vpop.xlane.xlu1 %1765 }
 0x391   : > { %13987 = vst [vmem:[#allocation51_spill] sm:$0xff] %v9089_v19  ;;  %v9091_v50 = vpop.xlane.xlu0 %1762 }
 0x392   : > { %13988 = vst [vmem:[#allocation52_spill] sm:$0xff] %v9091_v50 }
 0x394   : > { %v9093_v39 = vpop.xlane.xlu1 %1771 }
 0x395   : > { %13989 = vst [vmem:[#allocation53_spill] sm:$0xff] %v9093_v39  ;;  %v9095_v25 = vpop.xlane.xlu0 %1768 }
 0x396   : > { %13990 = vst [vmem:[#allocation54_spill] sm:$0xff] %v9095_v25 }
 0x398   : > { %v9097_v21 = vpop.xlane.xlu1 %1777 }
 0x399   : > { %13991 = vst [vmem:[#allocation55_spill] sm:$0xff] %v9097_v21  ;;  %v9099_v57 = vpop.xlane.xlu0 %1774 }
 0x39a   : > { %13992 = vst [vmem:[#allocation56_spill] sm:$0xff] %v9099_v57 }
 0x39c   : > { %v9101_v24 = vpop.xlane.xlu1 %1783 }
 0x39d   : > { %13993 = vst [vmem:[#allocation57_spill] sm:$0xff] %v9101_v24  ;;  %v9103_v20 = vpop.xlane.xlu0 %1780 }
 0x39e   : > { %13994 = vst [vmem:[#allocation58_spill] sm:$0xff] %v9103_v20 }
 0x3a0   : > { %v9105_v3 = vpop.xlane.xlu1 %1789 }
 0x3a1   : > { %13995 = vst [vmem:[#allocation59_spill] sm:$0xff] %v9105_v3  ;;  %v9107_v60 = vpop.xlane.xlu0 %1786 }
 0x3a2   : > { %13996 = vst [vmem:[#allocation60_spill] sm:$0xff] %v9107_v60 }
 0x3a4   : > { %v9109_v35 = vpop.xlane.xlu1 %1795 }
 0x3a5   : > { %13997 = vst [vmem:[#allocation61_spill] sm:$0xff] %v9109_v35  ;;  %v9111_v19 = vpop.xlane.xlu0 %1792 }
 0x3a6   : > { %13998 = vst [vmem:[#allocation62_spill] sm:$0xff] %v9111_v19 }
 0x3a8   : > { %v9113_v50 = vpop.xlane.xlu1 %1801 }
 0x3a9   : > { %13999 = vst [vmem:[#allocation63_spill] sm:$0xff] %v9113_v50  ;;  %v9115_v39 = vpop.xlane.xlu0 %1798 }
 0x3aa   : > { %14000 = vst [vmem:[#allocation64_spill] sm:$0xff] %v9115_v39 }
 0x3ac   : > { %v9117_v25 = vpop.xlane.xlu1 %1807 }
 0x3ad   : > { %14001 = vst [vmem:[#allocation65_spill] sm:$0xff] %v9117_v25  ;;  %v9119_v21 = vpop.xlane.xlu0 %1804 }
 0x3ae   : > { %14002 = vst [vmem:[#allocation66_spill] sm:$0xff] %v9119_v21 }
 0x3b0   : > { %v9121_v57 = vpop.xlane.xlu1 %1813 }
 0x3b1   : > { %14003 = vst [vmem:[#allocation67_spill] sm:$0xff] %v9121_v57  ;;  %v9123_v24 = vpop.xlane.xlu0 %1810 }
 0x3b2   : > { %14004 = vst [vmem:[#allocation68_spill] sm:$0xff] %v9123_v24 }
 0x3b4   : > { %v9125_v20 = vpop.xlane.xlu1 %1819 }
 0x3b5   : > { %14005 = vst [vmem:[#allocation69_spill] sm:$0xff] %v9125_v20  ;;  %v9127_v3 = vpop.xlane.xlu0 %1816 }
 0x3b6   : > { %14006 = vst [vmem:[#allocation70_spill] sm:$0xff] %v9127_v3 }
 0x3b8   : > { %v9129_v60 = vpop.xlane.xlu1 %1825 }
 0x3b9   : > { %14007 = vst [vmem:[#allocation71_spill] sm:$0xff] %v9129_v60  ;;  %v9131_v35 = vpop.xlane.xlu0 %1822 }
 0x3bc   : > { %v9133_v19 = vpop.xlane.xlu1 %1831 }
 0x3bd   : > { %14008 = vst [vmem:[#allocation72_spill] sm:$0xff] %v9133_v19  ;;  %v9135_v50 = vpop.xlane.xlu0 %1828 }
 0x3c0   : > { %v9137_v39 = vpop.xlane.xlu1 %1837 }
 0x3c1   : > { %14009 = vst [vmem:[#allocation73_spill] sm:$0xff] %v9137_v39  ;;  %v9139_v25 = vpop.xlane.xlu0 %1834 }
 0x3c4   : > { %v9141_v21 = vpop.xlane.xlu1 %1843 }
 0x3c5   : > { %14010 = vst [vmem:[#allocation74_spill] sm:$0xff] %v9141_v21  ;;  %v9143_v57 = vpop.xlane.xlu0 %1840 }
 0x3c6   : > { %14011 = vst [vmem:[#allocation75_spill] sm:$0xff] %v9143_v57 }
 0x3c8   : > { %v9145_v24 = vpop.xlane.xlu1 %1849 }
 0x3c9   : > { %14012 = vst [vmem:[#allocation76_spill] sm:$0xff] %v9145_v24  ;;  %v9147_v20 = vpop.xlane.xlu0 %1846 }
 0x3ca   : > { %14013 = vst [vmem:[#allocation77_spill] sm:$0xff] %v9147_v20 }
 0x3cc   : > { %v9149_v3 = vpop.permute.xlu1 %1862 }
 0x3cd   : > { %v9151_v60 = vpop.permute.xlu0 %1858  ;;  %v9155_v19 = vadd.f32 %v9149_v3, %v8606_v34 }
 0x3ce   : > { %v9159_v39 = vadd.f32 %v9151_v60, %v8585_v41 }
 0x3cf   : > { %14014 = vst [vmem:[#allocation78_spill] sm:$0xff] %v9155_v19  ;;  %2196 = vperm.xlu1 %7342, %v9155_v19  }
 0x3d0   : > { %14015 = vst [vmem:[#allocation79_spill] sm:$0xff] %v9159_v39  ;;  %2193 = vperm.xlu0 %7341, %v9159_v39   ;;  %v9163_v21 = vpop.permute.xlu1 %1866 }
 0x3d1   : > { %v9165_v24 = vpop.permute.xlu0 %1874  ;;  %v9169_v20 = vadd.f32 %v9163_v21, %v8580_v38 }
 0x3d2   : > { %v9182_v19 = vadd.f32 %v9165_v24, %v8622_v1 }
 0x3d3   : > { %14016 = vst [vmem:[#allocation80_spill] sm:$0xff] %v9169_v20  ;;  %2199 = vperm.xlu1 %7342, %v9169_v20  }
 0x3d4   : > { %v9172_v34 = vpop.permute.xlu1 %1870  ;;  %14018 = vst [vmem:[#allocation82_spill] sm:$0xff] %v9182_v19 }
 0x3d5   : > { %v9174_v57 = vpop.permute.xlu0 %1882  ;;  %v9178_v41 = vadd.f32 %v9172_v34, %v8601_v49 }
 0x3d6   : > { %v9196_v49 = vadd.f32 %v9174_v57, %v8638_v13 }
 0x3d7   : > { %14017 = vst [vmem:[#allocation81_spill] sm:$0xff] %v9178_v41  ;;  %2202 = vperm.xlu0 %7341, %v9178_v41   ;;  %2205 = vperm.xlu1 %7342, %v9182_v19  }
 0x3d8   : > { %v9186_v38 = vpop.permute.xlu1 %1878  ;;  %14020 = vst [vmem:[#allocation84_spill] sm:$0xff] %v9196_v49 }
 0x3d9   : > { %v9188_v39 = vpop.permute.xlu0 %1890  ;;  %v9192_v20 = vadd.f32 %v9186_v38, %v8617_v63 }
 0x3da   : > { %v9210_v63 = vadd.f32 %v9188_v39, %v8654_v31 }
 0x3db   : > { %14019 = vst [vmem:[#allocation83_spill] sm:$0xff] %v9192_v20  ;;  %2208 = vperm.xlu0 %7341, %v9192_v20   ;;  %2211 = vperm.xlu1 %7342, %v9196_v49  }
 0x3dc   : > { %v9200_v1 = vpop.permute.xlu1 %1886  ;;  %14022 = vst [vmem:[#allocation86_spill] sm:$0xff] %v9210_v63 }
 0x3dd   : > { %v9202_v41 = vpop.permute.xlu0 %1898  ;;  %v9206_v19 = vadd.f32 %v9200_v1, %v8633_v10 }
 0x3de   : > { %v9224_v10 = vadd.f32 %v9202_v41, %v8672_v47 }
 0x3df   : > { %14021 = vst [vmem:[#allocation85_spill] sm:$0xff] %v9206_v19  ;;  %2214 = vperm.xlu0 %7341, %v9206_v19   ;;  %2217 = vperm.xlu1 %7342, %v9210_v63  }
 0x3e0   : > { %v9214_v13 = vpop.permute.xlu1 %1894  ;;  %14024 = vst [vmem:[#allocation88_spill] sm:$0xff] %v9224_v10 }
 0x3e1   : > { %v9216_v20 = vpop.permute.xlu0 %1906  ;;  %v9220_v49 = vadd.f32 %v9214_v13, %v8649_v29 }
 0x3e2   : > { %v9236_v19 = vadd.f32 %v9216_v20, %v8691_v61 }
 0x3e3   : > { %14023 = vst [vmem:[#allocation87_spill] sm:$0xff] %v9220_v49  ;;  %2220 = vperm.xlu0 %7341, %v9220_v49   ;;  %2223 = vperm.xlu1 %7342, %v9224_v10  }
 0x3e4   : > { %v9228_v31 = vpop.permute.xlu1 %1902  ;;  %14026 = vst [vmem:[#allocation90_spill] sm:$0xff] %v9236_v19 }
 0x3e5   : > { %v9232_v63 = vadd.f32 %v9228_v31, %v8665_v44  ;;  %v9238_v29 = vpop.permute.xlu0 %1914 }
 0x3e6   : > { %v9250_v44 = vadd.f32 %v9238_v29, %v8707_v15  ;;  %v9272_v15 = vadd.f32 %v9163_v21, %v8739_v51  ;;  %v9292_v51 = vadd.f32 %v9174_v57, %v8771_v26  ;;  %v9312_v26 = vadd.f32 %v9202_v41, %v8805_v23 }
 0x3e7   : > { %14025 = vst [vmem:[#allocation89_spill] sm:$0xff] %v9232_v63  ;;  %2226 = vperm.xlu0 %7341, %v9232_v63   ;;  %2229 = vperm.xlu1 %7342, %v9236_v19   ;;  %v9262_v19 = vadd.f32 %v9151_v60, %v8723_v32  ;;  %v9282_v32 = vadd.f32 %v9165_v24, %v8755_v4 }
 0x3e8   : > { %v9242_v47 = vpop.permute.xlu1 %1910  ;;  %14028 = vst [vmem:[#allocation92_spill] sm:$0xff] %v9250_v44  ;;  %14032 = vst [vmem:[#allocation96_spill] sm:$0xff] %v9272_v15  ;;  %v9302_v4 = vadd.f32 %v9188_v39, %v8787_v46  ;;  %v9322_v46 = vadd.f32 %v9216_v20, %v8824_v33  ;;  %v9332_v23 = vadd.f32 %v9238_v29, %v8840_v36 }
 0x3e9   : > { %v9246_v10 = vadd.f32 %v9242_v47, %v8683_v58  ;;  %14030 = vst [vmem:[#allocation94_spill] sm:$0xff] %v9262_v19  ;;  %v9268_v58 = vadd.f32 %v9149_v3, %v8718_v30  ;;  %14034 = vst [vmem:[#allocation98_spill] sm:$0xff] %v9282_v32  ;;  %v9288_v30 = vadd.f32 %v9186_v38, %v8750_v2 }
 0x3ea   : > { %14036 = vst [vmem:[#allocation100_spill] sm:$0xff] %v9292_v51  ;;  %14038 = vst [vmem:[#allocation102_spill] sm:$0xff] %v9302_v4  ;;  %v9308_v2 = vadd.f32 %v9214_v13, %v8782_v43  ;;  %v9328_v43 = vadd.f32 %v9242_v47, %v8816_v27  ;;  %v9342_v33 = vadd.f32 %v9151_v60, %v8856_v11 }
 0x3eb   : > { %14027 = vst [vmem:[#allocation91_spill] sm:$0xff] %v9246_v10  ;;  %2232 = vperm.xlu0 %7341, %v9246_v10   ;;  %2235 = vperm.xlu1 %7342, %v9250_v44   ;;  %14031 = vst [vmem:[#allocation95_spill] sm:$0xff] %v9268_v58  ;;  %v9348_v27 = vadd.f32 %v9149_v3, %v8851_v16  ;;  %v9352_v36 = vadd.f32 %v9163_v21, %v8872_v52  ;;  %v14139_v10 = vld [vmem:[#allocation39_spill] sm:$0xff] }
 0x3ec   : > { %v9254_v61 = vpop.permute.xlu1 %1918  ;;  %14035 = vst [vmem:[#allocation99_spill] sm:$0xff] %v9288_v30  ;;  %14039 = vst [vmem:[#allocation103_spill] sm:$0xff] %v9308_v2  ;;  %v9362_v11 = vadd.f32 %v9165_v24, %v8888_v17  ;;  %v9368_v16 = vadd.f32 %v9186_v38, %v8883_v8  ;;  %v9372_v52 = vadd.f32 %v9174_v57, %v8904_v56 }
 0x3ed   : > { %v9258_v63 = vadd.f32 %v9254_v61, %v8702_v9  ;;  %v9278_v9 = vadd.f32 %v9172_v34, %v8734_v7  ;;  %v9298_v7 = vadd.f32 %v9200_v1, %v8766_v22  ;;  %14040 = vst [vmem:[#allocation104_spill] sm:$0xff] %v9312_v26  ;;  %v9318_v22 = vadd.f32 %v9228_v31, %v8798_v18 }
 0x3ee   : > { %14042 = vst [vmem:[#allocation106_spill] sm:$0xff] %v9322_v46  ;;  %14043 = vst [vmem:[#allocation107_spill] sm:$0xff] %v9328_v43  ;;  %v9338_v18 = vadd.f32 %v9254_v61, %v8835_v55  ;;  %v9358_v55 = vadd.f32 %v9172_v34, %v8867_v45  ;;  %v9378_v45 = vadd.f32 %v9200_v1, %v8899_v48 }
 0x3ef   : > { %14029 = vst [vmem:[#allocation93_spill] sm:$0xff] %v9258_v63  ;;  %2238 = vperm.xlu0 %7341, %v9258_v63   ;;  %2241 = vperm.xlu1 %7342, %v9262_v19   ;;  %14033 = vst [vmem:[#allocation97_spill] sm:$0xff] %v9278_v9  ;;  %v9382_v17 = vadd.f32 %v9188_v39, %v8920_v28  ;;  %v9388_v8 = vadd.f32 %v9214_v13, %v8915_v40  ;;  %v14058_v28 = vld [vmem:[#allocation7_spill] sm:$0xff]  ;;  %v14060_v40 = vld [vmem:[#allocation6_spill] sm:$0xff] }
 0x3f0   : > { %14037 = vst [vmem:[#allocation101_spill] sm:$0xff] %v9298_v7  ;;  %14041 = vst [vmem:[#allocation105_spill] sm:$0xff] %v9318_v22  ;;  %v9392_v56 = vadd.f32 %v9202_v41, %v8936_v0  ;;  %v9398_v48 = vadd.f32 %v9228_v31, %v8931_v59  ;;  %v9408_v0 = vadd.f32 %v9242_v47, %v14060_v40  ;;  %v14135_v19 = vld [vmem:[#allocation37_spill] sm:$0xff]  ;;  %v14167_v63 = vld [vmem:[#allocation54_spill] sm:$0xff] }
 0x3f1   : > { %14044 = vst [vmem:[#allocation108_spill] sm:$0xff] %v9332_v23  ;;  %14045 = vst [vmem:[#allocation109_spill] sm:$0xff] %v9338_v18  ;;  %v9418_v59 = vadd.f32 %v9254_v61, %v8960_v37  ;;  %v9432_v40 = vadd.f32 %v9163_v21, %v9027_v53  ;;  %v9438_v37 = vadd.f32 %v9172_v34, %v9025_v54  ;;  %v14071_v54 = vld [vmem:[#allocation24_spill] sm:$0xff] }
 0x3f2   : > { %14046 = vst [vmem:[#allocation110_spill] sm:$0xff] %v9342_v33  ;;  %14047 = vst [vmem:[#allocation111_spill] sm:$0xff] %v9348_v27  ;;  %v9452_v53 = vadd.f32 %v9174_v57, %v9035_v14  ;;  %v9654_v44 = vadd.f32 %v9186_v38, %v14135_v19 }
 0x3f3   : > { %2244 = vperm.xlu0 %7341, %v9268_v58   ;;  %2247 = vperm.xlu1 %7342, %v9272_v15   ;;  %14048 = vst [vmem:[#allocation112_spill] sm:$0xff] %v9352_v36  ;;  %14049 = vst [vmem:[#allocation113_spill] sm:$0xff] %v9358_v55  ;;  %v14131_v15 = vld [vmem:[#allocation35_spill] sm:$0xff] }
 0x3f4   : > { %14050 = vst [vmem:[#allocation114_spill] sm:$0xff] %v9362_v11  ;;  %14051 = vst [vmem:[#allocation115_spill] sm:$0xff] %v9368_v16 }
 0x3f5   : > { %14052 = vst [vmem:[#allocation116_spill] sm:$0xff] %v9372_v52  ;;  %14053 = vst [vmem:[#allocation117_spill] sm:$0xff] %v9378_v45 }
 0x3f6   : > { %14054 = vst [vmem:[#allocation118_spill] sm:$0xff] %v9382_v17  ;;  %14055 = vst [vmem:[#allocation119_spill] sm:$0xff] %v9388_v8 }
 0x3f7   : > { %2250 = vperm.xlu0 %7341, %v9278_v9   ;;  %2253 = vperm.xlu1 %7342, %v9282_v32   ;;  %14056 = vst [vmem:[#allocation120_spill] sm:$0xff] %v9392_v56  ;;  %14057 = vst [vmem:[#allocation121_spill] sm:$0xff] %v9398_v48  ;;  %v14127_v32 = vld [vmem:[#allocation33_spill] sm:$0xff]  ;;  %v14163_v9 = vld [vmem:[#allocation52_spill] sm:$0xff] }
 0x3f8   : > { %14061 = vst [vmem:[#allocation6_spill] sm:$0xff] %v9408_v0  ;;  %14063 = vst [vmem:[#allocation123_spill] sm:$0xff] %v9418_v59 }
 0x3f9   : > { %14066 = vst [vmem:[#allocation126_spill] sm:$0xff] %v9432_v40  ;;  %14067 = vst [vmem:[#allocation127_spill] sm:$0xff] %v9438_v37 }
 0x3fa   : > { %14070 = vst [vmem:[#allocation130_spill] sm:$0xff] %v9452_v53  ;;  %14136 = vst [vmem:[#allocation37_spill] sm:$0xff] %v9654_v44 }
 0x3fb   : > { %2256 = vperm.xlu0 %7341, %v9288_v30   ;;  %2259 = vperm.xlu1 %7342, %v9292_v51  }
 0x3ff   : > { %2262 = vperm.xlu0 %7341, %v9298_v7   ;;  %2265 = vperm.xlu1 %7342, %v9302_v4  }
 0x403   : > { %2268 = vperm.xlu0 %7341, %v9308_v2   ;;  %2271 = vperm.xlu1 %7342, %v9312_v26  }
 0x407   : > { %2274 = vperm.xlu0 %7341, %v9318_v22   ;;  %2277 = vperm.xlu1 %7342, %v9322_v46   ;;  %v14081_v22 = vld [vmem:[#allocation30_spill] sm:$0xff]  ;;  %v14097_v46 = vld [vmem:[#allocation13_spill] sm:$0xff] }
 0x40b   : > { %2280 = vperm.xlu0 %7341, %v9328_v43   ;;  %2283 = vperm.xlu1 %7342, %v9332_v23   ;;  %v9412_v43 = vadd.f32 %v9238_v29, %v8962_v42  ;;  %v9428_v42 = vadd.f32 %v9149_v3, %v9018_v12  ;;  %v9448_v12 = vadd.f32 %v9186_v38, %v9029_v5  ;;  %v14075_v5 = vld [vmem:[#allocation25_spill] sm:$0xff] }
 0x40c   : > { %v9468_v14 = vadd.f32 %v9214_v13, %v14075_v5  ;;  %v9482_v23 = vadd.f32 %v9216_v20, %v14081_v22  ;;  %v14083_v5 = vld [vmem:[#allocation29_spill] sm:$0xff]  ;;  %v14087_v22 = vld [vmem:[#allocation31_spill] sm:$0xff] }
 0x40d   : > { %14062 = vst [vmem:[#allocation122_spill] sm:$0xff] %v9412_v43  ;;  %14065 = vst [vmem:[#allocation125_spill] sm:$0xff] %v9428_v42 }
 0x40e   : > { %14069 = vst [vmem:[#allocation129_spill] sm:$0xff] %v9448_v12  ;;  %14076 = vst [vmem:[#allocation25_spill] sm:$0xff] %v9468_v14 }
 0x40f   : > { %2286 = vperm.xlu0 %7341, %v9338_v18   ;;  %2289 = vperm.xlu1 %7342, %v9342_v33   ;;  %v9402_v18 = vadd.f32 %v9216_v20, %v14058_v28  ;;  %v9422_v28 = vadd.f32 %v9151_v60, %v9020_v6  ;;  %v9442_v6 = vadd.f32 %v9165_v24, %v9031_v62 }
 0x410   : > { %v9458_v62 = vadd.f32 %v9200_v1, %v14071_v54  ;;  %v14079_v54 = vld [vmem:[#allocation27_spill] sm:$0xff]  ;;  %14082 = vst [vmem:[#allocation30_spill] sm:$0xff] %v9482_v23 }
 0x411   : > { %14059 = vst [vmem:[#allocation7_spill] sm:$0xff] %v9402_v18  ;;  %14064 = vst [vmem:[#allocation124_spill] sm:$0xff] %v9422_v28 }
 0x412   : > { %14068 = vst [vmem:[#allocation128_spill] sm:$0xff] %v9442_v6  ;;  %14072 = vst [vmem:[#allocation24_spill] sm:$0xff] %v9458_v62 }
 0x413   : > { %2292 = vperm.xlu0 %7341, %v9348_v27   ;;  %2295 = vperm.xlu1 %7342, %v9352_v36   ;;  %v14159_v36 = vld [vmem:[#allocation47_spill] sm:$0xff] }
 0x417   : > { %2298 = vperm.xlu0 %7341, %v9358_v55   ;;  %2301 = vperm.xlu1 %7342, %v9362_v11   ;;  %v14118_v55 = vld [vmem:[#allocation20_spill] sm:$0xff]  ;;  %v14148_v11 = vld [vmem:[#allocation43_spill] sm:$0xff] }
 0x41b   : > { %2304 = vperm.xlu0 %7341, %v9368_v16   ;;  %2307 = vperm.xlu1 %7342, %v9372_v52  }
 0x41f   : > { %2310 = vperm.xlu0 %7341, %v9378_v45   ;;  %2313 = vperm.xlu1 %7342, %v9382_v17  }
 0x423   : > { %2316 = vperm.xlu0 %7341, %v9388_v8   ;;  %2319 = vperm.xlu1 %7342, %v9392_v56   ;;  %v14085_v8 = vld [vmem:[#allocation32_spill] sm:$0xff] }
 0x424   : > { %v14099_v56 = vld [vmem:[#allocation12_spill] sm:$0xff] }
 0x425   : > { %v9542_v52 = vadd.f32 %v9186_v38, %v14099_v56 }
 0x427   : > { %2322 = vperm.xlu0 %7341, %v9398_v48   ;;  %2325 = vperm.xlu1 %7342, %v9402_v18   ;;  %v14077_v48 = vld [vmem:[#allocation28_spill] sm:$0xff]  ;;  %14100 = vst [vmem:[#allocation12_spill] sm:$0xff] %v9542_v52 }
 0x42b   : > { %2328 = vperm.xlu0 %7341, %v9408_v0   ;;  %2331 = vperm.xlu1 %7342, %v9412_v43   ;;  %v14073_v0 = vld [vmem:[#allocation26_spill] sm:$0xff]  ;;  %v9472_v43 = vadd.f32 %v9202_v41, %v14077_v48  ;;  %v9488_v48 = vadd.f32 %v9242_v47, %v14083_v5 }
 0x42d   : > { %14078 = vst [vmem:[#allocation28_spill] sm:$0xff] %v9472_v43  ;;  %14084 = vst [vmem:[#allocation29_spill] sm:$0xff] %v9488_v48 }
 0x42f   : > { %2334 = vperm.xlu0 %7341, %v9418_v59   ;;  %2337 = vperm.xlu1 %7342, %v9422_v28   ;;  %v9462_v59 = vadd.f32 %v9188_v39, %v14073_v0  ;;  %v9478_v0 = vadd.f32 %v9228_v31, %v14079_v54  ;;  %v9500_v54 = vadd.f32 %v9254_v61, %v14087_v22  ;;  %v14123_v28 = vld [vmem:[#allocation22_spill] sm:$0xff] }
 0x431   : > { %14074 = vst [vmem:[#allocation26_spill] sm:$0xff] %v9462_v59  ;;  %14080 = vst [vmem:[#allocation27_spill] sm:$0xff] %v9478_v0 }
 0x432   : > { %14088 = vst [vmem:[#allocation31_spill] sm:$0xff] %v9500_v54 }
 0x433   : > { %2340 = vperm.xlu0 %7341, %v9428_v42   ;;  %2343 = vperm.xlu1 %7342, %v9432_v40   ;;  %v14154_v40 = vld [vmem:[#allocation45_spill] sm:$0xff] }
 0x437   : > { %2346 = vperm.xlu0 %7341, %v9438_v37   ;;  %2349 = vperm.xlu1 %7342, %v9442_v6   ;;  %v14103_v6 = vld [vmem:[#allocation14_spill] sm:$0xff]  ;;  %v14107_v37 = vld [vmem:[#allocation16_spill] sm:$0xff] }
 0x438   : > { %v9556_v51 = vadd.f32 %v9200_v1, %v14103_v6 }
 0x43a   : > { %14104 = vst [vmem:[#allocation14_spill] sm:$0xff] %v9556_v51 }
 0x43b   : > { %2352 = vperm.xlu0 %7341, %v9448_v12   ;;  %2355 = vperm.xlu1 %7342, %v9452_v53  }
 0x43f   : > { %2358 = vperm.xlu0 %7341, %v9458_v62   ;;  %2361 = vperm.xlu1 %7342, %v9462_v59   ;;  %v14101_v59 = vld [vmem:[#allocation15_spill] sm:$0xff] }
 0x443   : > { %2364 = vperm.xlu0 %7341, %v9468_v14   ;;  %2367 = vperm.xlu1 %7342, %v9472_v43   ;;  %v9492_v14 = vadd.f32 %v9238_v29, %v14085_v8  ;;  %v14091_v8 = vld [vmem:[#allocation8_spill] sm:$0xff]  ;;  %v14095_v43 = vld [vmem:[#allocation10_spill] sm:$0xff] }
 0x445   : > { %14086 = vst [vmem:[#allocation32_spill] sm:$0xff] %v9492_v14 }
 0x447   : > { %2370 = vperm.xlu0 %7341, %v9478_v0   ;;  %2373 = vperm.xlu1 %7342, %v9482_v23   ;;  %v14089_v0 = vld [vmem:[#allocation9_spill] sm:$0xff] }
 0x448   : > { %v9504_v23 = vadd.f32 %v9151_v60, %v14089_v0 }
 0x44a   : > { %v9494_v18 = vpop.permute.xlu1 %2196  ;;  %14090 = vst [vmem:[#allocation9_spill] sm:$0xff] %v9504_v23 }
 0x44b   : > { %2376 = vperm.xlu0 %7341, %v9488_v48   ;;  %2379 = vperm.xlu1 %7342, %v9492_v14   ;;  %v9506_v5 = vpop.permute.xlu0 %2193  ;;  %v9514_v48 = vadd.f32 %v9149_v3, %v14091_v8  ;;  %v14093_v14 = vld [vmem:[#allocation11_spill] sm:$0xff]  ;;  %v9532_v8 = vadd.f32 %v9165_v24, %v14097_v46 }
 0x44c   : > { %v9518_v22 = vadd.f32 %v9163_v21, %v14093_v14 }
 0x44d   : > { %14092 = vst [vmem:[#allocation8_spill] sm:$0xff] %v9514_v48  ;;  %14098 = vst [vmem:[#allocation13_spill] sm:$0xff] %v9532_v8 }
 0x44e   : > { %v9508_v62 = vpop.permute.xlu1 %2199  ;;  %14094 = vst [vmem:[#allocation11_spill] sm:$0xff] %v9518_v22 }
 0x44f   : > { %2382 = vperm.xlu0 %7341, %v9500_v54   ;;  %2385 = vperm.xlu1 %7342, %v9504_v23   ;;  %v9528_v54 = vadd.f32 %v9172_v34, %v14095_v43  ;;  %v9546_v43 = vadd.f32 %v9174_v57, %v14101_v59  ;;  %v14112_v23 = vld [vmem:[#allocation18_spill] sm:$0xff] }
 0x451   : > { %14096 = vst [vmem:[#allocation10_spill] sm:$0xff] %v9528_v54  ;;  %14102 = vst [vmem:[#allocation15_spill] sm:$0xff] %v9546_v43 }
 0x452   : > { %v9520_v2 = vpop.permute.xlu1 %2205  ;;  %v9522_v0 = vpop.permute.xlu0 %2202 }
 0x453   : > { %2388 = vperm.xlu0 %7341, %v9514_v48   ;;  %2391 = vperm.xlu1 %7342, %v9518_v22  }
 0x456   : > { %v9534_v45 = vpop.permute.xlu1 %2211  ;;  %v9536_v14 = vpop.permute.xlu0 %2208 }
 0x457   : > { %2394 = vperm.xlu0 %7341, %v9528_v54   ;;  %2397 = vperm.xlu1 %7342, %v9532_v8   ;;  %v14105_v8 = vld [vmem:[#allocation17_spill] sm:$0xff] }
 0x458   : > { %v9560_v56 = vadd.f32 %v9188_v39, %v14105_v8 }
 0x45a   : > { %v9548_v26 = vpop.permute.xlu1 %2217  ;;  %v9550_v46 = vpop.permute.xlu0 %2214  ;;  %14106 = vst [vmem:[#allocation17_spill] sm:$0xff] %v9560_v56 }
 0x45b   : > { %2400 = vperm.xlu0 %7341, %v9542_v52   ;;  %2403 = vperm.xlu1 %7342, %v9546_v43   ;;  %v9570_v52 = vadd.f32 %v9214_v13, %v14107_v37  ;;  %v14109_v43 = vld [vmem:[#allocation19_spill] sm:$0xff] }
 0x45c   : > { %v9574_v6 = vadd.f32 %v9202_v41, %v14109_v43 }
 0x45d   : > { %14108 = vst [vmem:[#allocation16_spill] sm:$0xff] %v9570_v52 }
 0x45e   : > { %v9562_v17 = vpop.permute.xlu1 %2223  ;;  %v9564_v59 = vpop.permute.xlu0 %2220  ;;  %14110 = vst [vmem:[#allocation19_spill] sm:$0xff] %v9574_v6 }
 0x45f   : > { %2406 = vperm.xlu0 %7341, %v9556_v51   ;;  %2409 = vperm.xlu1 %7342, %v9560_v56   ;;  %v9584_v51 = vadd.f32 %v9228_v31, %v14112_v23  ;;  %v14114_v56 = vld [vmem:[#allocation21_spill] sm:$0xff] }
 0x460   : > { %v9588_v37 = vadd.f32 %v9216_v20, %v14114_v56 }
 0x461   : > { %14113 = vst [vmem:[#allocation18_spill] sm:$0xff] %v9584_v51 }
 0x462   : > { %v9576_v30 = vpop.permute.xlu1 %2229  ;;  %v9578_v8 = vpop.permute.xlu0 %2226  ;;  %14115 = vst [vmem:[#allocation21_spill] sm:$0xff] %v9588_v37 }
 0x463   : > { %14111 = vst [vmem:[#allocation131_spill] sm:$0xff] %v9576_v30  ;;  %2412 = vperm.xlu0 %7341, %v9570_v52   ;;  %2415 = vperm.xlu1 %7342, %v9574_v6   ;;  %v9598_v52 = vadd.f32 %v9242_v47, %v14118_v55  ;;  %v14120_v6 = vld [vmem:[#allocation23_spill] sm:$0xff]  ;;  %v14205_v30 = vld [vmem:[#allocation70_spill] sm:$0xff] }
 0x464   : > { %v9602_v23 = vadd.f32 %v9238_v29, %v14120_v6 }
 0x465   : > { %14119 = vst [vmem:[#allocation20_spill] sm:$0xff] %v9598_v52 }
 0x466   : > { %v9590_v53 = vpop.permute.xlu1 %2235  ;;  %v9592_v43 = vpop.permute.xlu0 %2232  ;;  %14121 = vst [vmem:[#allocation23_spill] sm:$0xff] %v9602_v23 }
 0x467   : > { %14116 = vst [vmem:[#allocation132_spill] sm:$0xff] %v9590_v53  ;;  %14117 = vst [vmem:[#allocation133_spill] sm:$0xff] %v9592_v43  ;;  %2418 = vperm.xlu0 %7341, %v9584_v51   ;;  %2421 = vperm.xlu1 %7342, %v9588_v37   ;;  %v9612_v51 = vadd.f32 %v9254_v61, %v14123_v28  ;;  %v14125_v37 = vld [vmem:[#allocation34_spill] sm:$0xff] }
 0x468   : > { %v9616_v55 = vadd.f32 %v9151_v60, %v14125_v37 }
 0x469   : > { %14124 = vst [vmem:[#allocation22_spill] sm:$0xff] %v9612_v51 }
 0x46a   : > { %v9604_v4 = vpop.permute.xlu1 %2241  ;;  %v9606_v56 = vpop.permute.xlu0 %2238  ;;  %14126 = vst [vmem:[#allocation34_spill] sm:$0xff] %v9616_v55 }
 0x46b   : > { %14122 = vst [vmem:[#allocation134_spill] sm:$0xff] %v9606_v56  ;;  %2424 = vperm.xlu0 %7341, %v9598_v52   ;;  %2427 = vperm.xlu1 %7342, %v9602_v23   ;;  %v9626_v52 = vadd.f32 %v9149_v3, %v14127_v32  ;;  %v14129_v23 = vld [vmem:[#allocation36_spill] sm:$0xff]  ;;  %v14175_v56 = vld [vmem:[#allocation58_spill] sm:$0xff] }
 0x46c   : > { %v9630_v28 = vadd.f32 %v9163_v21, %v14129_v23 }
 0x46d   : > { %14128 = vst [vmem:[#allocation33_spill] sm:$0xff] %v9626_v52 }
 0x46e   : > { %v9618_v27 = vpop.permute.xlu1 %2247  ;;  %v9620_v6 = vpop.permute.xlu0 %2244  ;;  %14130 = vst [vmem:[#allocation36_spill] sm:$0xff] %v9630_v28 }
 0x46f   : > { %2430 = vperm.xlu0 %7341, %v9612_v51   ;;  %2433 = vperm.xlu1 %7342, %v9616_v55   ;;  %v9640_v51 = vadd.f32 %v9172_v34, %v14131_v15  ;;  %v14133_v55 = vld [vmem:[#allocation38_spill] sm:$0xff] }
 0x470   : > { %v9644_v32 = vadd.f32 %v9165_v24, %v14133_v55 }
 0x471   : > { %14132 = vst [vmem:[#allocation35_spill] sm:$0xff] %v9640_v51 }
 0x472   : > { %v9632_v12 = vpop.permute.xlu1 %2253  ;;  %v9634_v37 = vpop.permute.xlu0 %2250  ;;  %14134 = vst [vmem:[#allocation38_spill] sm:$0xff] %v9644_v32 }
 0x473   : > { %2436 = vperm.xlu0 %7341, %v9626_v52   ;;  %2439 = vperm.xlu1 %7342, %v9630_v28   ;;  %v14137_v28 = vld [vmem:[#allocation40_spill] sm:$0xff]  ;;  %v14143_v52 = vld [vmem:[#allocation41_spill] sm:$0xff] }
 0x474   : > { %v9658_v15 = vadd.f32 %v9174_v57, %v14137_v28 }
 0x476   : > { %v9646_v7 = vpop.permute.xlu1 %2259  ;;  %v9648_v23 = vpop.permute.xlu0 %2256  ;;  %14138 = vst [vmem:[#allocation40_spill] sm:$0xff] %v9658_v15 }
 0x477   : > { %2442 = vperm.xlu0 %7341, %v9640_v51   ;;  %2445 = vperm.xlu1 %7342, %v9644_v32   ;;  %v9668_v51 = vadd.f32 %v9200_v1, %v14139_v10  ;;  %v14141_v32 = vld [vmem:[#allocation42_spill] sm:$0xff] }
 0x478   : > { %v9672_v19 = vadd.f32 %v9188_v39, %v14141_v32 }
 0x479   : > { %14140 = vst [vmem:[#allocation39_spill] sm:$0xff] %v9668_v51 }
 0x47a   : > { %v9660_v54 = vpop.permute.xlu1 %2265  ;;  %v9662_v55 = vpop.permute.xlu0 %2262  ;;  %14142 = vst [vmem:[#allocation42_spill] sm:$0xff] %v9672_v19 }
 0x47b   : > { %2448 = vperm.xlu0 %7341, %v9654_v44   ;;  %2451 = vperm.xlu1 %7342, %v9658_v15   ;;  %v9682_v44 = vadd.f32 %v9214_v13, %v14143_v52  ;;  %v14145_v15 = vld [vmem:[#allocation44_spill] sm:$0xff] }
 0x47c   : > { %v9686_v10 = vadd.f32 %v9202_v41, %v14145_v15 }
 0x47d   : > { %14144 = vst [vmem:[#allocation41_spill] sm:$0xff] %v9682_v44 }
 0x47e   : > { %v9674_v16 = vpop.permute.xlu1 %2271  ;;  %v9676_v28 = vpop.permute.xlu0 %2268  ;;  %14146 = vst [vmem:[#allocation44_spill] sm:$0xff] %v9686_v10 }
 0x47f   : > { %2454 = vperm.xlu0 %7341, %v9668_v51   ;;  %2457 = vperm.xlu1 %7342, %v9672_v19   ;;  %v9696_v51 = vadd.f32 %v9228_v31, %v14148_v11  ;;  %v14150_v19 = vld [vmem:[#allocation46_spill] sm:$0xff] }
 0x480   : > { %v9700_v52 = vadd.f32 %v9216_v20, %v14150_v19 }
 0x481   : > { %14149 = vst [vmem:[#allocation43_spill] sm:$0xff] %v9696_v51 }
 0x482   : > { %v9688_v22 = vpop.permute.xlu1 %2277  ;;  %v9690_v32 = vpop.permute.xlu0 %2274  ;;  %14151 = vst [vmem:[#allocation46_spill] sm:$0xff] %v9700_v52 }
 0x483   : > { %14147 = vst [vmem:[#allocation135_spill] sm:$0xff] %v9688_v22  ;;  %2460 = vperm.xlu0 %7341, %v9682_v44   ;;  %2463 = vperm.xlu1 %7342, %v9686_v10   ;;  %v9710_v44 = vadd.f32 %v9242_v47, %v14154_v40  ;;  %v14156_v10 = vld [vmem:[#allocation48_spill] sm:$0xff] }
 0x484   : > { %v9714_v11 = vadd.f32 %v9238_v29, %v14156_v10 }
 0x485   : > { %14155 = vst [vmem:[#allocation45_spill] sm:$0xff] %v9710_v44 }
 0x486   : > { %v9702_v48 = vpop.permute.xlu1 %2283  ;;  %v9704_v15 = vpop.permute.xlu0 %2280  ;;  %14157 = vst [vmem:[#allocation48_spill] sm:$0xff] %v9714_v11 }
 0x487   : > { %14152 = vst [vmem:[#allocation136_spill] sm:$0xff] %v9702_v48  ;;  %14153 = vst [vmem:[#allocation137_spill] sm:$0xff] %v9704_v15  ;;  %2466 = vperm.xlu0 %7341, %v9696_v51   ;;  %2469 = vperm.xlu1 %7342, %v9700_v52   ;;  %v9724_v51 = vadd.f32 %v9254_v61, %v14159_v36  ;;  %v14161_v52 = vld [vmem:[#allocation50_spill] sm:$0xff]  ;;  %v14180_v15 = vld [vmem:[#allocation60_spill] sm:$0xff] }
 0x488   : > { %v9728_v40 = vadd.f32 %v9151_v60, %v14161_v52 }
 0x489   : > { %14160 = vst [vmem:[#allocation47_spill] sm:$0xff] %v9724_v51 }
 0x48a   : > { %v9716_v42 = vpop.permute.xlu1 %2289  ;;  %v9718_v19 = vpop.permute.xlu0 %2286  ;;  %14162 = vst [vmem:[#allocation50_spill] sm:$0xff] %v9728_v40 }
 0x48b   : > { %14158 = vst [vmem:[#allocation138_spill] sm:$0xff] %v9718_v19  ;;  %2472 = vperm.xlu0 %7341, %v9710_v44   ;;  %2475 = vperm.xlu1 %7342, %v9714_v11   ;;  %v9738_v44 = vadd.f32 %v9163_v21, %v14163_v9  ;;  %v14165_v11 = vld [vmem:[#allocation49_spill] sm:$0xff]  ;;  %v14171_v19 = vld [vmem:[#allocation56_spill] sm:$0xff] }
 0x48c   : > { %v9742_v36 = vadd.f32 %v9149_v3, %v14165_v11 }
 0x48d   : > { %14164 = vst [vmem:[#allocation52_spill] sm:$0xff] %v9738_v44 }
 0x48e   : > { %v9730_v33 = vpop.permute.xlu1 %2295  ;;  %v9732_v10 = vpop.permute.xlu0 %2292  ;;  %14166 = vst [vmem:[#allocation49_spill] sm:$0xff] %v9742_v36 }
 0x48f   : > { %2478 = vperm.xlu0 %7341, %v9724_v51   ;;  %2481 = vperm.xlu1 %7342, %v9728_v40   ;;  %v9752_v51 = vadd.f32 %v9165_v24, %v14167_v63  ;;  %v14169_v40 = vld [vmem:[#allocation51_spill] sm:$0xff] }
 0x490   : > { %v9756_v9 = vadd.f32 %v9172_v34, %v14169_v40 }
 0x491   : > { %14168 = vst [vmem:[#allocation54_spill] sm:$0xff] %v9752_v51 }
 0x492   : > { %v9744_v58 = vpop.permute.xlu1 %2301  ;;  %v9746_v52 = vpop.permute.xlu0 %2298  ;;  %14170 = vst [vmem:[#allocation51_spill] sm:$0xff] %v9756_v9 }
 0x493   : > { %2487 = vperm.xlu1 %7342, %v9738_v44   ;;  %2484 = vperm.xlu0 %7341, %v9742_v36   ;;  %v9766_v44 = vadd.f32 %v9174_v57, %v14171_v19  ;;  %v14173_v36 = vld [vmem:[#allocation53_spill] sm:$0xff] }
 0x494   : > { %v9770_v63 = vadd.f32 %v9186_v38, %v14173_v36 }
 0x495   : > { %14172 = vst [vmem:[#allocation56_spill] sm:$0xff] %v9766_v44 }
 0x496   : > { %v9758_v49 = vpop.permute.xlu1 %2307  ;;  %v9760_v11 = vpop.permute.xlu0 %2304  ;;  %14174 = vst [vmem:[#allocation53_spill] sm:$0xff] %v9770_v63 }
 0x497   : > { %2493 = vperm.xlu1 %7342, %v9752_v51   ;;  %2490 = vperm.xlu0 %7341, %v9756_v9   ;;  %v9780_v51 = vadd.f32 %v9188_v39, %v14175_v56  ;;  %v14177_v9 = vld [vmem:[#allocation55_spill] sm:$0xff] }
 0x498   : > { %v9784_v19 = vadd.f32 %v9200_v1, %v14177_v9 }
 0x499   : > { %14176 = vst [vmem:[#allocation58_spill] sm:$0xff] %v9780_v51 }
 0x49a   : > { %v9772_v48 = vpop.permute.xlu1 %2313  ;;  %v9774_v40 = vpop.permute.xlu0 %2310  ;;  %14178 = vst [vmem:[#allocation55_spill] sm:$0xff] %v9784_v19 }
 0x49b   : > { %2499 = vperm.xlu1 %7342, %v9766_v44   ;;  %2496 = vperm.xlu0 %7341, %v9770_v63   ;;  %v9794_v44 = vadd.f32 %v9202_v41, %v14180_v15  ;;  %v14182_v63 = vld [vmem:[#allocation57_spill] sm:$0xff] }
 0x49c   : > { %v9798_v56 = vadd.f32 %v9214_v13, %v14182_v63 }
 0x49d   : > { %14181 = vst [vmem:[#allocation60_spill] sm:$0xff] %v9794_v44 }
 0x49e   : > { %v9786_v53 = vpop.permute.xlu1 %2319  ;;  %v9788_v36 = vpop.permute.xlu0 %2316  ;;  %14183 = vst [vmem:[#allocation57_spill] sm:$0xff] %v9798_v56 }
 0x49f   : > { %14179 = vst [vmem:[#allocation139_spill] sm:$0xff] %v9786_v53  ;;  %2505 = vperm.xlu1 %7342, %v9780_v51   ;;  %2502 = vperm.xlu0 %7341, %v9784_v19   ;;  %v14186_v53 = vld [vmem:[#allocation62_spill] sm:$0xff]  ;;  %v14188_v19 = vld [vmem:[#allocation59_spill] sm:$0xff] }
 0x4a0   : > { %v9808_v51 = vadd.f32 %v9216_v20, %v14186_v53  ;;  %v9812_v15 = vadd.f32 %v9228_v31, %v14188_v19 }
 0x4a2   : > { %v9800_v22 = vpop.permute.xlu1 %2325  ;;  %v9802_v9 = vpop.permute.xlu0 %2322  ;;  %14187 = vst [vmem:[#allocation62_spill] sm:$0xff] %v9808_v51  ;;  %14189 = vst [vmem:[#allocation59_spill] sm:$0xff] %v9812_v15 }
 0x4a3   : > { %14184 = vst [vmem:[#allocation140_spill] sm:$0xff] %v9800_v22  ;;  %14185 = vst [vmem:[#allocation141_spill] sm:$0xff] %v9802_v9  ;;  %2511 = vperm.xlu1 %7342, %v9794_v44   ;;  %2508 = vperm.xlu0 %7341, %v9798_v56   ;;  %v14192_v22 = vld [vmem:[#allocation64_spill] sm:$0xff]  ;;  %v14194_v56 = vld [vmem:[#allocation61_spill] sm:$0xff] }
 0x4a4   : > { %v9822_v44 = vadd.f32 %v9238_v29, %v14192_v22  ;;  %v9826_v53 = vadd.f32 %v9242_v47, %v14194_v56 }
 0x4a6   : > { %v9814_v43 = vpop.permute.xlu1 %2331  ;;  %v9816_v63 = vpop.permute.xlu0 %2328  ;;  %14193 = vst [vmem:[#allocation64_spill] sm:$0xff] %v9822_v44  ;;  %14195 = vst [vmem:[#allocation61_spill] sm:$0xff] %v9826_v53 }
 0x4a7   : > { %14190 = vst [vmem:[#allocation142_spill] sm:$0xff] %v9814_v43  ;;  %14191 = vst [vmem:[#allocation143_spill] sm:$0xff] %v9816_v63  ;;  %2517 = vperm.xlu1 %7342, %v9808_v51   ;;  %2514 = vperm.xlu0 %7341, %v9812_v15   ;;  %v14197_v43 = vld [vmem:[#allocation66_spill] sm:$0xff]  ;;  %v14199_v15 = vld [vmem:[#allocation63_spill] sm:$0xff] }
 0x4a8   : > { %v9836_v51 = vadd.f32 %v9151_v60, %v14197_v43  ;;  %v9840_v22 = vadd.f32 %v9254_v61, %v14199_v15 }
 0x4aa   : > { %v9828_v9 = vpop.permute.xlu1 %2337  ;;  %v9830_v19 = vpop.permute.xlu0 %2334  ;;  %14198 = vst [vmem:[#allocation66_spill] sm:$0xff] %v9836_v51  ;;  %14200 = vst [vmem:[#allocation63_spill] sm:$0xff] %v9840_v22 }
 0x4ab   : > { %14196 = vst [vmem:[#allocation144_spill] sm:$0xff] %v9830_v19  ;;  %2523 = vperm.xlu1 %7342, %v9822_v44   ;;  %2520 = vperm.xlu0 %7341, %v9826_v53   ;;  %v14201_v19 = vld [vmem:[#allocation68_spill] sm:$0xff]  ;;  %v14203_v53 = vld [vmem:[#allocation65_spill] sm:$0xff] }
 0x4ac   : > { %v9850_v44 = vadd.f32 %v9163_v21, %v14201_v19  ;;  %v9854_v60 = vadd.f32 %v9149_v3, %v14203_v53  ;;  %v9878_v53 = vadd.f32 %v9174_v57, %v9131_v35 }
 0x4ae   : > { %v9842_v63 = vpop.permute.xlu1 %2343  ;;  %v9844_v56 = vpop.permute.xlu0 %2340  ;;  %14202 = vst [vmem:[#allocation68_spill] sm:$0xff] %v9850_v44  ;;  %14204 = vst [vmem:[#allocation65_spill] sm:$0xff] %v9854_v60 }
 0x4af   : > { %2529 = vperm.xlu1 %7342, %v9836_v51   ;;  %2526 = vperm.xlu0 %7341, %v9840_v22   ;;  %v9864_v51 = vadd.f32 %v9165_v24, %v14205_v30  ;;  %v14207_v22 = vld [vmem:[#allocation67_spill] sm:$0xff]  ;;  %14209 = vst [vmem:[#allocation145_spill] sm:$0xff] %v9878_v53 }
 0x4b0   : > { %v9868_v21 = vadd.f32 %v9172_v34, %v14207_v22  ;;  %v9892_v22 = vadd.f32 %v9188_v39, %v9135_v50 }
 0x4b1   : > { %14206 = vst [vmem:[#allocation70_spill] sm:$0xff] %v9864_v51 }
 0x4b2   : > { %v9856_v43 = vpop.permute.xlu1 %2349  ;;  %v9858_v15 = vpop.permute.xlu0 %2346  ;;  %14208 = vst [vmem:[#allocation67_spill] sm:$0xff] %v9868_v21  ;;  %14212 = vst [vmem:[#allocation146_spill] sm:$0xff] %v9892_v22 }
 0x4b3   : > { %2535 = vperm.xlu1 %7342, %v9850_v44   ;;  %2532 = vperm.xlu0 %7341, %v9854_v60   ;;  %v14210_v60 = vld [vmem:[#allocation69_spill] sm:$0xff] }
 0x4b4   : > { %v9882_v24 = vadd.f32 %v9186_v38, %v14210_v60  ;;  %v9906_v60 = vadd.f32 %v9202_v41, %v9139_v25 }
 0x4b6   : > { %v9870_v19 = vpop.permute.xlu1 %2355  ;;  %v9872_v3 = vpop.permute.xlu0 %2352  ;;  %14211 = vst [vmem:[#allocation69_spill] sm:$0xff] %v9882_v24  ;;  %14217 = vst [vmem:[#allocation149_spill] sm:$0xff] %v9906_v60 }
 0x4b7   : > { %2541 = vperm.xlu1 %7342, %v9864_v51   ;;  %2538 = vperm.xlu0 %7341, %v9868_v21   ;;  %v14213_v21 = vld [vmem:[#allocation71_spill] sm:$0xff] }
 0x4b8   : > { %v9896_v35 = vadd.f32 %v9200_v1, %v14213_v21  ;;  %v14222_v21 = vld [vmem:[#allocation75_spill] sm:$0xff] }
 0x4ba   : > { %v9884_v30 = vpop.permute.xlu1 %2361  ;;  %v9886_v34 = vpop.permute.xlu0 %2358  ;;  %14214 = vst [vmem:[#allocation71_spill] sm:$0xff] %v9896_v35 }
 0x4bb   : > { %2547 = vperm.xlu1 %7342, %v9878_v53   ;;  %2544 = vperm.xlu0 %7341, %v9882_v24   ;;  %v14218_v24 = vld [vmem:[#allocation72_spill] sm:$0xff] }
 0x4bc   : > { %v9910_v50 = vadd.f32 %v9214_v13, %v14218_v24  ;;  %v14228_v24 = vld [vmem:[#allocation77_spill] sm:$0xff] }
 0x4be   : > { %v9898_v57 = vpop.permute.xlu1 %2367  ;;  %v9900_v38 = vpop.permute.xlu0 %2364  ;;  %14219 = vst [vmem:[#allocation72_spill] sm:$0xff] %v9910_v50 }
 0x4bf   : > { %14215 = vst [vmem:[#allocation147_spill] sm:$0xff] %v9898_v57  ;;  %14216 = vst [vmem:[#allocation148_spill] sm:$0xff] %v9900_v38  ;;  %2553 = vperm.xlu1 %7342, %v9892_v22   ;;  %2550 = vperm.xlu0 %7341, %v9896_v35   ;;  %v9920_v22 = vadd.f32 %v9216_v20, %v14222_v21  ;;  %v14224_v35 = vld [vmem:[#allocation73_spill] sm:$0xff] }
 0x4c0   : > { %v9924_v25 = vadd.f32 %v9228_v31, %v14224_v35  ;;  %v14234_v35 = vld [vmem:[#allocation76_spill] sm:$0xff] }
 0x4c1   : > { %14223 = vst [vmem:[#allocation75_spill] sm:$0xff] %v9920_v22 }
 0x4c2   : > { %v9912_v39 = vpop.permute.xlu1 %2373  ;;  %v9914_v1 = vpop.permute.xlu0 %2370  ;;  %14225 = vst [vmem:[#allocation73_spill] sm:$0xff] %v9924_v25 }
 0x4c3   : > { %14220 = vst [vmem:[#allocation150_spill] sm:$0xff] %v9912_v39  ;;  %14221 = vst [vmem:[#allocation151_spill] sm:$0xff] %v9914_v1  ;;  %2559 = vperm.xlu1 %7342, %v9906_v60   ;;  %2556 = vperm.xlu0 %7341, %v9910_v50   ;;  %v9934_v60 = vadd.f32 %v9238_v29, %v14228_v24  ;;  %v14230_v50 = vld [vmem:[#allocation74_spill] sm:$0xff] }
 0x4c4   : > { %v9938_v20 = vadd.f32 %v9242_v47, %v14230_v50 }
 0x4c5   : > { %14229 = vst [vmem:[#allocation77_spill] sm:$0xff] %v9934_v60 }
 0x4c6   : > { %v9926_v41 = vpop.permute.xlu1 %2379  ;;  %v9928_v13 = vpop.permute.xlu0 %2376  ;;  %14231 = vst [vmem:[#allocation74_spill] sm:$0xff] %v9938_v20 }
 0x4c7   : > { %14226 = vst [vmem:[#allocation152_spill] sm:$0xff] %v9926_v41  ;;  %14227 = vst [vmem:[#allocation153_spill] sm:$0xff] %v9928_v13  ;;  %2565 = vperm.xlu1 %7342, %v9920_v22   ;;  %2562 = vperm.xlu0 %7341, %v9924_v25   ;;  %v9948_v22 = vadd.f32 %v9254_v61, %v14234_v35 }
 0x4c9   : > { %14235 = vst [vmem:[#allocation76_spill] sm:$0xff] %v9948_v22 }
 0x4ca   : > { %v9940_v21 = vpop.permute.xlu1 %2385  ;;  %v9942_v31 = vpop.permute.xlu0 %2382 }
 0x4cb   : > { %14232 = vst [vmem:[#allocation154_spill] sm:$0xff] %v9940_v21  ;;  %14233 = vst [vmem:[#allocation155_spill] sm:$0xff] %v9942_v31  ;;  %2571 = vperm.xlu1 %7342, %v9934_v60   ;;  %2568 = vperm.xlu0 %7341, %v9938_v20  }
 0x4ce   : > { %v9950_v25 = vpop.permute.xlu1 %2391  ;;  %v9952_v29 = vpop.permute.xlu0 %2388 }
 0x4cf   : > { %14236 = vst [vmem:[#allocation156_spill] sm:$0xff] %v9950_v25  ;;  %2574 = vperm.xlu0 %7341, %v9948_v22  }
 0x4d2   : > { %v9955_v47 = vpop.permute.xlu1 %2397  ;;  %v9957_v50 = vpop.permute.xlu0 %2394 }
 0x4d3   : > { %14237 = vst [vmem:[#allocation157_spill] sm:$0xff] %v9955_v47  ;;  %14238 = vst [vmem:[#allocation158_spill] sm:$0xff] %v9957_v50 }
 0x4d6   : > { %v9959_v24 = vpop.permute.xlu1 %2403  ;;  %v9961_v53 = vpop.permute.xlu0 %2400 }
 0x4d7   : > { %14239 = vst [vmem:[#allocation159_spill] sm:$0xff] %v9959_v24  ;;  %14240 = vst [vmem:[#allocation160_spill] sm:$0xff] %v9961_v53 }
 0x4da   : > { %v9963_v60 = vpop.permute.xlu1 %2409  ;;  %v9965_v20 = vpop.permute.xlu0 %2406 }
 0x4db   : > { %14241 = vst [vmem:[#allocation161_spill] sm:$0xff] %v9963_v60  ;;  %14242 = vst [vmem:[#allocation162_spill] sm:$0xff] %v9965_v20 }
 0x4de   : > { %v9967_v61 = vpop.permute.xlu1 %2415  ;;  %v9969_v35 = vpop.permute.xlu0 %2412 }
 0x4df   : > { %14243 = vst [vmem:[#allocation163_spill] sm:$0xff] %v9967_v61  ;;  %14244 = vst [vmem:[#allocation164_spill] sm:$0xff] %v9969_v35 }
 0x4e2   : > { %v9971_v51 = vpop.permute.xlu1 %2421  ;;  %v9973_v44 = vpop.permute.xlu0 %2418 }
 0x4e3   : > { %14245 = vst [vmem:[#allocation165_spill] sm:$0xff] %v9971_v51  ;;  %14246 = vst [vmem:[#allocation166_spill] sm:$0xff] %v9973_v44  ;;  %v14257_v44 = vlaneseq }
 0x4e6   : > { %v9975_v22 = vpop.permute.xlu1 %2427  ;;  %v9977_v31 = vpop.permute.xlu0 %2424 }
 0x4e7   : > { %14247 = vst [vmem:[#allocation167_spill] sm:$0xff] %v9975_v22  ;;  %14248 = vst [vmem:[#allocation168_spill] sm:$0xff] %v9977_v31  ;;  %v9996_v22 = vand.u32 127, %v14257_v44 }
 0x4e9   : > { %v2617_v47 = vadd.s32 4294967248, %v9996_v22  ;;  %v2610_v1 = vadd.s32 4294967256, %v9996_v22 }
 0x4ea   : > { %v9979_v13 = vpop.permute.xlu1 %2433  ;;  %v9981_v41 = vpop.permute.xlu0 %2430 }
 0x4eb   : > { %14249 = vst [vmem:[#allocation169_spill] sm:$0xff] %v9979_v13  ;;  %14250 = vst [vmem:[#allocation170_spill] sm:$0xff] %v9981_v41  ;;  %v2582_v41 = vadd.s32 4294967288, %v9996_v22 }
 0x4ee   : > { %v9983_v24 = vpop.permute.xlu1 %2439  ;;  %v9985_v60 = vpop.permute.xlu0 %2436 }
 0x4ef   : > { %14251 = vst [vmem:[#allocation171_spill] sm:$0xff] %v9983_v24  ;;  %14252 = vst [vmem:[#allocation172_spill] sm:$0xff] %v9985_v60  ;;  %v2624_v60 = vadd.s32 4294967240, %v9996_v22 }
 0x4f2   : > { %v9987_v20 = vpop.permute.xlu1 %2445  ;;  %v9989_v61 = vpop.permute.xlu0 %2442 }
 0x4f3   : > { %14253 = vst [vmem:[#allocation173_spill] sm:$0xff] %v9987_v20  ;;  %14254 = vst [vmem:[#allocation174_spill] sm:$0xff] %v9989_v61  ;;  %v2589_v20 = vadd.s32 4294967280, %v9996_v22  ;;  %v2596_v61 = vadd.s32 4294967272, %v9996_v22 }
 0x4f6   : > { %v9991_v35 = vpop.permute.xlu1 %2451  ;;  %v9993_v51 = vpop.permute.xlu0 %2448 }
 0x4f7   : > { %14255 = vst [vmem:[#allocation175_spill] sm:$0xff] %v9991_v35  ;;  %14256 = vst [vmem:[#allocation176_spill] sm:$0xff] %v9993_v51  ;;  %v2603_v35 = vadd.s32 4294967264, %v9996_v22  ;;  %v14262_v51 = vld [vmem:[#allocation4_spill] sm:$0xff] }
 0x4f8   : > { %v10011_v53 = vsub.s32 %v2582_v41, %v14262_v51  ;;  %v10015_v44 = vsub.s32 %v9996_v22, %v14262_v51  ;;  %v10052_v25 = vsub.s32 %v2617_v47, %v14262_v51  ;;  %v10067_v47 = vsub.s32 %v2624_v60, %v14262_v51 }
 0x4f9   : > { %v10029_v41 = vsub.s32 %v2603_v35, %v14262_v51 }
 0x4fa   : > { %v9998_v31 = vpop.permute.xlu1 %2457  ;;  %v10000_v39 = vpop.permute.xlu0 %2454  ;;  %14263 = vst [vmem:[#allocation181_spill] sm:$0xff] %v10011_v53  ;;  %14264 = vst [vmem:[#allocation182_spill] sm:$0xff] %v10015_v44 }
 0x4fb   : > { %14258 = vst [vmem:[#allocation177_spill] sm:$0xff] %v9998_v31  ;;  %14259 = vst [vmem:[#allocation178_spill] sm:$0xff] %v10000_v39  ;;  %v2607_v60 = vrot.slane %v9520_v2, %v10029_v41 }
 0x4fc   : > { %14269 = vst [vmem:[#allocation187_spill] sm:$0xff] %v10029_v41  ;;  %14272 = vst [vmem:[#allocation190_spill] sm:$0xff] %v10052_v25 }
 0x4fe   : > { %v10003_v24 = vpop.permute.xlu1 %2463  ;;  %v10005_v13 = vpop.permute.xlu0 %2460 }
 0x4ff   : > { %14260 = vst [vmem:[#allocation179_spill] sm:$0xff] %v10003_v24  ;;  %14261 = vst [vmem:[#allocation180_spill] sm:$0xff] %v10005_v13  ;;  %v10022_v24 = vsub.s32 %v2589_v20, %v14262_v51  ;;  %v10025_v13 = vsub.s32 %v2596_v61, %v14262_v51  ;;  %v2586_v20 = vrot.slane %v9494_v18, %v10011_v53  ;;  %v2631_v61 = vadd.s32 4294967232, %v9996_v22 }
 0x500   : > { %v2690_v18 = vrot.slane %v9604_v4, %v10015_v44 }
 0x501   : > { %14267 = vst [vmem:[#allocation185_spill] sm:$0xff] %v10022_v24  ;;  %14268 = vst [vmem:[#allocation186_spill] sm:$0xff] %v10025_v13  ;;  %v2593_v50 = vrot.slane %v9508_v62, %v10022_v24  ;;  %v2704_v21 = vrot.slane %v9634_v37, %v10025_v13  ;;  %v2659_v37 = vadd.s32 4294967200, %v9996_v22 }
 0x502   : > { %v10017_v31 = vpop.permute.xlu1 %2469  ;;  %v10019_v39 = vpop.permute.xlu0 %2466 }
 0x503   : > { %14265 = vst [vmem:[#allocation183_spill] sm:$0xff] %v10017_v31  ;;  %14266 = vst [vmem:[#allocation184_spill] sm:$0xff] %v10019_v39  ;;  %v2694_v31 = vrot.slane %v9620_v6, %v10011_v53  ;;  %v2581_v39 = vrot.slane %v9506_v5, %v10015_v44  ;;  %v2645_v6 = vadd.s32 4294967216, %v9996_v22  ;;  %v2600_v5 = vrot.slane %v9522_v0, %v10025_v13 }
 0x504   : > { %v10064_v0 = vsub.s32 %v2631_v61, %v14262_v51  ;;  %v2709_v61 = vrot.slane %v9632_v12, %v10029_v41  ;;  %v2652_v12 = vadd.s32 4294967208, %v9996_v22 }
 0x505   : > { %v2695_v62 = vsel %vm2587_vm4, %v2694_v31, %v2690_v18  ;;  %v2588_v4 = vsel %vm2587_vm4, %v2586_v20, %v2581_v39  ;;  %v10076_v18 = vsub.s32 %v2645_v6, %v14262_v51  ;;  %v2773_v39 = vrot.slane %v9732_v10, %v10011_v53 }
 0x506   : > { %v10040_v57 = vpop.permute.xlu1 %2475  ;;  %v10042_v35 = vpop.permute.xlu0 %2472  ;;  %v2595_v31 = vsel %vm2594_vm5, %v2593_v50, %v2588_v4  ;;  %v2769_v10 = vrot.slane %v9716_v42, %v10015_v44  ;;  %v2666_v42 = vadd.s32 4294967192, %v9996_v22 }
 0x507   : > { %14270 = vst [vmem:[#allocation188_spill] sm:$0xff] %v10040_v57  ;;  %14271 = vst [vmem:[#allocation189_spill] sm:$0xff] %v10042_v35  ;;  %v2699_v57 = vrot.slane %v9618_v27, %v10022_v24  ;;  %v10057_v35 = vsub.s32 %v2610_v1, %v14262_v51  ;;  %v2638_v27 = vadd.s32 4294967224, %v9996_v22  ;;  %v2602_v20 = vsel %vm13909_vm6, %v2600_v5, %v2595_v31 }
 0x508   : > { %14275 = vst [vmem:[#allocation193_spill] sm:$0xff] %v10076_v18  ;;  %v2609_v31 = vsel %vm2608_vm7, %v2607_v60, %v2602_v20 }
 0x509   : > { %v2614_v50 = vrot.slane %v9536_v14, %v10057_v35  ;;  %v2714_v4 = vrot.slane %v9648_v23, %v10057_v35  ;;  %v10095_v2 = vsub.s32 %v2638_v27, %v14262_v51  ;;  %v2778_v14 = vrot.slane %v9730_v33, %v10022_v24 }
 0x50a   : > { %v10070_v38 = vpop.permute.xlu1 %2481  ;;  %v10072_v1 = vpop.permute.xlu0 %2478  ;;  %v10106_v23 = vsub.s32 %v2659_v37, %v14262_v51  ;;  %v2783_v27 = vrot.slane %v9746_v52, %v10025_v13  ;;  %v2719_v33 = vrot.slane %v9646_v7, %v10052_v25  ;;  %v2724_v52 = vrot.slane %v9662_v55, %v10067_v47 }
 0x50b   : > { %14273 = vst [vmem:[#allocation191_spill] sm:$0xff] %v10070_v38  ;;  %14274 = vst [vmem:[#allocation192_spill] sm:$0xff] %v10072_v1  ;;  %v2700_v1 = vsel %vm2594_vm5, %v2699_v57, %v2695_v62  ;;  %v2673_v57 = vadd.s32 4294967184, %v9996_v22  ;;  %v2774_v62 = vsel %vm2587_vm4, %v2773_v39, %v2769_v10  ;;  %v2616_v37 = vsel %vm2615_vm8, %v2614_v50, %v2609_v31 }
 0x50c   : > { %v2705_v6 = vsel %vm13909_vm6, %v2704_v21, %v2700_v1  ;;  %14276 = vst [vmem:[#allocation194_spill] sm:$0xff] %v10095_v2  ;;  %14278 = vst [vmem:[#allocation196_spill] sm:$0xff] %v10106_v23  ;;  %v2621_v1 = vrot.slane %v9534_v45, %v10052_v25  ;;  %v2628_v38 = vrot.slane %v9550_v46, %v10067_v47  ;;  %v2680_v55 = vadd.s32 4294967176, %v9996_v22 }
 0x50d   : > { %v10125_v45 = vsub.s32 %v2652_v12, %v14262_v51  ;;  %v10128_v60 = vsub.s32 %v2673_v57, %v14262_v51  ;;  %v2788_v7 = vrot.slane %v9744_v58, %v10029_v41  ;;  %v2779_v20 = vsel %vm2594_vm5, %v2778_v14, %v2774_v62 }
 0x50e   : > { %v10101_v5 = vpop.permute.xlu1 %2487  ;;  %v10103_v21 = vpop.permute.xlu0 %2484  ;;  %v10138_v50 = vsub.s32 %v2666_v42, %v14262_v51  ;;  %v2635_v10 = vrot.slane %v9548_v26, %v10064_v0  ;;  %v2623_v58 = vsel %vm13752_vm9, %v2621_v1, %v2616_v37  ;;  %v2852_v57 = vrot.slane %v9844_v56, %v10011_v53 }
 0x50f   : > { %14277 = vst [vmem:[#allocation195_spill] sm:$0xff] %v10101_v5  ;;  %v2710_v5 = vsel %vm2608_vm7, %v2709_v61, %v2705_v6  ;;  %14279 = vst [vmem:[#allocation197_spill] sm:$0xff] %v10125_v45  ;;  %v2784_v6 = vsel %vm13909_vm6, %v2783_v27, %v2779_v20  ;;  %v2630_v14 = vsel %vm2629_vm10, %v2628_v38, %v2623_v58 }
 0x510   : > { %v2715_v39 = vsel %vm2615_vm8, %v2714_v4, %v2710_v5  ;;  %14280 = vst [vmem:[#allocation198_spill] sm:$0xff] %v10128_v60  ;;  %14281 = vst [vmem:[#allocation199_spill] sm:$0xff] %v10138_v50  ;;  %v2793_v4 = vrot.slane %v9760_v11, %v10057_v35  ;;  %v2642_v22 = vrot.slane %v9564_v59, %v10095_v2 }
 0x511   : > { %v2720_v12 = vsel %vm13752_vm9, %v2719_v33, %v2715_v39  ;;  %v2729_v5 = vrot.slane %v9660_v54, %v10064_v0  ;;  %v2734_v26 = vrot.slane %v9676_v28, %v10095_v2  ;;  %v2798_v42 = vrot.slane %v9758_v49, %v10052_v25 }
 0x512   : > { %v10133_v61 = vpop.permute.xlu1 %2493  ;;  %v10135_v46 = vpop.permute.xlu0 %2490  ;;  %v2725_v11 = vsel %vm2629_vm10, %v2724_v52, %v2720_v12  ;;  %v2789_v56 = vsel %vm2608_vm7, %v2788_v7, %v2784_v6  ;;  %v2848_v38 = vrot.slane %v9828_v9, %v10015_v44  ;;  %v10168_v54 = vsub.s32 %v2680_v55, %v14262_v51 }
 0x513   : > { %v2794_v27 = vsel %vm2615_vm8, %v2793_v4, %v2789_v56  ;;  %v2803_v28 = vrot.slane %v9774_v40, %v10067_v47  ;;  %v2857_v49 = vrot.slane %v9842_v63, %v10022_v24  ;;  %v2649_v1 = vrot.slane %v9562_v17, %v10076_v18  ;;  %v14283_v4 = vld [vmem:[#allocation131_spill] sm:$0xff] }
 0x514   : > { %14282 = vst [vmem:[#allocation200_spill] sm:$0xff] %v10168_v54  ;;  %v2637_v9 = vsel %vm13910_vm11, %v2635_v10, %v2630_v14  ;;  %v2853_v31 = vsel %vm2587_vm4, %v2852_v57, %v2848_v38  ;;  %v2862_v33 = vrot.slane %v9858_v15, %v10025_v13  ;;  %v2656_v39 = vrot.slane %v9578_v8, %v10125_v45  ;;  %v14284_v14 = vld [vmem:[#allocation133_spill] sm:$0xff]  ;;  %v14287_v56 = vld [vmem:[#allocation139_spill] sm:$0xff] }
 0x515   : > { %v2644_v37 = vsel %vm13756_vm12, %v2642_v22, %v2637_v9  ;;  %v2739_v40 = vrot.slane %v9674_v16, %v10076_v18  ;;  %v2730_v63 = vsel %vm13910_vm11, %v2729_v5, %v2725_v11  ;;  %v2744_v17 = vrot.slane %v9690_v32, %v10125_v45  ;;  %v14285_v22 = vld [vmem:[#allocation135_spill] sm:$0xff] }
 0x516   : > { %v10163_v62 = vpop.permute.xlu1 %2499  ;;  %v10165_v59 = vpop.permute.xlu0 %2496  ;;  %v2735_v52 = vsel %vm13756_vm12, %v2734_v26, %v2730_v63  ;;  %v2808_v7 = vrot.slane %v9772_v48, %v10064_v0  ;;  %v2799_v15 = vsel %vm13752_vm9, %v2798_v42, %v2794_v27  ;;  %v2813_v16 = vrot.slane %v9788_v36, %v10095_v2  ;;  %v14286_v26 = vld [vmem:[#allocation137_spill] sm:$0xff] }
 0x517   : > { %v2804_v8 = vsel %vm2629_vm10, %v2803_v28, %v2799_v15  ;;  %v2867_v6 = vrot.slane %v9856_v43, %v10029_v41  ;;  %v2858_v32 = vsel %vm2594_vm5, %v2857_v49, %v2853_v31  ;;  %v2663_v48 = vrot.slane %v14283_v4, %v10106_v23 }
 0x518   : > { %v2651_v10 = vsel %vm13755_vm13, %v2649_v1, %v2644_v37  ;;  %v2863_v58 = vsel %vm13909_vm6, %v2862_v33, %v2858_v32  ;;  %v2872_v12 = vrot.slane %v9872_v3, %v10057_v35  ;;  %v2670_v36 = vrot.slane %v14284_v14, %v10138_v50  ;;  %v14288_v1 = vld [vmem:[#allocation141_spill] sm:$0xff]  ;;  %v14289_v37 = vld [vmem:[#allocation132_spill] sm:$0xff]  ;;  %v14292_v32 = vld [vmem:[#allocation138_spill] sm:$0xff] }
 0x519   : > { %v2658_v57 = vsel %vm13753_vm14, %v2656_v39, %v2651_v10  ;;  %v2749_v43 = vrot.slane %v14285_v22, %v10106_v23  ;;  %v2740_v5 = vsel %vm13755_vm13, %v2739_v40, %v2735_v52  ;;  %v2754_v42 = vrot.slane %v14286_v26, %v10138_v50 }
 0x51a   : > { %v10193_v20 = vpop.permute.xlu1 %2505  ;;  %v10195_v55 = vpop.permute.xlu0 %2502  ;;  %v2745_v11 = vsel %vm13753_vm14, %v2744_v17, %v2740_v5  ;;  %v2818_v38 = vrot.slane %v14287_v56, %v10076_v18  ;;  %v2809_v3 = vsel %vm13910_vm11, %v2808_v7, %v2804_v8  ;;  %v2823_v9 = vrot.slane %v14288_v1, %v10125_v45  ;;  %v14290_v7 = vld [vmem:[#allocation134_spill] sm:$0xff]  ;;  %v14291_v8 = vld [vmem:[#allocation136_spill] sm:$0xff] }
 0x51b   : > { %v2814_v49 = vsel %vm13756_vm12, %v2813_v16, %v2809_v3  ;;  %v2877_v31 = vrot.slane %v9870_v19, %v10052_v25  ;;  %v2868_v33 = vsel %vm2608_vm7, %v2867_v6, %v2863_v58  ;;  %v2677_v39 = vrot.slane %v14289_v37, %v10128_v60  ;;  %v14297_v3 = vld [vmem:[#allocation156_spill] sm:$0xff] }
 0x51c   : > { %v2665_v40 = vsel %vm2664_vm15, %v2663_v48, %v2658_v57  ;;  %v2873_v63 = vsel %vm2615_vm8, %v2872_v12, %v2868_v33  ;;  %v2882_v52 = vrot.slane %v9886_v34, %v10067_v47  ;;  %v2684_v15 = vrot.slane %v14290_v7, %v10168_v54  ;;  %v14293_v12 = vld [vmem:[#allocation140_spill] sm:$0xff] }
 0x51d   : > { %v2672_v17 = vsel %vm2671_vm0, %v2670_v36, %v2665_v40  ;;  %v2759_v19 = vrot.slane %v14291_v8, %v10128_v60  ;;  %v2750_v16 = vsel %vm2664_vm15, %v2749_v43, %v2745_v11  ;;  %v2764_v4 = vrot.slane %v14292_v32, %v10168_v54  ;;  %v14294_v43 = vld [vmem:[#allocation143_spill] sm:$0xff]  ;;  %v14301_v32 = vld [vmem:[#allocation172_spill] sm:$0xff] }
 0x51e   : > { %v10221_v27 = vpop.permute.xlu1 %2511  ;;  %v10223_v28 = vpop.permute.xlu0 %2508  ;;  %v2755_v6 = vsel %vm2671_vm0, %v2754_v42, %v2750_v16  ;;  %v2819_v48 = vsel %vm13755_vm13, %v2818_v38, %v2814_v49  ;;  %v2931_v34 = vrot.slane %v9952_v29, %v10011_v53  ;;  %v2828_v57 = vrot.slane %v14293_v12, %v10106_v23  ;;  %v14295_v29 = vld [vmem:[#allocation148_spill] sm:$0xff]  ;;  %v14296_v42 = vld [vmem:[#allocation154_spill] sm:$0xff]  ;;  %v14300_v8 = vld [vmem:[#allocation147_spill] sm:$0xff] }
 0x51f   : > { %v2824_v14 = vsel %vm13753_vm14, %v2823_v9, %v2819_v48  ;;  %v2887_v36 = vrot.slane %v9884_v30, %v10064_v0  ;;  %v2878_v22 = vsel %vm13752_vm9, %v2877_v31, %v2873_v63  ;;  %v2833_v5 = vrot.slane %v14294_v43, %v10138_v50  ;;  %v14298_v31 = vld [vmem:[#allocation158_spill] sm:$0xff] }
 0x520   : > { %v2883_v11 = vsel %vm2629_vm10, %v2882_v52, %v2878_v22  ;;  %v2892_v26 = vrot.slane %v14295_v29, %v10095_v2  ;;  %v2927_v56 = vrot.slane %v14296_v42, %v10015_v44  ;;  %v2760_v38 = vsel %vm2678_vm1, %v2759_v19, %v2755_v6  ;;  %v14299_v63 = vld [vmem:[#allocation142_spill] sm:$0xff]  ;;  %v14304_v22 = vld [vmem:[#allocation160_spill] sm:$0xff] }
 0x521   : > { %v2936_v30 = vrot.slane %v14297_v3, %v10022_v24  ;;  %v2679_v49 = vsel %vm2678_vm1, %v2677_v39, %v2672_v17  ;;  %v2765_v1 = vsel %vm2685_vm2, %v2764_v4, %v2760_v38  ;;  %v2941_v33 = vrot.slane %v14298_v31, %v10025_v13  ;;  %v14306_v38 = vld [vmem:[#allocation144_spill] sm:$0xff] }
 0x522   : > { %v10249_v10 = vpop.permute.xlu1 %2517  ;;  %v10251_v58 = vpop.permute.xlu0 %2514  ;;  %v2932_v9 = vsel %vm2587_vm4, %v2931_v34, %v2927_v56  ;;  %v2838_v52 = vrot.slane %v14299_v63, %v10128_v60  ;;  %v2829_v7 = vsel %vm2664_vm15, %v2828_v57, %v2824_v14  ;;  %v2897_v19 = vrot.slane %v14300_v8, %v10076_v18  ;;  %v14302_v34 = vld [vmem:[#allocation151_spill] sm:$0xff]  ;;  %v14303_v57 = vld [vmem:[#allocation157_spill] sm:$0xff] }
 0x523   : > { %v2888_v39 = vsel %vm13910_vm11, %v2887_v36, %v2883_v11  ;;  %v2686_v17 = vsel %vm2685_vm2, %v2684_v15, %v2679_v49  ;;  %v2834_v16 = vsel %vm2671_vm0, %v2833_v5, %v2829_v7  ;;  %v3010_v4 = vrot.slane %v14301_v32, %v10011_v53  ;;  %v14305_v5 = vld [vmem:[#allocation169_spill] sm:$0xff]  ;;  %v14307_v49 = vld [vmem:[#allocation171_spill] sm:$0xff] }
 0x524   : > { %v2893_v6 = vsel %vm13756_vm12, %v2892_v26, %v2888_v39  ;;  %v10290_v48 = vsel %vm13751_vm3, %v2765_v1, %v2686_v17  ;;  %v2902_v12 = vrot.slane %v14302_v34, %v10125_v45  ;;  %v2946_v14 = vrot.slane %v14303_v57, %v10029_v41  ;;  %v14310_v7 = vld [vmem:[#allocation191_spill] sm:$0xff] }
 0x525   : > { %v2937_v36 = vsel %vm2594_vm5, %v2936_v30, %v2932_v9  ;;  %v2951_v43 = vrot.slane %v14304_v22, %v10057_v35  ;;  %v3006_v11 = vrot.slane %v14305_v5, %v10015_v44  ;;  %v3089_v29 = vrot.slane %v10103_v21, %v10011_v53  ;;  %v14308_v9 = vld [vmem:[#allocation150_spill] sm:$0xff]  ;;  %v14311_v39 = vld [vmem:[#allocation159_spill] sm:$0xff]  ;;  %v14314_v5 = vld [vmem:[#allocation173_spill] sm:$0xff] }
 0x526   : > { %v10274_v37 = vpop.permute.xlu1 %2523  ;;  %v10276_v40 = vpop.permute.xlu0 %2520  ;;  %v2942_v15 = vsel %vm13909_vm6, %v2941_v33, %v2937_v36  ;;  %v2839_v56 = vsel %vm2678_vm1, %v2838_v52, %v2834_v16  ;;  %v2843_v3 = vrot.slane %v14306_v38, %v10168_v54  ;;  %v2898_v30 = vsel %vm13755_vm13, %v2897_v19, %v2893_v6  ;;  %v14309_v21 = vld [vmem:[#allocation174_spill] sm:$0xff]  ;;  %v14312_v16 = vld [vmem:[#allocation195_spill] sm:$0xff] }
 0x527   : > { %v3015_v1 = vrot.slane %v14307_v49, %v10022_v24  ;;  %v2907_v31 = vrot.slane %v14308_v9, %v10106_v23  ;;  %v3011_v33 = vsel %vm2587_vm4, %v3010_v4, %v3006_v11  ;;  %v3020_v63 = vrot.slane %v14309_v21, %v10025_v13  ;;  %v14313_v4 = vld [vmem:[#allocation162_spill] sm:$0xff] }
 0x528   : > { %v3085_v8 = vrot.slane %v14310_v7, %v10015_v44  ;;  %v2903_v52 = vsel %vm13753_vm14, %v2902_v12, %v2898_v30  ;;  %v2956_v17 = vrot.slane %v14311_v39, %v10052_v25  ;;  %v2947_v19 = vsel %vm2608_vm7, %v2946_v14, %v2942_v15 }
 0x529   : > { %v3094_v6 = vrot.slane %v14312_v16, %v10022_v24  ;;  %v2952_v32 = vsel %vm2615_vm8, %v2951_v43, %v2947_v19  ;;  %v2961_v34 = vrot.slane %v14313_v4, %v10067_v47  ;;  %v3099_v36 = vrot.slane %v10135_v46, %v10025_v13 }
 0x52a   : > { %v2530_v26 = vpop.permute.xlu1 %2529  ;;  %v10304_v42 = vpop.permute.xlu0 %2526  ;;  %v3090_v57 = vsel %vm2587_vm4, %v3089_v29, %v3085_v8  ;;  %v3025_v11 = vrot.slane %v14314_v5, %v10029_v41  ;;  %v3016_v14 = vsel %vm2594_vm5, %v3015_v1, %v3011_v33  ;;  %v10337_v43 = vsel %vm2685_vm2, %v2843_v3, %v2839_v56  ;;  %v14315_v29 = vld [vmem:[#allocation176_spill] sm:$0xff]  ;;  %v14316_v33 = vld [vmem:[#allocation161_spill] sm:$0xff] }
 0x52b   : > { %v3164_v15 = vrot.slane %v2530_v26, %v10015_v44  ;;  %v3021_v30 = vsel %vm13909_vm6, %v3020_v63, %v3016_v14  ;;  %v3030_v49 = vrot.slane %v14315_v29, %v10057_v35  ;;  %v2908_v9 = vsel %vm2664_vm15, %v2907_v31, %v2903_v52  ;;  %v14320_v5 = vld [vmem:[#allocation153_spill] sm:$0xff]  ;;  %v14321_v14 = vld [vmem:[#allocation164_spill] sm:$0xff] }
 0x52c   : > { %v3104_v21 = vrot.slane %v10133_v61, %v10029_v41  ;;  %v3095_v1 = vsel %vm2594_vm5, %v3094_v6, %v3090_v57  ;;  %v2966_v56 = vrot.slane %v14316_v33, %v10064_v0  ;;  %v2957_v3 = vsel %vm13752_vm9, %v2956_v17, %v2952_v32  ;;  %v14317_v61 = vld [vmem:[#allocation175_spill] sm:$0xff]  ;;  %v14318_v17 = vld [vmem:[#allocation178_spill] sm:$0xff]  ;;  %v14319_v57 = vld [vmem:[#allocation152_spill] sm:$0xff] }
 0x52d   : > { %v3100_v63 = vsel %vm13909_vm6, %v3099_v36, %v3095_v1  ;;  %v3109_v7 = vrot.slane %v10165_v59, %v10057_v35  ;;  %v2962_v31 = vsel %vm2629_vm10, %v2961_v34, %v2957_v3  ;;  %v3035_v52 = vrot.slane %v14317_v61, %v10052_v25  ;;  %v14323_v3 = vld [vmem:[#allocation180_spill] sm:$0xff] }
 0x52e   : > { %v2536_v22 = vpop.permute.xlu1 %2535  ;;  %v2533_v12 = vpop.permute.xlu0 %2532  ;;  %v3026_v19 = vsel %vm2608_vm7, %v3025_v11, %v3021_v30  ;;  %v3040_v32 = vrot.slane %v14318_v17, %v10067_v47  ;;  %v2917_v36 = vrot.slane %v14319_v57, %v10128_v60  ;;  %v3114_v34 = vrot.slane %v10163_v62, %v10052_v25  ;;  %v14322_v62 = vld [vmem:[#allocation177_spill] sm:$0xff] }
 0x52f   : > { %v3168_v38 = vrot.slane %v2533_v12, %v10011_v53  ;;  %v3173_v46 = vrot.slane %v2536_v22, %v10022_v24  ;;  %v3031_v6 = vsel %vm2615_vm8, %v3030_v49, %v3026_v19  ;;  %v3105_v22 = vsel %vm2608_vm7, %v3104_v21, %v3100_v63  ;;  %v14325_v19 = vld [vmem:[#allocation166_spill] sm:$0xff] }
 0x530   : > { %v2912_v11 = vrot.slane %v14320_v5, %v10138_v50  ;;  %v3119_v30 = vrot.slane %v10195_v55, %v10067_v47  ;;  %v3045_v21 = vrot.slane %v14322_v62, %v10064_v0  ;;  %v3036_v1 = vsel %vm13752_vm9, %v3035_v52, %v3031_v6 }
 0x531   : > { %v3169_v26 = vsel %vm2587_vm4, %v3168_v38, %v3164_v15  ;;  %v2971_v15 = vrot.slane %v14321_v14, %v10095_v2  ;;  %v3110_v38 = vsel %vm2615_vm8, %v3109_v7, %v3105_v22  ;;  %v3041_v33 = vsel %vm2629_vm10, %v3040_v32, %v3036_v1  ;;  %v14327_v14 = vld [vmem:[#allocation184_spill] sm:$0xff] }
 0x532   : > { %v2542_v8 = vpop.permute.xlu1 %2541  ;;  %v2539_v39 = vpop.permute.xlu0 %2538  ;;  %v3174_v59 = vsel %vm2594_vm5, %v3173_v46, %v3169_v26  ;;  %v2967_v46 = vsel %vm13910_vm11, %v2966_v56, %v2962_v31  ;;  %v3050_v63 = vrot.slane %v14323_v3, %v10095_v2  ;;  %v3124_v56 = vrot.slane %v10193_v20, %v10064_v0  ;;  %v14326_v20 = vld [vmem:[#allocation179_spill] sm:$0xff]  ;;  %v14329_v3 = vld [vmem:[#allocation168_spill] sm:$0xff] }
 0x533   : > { %v3178_v16 = vrot.slane %v2539_v39, %v10025_v13  ;;  %v3183_v4 = vrot.slane %v2542_v8, %v10029_v41  ;;  %v14324_v8 = vld [vmem:[#allocation163_spill] sm:$0xff]  ;;  %v3115_v31 = vsel %vm13752_vm9, %v3114_v34, %v3110_v38  ;;  %v2972_v52 = vsel %vm13756_vm12, %v2971_v15, %v2967_v46 }
 0x534   : > { %v2976_v39 = vrot.slane %v14324_v8, %v10076_v18  ;;  %v3120_v6 = vsel %vm2629_vm10, %v3119_v30, %v3115_v31  ;;  %v3129_v17 = vrot.slane %v10223_v28, %v10095_v2  ;;  %vm13754_vm3 = vcmask 1042434  }
 0x535   : > { %v3179_v12 = vsel %vm13909_vm6, %v3178_v16, %v3174_v59  ;;  %v2981_v16 = vrot.slane %v14325_v19, %v10125_v45  ;;  %v2913_v59 = vsel %vm2671_vm0, %v2912_v11, %v2908_v9  ;;  %v3055_v34 = vrot.slane %v14326_v20, %v10076_v18 }
 0x536   : > { %v2548_v29 = vpop.permute.xlu1 %2547  ;;  %v2545_v49 = vpop.permute.xlu0 %2544  ;;  %v3184_v55 = vsel %vm2608_vm7, %v3183_v4, %v3179_v12  ;;  %v3046_v22 = vsel %vm13910_vm11, %v3045_v21, %v3041_v33  ;;  %v3060_v15 = vrot.slane %v14327_v14, %v10125_v45  ;;  %v2977_v30 = vsel %vm13755_vm13, %v2976_v39, %v2972_v52  ;;  %v14332_v52 = vld [vmem:[#allocation155_spill] sm:$0xff] }
 0x537   : > { %v3188_v26 = vrot.slane %v2545_v49, %v10057_v35  ;;  %v3193_v7 = vrot.slane %v2548_v29, %v10052_v25  ;;  %v3051_v5 = vsel %vm13756_vm12, %v3050_v63, %v3046_v22  ;;  %v3134_v9 = vrot.slane %v10221_v27, %v10076_v18  ;;  %v14328_v49 = vld [vmem:[#allocation165_spill] sm:$0xff]  ;;  %v14330_v63 = vld [vmem:[#allocation183_spill] sm:$0xff] }
 0x538   : > { %v3125_v11 = vsel %vm13910_vm11, %v3124_v56, %v3120_v6  ;;  %v2986_v46 = vrot.slane %v14328_v49, %v10106_v23  ;;  %v2982_v62 = vsel %vm13753_vm14, %v2981_v16, %v2977_v30  ;;  %v3139_v1 = vrot.slane %v10251_v58, %v10125_v45  ;;  %v14331_v56 = vld [vmem:[#allocation189_spill] sm:$0xff]  ;;  %v14335_v30 = vld [vmem:[#allocation188_spill] sm:$0xff] }
 0x539   : > { %v3189_v61 = vsel %vm2615_vm8, %v3188_v26, %v3184_v55  ;;  %v3130_v21 = vsel %vm13756_vm12, %v3129_v17, %v3125_v11  ;;  %v2991_v27 = vrot.slane %v14329_v3, %v10138_v50  ;;  %v3056_v55 = vsel %vm13755_vm13, %v3055_v34, %v3051_v5  ;;  %v14336_v49 = vld [vmem:[#allocation192_spill] sm:$0xff] }
 0x53a   : > { %v2554_v32 = vpop.permute.xlu1 %2553  ;;  %v2551_v4 = vpop.permute.xlu0 %2550  ;;  %v3194_v28 = vsel %vm13752_vm9, %v3193_v7, %v3189_v61  ;;  %vm3244_vm9 = vcmask 1043459   ;;  %v3065_v7 = vrot.slane %v14330_v63, %v10106_v23  ;;  %v3061_v39 = vsel %vm13753_vm14, %v3060_v15, %v3056_v55 }
 0x53b   : > { %v3198_v12 = vrot.slane %v2551_v4, %v10067_v47  ;;  %v3203_v38 = vrot.slane %v2554_v32, %v10064_v0  ;;  %v3070_v31 = vrot.slane %v14331_v56, %v10138_v50  ;;  %v2922_v19 = vrot.slane %v14332_v52, %v10168_v54  ;;  %v14333_v32 = vld [vmem:[#allocation167_spill] sm:$0xff] }
 0x53c   : > { %v3144_v16 = vrot.slane %v10249_v10, %v10106_v23  ;;  %v3135_v6 = vsel %vm13755_vm13, %v3134_v9, %v3130_v21  ;;  %v2996_v4 = vrot.slane %v14333_v32, %v10128_v60  ;;  %v2987_v20 = vsel %vm2664_vm15, %v2986_v46, %v2982_v62  ;;  %v14334_v10 = vld [vmem:[#allocation170_spill] sm:$0xff] }
 0x53d   : > { %v3199_v29 = vsel %vm2629_vm10, %v3198_v12, %v3194_v28  ;;  %v3140_v34 = vsel %vm13753_vm14, %v3139_v1, %v3135_v6  ;;  %v3149_v22 = vrot.slane %v10276_v40, %v10138_v50  ;;  %v2992_v14 = vsel %vm2671_vm0, %v2991_v27, %v2987_v20 }
 0x53e   : > { %v2560_v26 = vpop.permute.xlu1 %2559  ;;  %v2557_v33 = vpop.permute.xlu0 %2556  ;;  %v3204_v61 = vsel %vm13910_vm11, %v3203_v38, %v3199_v29  ;;  %v3001_v15 = vrot.slane %v14334_v10, %v10168_v54  ;;  %v3066_v38 = vsel %vm2664_vm15, %v3065_v7, %v3061_v39  ;;  %v3075_v9 = vrot.slane %v14335_v30, %v10128_v60  ;;  %v14340_v10 = vld [vmem:[#allocation79_spill] sm:$0xff]  ;;  %v14342_v30 = vld [vmem:[#allocation78_spill] sm:$0xff] }
 0x53f   : > { %v3208_v8 = vrot.slane %v2557_v33, %v10095_v2  ;;  %v3213_v58 = vrot.slane %v2560_v26, %v10076_v18  ;;  %v3071_v11 = vsel %vm2671_vm0, %v3070_v31, %v3066_v38  ;;  %v3080_v46 = vrot.slane %v14336_v49, %v10168_v54  ;;  %v14341_v38 = vld [vmem:[#allocation93_spill] sm:$0xff] }
 0x540   : > { %v3154_v62 = vrot.slane %v10274_v37, %v10128_v60  ;;  %v3145_v21 = vsel %vm2664_vm15, %v3144_v16, %v3140_v34  ;;  %v3243_v26 = vsel %vm13754_vm3, %v10337_v43, %v10290_v48  ;;  %v2918_v33 = vsel %vm2678_vm1, %v2917_v36, %v2913_v59  ;;  %v14338_v34 = vld [vmem:[#allocation5_spill] sm:$0xff] }
 0x541   : > { %v3209_v17 = vsel %vm13756_vm12, %v3208_v8, %v3204_v61  ;;  %v3150_v3 = vsel %vm2671_vm0, %v3149_v22, %v3145_v21  ;;  %v3159_v27 = vrot.slane %v10304_v42, %v10168_v54  ;;  %v2923_v7 = vsel %vm2685_vm2, %v2922_v19, %v2918_v33 }
 0x542   : > { %v2566_v12 = vpop.permute.xlu1 %2565  ;;  %v2563_v5 = vpop.permute.xlu0 %2562  ;;  %v3214_v40 = vsel %vm13755_vm13, %v3213_v58, %v3209_v17  ;;  %v2997_v55 = vsel %vm2678_vm1, %v2996_v4, %v2992_v14  ;;  %v3076_v43 = vsel %vm2678_vm1, %v3075_v9, %v3071_v11  ;;  %v3155_v39 = vsel %vm2678_vm1, %v3154_v62, %v3150_v3 }
 0x543   : > { %v3218_v28 = vrot.slane %v2563_v5, %v10125_v45  ;;  %v3223_v29 = vrot.slane %v2566_v12, %v10106_v23  ;;  %v3002_v48 = vsel %vm2685_vm2, %v3001_v15, %v2997_v55  ;;  %v3081_v59 = vsel %vm2685_vm2, %v3080_v46, %v3076_v43  ;;  %v14339_v5 = vld [vmem:[#allocation87_spill] sm:$0xff]  ;;  %v14348_v43 = vld [vmem:[#allocation110_spill] sm:$0xff] }
 0x544   : > { %vm3248_vm3 = vcmask 1045509   ;;  %v3245_v56 = vsel %vm3244_vm9, %v2923_v7, %v3243_v26  ;;  %v3160_v58 = vsel %vm2685_vm2, %v3159_v27, %v3155_v39  ;;  %vm13896_vm13 = vcmask 1046534   ;;  %v14344_v46 = vld [vmem:[#allocation95_spill] sm:$0xff]  ;;  %v14346_v27 = vld [vmem:[#allocation97_spill] sm:$0xff] }
 0x545   : > { %v3219_v1 = vsel %vm13753_vm14, %v3218_v28, %v3214_v40  ;;  %vm3246_vm14 = vcmask 1044484   ;;  %vm13895_vm12 = vcmask 1047559   ;;  %v10491_v20 = vsub.s32 1, %v14262_v51  ;;  %v14347_v7 = vld [vmem:[#allocation81_spill] sm:$0xff] }
 0x546   : > { %v2572_v63 = vpop.permute.xlu1 %2571  ;;  %v2569_v37 = vpop.permute.xlu0 %2568  ;;  %v3224_v36 = vsel %vm2664_vm15, %v3223_v29, %v3219_v1  ;;  %v3247_v52 = vsel %vm3246_vm14, %v3002_v48, %v3245_v56  ;;  %v10510_v40 = vsub.s32 2, %v14262_v51  ;;  %v14345_v1 = vld [vmem:[#allocation80_spill] sm:$0xff] }
 0x547   : > { %v3228_v8 = vrot.slane %v2569_v37, %v10138_v50  ;;  %v3233_v57 = vrot.slane %v2572_v63, %v10128_v60  ;;  %v3249_v16 = vsel %vm3248_vm3, %v3081_v59, %v3247_v52  ;;  %14337 = vst [vmem:[#allocation131_spill] sm:$0xff] %v10491_v20  ;;  %v14349_v59 = vld [vmem:[#allocation82_spill] sm:$0xff] }
 0x548   : > { %v3251_v17 = vsel %vm13896_vm13, %v3160_v58, %v3249_v16  ;;  %14343 = vst [vmem:[#allocation133_spill] sm:$0xff] %v10510_v40  ;;  %vm14659_vm13 = vcmask 720512  }
 0x549   : > { %v3229_v42 = vsel %vm2671_vm0, %v3228_v8, %v3224_v36  ;;  %v13760_v8 = vsub.s32 3, %v14262_v51 }
 0x54a   : > { %v2575_v31 = vpop.permute.xlu0 %2574  ;;  %v3234_v19 = vsel %vm2678_vm1, %v3233_v57, %v3229_v42 }
 0x54b   : > { %v3238_v61 = vrot.slane %v2575_v31, %v10168_v54  ;;  %v14350_v31 = vld [vmem:[#allocation112_spill] sm:$0xff] }
 0x54d   : > { %v3239_v6 = vsel %vm2685_vm2, %v3238_v61, %v3234_v19  ;;  %v14352_v19 = vld [vmem:[#allocation83_spill] sm:$0xff] }
 0x54e   : > { %v3253_v32 = vsel %vm13895_vm12, %v3239_v6, %v3251_v17  ;;  %v13758_v17 = vsub.s32 4, %v14262_v51  ;;  %vm14657_vm12 = vcmask 458112  }
 0x54f   : > { %3255 = vmax.xlane.f32.xlu1 %v3253_v32 }
 0x5d8   : > { %v10488_v4 = vpop.xlane.xlu1 %3255 }
 0x5d9   : > { %v10495_v22 = vrot.slane %v10488_v4, %v14338_v34  ;;  %v10499_v12 = vrot.slane %v10488_v4, %v10491_v20  ;;  %v10518_v33 = vrot.slane %v10488_v4, %v10510_v40  ;;  %v10532_v39 = vrot.slane %v10488_v4, %v13760_v8 }
 0x5db   : > { %v3307_v14 = vsub.f32 %v14339_v5, %v10495_v22  ;;  %v3298_v15 = vsub.f32 %v14340_v10, %v10495_v22  ;;  %v3313_v28 = vsub.f32 %v14341_v38, %v10495_v22  ;;  %v3299_v9 = vsub.f32 %v14342_v30, %v10495_v22  ;;  %v14354_v5 = vld [vmem:[#allocation125_spill] sm:$0xff]  ;;  %v14356_v38 = vld [vmem:[#allocation84_spill] sm:$0xff] }
 0x5dc   : > { %v3315_v62 = vsub.f32 %v14344_v46, %v10499_v12  ;;  %v3300_v26 = vsub.f32 %v14345_v1, %v10495_v22  ;;  %v3317_v63 = vsub.f32 %v14346_v27, %v10499_v12  ;;  %v3301_v55 = vsub.f32 %v14347_v7, %v10495_v22  ;;  %v14362_v27 = vld [vmem:[#allocation8_spill] sm:$0xff] }
 0x5dd   : > { %v3444_v11 = vmul.f32 1.442695, %v3307_v14  ;;  %v3426_v29 = vmul.f32 1.442695, %v3298_v15  ;;  %v3456_v49 = vmul.f32 1.442695, %v3313_v28  ;;  %v3330_v57 = vsub.f32 %v14348_v43, %v10518_v33 }
 0x5de   : > { %v3428_v21 = vmul.f32 1.442695, %v3299_v9  ;;  %v3460_v3 = vmul.f32 1.442695, %v3315_v62  ;;  %v3430_v37 = vmul.f32 1.442695, %v3300_v26  ;;  %v3302_v42 = vsub.f32 %v14349_v59, %v10495_v22 }
 0x5df   : > { %7599 = vpow2.f32 %v3444_v11  ;;  %v3464_v48 = vmul.f32 1.442695, %v3317_v63  ;;  %v3432_v36 = vmul.f32 1.442695, %v3301_v55  ;;  %v3490_v56 = vmul.f32 1.442695, %v3330_v57 }
 0x5e0   : > { %7601 = vpow2.f32 %v3426_v29  ;;  %v3332_v58 = vsub.f32 %v14350_v31, %v10518_v33  ;;  %v3434_v52 = vmul.f32 1.442695, %v3302_v42  ;;  %v3303_v16 = vsub.f32 %v14352_v19, %v10495_v22  ;;  %v14358_v29 = vld [vmem:[#allocation126_spill] sm:$0xff] }
 0x5e1   : > { %7603 = vpow2.f32 %v3456_v49  ;;  %v3347_v14 = vsub.f32 %v14354_v5, %v10532_v39  ;;  %v3304_v28 = vsub.f32 %v14356_v38, %v10495_v22  ;;  %v10558_v9 = vrot.slane %v10488_v4, %v13758_v17  ;;  %v14364_v55 = vld [vmem:[#allocation86_spill] sm:$0xff]  ;;  %v14370_v5 = vld [vmem:[#allocation11_spill] sm:$0xff] }
 0x5e2   : > { %7605 = vpow2.f32 %v3428_v21  ;;  %v3494_v32 = vmul.f32 1.442695, %v3332_v58  ;;  %v3436_v15 = vmul.f32 1.442695, %v3303_v16  ;;  %v3348_v49 = vsub.f32 %v14358_v29, %v10532_v39  ;;  %v14360_v21 = vld [vmem:[#allocation85_spill] sm:$0xff]  ;;  %v14366_v59 = vld [vmem:[#allocation114_spill] sm:$0xff] }
 0x5e3   : > { %7607 = vpow2.f32 %v3460_v3  ;;  %v3524_v11 = vmul.f32 1.442695, %v3347_v14  ;;  %v3438_v62 = vmul.f32 1.442695, %v3304_v28  ;;  %v3305_v1 = vsub.f32 %v14360_v21, %v10495_v22  ;;  %v14368_v58 = vld [vmem:[#allocation88_spill] sm:$0xff]  ;;  %v14372_v28 = vld [vmem:[#allocation89_spill] sm:$0xff] }
 0x5e4   : > { %7609 = vpow2.f32 %v3430_v37  ;;  %v3526_v3 = vmul.f32 1.442695, %v3348_v49  ;;  %v3363_v63 = vsub.f32 %v14362_v27, %v10558_v9  ;;  %v13759_v57 = vsub.s32 5, %v14262_v51  ;;  %v14376_v27 = vld [vmem:[#allocation90_spill] sm:$0xff] }
 0x5e5   : > { %7611 = vpow2.f32 %v3464_v48  ;;  %v3440_v7 = vmul.f32 1.442695, %v3305_v1  ;;  %v3306_v48 = vsub.f32 %v14364_v55, %v10495_v22  ;;  %v3334_v42 = vsub.f32 %v14366_v59, %v10518_v33 }
 0x5e6   : > { %7613 = vpow2.f32 %v3432_v36  ;;  %v3556_v36 = vmul.f32 1.442695, %v3363_v63  ;;  %v10594_v16 = vrot.slane %v10488_v4, %v13759_v57  ;;  %v3364_v14 = vsub.f32 %v14370_v5, %v10558_v9  ;;  %v14400_v57 = vld [vmem:[#allocation111_spill] sm:$0xff] }
 0x5e7   : > { %7615 = vpow2.f32 %v3490_v56  ;;  %v3442_v31 = vmul.f32 1.442695, %v3306_v48  ;;  %v3310_v63 = vsub.f32 %v14376_v27, %v10495_v22  ;;  %v13757_v55 = vsub.s32 6, %v14262_v51 }
 0x5e8   : > { %7617 = vpow2.f32 %v3434_v52  ;;  %v3308_v52 = vsub.f32 %v14368_v58, %v10495_v22  ;;  %v3558_v49 = vmul.f32 1.442695, %v3364_v14  ;;  %v14380_v58 = vld [vmem:[#allocation91_spill] sm:$0xff]  ;;  %v3331_v8 = vsub.f32 %v14400_v57, %v10518_v33 }
 0x5e9   : > { %7619 = vpow2.f32 %v3494_v32  ;;  %v3498_v32 = vmul.f32 1.442695, %v3334_v42  ;;  %v10630_v5 = vrot.slane %v10488_v4, %v13757_v55 }
 0x5ea   : > { %7621 = vpow2.f32 %v3436_v15  ;;  %v3446_v38 = vmul.f32 1.442695, %v3308_v52  ;;  %v3311_v52 = vsub.f32 %v14380_v58, %v10495_v22 }
 0x5eb   : > { %7623 = vpow2.f32 %v3524_v11  ;;  %v3309_v11 = vsub.f32 %v14372_v28, %v10495_v22 }
 0x5ec   : > { %v10536_v61 = vpop.eup %7599  ;;  %7625 = vpow2.f32 %v3438_v62  ;;  %v14374_v62 = vld [vmem:[#allocation33_spill] sm:$0xff] }
 0x5ed   : > { %14351 = vst [vmem:[#allocation135_spill] sm:$0xff] %v10536_v61  ;;  %v10540_v6 = vpop.eup %7601  ;;  %3838 = vperm.xlu1 %7342, %v10536_v61   ;;  %7627 = vpow2.f32 %v3526_v3  ;;  %v3379_v21 = vsub.f32 %v14374_v62, %v10594_v16  ;;  %v3448_v3 = vmul.f32 1.442695, %v3309_v11  ;;  %v14384_v62 = vld [vmem:[#allocation92_spill] sm:$0xff] }
 0x5ee   : > { %14353 = vst [vmem:[#allocation137_spill] sm:$0xff] %v10540_v6  ;;  %3811 = vperm.xlu0 %7341, %v10540_v6   ;;  %v10547_v10 = vpop.eup %7603  ;;  %7629 = vpow2.f32 %v3440_v7 }
 0x5ef   : > { %14355 = vst [vmem:[#allocation139_spill] sm:$0xff] %v10547_v10  ;;  %v10551_v30 = vpop.eup %7605  ;;  %7631 = vpow2.f32 %v3556_v36  ;;  %v3588_v48 = vmul.f32 1.442695, %v3379_v21  ;;  %v14378_v36 = vld [vmem:[#allocation115_spill] sm:$0xff]  ;;  %v3312_v21 = vsub.f32 %v14384_v62, %v10495_v22 }
 0x5f0   : > { %14357 = vst [vmem:[#allocation141_spill] sm:$0xff] %v10551_v30  ;;  %v10562_v46 = vpop.eup %7607  ;;  %7633 = vpow2.f32 %v3442_v31  ;;  %v3335_v59 = vsub.f32 %v14378_v36, %v10518_v33  ;;  %v3450_v31 = vmul.f32 1.442695, %v3310_v63  ;;  %v14386_v63 = vld [vmem:[#allocation50_spill] sm:$0xff] }
 0x5f1   : > { %3856 = vperm.xlu1 %7342, %v10547_v10   ;;  %14359 = vst [vmem:[#allocation132_spill] sm:$0xff] %v10562_v46  ;;  %v10566_v26 = vpop.eup %7609  ;;  %7635 = vpow2.f32 %v3498_v32 }
 0x5f2   : > { %3814 = vperm.xlu0 %7341, %v10551_v30   ;;  %14361 = vst [vmem:[#allocation134_spill] sm:$0xff] %v10566_v26  ;;  %v10572_v37 = vpop.eup %7611  ;;  %7637 = vpow2.f32 %v3446_v38  ;;  %v3500_v14 = vmul.f32 1.442695, %v3335_v59  ;;  %v14382_v38 = vld [vmem:[#allocation10_spill] sm:$0xff]  ;;  %v3454_v59 = vmul.f32 1.442695, %v3312_v21 }
 0x5f3   : > { %14363 = vst [vmem:[#allocation136_spill] sm:$0xff] %v10572_v37  ;;  %v10576_v43 = vpop.eup %7613  ;;  %7639 = vpow2.f32 %v3558_v49  ;;  %v3365_v28 = vsub.f32 %v14382_v38, %v10558_v9  ;;  %v3452_v49 = vmul.f32 1.442695, %v3311_v52 }
 0x5f4   : > { %14365 = vst [vmem:[#allocation138_spill] sm:$0xff] %v10576_v43  ;;  %v10583_v56 = vpop.eup %7615  ;;  %7641 = vpow2.f32 %v3448_v3 }
 0x5f5   : > { %3862 = vperm.xlu1 %7342, %v10562_v46   ;;  %14367 = vst [vmem:[#allocation140_spill] sm:$0xff] %v10583_v56  ;;  %v10587_v19 = vpop.eup %7617  ;;  %7643 = vpow2.f32 %v3588_v48  ;;  %v3560_v27 = vmul.f32 1.442695, %v3365_v28  ;;  %v3394_v48 = vsub.f32 %v14386_v63, %v10630_v5 }
 0x5f6   : > { %3817 = vperm.xlu0 %7341, %v10566_v26   ;;  %14369 = vst [vmem:[#allocation143_spill] sm:$0xff] %v10587_v19  ;;  %v10598_v15 = vpop.eup %7619  ;;  %7645 = vpow2.f32 %v3450_v31  ;;  %v14388_v31 = vld [vmem:[#allocation94_spill] sm:$0xff] }
 0x5f7   : > { %14371 = vst [vmem:[#allocation148_spill] sm:$0xff] %v10598_v15  ;;  %v10602_v29 = vpop.eup %7621  ;;  %7647 = vpow2.f32 %v3500_v14  ;;  %v3314_v58 = vsub.f32 %v14388_v31, %v10499_v12  ;;  %v3618_v22 = vmul.f32 1.442695, %v3394_v48  ;;  %v14390_v14 = vld [vmem:[#allocation101_spill] sm:$0xff]  ;;  %v13762_v31 = vsub.s32 7, %v14262_v51 }
 0x5f8   : > { %14373 = vst [vmem:[#allocation154_spill] sm:$0xff] %v10602_v29  ;;  %v10608_v1 = vpop.eup %7623  ;;  %7649 = vpow2.f32 %v3452_v49  ;;  %v3321_v38 = vsub.f32 %v14390_v14, %v10499_v12  ;;  %v14392_v49 = vld [vmem:[#allocation96_spill] sm:$0xff]  ;;  %v14394_v48 = vld [vmem:[#allocation129_spill] sm:$0xff] }
 0x5f9   : > { %3868 = vperm.xlu1 %7342, %v10572_v37   ;;  %14375 = vst [vmem:[#allocation156_spill] sm:$0xff] %v10608_v1  ;;  %v10612_v7 = vpop.eup %7625  ;;  %7651 = vpow2.f32 %v3560_v27  ;;  %v3458_v62 = vmul.f32 1.442695, %v3314_v58  ;;  %v3316_v21 = vsub.f32 %v14392_v49, %v10499_v12  ;;  %v3351_v14 = vsub.f32 %v14394_v48, %v10532_v39  ;;  %v14396_v58 = vld [vmem:[#allocation98_spill] sm:$0xff]  ;;  %v14398_v48 = vld [vmem:[#allocation35_spill] sm:$0xff] }
 0x5fa   : > { %3820 = vperm.xlu0 %7341, %v10576_v43   ;;  %14377 = vst [vmem:[#allocation158_spill] sm:$0xff] %v10612_v7  ;;  %v10619_v42 = vpop.eup %7627  ;;  %7653 = vpow2.f32 %v3454_v59  ;;  %v3472_v27 = vmul.f32 1.442695, %v3321_v38  ;;  %v3318_v49 = vsub.f32 %v14396_v58, %v10499_v12 }
 0x5fb   : > { %14379 = vst [vmem:[#allocation142_spill] sm:$0xff] %v10619_v42  ;;  %v10623_v32 = vpop.eup %7629  ;;  %7655 = vpow2.f32 %v3618_v22  ;;  %v3462_v59 = vmul.f32 1.442695, %v3316_v21  ;;  %v10676_v22 = vrot.slane %v10488_v4, %v13762_v31  ;;  %v3532_v38 = vmul.f32 1.442695, %v3351_v14 }
 0x5fc   : > { %14381 = vst [vmem:[#allocation147_spill] sm:$0xff] %v10623_v32  ;;  %v10634_v11 = vpop.eup %7631  ;;  %7657 = vpow2.f32 %v3458_v62  ;;  %v3381_v62 = vsub.f32 %v14398_v48, %v10594_v16  ;;  %v3466_v58 = vmul.f32 1.442695, %v3318_v49  ;;  %v3492_v48 = vmul.f32 1.442695, %v3331_v8  ;;  %v14408_v8 = vld [vmem:[#allocation113_spill] sm:$0xff] }
 0x5fd   : > { %3907 = vperm.xlu1 %7342, %v10583_v56   ;;  %14383 = vst [vmem:[#allocation172_spill] sm:$0xff] %v10634_v11  ;;  %v10638_v3 = vpop.eup %7633  ;;  %7659 = vpow2.f32 %v3472_v27  ;;  %v14402_v27 = vld [vmem:[#allocation66_spill] sm:$0xff] }
 0x5fe   : > { %3823 = vperm.xlu0 %7341, %v10587_v19   ;;  %14385 = vst [vmem:[#allocation151_spill] sm:$0xff] %v10638_v3  ;;  %v10644_v36 = vpop.eup %7635  ;;  %7661 = vpow2.f32 %v3462_v59  ;;  %v3592_v4 = vmul.f32 1.442695, %v3381_v62  ;;  %v3410_v14 = vsub.f32 %v14402_v27, %v10676_v22  ;;  %v14404_v59 = vld [vmem:[#allocation124_spill] sm:$0xff] }
 0x5ff   : > { %14387 = vst [vmem:[#allocation157_spill] sm:$0xff] %v10644_v36  ;;  %v10648_v52 = vpop.eup %7637  ;;  %7663 = vpow2.f32 %v3532_v38  ;;  %v3346_v49 = vsub.f32 %v14404_v59, %v10532_v39  ;;  %v14406_v38 = vld [vmem:[#allocation102_spill] sm:$0xff] }
 0x600   : > { %14389 = vst [vmem:[#allocation160_spill] sm:$0xff] %v10648_v52  ;;  %v10654_v28 = vpop.eup %7639  ;;  %7665 = vpow2.f32 %v3466_v58  ;;  %v3650_v57 = vmul.f32 1.442695, %v3410_v14  ;;  %v3322_v62 = vsub.f32 %v14406_v38, %v10499_v12  ;;  %v3333_v58 = vsub.f32 %v14408_v8, %v10518_v33 }
 0x601   : > { %3913 = vperm.xlu1 %7342, %v10598_v15   ;;  %14391 = vst [vmem:[#allocation169_spill] sm:$0xff] %v10654_v28  ;;  %v10658_v63 = vpop.eup %7641  ;;  %7667 = vpow2.f32 %v3592_v4  ;;  %v3522_v27 = vmul.f32 1.442695, %v3346_v49  ;;  %v14410_v4 = vld [vmem:[#allocation130_spill] sm:$0xff] }
 0x602   : > { %3826 = vperm.xlu0 %7341, %v10602_v29   ;;  %14393 = vst [vmem:[#allocation144_spill] sm:$0xff] %v10658_v63  ;;  %v10665_v55 = vpop.eup %7643  ;;  %7669 = vpow2.f32 %v3492_v48  ;;  %v3474_v59 = vmul.f32 1.442695, %v3322_v62  ;;  %v3352_v14 = vsub.f32 %v14410_v4, %v10532_v39  ;;  %v3496_v38 = vmul.f32 1.442695, %v3333_v58  ;;  %v14412_v48 = vld [vmem:[#allocation9_spill] sm:$0xff] }
 0x603   : > { %14395 = vst [vmem:[#allocation171_spill] sm:$0xff] %v10665_v55  ;;  %v10669_v17 = vpop.eup %7645  ;;  %7671 = vpow2.f32 %v3650_v57  ;;  %v3362_v49 = vsub.f32 %v14412_v48, %v10558_v9  ;;  %v14414_v57 = vld [vmem:[#allocation38_spill] sm:$0xff] }
 0x604   : > { %14397 = vst [vmem:[#allocation150_spill] sm:$0xff] %v10669_v17  ;;  %v10680_v21 = vpop.eup %7647  ;;  %7673 = vpow2.f32 %v3522_v27  ;;  %v3534_v8 = vmul.f32 1.442695, %v3352_v14  ;;  %v3382_v62 = vsub.f32 %v14414_v57, %v10594_v16  ;;  %v14416_v27 = vld [vmem:[#allocation99_spill] sm:$0xff] }
 0x605   : > { %3958 = vperm.xlu1 %7342, %v10608_v1   ;;  %14399 = vst [vmem:[#allocation174_spill] sm:$0xff] %v10680_v21  ;;  %v10684_v10 = vpop.eup %7649  ;;  %7675 = vpow2.f32 %v3474_v59  ;;  %v3554_v4 = vmul.f32 1.442695, %v3362_v49  ;;  %v3319_v58 = vsub.f32 %v14416_v27, %v10499_v12  ;;  %v14418_v59 = vld [vmem:[#allocation68_spill] sm:$0xff] }
 0x606   : > { %3829 = vperm.xlu0 %7341, %v10612_v7   ;;  %14401 = vst [vmem:[#allocation191_spill] sm:$0xff] %v10684_v10  ;;  %v10690_v31 = vpop.eup %7651  ;;  %7677 = vpow2.f32 %v3496_v38  ;;  %v3594_v48 = vmul.f32 1.442695, %v3382_v62  ;;  %v3412_v14 = vsub.f32 %v14418_v59, %v10676_v22  ;;  %v14420_v38 = vld [vmem:[#allocation127_spill] sm:$0xff] }
 0x607   : > { %14403 = vst [vmem:[#allocation159_spill] sm:$0xff] %v10690_v31  ;;  %7679 = vpow2.f32 %v3534_v8  ;;  %v3468_v57 = vmul.f32 1.442695, %v3319_v58  ;;  %v3349_v49 = vsub.f32 %v14420_v38, %v10532_v39  ;;  %v14422_v8 = vld [vmem:[#allocation118_spill] sm:$0xff] }
 0x608   : > { %7681 = vpow2.f32 %v3554_v4  ;;  %v3654_v27 = vmul.f32 1.442695, %v3412_v14  ;;  %v3338_v62 = vsub.f32 %v14422_v8, %v10518_v33  ;;  %v14424_v4 = vld [vmem:[#allocation34_spill] sm:$0xff] }
 0x609   : > { %3961 = vperm.xlu1 %7342, %v10619_v42   ;;  %7683 = vpow2.f32 %v3594_v48  ;;  %v3528_v59 = vmul.f32 1.442695, %v3349_v49  ;;  %v3378_v58 = vsub.f32 %v14424_v4, %v10594_v16  ;;  %v14426_v48 = vld [vmem:[#allocation15_spill] sm:$0xff] }
 0x60a   : > { %3832 = vperm.xlu0 %7341, %v10623_v32   ;;  %v3506_v38 = vmul.f32 1.442695, %v3338_v62  ;;  %v3368_v14 = vsub.f32 %v14426_v48, %v10558_v9 }
 0x60b   : > { %v3586_v8 = vmul.f32 1.442695, %v3378_v58 }
 0x60c   : > { %v3566_v4 = vmul.f32 1.442695, %v3368_v14 }
 0x60d   : > { %4006 = vperm.xlu1 %7342, %v10634_v11  }
 0x60e   : > { %3835 = vperm.xlu0 %7341, %v10638_v3  }
 0x611   : > { %3919 = vperm.xlu1 %7342, %v10644_v36  }
 0x612   : > { %3841 = vperm.xlu0 %7341, %v10648_v52  }
 0x615   : > { %4009 = vperm.xlu1 %7342, %v10654_v28  }
 0x616   : > { %3844 = vperm.xlu0 %7341, %v10658_v63  }
 0x619   : > { %4054 = vperm.xlu1 %7342, %v10665_v55  }
 0x61a   : > { %3847 = vperm.xlu0 %7341, %v10669_v17   ;;  %v10694_v17 = vpop.eup %7653  ;;  %7685 = vpow2.f32 %v3468_v57  ;;  %v14428_v57 = vld [vmem:[#allocation100_spill] sm:$0xff] }
 0x61b   : > { %14405 = vst [vmem:[#allocation195_spill] sm:$0xff] %v10694_v17  ;;  %v3320_v49 = vsub.f32 %v14428_v57, %v10499_v12 }
 0x61d   : > { %3922 = vperm.xlu1 %7342, %v10680_v21   ;;  %v3470_v48 = vmul.f32 1.442695, %v3320_v49 }
 0x61e   : > { %3850 = vperm.xlu0 %7341, %v10684_v10   ;;  %v10700_v10 = vpop.eup %7655  ;;  %7687 = vpow2.f32 %v3654_v27  ;;  %v14430_v27 = vld [vmem:[#allocation54_spill] sm:$0xff] }
 0x61f   : > { %14407 = vst [vmem:[#allocation162_spill] sm:$0xff] %v10700_v10  ;;  %v10704_v63 = vpop.eup %7657  ;;  %7689 = vpow2.f32 %v3528_v59  ;;  %v3398_v62 = vsub.f32 %v14430_v27, %v10630_v5  ;;  %v14432_v59 = vld [vmem:[#allocation128_spill] sm:$0xff] }
 0x620   : > { %14409 = vst [vmem:[#allocation173_spill] sm:$0xff] %v10704_v63  ;;  %v3350_v58 = vsub.f32 %v14432_v59, %v10532_v39 }
 0x621   : > { %4012 = vperm.xlu1 %7342, %v10690_v31   ;;  %v3626_v57 = vmul.f32 1.442695, %v3398_v62 }
 0x622   : > { %3853 = vperm.xlu0 %7341, %v10694_v17   ;;  %v10710_v17 = vpop.eup %7659  ;;  %7691 = vpow2.f32 %v3506_v38  ;;  %v14434_v38 = vld [vmem:[#allocation104_spill] sm:$0xff]  ;;  %v3530_v27 = vmul.f32 1.442695, %v3350_v58 }
 0x623   : > { %14411 = vst [vmem:[#allocation176_spill] sm:$0xff] %v10710_v17  ;;  %v10714_v52 = vpop.eup %7661  ;;  %7693 = vpow2.f32 %v3586_v8  ;;  %v3324_v14 = vsub.f32 %v14434_v38, %v10499_v12  ;;  %v14436_v8 = vld [vmem:[#allocation36_spill] sm:$0xff] }
 0x624   : > { %14413 = vst [vmem:[#allocation161_spill] sm:$0xff] %v10714_v52  ;;  %v10720_v61 = vpop.eup %7663  ;;  %7695 = vpow2.f32 %v3566_v4  ;;  %v3380_v49 = vsub.f32 %v14436_v8, %v10594_v16  ;;  %v14438_v4 = vld [vmem:[#allocation26_spill] sm:$0xff] }
 0x625   : > { %4099 = vperm.xlu1 %7342, %v10700_v10   ;;  %14415 = vst [vmem:[#allocation175_spill] sm:$0xff] %v10720_v61  ;;  %v10724_v21 = vpop.eup %7665  ;;  %7697 = vpow2.f32 %v3470_v48  ;;  %v3478_v59 = vmul.f32 1.442695, %v3324_v14  ;;  %v3354_v62 = vsub.f32 %v14438_v4, %v10532_v39  ;;  %v14440_v48 = vld [vmem:[#allocation49_spill] sm:$0xff] }
 0x626   : > { %3859 = vperm.xlu0 %7341, %v10704_v63   ;;  %14417 = vst [vmem:[#allocation178_spill] sm:$0xff] %v10724_v21  ;;  %v3590_v38 = vmul.f32 1.442695, %v3380_v49  ;;  %v3395_v58 = vsub.f32 %v14440_v48, %v10630_v5 }
 0x627   : > { %v3538_v8 = vmul.f32 1.442695, %v3354_v62 }
 0x628   : > { %v3620_v4 = vmul.f32 1.442695, %v3395_v58 }
 0x629   : > { %3880 = vperm.xlu1 %7342, %v10710_v17   ;;  %v10730_v17 = vpop.eup %7667  ;;  %7699 = vpow2.f32 %v3626_v57  ;;  %v14442_v57 = vld [vmem:[#allocation40_spill] sm:$0xff] }
 0x62a   : > { %3865 = vperm.xlu0 %7341, %v10714_v52   ;;  %14419 = vst [vmem:[#allocation152_spill] sm:$0xff] %v10730_v17  ;;  %v10734_v3 = vpop.eup %7669  ;;  %7701 = vpow2.f32 %v3530_v27  ;;  %v3384_v14 = vsub.f32 %v14442_v57, %v10594_v16  ;;  %v14444_v27 = vld [vmem:[#allocation116_spill] sm:$0xff] }
 0x62b   : > { %14421 = vst [vmem:[#allocation153_spill] sm:$0xff] %v10734_v3  ;;  %v10740_v36 = vpop.eup %7671  ;;  %7703 = vpow2.f32 %v3478_v59  ;;  %v3336_v49 = vsub.f32 %v14444_v27, %v10518_v33  ;;  %v14446_v59 = vld [vmem:[#allocation70_spill] sm:$0xff] }
 0x62c   : > { %14423 = vst [vmem:[#allocation164_spill] sm:$0xff] %v10740_v36  ;;  %v10744_v19 = vpop.eup %7673  ;;  %7705 = vpow2.f32 %v3590_v38  ;;  %v3598_v48 = vmul.f32 1.442695, %v3384_v14  ;;  %v3414_v62 = vsub.f32 %v14446_v59, %v10676_v22  ;;  %v14448_v38 = vld [vmem:[#allocation13_spill] sm:$0xff] }
 0x62d   : > { %3970 = vperm.xlu1 %7342, %v10720_v61   ;;  %14425 = vst [vmem:[#allocation177_spill] sm:$0xff] %v10744_v19  ;;  %v3502_v57 = vmul.f32 1.442695, %v3336_v49  ;;  %v3366_v58 = vsub.f32 %v14448_v38, %v10558_v9 }
 0x62e   : > { %3871 = vperm.xlu0 %7341, %v10724_v21   ;;  %v3658_v27 = vmul.f32 1.442695, %v3414_v62 }
 0x62f   : > { %v3562_v59 = vmul.f32 1.442695, %v3366_v58 }
 0x631   : > { %4060 = vperm.xlu1 %7342, %v10730_v17   ;;  %v10750_v17 = vpop.eup %7675  ;;  %7707 = vpow2.f32 %v3538_v8  ;;  %v14450_v8 = vld [vmem:[#allocation120_spill] sm:$0xff] }
 0x632   : > { %3910 = vperm.xlu0 %7341, %v10734_v3   ;;  %14427 = vst [vmem:[#allocation180_spill] sm:$0xff] %v10750_v17  ;;  %v10754_v32 = vpop.eup %7677  ;;  %7709 = vpow2.f32 %v3620_v4  ;;  %v3340_v14 = vsub.f32 %v14450_v8, %v10518_v33  ;;  %v14452_v4 = vld [vmem:[#allocation52_spill] sm:$0xff] }
 0x633   : > { %14429 = vst [vmem:[#allocation163_spill] sm:$0xff] %v10754_v32  ;;  %v3396_v49 = vsub.f32 %v14452_v4, %v10630_v5 }
 0x634   : > { %v3510_v38 = vmul.f32 1.442695, %v3340_v14 }
 0x635   : > { %4147 = vperm.xlu1 %7342, %v10740_v36   ;;  %v10760_v36 = vpop.eup %7679  ;;  %7711 = vpow2.f32 %v3598_v48  ;;  %v14454_v48 = vld [vmem:[#allocation17_spill] sm:$0xff]  ;;  %v3622_v8 = vmul.f32 1.442695, %v3396_v49 }
 0x636   : > { %3955 = vperm.xlu0 %7341, %v10744_v19   ;;  %14431 = vst [vmem:[#allocation166_spill] sm:$0xff] %v10760_v36  ;;  %v10764_v10 = vpop.eup %7681  ;;  %7713 = vpow2.f32 %v3502_v57  ;;  %v3370_v62 = vsub.f32 %v14454_v48, %v10558_v9  ;;  %v14456_v57 = vld [vmem:[#allocation65_spill] sm:$0xff] }
 0x637   : > { %14433 = vst [vmem:[#allocation179_spill] sm:$0xff] %v10764_v10  ;;  %v3411_v58 = vsub.f32 %v14456_v57, %v10676_v22 }
 0x638   : > { %v3570_v4 = vmul.f32 1.442695, %v3370_v62 }
 0x639   : > { %3883 = vperm.xlu1 %7342, %v10750_v17   ;;  %v10770_v17 = vpop.eup %7683  ;;  %7715 = vpow2.f32 %v3658_v27  ;;  %v14458_v27 = vld [vmem:[#allocation56_spill] sm:$0xff]  ;;  %v3652_v48 = vmul.f32 1.442695, %v3411_v58 }
 0x63a   : > { %3916 = vperm.xlu0 %7341, %v10754_v32   ;;  %14435 = vst [vmem:[#allocation184_spill] sm:$0xff] %v10770_v17  ;;  %v10774_v32 = vpop.eup %7685  ;;  %7717 = vpow2.f32 %v3562_v59  ;;  %v3400_v14 = vsub.f32 %v14458_v27, %v10630_v5  ;;  %v14460_v59 = vld [vmem:[#allocation117_spill] sm:$0xff] }
 0x63b   : > { %14437 = vst [vmem:[#allocation165_spill] sm:$0xff] %v10774_v32  ;;  %v3337_v49 = vsub.f32 %v14460_v59, %v10518_v33 }
 0x63c   : > { %v3630_v57 = vmul.f32 1.442695, %v3400_v14 }
 0x63d   : > { %3973 = vperm.xlu1 %7342, %v10760_v36   ;;  %v10780_v36 = vpop.eup %7687  ;;  %7719 = vpow2.f32 %v3510_v38  ;;  %v14462_v38 = vld [vmem:[#allocation106_spill] sm:$0xff]  ;;  %v3504_v27 = vmul.f32 1.442695, %v3337_v49 }
 0x63e   : > { %4003 = vperm.xlu0 %7341, %v10764_v10   ;;  %14439 = vst [vmem:[#allocation168_spill] sm:$0xff] %v10780_v36  ;;  %v10784_v61 = vpop.eup %7689  ;;  %7721 = vpow2.f32 %v3622_v8  ;;  %v3326_v62 = vsub.f32 %v14462_v38, %v10499_v12  ;;  %v14464_v8 = vld [vmem:[#allocation12_spill] sm:$0xff] }
 0x63f   : > { %14441 = vst [vmem:[#allocation183_spill] sm:$0xff] %v10784_v61  ;;  %v3367_v58 = vsub.f32 %v14464_v8, %v10558_v9 }
 0x640   : > { %v3482_v59 = vmul.f32 1.442695, %v3326_v62 }
 0x641   : > { %4063 = vperm.xlu1 %7342, %v10770_v17   ;;  %v10790_v17 = vpop.eup %7691  ;;  %7723 = vpow2.f32 %v3570_v4  ;;  %v14466_v4 = vld [vmem:[#allocation28_spill] sm:$0xff]  ;;  %v3564_v38 = vmul.f32 1.442695, %v3367_v58 }
 0x642   : > { %3874 = vperm.xlu0 %7341, %v10774_v32   ;;  %14443 = vst [vmem:[#allocation189_spill] sm:$0xff] %v10790_v17  ;;  %v10794_v32 = vpop.eup %7693  ;;  %7725 = vpow2.f32 %v3652_v48  ;;  %v3356_v14 = vsub.f32 %v14466_v4, %v10532_v39  ;;  %v14468_v48 = vld [vmem:[#allocation51_spill] sm:$0xff] }
 0x643   : > { %14445 = vst [vmem:[#allocation155_spill] sm:$0xff] %v10794_v32  ;;  %v3397_v49 = vsub.f32 %v14468_v48, %v10630_v5 }
 0x644   : > { %v3542_v8 = vmul.f32 1.442695, %v3356_v14 }
 0x645   : > { %4153 = vperm.xlu1 %7342, %v10780_v36   ;;  %v3624_v4 = vmul.f32 1.442695, %v3397_v49  ;;  %v14476_v49 = vld [vmem:[#allocation24_spill] sm:$0xff] }
 0x646   : > { %3964 = vperm.xlu0 %7341, %v10784_v61   ;;  %v10800_v61 = vpop.eup %7695  ;;  %7727 = vpow2.f32 %v3630_v57  ;;  %v14470_v57 = vld [vmem:[#allocation42_spill] sm:$0xff] }
 0x647   : > { %14447 = vst [vmem:[#allocation167_spill] sm:$0xff] %v10800_v61  ;;  %v10804_v37 = vpop.eup %7697  ;;  %7729 = vpow2.f32 %v3504_v27  ;;  %v3386_v62 = vsub.f32 %v14470_v57, %v10594_v16  ;;  %v14472_v27 = vld [vmem:[#allocation103_spill] sm:$0xff] }
 0x648   : > { %14449 = vst [vmem:[#allocation170_spill] sm:$0xff] %v10804_v37  ;;  %v3323_v58 = vsub.f32 %v14472_v27, %v10499_v12  ;;  %v3353_v27 = vsub.f32 %v14476_v49, %v10532_v39  ;;  %v14480_v49 = vld [vmem:[#allocation37_spill] sm:$0xff] }
 0x649   : > { %3931 = vperm.xlu1 %7342, %v10790_v17   ;;  %v10810_v17 = vpop.eup %7699  ;;  %7731 = vpow2.f32 %v3482_v59  ;;  %v3602_v48 = vmul.f32 1.442695, %v3386_v62  ;;  %v14474_v59 = vld [vmem:[#allocation145_spill] sm:$0xff]  ;;  %v14478_v62 = vld [vmem:[#allocation7_spill] sm:$0xff] }
 0x64a   : > { %4051 = vperm.xlu0 %7341, %v10794_v32   ;;  %14451 = vst [vmem:[#allocation188_spill] sm:$0xff] %v10810_v17  ;;  %v10814_v32 = vpop.eup %7701  ;;  %7733 = vpow2.f32 %v3564_v38  ;;  %v3416_v14 = vsub.f32 %v14474_v59, %v10676_v22  ;;  %v3476_v38 = vmul.f32 1.442695, %v3323_v58  ;;  %v3342_v59 = vsub.f32 %v14478_v62, %v10518_v33 }
 0x64b   : > { %14453 = vst [vmem:[#allocation192_spill] sm:$0xff] %v10814_v32  ;;  %v3536_v58 = vmul.f32 1.442695, %v3353_v27 }
 0x64d   : > { %4021 = vperm.xlu1 %7342, %v10800_v61  }
 0x64e   : > { %3877 = vperm.xlu0 %7341, %v10804_v37   ;;  %v10820_v37 = vpop.eup %7703  ;;  %7735 = vpow2.f32 %v3542_v8  ;;  %v3662_v8 = vmul.f32 1.442695, %v3416_v14  ;;  %v14482_v14 = vld [vmem:[#allocation19_spill] sm:$0xff] }
 0x64f   : > { %14455 = vst [vmem:[#allocation87_spill] sm:$0xff] %v10820_v37  ;;  %v10824_v61 = vpop.eup %7705  ;;  %7737 = vpow2.f32 %v3624_v4  ;;  %v3372_v62 = vsub.f32 %v14482_v14, %v10558_v9 }
 0x650   : > { %14457 = vst [vmem:[#allocation79_spill] sm:$0xff] %v10824_v61 }
 0x651   : > { %4111 = vperm.xlu1 %7342, %v10810_v17   ;;  %v10830_v17 = vpop.eup %7707  ;;  %7739 = vpow2.f32 %v3602_v48  ;;  %v3514_v48 = vmul.f32 1.442695, %v3342_v59  ;;  %v14486_v59 = vld [vmem:[#allocation58_spill] sm:$0xff] }
 0x652   : > { %3967 = vperm.xlu0 %7341, %v10814_v32   ;;  %14459 = vst [vmem:[#allocation93_spill] sm:$0xff] %v10830_v17  ;;  %v10834_v7 = vpop.eup %7709  ;;  %7741 = vpow2.f32 %v3476_v38  ;;  %v3402_v14 = vsub.f32 %v14486_v59, %v10630_v5 }
 0x653   : > { %14461 = vst [vmem:[#allocation78_spill] sm:$0xff] %v10834_v7 }
 0x655   : > { %3889 = vperm.xlu1 %7342, %v10820_v37   ;;  %v10840_v37 = vpop.eup %7711  ;;  %7743 = vpow2.f32 %v3662_v8  ;;  %v3574_v8 = vmul.f32 1.442695, %v3372_v62  ;;  %v14490_v62 = vld [vmem:[#allocation108_spill] sm:$0xff] }
 0x656   : > { %4057 = vperm.xlu0 %7341, %v10824_v61   ;;  %14463 = vst [vmem:[#allocation95_spill] sm:$0xff] %v10840_v37  ;;  %v10844_v43 = vpop.eup %7713  ;;  %7745 = vpow2.f32 %v3536_v58  ;;  %v3328_v59 = vsub.f32 %v14490_v62, %v10499_v12 }
 0x657   : > { %14465 = vst [vmem:[#allocation80_spill] sm:$0xff] %v10844_v43 }
 0x659   : > { %3979 = vperm.xlu1 %7342, %v10830_v17   ;;  %v10850_v17 = vpop.eup %7715  ;;  %7747 = vpow2.f32 %v3514_v48  ;;  %v3634_v48 = vmul.f32 1.442695, %v3402_v14  ;;  %v14494_v14 = vld [vmem:[#allocation30_spill] sm:$0xff] }
 0x65a   : > { %4102 = vperm.xlu0 %7341, %v10834_v7   ;;  %14467 = vst [vmem:[#allocation97_spill] sm:$0xff] %v10850_v17  ;;  %v10854_v11 = vpop.eup %7717  ;;  %v3358_v62 = vsub.f32 %v14494_v14, %v10532_v39 }
 0x65b   : > { %14469 = vst [vmem:[#allocation81_spill] sm:$0xff] %v10854_v11 }
 0x65d   : > { %4069 = vperm.xlu1 %7342, %v10840_v37   ;;  %v10860_v37 = vpop.eup %7719 }
 0x65e   : > { %3925 = vperm.xlu0 %7341, %v10844_v43   ;;  %14471 = vst [vmem:[#allocation110_spill] sm:$0xff] %v10860_v37  ;;  %v10864_v43 = vpop.eup %7721 }
 0x65f   : > { %14473 = vst [vmem:[#allocation82_spill] sm:$0xff] %v10864_v43 }
 0x661   : > { %4159 = vperm.xlu1 %7342, %v10850_v17   ;;  %v10870_v17 = vpop.eup %7723 }
 0x662   : > { %4015 = vperm.xlu0 %7341, %v10854_v11   ;;  %14475 = vst [vmem:[#allocation112_spill] sm:$0xff] %v10870_v17  ;;  %v10876_v11 = vpop.eup %7725 }
 0x663   : > { %14477 = vst [vmem:[#allocation83_spill] sm:$0xff] %v10876_v11 }
 0x665   : > { %3937 = vperm.xlu1 %7342, %v10860_v37   ;;  %v10884_v37 = vpop.eup %7727 }
 0x666   : > { %4105 = vperm.xlu0 %7341, %v10864_v43   ;;  %14479 = vst [vmem:[#allocation125_spill] sm:$0xff] %v10884_v37  ;;  %v3383_v43 = vsub.f32 %v14480_v49, %v10594_v16  ;;  %v10890_v10 = vpop.eup %7729  ;;  %v14484_v49 = vld [vmem:[#allocation67_spill] sm:$0xff] }
 0x667   : > { %14481 = vst [vmem:[#allocation84_spill] sm:$0xff] %v10890_v10  ;;  %v3413_v15 = vsub.f32 %v14484_v49, %v10676_v22  ;;  %v14488_v49 = vld [vmem:[#allocation119_spill] sm:$0xff] }
 0x668   : > { %v10872_v57 = vpop.permute.xlu1 %3838  ;;  %v3596_v27 = vmul.f32 1.442695, %v3383_v43 }
 0x669   : > { %v10878_v36 = vpop.permute.xlu0 %3811  ;;  %4027 = vperm.xlu1 %7342, %v10870_v17   ;;  %v10898_v17 = vpop.eup %7731  ;;  %v3656_v43 = vmul.f32 1.442695, %v3413_v15 }
 0x66a   : > { %4150 = vperm.xlu0 %7341, %v10876_v11   ;;  %14483 = vst [vmem:[#allocation126_spill] sm:$0xff] %v10898_v17  ;;  %v10904_v29 = vpop.eup %7733  ;;  %7749 = vpow2.f32 %v3596_v27 }
 0x66b   : > { %14485 = vst [vmem:[#allocation85_spill] sm:$0xff] %v10904_v29  ;;  %7751 = vpow2.f32 %v3574_v8  ;;  %v3486_v8 = vmul.f32 1.442695, %v3328_v59  ;;  %v14498_v59 = vld [vmem:[#allocation44_spill] sm:$0xff] }
 0x66c   : > { %v10886_v4 = vpop.permute.xlu1 %3856  ;;  %7753 = vpow2.f32 %v3656_v43  ;;  %v3388_v14 = vsub.f32 %v14498_v59, %v10594_v16 }
 0x66d   : > { %v10892_v32 = vpop.permute.xlu0 %3814  ;;  %4117 = vperm.xlu1 %7342, %v10884_v37   ;;  %v10912_v37 = vpop.eup %7735  ;;  %7755 = vpow2.f32 %v3634_v48  ;;  %v3546_v48 = vmul.f32 1.442695, %v3358_v62  ;;  %v14502_v62 = vld [vmem:[#allocation146_spill] sm:$0xff] }
 0x66e   : > { %3928 = vperm.xlu0 %7341, %v10890_v10   ;;  %14487 = vst [vmem:[#allocation8_spill] sm:$0xff] %v10912_v37  ;;  %v3339_v10 = vsub.f32 %v14488_v49, %v10518_v33  ;;  %v10918_v31 = vpop.eup %7737  ;;  %v14492_v49 = vld [vmem:[#allocation14_spill] sm:$0xff]  ;;  %v3418_v59 = vsub.f32 %v14502_v62, %v10676_v22 }
 0x66f   : > { %14489 = vst [vmem:[#allocation86_spill] sm:$0xff] %v10918_v31 }
 0x670   : > { %v10900_v38 = vpop.permute.xlu1 %3862  ;;  %v3508_v15 = vmul.f32 1.442695, %v3339_v10 }
 0x671   : > { %v10906_v1 = vpop.permute.xlu0 %3817  ;;  %3895 = vperm.xlu1 %7342, %v10898_v17   ;;  %v10926_v17 = vpop.eup %7739 }
 0x672   : > { %4018 = vperm.xlu0 %7341, %v10904_v29   ;;  %14491 = vst [vmem:[#allocation114_spill] sm:$0xff] %v10926_v17  ;;  %v3369_v29 = vsub.f32 %v14492_v49, %v10558_v9  ;;  %v10932_v11 = vpop.eup %7741  ;;  %7757 = vpow2.f32 %v3508_v15  ;;  %v14496_v49 = vld [vmem:[#allocation53_spill] sm:$0xff] }
 0x673   : > { %14493 = vst [vmem:[#allocation88_spill] sm:$0xff] %v10932_v11  ;;  %7759 = vpow2.f32 %v3486_v8  ;;  %v3606_v8 = vmul.f32 1.442695, %v3388_v14  ;;  %v14506_v14 = vld [vmem:[#allocation122_spill] sm:$0xff] }
 0x674   : > { %v10914_v58 = vpop.permute.xlu1 %3868  ;;  %v3568_v10 = vmul.f32 1.442695, %v3369_v29  ;;  %v3344_v62 = vsub.f32 %v14506_v14, %v10518_v33 }
 0x675   : > { %v10920_v52 = vpop.permute.xlu0 %3820  ;;  %3985 = vperm.xlu1 %7342, %v10912_v37   ;;  %v10940_v37 = vpop.eup %7743 }
 0x676   : > { %4108 = vperm.xlu0 %7341, %v10918_v31   ;;  %14495 = vst [vmem:[#allocation11_spill] sm:$0xff] %v10940_v37  ;;  %v3399_v31 = vsub.f32 %v14496_v49, %v10630_v5  ;;  %v10946_v61 = vpop.eup %7745  ;;  %7761 = vpow2.f32 %v3568_v10  ;;  %v14500_v49 = vld [vmem:[#allocation105_spill] sm:$0xff] }
 0x677   : > { %14497 = vst [vmem:[#allocation89_spill] sm:$0xff] %v10946_v61  ;;  %7763 = vpow2.f32 %v3546_v48  ;;  %v3666_v48 = vmul.f32 1.442695, %v3418_v59  ;;  %v14510_v59 = vld [vmem:[#allocation21_spill] sm:$0xff] }
 0x678   : > { %v10928_v27 = vpop.permute.xlu1 %3907  ;;  %v3628_v29 = vmul.f32 1.442695, %v3399_v31  ;;  %v3374_v14 = vsub.f32 %v14510_v59, %v10558_v9 }
 0x679   : > { %v10934_v26 = vpop.permute.xlu0 %3823  ;;  %4075 = vperm.xlu1 %7342, %v10926_v17   ;;  %v10954_v17 = vpop.eup %7747 }
 0x67a   : > { %3886 = vperm.xlu0 %7341, %v10932_v11   ;;  %14499 = vst [vmem:[#allocation33_spill] sm:$0xff] %v10954_v17  ;;  %v3325_v11 = vsub.f32 %v14500_v49, %v10499_v12  ;;  %v10960_v21 = vpop.eup %7749  ;;  %7765 = vpow2.f32 %v3628_v29  ;;  %v14504_v49 = vld [vmem:[#allocation25_spill] sm:$0xff] }
 0x67b   : > { %14501 = vst [vmem:[#allocation90_spill] sm:$0xff] %v10960_v21  ;;  %7767 = vpow2.f32 %v3606_v8  ;;  %v3518_v8 = vmul.f32 1.442695, %v3344_v62  ;;  %v14515_v62 = vld [vmem:[#allocation60_spill] sm:$0xff] }
 0x67c   : > { %v10942_v43 = vpop.permute.xlu1 %3913  ;;  %v3480_v31 = vmul.f32 1.442695, %v3325_v11  ;;  %v3404_v59 = vsub.f32 %v14515_v62, %v10630_v5 }
 0x67d   : > { %v10948_v3 = vpop.permute.xlu0 %3826  ;;  %4165 = vperm.xlu1 %7342, %v10940_v37   ;;  %v10968_v37 = vpop.eup %7751 }
 0x67e   : > { %3976 = vperm.xlu0 %7341, %v10946_v61   ;;  %14503 = vst [vmem:[#allocation115_spill] sm:$0xff] %v10968_v37  ;;  %v3355_v61 = vsub.f32 %v14504_v49, %v10532_v39  ;;  %v10974_v7 = vpop.eup %7753  ;;  %7769 = vpow2.f32 %v3480_v31  ;;  %v14508_v49 = vld [vmem:[#allocation39_spill] sm:$0xff] }
 0x67f   : > { %14505 = vst [vmem:[#allocation91_spill] sm:$0xff] %v10974_v7  ;;  %7771 = vpow2.f32 %v3666_v48  ;;  %v3578_v48 = vmul.f32 1.442695, %v3374_v14  ;;  %v14520_v14 = vld [vmem:[#allocation123_spill] sm:$0xff] }
 0x680   : > { %v10956_v15 = vpop.permute.xlu1 %3958  ;;  %v3540_v11 = vmul.f32 1.442695, %v3355_v61  ;;  %v3345_v62 = vsub.f32 %v14520_v14, %v10518_v33 }
 0x681   : > { %v10962_v56 = vpop.permute.xlu0 %3829  ;;  %3943 = vperm.xlu1 %7342, %v10954_v17   ;;  %v10982_v17 = vpop.eup %7755 }
 0x682   : > { %4066 = vperm.xlu0 %7341, %v10960_v21   ;;  %14507 = vst [vmem:[#allocation10_spill] sm:$0xff] %v10982_v17  ;;  %v3385_v21 = vsub.f32 %v14508_v49, %v10594_v16  ;;  %v10988_v28 = vpop.eup %7757  ;;  %7773 = vpow2.f32 %v3540_v11  ;;  %v14513_v49 = vld [vmem:[#allocation69_spill] sm:$0xff] }
 0x683   : > { %14509 = vst [vmem:[#allocation92_spill] sm:$0xff] %v10988_v28  ;;  %7775 = vpow2.f32 %v3518_v8  ;;  %v3638_v8 = vmul.f32 1.442695, %v3404_v59  ;;  %v14525_v59 = vld [vmem:[#allocation20_spill] sm:$0xff] }
 0x684   : > { %v10970_v10 = vpop.permute.xlu1 %3961  ;;  %v3600_v61 = vmul.f32 1.442695, %v3385_v21  ;;  %v3375_v14 = vsub.f32 %v14525_v59, %v10558_v9 }
 0x685   : > { %v10976_v46 = vpop.permute.xlu0 %3832  ;;  %4033 = vperm.xlu1 %7342, %v10968_v37   ;;  %v10996_v37 = vpop.eup %7759 }
 0x686   : > { %4156 = vperm.xlu0 %7341, %v10974_v7   ;;  %14511 = vst [vmem:[#allocation50_spill] sm:$0xff] %v10996_v37  ;;  %v3415_v7 = vsub.f32 %v14513_v49, %v10676_v22  ;;  %v11002_v63 = vpop.eup %7761  ;;  %7777 = vpow2.f32 %v3600_v61  ;;  %v14518_v49 = vld [vmem:[#allocation121_spill] sm:$0xff] }
 0x687   : > { %14514 = vst [vmem:[#allocation101_spill] sm:$0xff] %v11002_v63  ;;  %7779 = vpow2.f32 %v3578_v48  ;;  %v3520_v48 = vmul.f32 1.442695, %v3345_v62  ;;  %v14530_v62 = vld [vmem:[#allocation59_spill] sm:$0xff] }
 0x688   : > { %v10984_v29 = vpop.permute.xlu1 %4006  ;;  %v3660_v21 = vmul.f32 1.442695, %v3415_v7  ;;  %v3405_v59 = vsub.f32 %v14530_v62, %v10630_v5 }
 0x689   : > { %v10990_v40 = vpop.permute.xlu0 %3835  ;;  %4123 = vperm.xlu1 %7342, %v10982_v17   ;;  %v11010_v17 = vpop.eup %7763 }
 0x68a   : > { %3934 = vperm.xlu0 %7341, %v10988_v28   ;;  %14516 = vst [vmem:[#allocation96_spill] sm:$0xff] %v11010_v17  ;;  %v3341_v28 = vsub.f32 %v14518_v49, %v10518_v33  ;;  %v11016_v30 = vpop.eup %7765  ;;  %7781 = vpow2.f32 %v3660_v21  ;;  %v14523_v49 = vld [vmem:[#allocation16_spill] sm:$0xff] }
 0x68b   : > { %14519 = vst [vmem:[#allocation98_spill] sm:$0xff] %v11016_v30  ;;  %7783 = vpow2.f32 %v3638_v8  ;;  %v3580_v8 = vmul.f32 1.442695, %v3375_v14  ;;  %v14535_v14 = vld [vmem:[#allocation31_spill] sm:$0xff] }
 0x68c   : > { %v10998_v31 = vpop.permute.xlu1 %3919  ;;  %v3512_v7 = vmul.f32 1.442695, %v3341_v28  ;;  %v3361_v62 = vsub.f32 %v14535_v14, %v10532_v39 }
 0x68d   : > { %14512 = vst [vmem:[#allocation94_spill] sm:$0xff] %v10998_v31  ;;  %v11004_v55 = vpop.permute.xlu0 %3841  ;;  %3901 = vperm.xlu1 %7342, %v10996_v37   ;;  %v11024_v37 = vpop.eup %7767 }
 0x68e   : > { %4024 = vperm.xlu0 %7341, %v11002_v63   ;;  %14521 = vst [vmem:[#allocation35_spill] sm:$0xff] %v11024_v37  ;;  %v3371_v63 = vsub.f32 %v14523_v49, %v10558_v9  ;;  %v11030_v20 = vpop.eup %7769  ;;  %7785 = vpow2.f32 %v3512_v7  ;;  %v14528_v49 = vld [vmem:[#allocation55_spill] sm:$0xff] }
 0x68f   : > { %14524 = vst [vmem:[#allocation66_spill] sm:$0xff] %v11030_v20  ;;  %7787 = vpow2.f32 %v3520_v48  ;;  %v3640_v48 = vmul.f32 1.442695, %v3405_v59  ;;  %v14540_v59 = vld [vmem:[#allocation45_spill] sm:$0xff] }
 0x690   : > { %v11012_v11 = vpop.permute.xlu1 %4009  ;;  %v3572_v28 = vmul.f32 1.442695, %v3371_v63  ;;  %v3391_v14 = vsub.f32 %v14540_v59, %v10594_v16 }
 0x691   : > { %14517 = vst [vmem:[#allocation129_spill] sm:$0xff] %v11012_v11  ;;  %v11018_v42 = vpop.permute.xlu0 %3844  ;;  %3991 = vperm.xlu1 %7342, %v11010_v17   ;;  %v11038_v17 = vpop.eup %7771 }
 0x692   : > { %4114 = vperm.xlu0 %7341, %v11016_v30   ;;  %14526 = vst [vmem:[#allocation124_spill] sm:$0xff] %v11038_v17  ;;  %v3401_v30 = vsub.f32 %v14528_v49, %v10630_v5  ;;  %v11044_v19 = vpop.eup %7773  ;;  %7789 = vpow2.f32 %v3572_v28  ;;  %v14533_v49 = vld [vmem:[#allocation107_spill] sm:$0xff] }
 0x693   : > { %14529 = vst [vmem:[#allocation113_spill] sm:$0xff] %v11044_v19  ;;  %7791 = vpow2.f32 %v3580_v8  ;;  %v3552_v8 = vmul.f32 1.442695, %v3361_v62  ;;  %v14545_v62 = vld [vmem:[#allocation73_spill] sm:$0xff] }
 0x694   : > { %v11026_v61 = vpop.permute.xlu1 %4054  ;;  %v3632_v63 = vmul.f32 1.442695, %v3401_v30  ;;  %v3421_v59 = vsub.f32 %v14545_v62, %v10676_v22 }
 0x695   : > { %14522 = vst [vmem:[#allocation111_spill] sm:$0xff] %v11026_v61  ;;  %v11032_v6 = vpop.permute.xlu0 %3847  ;;  %4081 = vperm.xlu1 %7342, %v11024_v37   ;;  %v11052_v37 = vpop.eup %7775 }
 0x696   : > { %3892 = vperm.xlu0 %7341, %v11030_v20   ;;  %14531 = vst [vmem:[#allocation130_spill] sm:$0xff] %v11052_v37  ;;  %v3327_v20 = vsub.f32 %v14533_v49, %v10499_v12  ;;  %v11058_v34 = vpop.eup %7777  ;;  %7793 = vpow2.f32 %v3632_v63  ;;  %v14538_v49 = vld [vmem:[#allocation27_spill] sm:$0xff] }
 0x697   : > { %14534 = vst [vmem:[#allocation38_spill] sm:$0xff] %v11058_v34  ;;  %7795 = vpow2.f32 %v3640_v48  ;;  %v3612_v48 = vmul.f32 1.442695, %v3391_v14  ;;  %v14551_v14 = vld [vmem:[#allocation48_spill] sm:$0xff] }
 0x698   : > { %v11040_v21 = vpop.permute.xlu1 %3922  ;;  %v3484_v30 = vmul.f32 1.442695, %v3327_v20  ;;  %v3392_v62 = vsub.f32 %v14551_v14, %v10594_v16 }
 0x699   : > { %14527 = vst [vmem:[#allocation102_spill] sm:$0xff] %v11040_v21  ;;  %v11046_v51 = vpop.permute.xlu0 %3850  ;;  %4171 = vperm.xlu1 %7342, %v11038_v17   ;;  %v11066_v17 = vpop.eup %7779 }
 0x69a   : > { %3982 = vperm.xlu0 %7341, %v11044_v19   ;;  %14536 = vst [vmem:[#allocation99_spill] sm:$0xff] %v11066_v17  ;;  %v3357_v19 = vsub.f32 %v14538_v49, %v10532_v39  ;;  %7797 = vpow2.f32 %v3484_v30  ;;  %v14543_v49 = vld [vmem:[#allocation41_spill] sm:$0xff] }
 0x69b   : > { %7799 = vpow2.f32 %v3552_v8  ;;  %v3672_v8 = vmul.f32 1.442695, %v3421_v59  ;;  %v14556_v59 = vld [vmem:[#allocation75_spill] sm:$0xff] }
 0x69c   : > { %v11054_v7 = vpop.permute.xlu1 %4012  ;;  %v3544_v20 = vmul.f32 1.442695, %v3357_v19  ;;  %v3422_v14 = vsub.f32 %v14556_v59, %v10676_v22 }
 0x69d   : > { %14532 = vst [vmem:[#allocation9_spill] sm:$0xff] %v11054_v7  ;;  %v11060_v21 = vpop.permute.xlu0 %3853  ;;  %3949 = vperm.xlu1 %7342, %v11052_v37   ;;  %v11072_v7 = vpop.eup %7781 }
 0x69e   : > { %4072 = vperm.xlu0 %7341, %v11058_v34   ;;  %14539 = vst [vmem:[#allocation127_spill] sm:$0xff] %v11072_v7  ;;  %v11080_v37 = vpop.eup %7783  ;;  %v3387_v34 = vsub.f32 %v14543_v49, %v10594_v16  ;;  %7801 = vpow2.f32 %v3544_v20  ;;  %v14548_v49 = vld [vmem:[#allocation71_spill] sm:$0xff] }
 0x69f   : > { %14541 = vst [vmem:[#allocation118_spill] sm:$0xff] %v11080_v37  ;;  %7803 = vpow2.f32 %v3612_v48  ;;  %v3614_v48 = vmul.f32 1.442695, %v3392_v62  ;;  %v14562_v62 = vld [vmem:[#allocation64_spill] sm:$0xff] }
 0x6a0   : > { %v11068_v28 = vpop.permute.xlu1 %4099  ;;  %v3604_v19 = vmul.f32 1.442695, %v3387_v34  ;;  %v3408_v59 = vsub.f32 %v14562_v62, %v10630_v5 }
 0x6a1   : > { %14537 = vst [vmem:[#allocation68_spill] sm:$0xff] %v11068_v28  ;;  %v11074_v61 = vpop.permute.xlu0 %3859  ;;  %4039 = vperm.xlu1 %7342, %v11066_v17   ;;  %v11086_v28 = vpop.eup %7785 }
 0x6a2   : > { %4162 = vperm.xlu0 %7341, %v11072_v7   ;;  %14544 = vst [vmem:[#allocation15_spill] sm:$0xff] %v11086_v28  ;;  %v11094_v17 = vpop.eup %7787  ;;  %v3417_v7 = vsub.f32 %v14548_v49, %v10676_v22  ;;  %7805 = vpow2.f32 %v3604_v19  ;;  %v14554_v49 = vld [vmem:[#allocation6_spill] sm:$0xff] }
 0x6a3   : > { %14546 = vst [vmem:[#allocation100_spill] sm:$0xff] %v11094_v17  ;;  %7807 = vpow2.f32 %v3672_v8  ;;  %v3674_v8 = vmul.f32 1.442695, %v3422_v14  ;;  %v14568_v14 = vld [vmem:[#allocation63_spill] sm:$0xff] }
 0x6a4   : > { %v11082_v63 = vpop.permute.xlu1 %3880  ;;  %v3664_v34 = vmul.f32 1.442695, %v3417_v7  ;;  %v3409_v62 = vsub.f32 %v14568_v14, %v10630_v5 }
 0x6a5   : > { %14542 = vst [vmem:[#allocation34_spill] sm:$0xff] %v11082_v63  ;;  %v11088_v11 = vpop.permute.xlu0 %3865  ;;  %4129 = vperm.xlu1 %7342, %v11080_v37   ;;  %v11100_v63 = vpop.eup %7789 }
 0x6a6   : > { %3940 = vperm.xlu0 %7341, %v11086_v28   ;;  %14549 = vst [vmem:[#allocation128_spill] sm:$0xff] %v11100_v63  ;;  %v11108_v37 = vpop.eup %7791  ;;  %v3343_v28 = vsub.f32 %v14554_v49, %v10518_v33  ;;  %7809 = vpow2.f32 %v3664_v34  ;;  %v14559_v33 = vld [vmem:[#allocation18_spill] sm:$0xff] }
 0x6a7   : > { %14552 = vst [vmem:[#allocation36_spill] sm:$0xff] %v11108_v37  ;;  %v3373_v49 = vsub.f32 %v14559_v33, %v10558_v9  ;;  %7811 = vpow2.f32 %v3614_v48  ;;  %v14565_v33 = vld [vmem:[#allocation57_spill] sm:$0xff]  ;;  %v3646_v48 = vmul.f32 1.442695, %v3408_v59  ;;  %v14573_v59 = vld [vmem:[#allocation76_spill] sm:$0xff] }
 0x6a8   : > { %v11096_v30 = vpop.permute.xlu1 %3970  ;;  %v3516_v7 = vmul.f32 1.442695, %v3343_v28  ;;  %v3425_v14 = vsub.f32 %v14573_v59, %v10676_v22 }
 0x6a9   : > { %14547 = vst [vmem:[#allocation54_spill] sm:$0xff] %v11096_v30  ;;  %v11102_v31 = vpop.permute.xlu0 %3871  ;;  %3952 = vperm.xlu1 %7342, %v11094_v17   ;;  %v11114_v30 = vpop.eup %7793  ;;  %v3576_v28 = vmul.f32 1.442695, %v3373_v49 }
 0x6aa   : > { %14550 = vst [vmem:[#allocation104_spill] sm:$0xff] %v11102_v31  ;;  %4030 = vperm.xlu0 %7341, %v11100_v63   ;;  %14555 = vst [vmem:[#allocation49_spill] sm:$0xff] %v11114_v30  ;;  %v11122_v17 = vpop.eup %7795  ;;  %7813 = vpow2.f32 %v3516_v7 }
 0x6ab   : > { %14557 = vst [vmem:[#allocation40_spill] sm:$0xff] %v11122_v17  ;;  %v11128_v63 = vpop.eup %7797  ;;  %7815 = vpow2.f32 %v3674_v8  ;;  %v3648_v8 = vmul.f32 1.442695, %v3409_v62 }
 0x6ac   : > { %v11110_v20 = vpop.permute.xlu1 %4060  ;;  %14560 = vst [vmem:[#allocation70_spill] sm:$0xff] %v11128_v63  ;;  %7817 = vpow2.f32 %v3576_v28 }
 0x6ad   : > { %14553 = vst [vmem:[#allocation26_spill] sm:$0xff] %v11110_v20  ;;  %v11116_v31 = vpop.permute.xlu0 %3910  ;;  %4042 = vperm.xlu1 %7342, %v11108_v37   ;;  %v11136_v37 = vpop.eup %7799  ;;  %7819 = vpow2.f32 %v3646_v48  ;;  %v3680_v48 = vmul.f32 1.442695, %v3425_v14 }
 0x6ae   : > { %4120 = vperm.xlu0 %7341, %v11114_v30   ;;  %14563 = vst [vmem:[#allocation120_spill] sm:$0xff] %v11136_v37  ;;  %v3403_v30 = vsub.f32 %v14565_v33, %v10630_v5  ;;  %v14571_v33 = vld [vmem:[#allocation109_spill] sm:$0xff] }
 0x6b0   : > { %v11124_v19 = vpop.permute.xlu1 %4147  ;;  %v3636_v49 = vmul.f32 1.442695, %v3403_v30 }
 0x6b1   : > { %14558 = vst [vmem:[#allocation116_spill] sm:$0xff] %v11124_v19  ;;  %v11130_v20 = vpop.permute.xlu0 %3955  ;;  %4132 = vperm.xlu1 %7342, %v11122_v17   ;;  %v11142_v19 = vpop.eup %7801 }
 0x6b2   : > { %14561 = vst [vmem:[#allocation13_spill] sm:$0xff] %v11130_v20  ;;  %3898 = vperm.xlu0 %7341, %v11128_v63   ;;  %14566 = vst [vmem:[#allocation17_spill] sm:$0xff] %v11142_v19  ;;  %v11150_v17 = vpop.eup %7803  ;;  %v3329_v63 = vsub.f32 %v14571_v33, %v10499_v12  ;;  %7821 = vpow2.f32 %v3636_v49  ;;  %v14576_v12 = vld [vmem:[#allocation29_spill] sm:$0xff] }
 0x6b3   : > { %14569 = vst [vmem:[#allocation56_spill] sm:$0xff] %v11150_v17  ;;  %v3359_v33 = vsub.f32 %v14576_v12, %v10532_v39  ;;  %7823 = vpow2.f32 %v3648_v8 }
 0x6b4   : > { %v11138_v34 = vpop.permute.xlu1 %3883  ;;  %v3488_v30 = vmul.f32 1.442695, %v3329_v63  ;;  %v14580_v63 = vld [vmem:[#allocation43_spill] sm:$0xff] }
 0x6b5   : > { %14564 = vst [vmem:[#allocation52_spill] sm:$0xff] %v11138_v34  ;;  %v11144_v20 = vpop.permute.xlu0 %3916  ;;  %4000 = vperm.xlu1 %7342, %v11136_v37   ;;  %v11156_v34 = vpop.eup %7805  ;;  %v3548_v49 = vmul.f32 1.442695, %v3359_v33 }
 0x6b6   : > { %14567 = vst [vmem:[#allocation65_spill] sm:$0xff] %v11144_v20  ;;  %3988 = vperm.xlu0 %7341, %v11142_v19   ;;  %14572 = vst [vmem:[#allocation106_spill] sm:$0xff] %v11156_v34  ;;  %v11164_v37 = vpop.eup %7807  ;;  %7825 = vpow2.f32 %v3488_v30  ;;  %v14584_v30 = vld [vmem:[#allocation72_spill] sm:$0xff] }
 0x6b7   : > { %14574 = vst [vmem:[#allocation12_spill] sm:$0xff] %v11164_v37  ;;  %v11170_v19 = vpop.eup %7809  ;;  %7827 = vpow2.f32 %v3680_v48  ;;  %v3419_v33 = vsub.f32 %v14584_v30, %v10676_v22 }
 0x6b8   : > { %v11152_v7 = vpop.permute.xlu1 %3973  ;;  %14577 = vst [vmem:[#allocation51_spill] sm:$0xff] %v11170_v19  ;;  %v11176_v62 = vpop.eup %7811  ;;  %7829 = vpow2.f32 %v3548_v49  ;;  %v14588_v49 = vld [vmem:[#allocation32_spill] sm:$0xff] }
 0x6b9   : > { %14570 = vst [vmem:[#allocation117_spill] sm:$0xff] %v11152_v7  ;;  %v11158_v20 = vpop.permute.xlu0 %4003  ;;  %4090 = vperm.xlu1 %7342, %v11150_v17   ;;  %14578 = vst [vmem:[#allocation42_spill] sm:$0xff] %v11176_v62  ;;  %v3389_v17 = vsub.f32 %v14580_v63, %v10594_v16  ;;  %v11182_v12 = vpop.eup %7813 }
 0x6ba   : > { %4078 = vperm.xlu0 %7341, %v11156_v34   ;;  %14581 = vst [vmem:[#allocation145_spill] sm:$0xff] %v11182_v12  ;;  %v11188_v8 = vpop.eup %7815 }
 0x6bb   : > { %14582 = vst [vmem:[#allocation24_spill] sm:$0xff] %v11188_v8 }
 0x6bc   : > { %v11166_v28 = vpop.permute.xlu1 %4063 }
 0x6bd   : > { %14575 = vst [vmem:[#allocation28_spill] sm:$0xff] %v11166_v28  ;;  %v11172_v7 = vpop.permute.xlu0 %3874  ;;  %4180 = vperm.xlu1 %7342, %v11164_v37   ;;  %v3608_v37 = vmul.f32 1.442695, %v3389_v17  ;;  %v3360_v17 = vsub.f32 %v14588_v49, %v10532_v39  ;;  %v14601_v28 = vld [vmem:[#allocation23_spill] sm:$0xff] }
 0x6be   : > { %4168 = vperm.xlu0 %7341, %v11170_v19   ;;  %v11194_v19 = vpop.eup %7817 }
 0x6bf   : > { %14585 = vst [vmem:[#allocation37_spill] sm:$0xff] %v11194_v19  ;;  %7831 = vpow2.f32 %v3608_v37  ;;  %v14592_v37 = vld [vmem:[#allocation46_spill] sm:$0xff] }
 0x6c0   : > { %v11178_v59 = vpop.permute.xlu1 %4153 }
 0x6c1   : > { %14579 = vst [vmem:[#allocation103_spill] sm:$0xff] %v11178_v59  ;;  %v11184_v34 = vpop.permute.xlu0 %3964  ;;  %4093 = vperm.xlu1 %7342, %v11176_v62   ;;  %v11200_v62 = vpop.eup %7819  ;;  %v3550_v59 = vmul.f32 1.442695, %v3360_v17 }
 0x6c2   : > { %3946 = vperm.xlu0 %7341, %v11182_v12   ;;  %14586 = vst [vmem:[#allocation19_spill] sm:$0xff] %v11200_v62  ;;  %v3668_v12 = vmul.f32 1.442695, %v3419_v33  ;;  %v3390_v33 = vsub.f32 %v14592_v37, %v10594_v16 }
 0x6c4   : > { %v11190_v14 = vpop.permute.xlu1 %3931  ;;  %7833 = vpow2.f32 %v3668_v12  ;;  %v14597_v12 = vld [vmem:[#allocation149_spill] sm:$0xff] }
 0x6c5   : > { %14583 = vst [vmem:[#allocation7_spill] sm:$0xff] %v11190_v14  ;;  %v11196_v63 = vpop.permute.xlu0 %4051  ;;  %4183 = vperm.xlu1 %7342, %v11188_v8   ;;  %v11206_v14 = vpop.eup %7821  ;;  %7835 = vpow2.f32 %v3550_v59  ;;  %v3420_v17 = vsub.f32 %v14597_v12, %v10676_v22 }
 0x6c6   : > { %4036 = vperm.xlu0 %7341, %v11194_v19   ;;  %14589 = vst [vmem:[#allocation58_spill] sm:$0xff] %v11206_v14  ;;  %v11212_v8 = vpop.eup %7823 }
 0x6c7   : > { %14590 = vst [vmem:[#allocation119_spill] sm:$0xff] %v11212_v8 }
 0x6c8   : > { %v11202_v48 = vpop.permute.xlu1 %4021 }
 0x6c9   : > { %14587 = vst [vmem:[#allocation67_spill] sm:$0xff] %v11202_v48  ;;  %v11208_v30 = vpop.permute.xlu0 %3877  ;;  %4141 = vperm.xlu1 %7342, %v11200_v62   ;;  %v11218_v48 = vpop.eup %7825 }
 0x6ca   : > { %4126 = vperm.xlu0 %7341, %v11206_v14   ;;  %14593 = vst [vmem:[#allocation14_spill] sm:$0xff] %v11218_v48  ;;  %v11224_v49 = vpop.eup %7827  ;;  %v3610_v14 = vmul.f32 1.442695, %v3390_v33 }
 0x6cb   : > { %14595 = vst [vmem:[#allocation53_spill] sm:$0xff] %v11224_v49 }
 0x6cc   : > { %v11214_v19 = vpop.permute.xlu1 %4111  ;;  %7837 = vpow2.f32 %v3610_v14 }
 0x6cd   : > { %14591 = vst [vmem:[#allocation108_spill] sm:$0xff] %v11214_v19  ;;  %v11220_v39 = vpop.permute.xlu0 %3967  ;;  %4144 = vperm.xlu1 %7342, %v11212_v8   ;;  %v11230_v19 = vpop.eup %7829 }
 0x6ce   : > { %14594 = vst [vmem:[#allocation30_spill] sm:$0xff] %v11220_v39  ;;  %3904 = vperm.xlu0 %7341, %v11218_v48   ;;  %14598 = vst [vmem:[#allocation105_spill] sm:$0xff] %v11230_v19  ;;  %v3670_v48 = vmul.f32 1.442695, %v3420_v17  ;;  %v11240_v59 = vpop.eup %7831 }
 0x6cf   : > { %14602 = vst [vmem:[#allocation122_spill] sm:$0xff] %v11240_v59 }
 0x6d0   : > { %v11226_v62 = vpop.permute.xlu1 %3889  ;;  %7839 = vpow2.f32 %v3670_v48 }
 0x6d1   : > { %14596 = vst [vmem:[#allocation44_spill] sm:$0xff] %v11226_v62  ;;  %v11232_v37 = vpop.permute.xlu0 %4057  ;;  %4192 = vperm.xlu1 %7342, %v11224_v49   ;;  %v3376_v62 = vsub.f32 %v14601_v28, %v10558_v9  ;;  %v14605_v49 = vld [vmem:[#allocation62_spill] sm:$0xff]  ;;  %v11249_v39 = vpop.eup %7833 }
 0x6d2   : > { %14599 = vst [vmem:[#allocation146_spill] sm:$0xff] %v11232_v37  ;;  %3994 = vperm.xlu0 %7341, %v11230_v19   ;;  %v3406_v19 = vsub.f32 %v14605_v49, %v10630_v5  ;;  %14606 = vst [vmem:[#allocation69_spill] sm:$0xff] %v11249_v39 }
 0x6d3   : > { %v3582_v37 = vmul.f32 1.442695, %v3376_v62 }
 0x6d4   : > { %v11236_v8 = vpop.permute.xlu1 %3979  ;;  %v3642_v17 = vmul.f32 1.442695, %v3406_v19 }
 0x6d5   : > { %14600 = vst [vmem:[#allocation25_spill] sm:$0xff] %v11236_v8  ;;  %v11242_v33 = vpop.permute.xlu0 %4102  ;;  %7841 = vpow2.f32 %v3582_v37  ;;  %v14609_v8 = vld [vmem:[#allocation22_spill] sm:$0xff] }
 0x6d6   : > { %14603 = vst [vmem:[#allocation39_spill] sm:$0xff] %v11242_v33  ;;  %4084 = vperm.xlu0 %7341, %v11240_v59   ;;  %v3377_v59 = vsub.f32 %v14609_v8, %v10558_v9  ;;  %v11258_v33 = vpop.eup %7835  ;;  %7843 = vpow2.f32 %v3642_v17  ;;  %v14615_v8 = vld [vmem:[#allocation47_spill] sm:$0xff] }
 0x6d7   : > { %14610 = vst [vmem:[#allocation123_spill] sm:$0xff] %v11258_v33 }
 0x6d8   : > { %v11245_v12 = vpop.permute.xlu1 %4069  ;;  %v3584_v49 = vmul.f32 1.442695, %v3377_v59 }
 0x6d9   : > { %14604 = vst [vmem:[#allocation21_spill] sm:$0xff] %v11245_v12  ;;  %v11251_v14 = vpop.permute.xlu0 %3925  ;;  %v14612_v12 = vld [vmem:[#allocation61_spill] sm:$0xff] }
 0x6da   : > { %14607 = vst [vmem:[#allocation60_spill] sm:$0xff] %v11251_v14  ;;  %4174 = vperm.xlu0 %7341, %v11249_v39   ;;  %v3407_v39 = vsub.f32 %v14612_v12, %v10630_v5  ;;  %v11267_v14 = vpop.eup %7837  ;;  %7845 = vpow2.f32 %v3584_v49  ;;  %v14618_v12 = vld [vmem:[#allocation74_spill] sm:$0xff] }
 0x6db   : > { %14613 = vst [vmem:[#allocation20_spill] sm:$0xff] %v11267_v14 }
 0x6dc   : > { %v11254_v28 = vpop.permute.xlu1 %4159  ;;  %v3644_v19 = vmul.f32 1.442695, %v3407_v39 }
 0x6dd   : > { %14608 = vst [vmem:[#allocation121_spill] sm:$0xff] %v11254_v28  ;;  %v11260_v48 = vpop.permute.xlu0 %4015  ;;  %v11276_v28 = vpop.eup %7839 }
 0x6de   : > { %3997 = vperm.xlu0 %7341, %v11258_v33   ;;  %v3393_v33 = vsub.f32 %v14615_v8, %v10594_v16  ;;  %14616 = vst [vmem:[#allocation59_spill] sm:$0xff] %v11276_v28  ;;  %7847 = vpow2.f32 %v3644_v19  ;;  %v14621_v8 = vld [vmem:[#allocation77_spill] sm:$0xff] }
 0x6e0   : > { %v11263_v62 = vpop.permute.xlu1 %3937  ;;  %v3616_v59 = vmul.f32 1.442695, %v3393_v33 }
 0x6e1   : > { %14611 = vst [vmem:[#allocation16_spill] sm:$0xff] %v11263_v62  ;;  %v11269_v37 = vpop.permute.xlu0 %4105 }
 0x6e2   : > { %4087 = vperm.xlu0 %7341, %v11267_v14   ;;  %v3423_v14 = vsub.f32 %v14618_v12, %v10676_v22  ;;  %v11285_v62 = vpop.eup %7841  ;;  %7849 = vpow2.f32 %v3616_v59 }
 0x6e3   : > { %14619 = vst [vmem:[#allocation31_spill] sm:$0xff] %v11285_v62 }
 0x6e4   : > { %v11272_v9 = vpop.permute.xlu1 %4027  ;;  %v3676_v39 = vmul.f32 1.442695, %v3423_v14 }
 0x6e5   : > { %14614 = vst [vmem:[#allocation55_spill] sm:$0xff] %v11272_v9  ;;  %v11278_v17 = vpop.permute.xlu0 %4150  ;;  %v11294_v9 = vpop.eup %7843 }
 0x6e6   : > { %4177 = vperm.xlu0 %7341, %v11276_v28   ;;  %v3424_v28 = vsub.f32 %v14621_v8, %v10676_v22  ;;  %14622 = vst [vmem:[#allocation45_spill] sm:$0xff] %v11294_v9  ;;  %7851 = vpow2.f32 %v3676_v39 }
 0x6e7   : > { %v11299_v12 = vpop.eup %7845 }
 0x6e8   : > { %v11281_v5 = vpop.permute.xlu1 %4117  ;;  %v3678_v33 = vmul.f32 1.442695, %v3424_v28  ;;  %14623 = vst [vmem:[#allocation41_spill] sm:$0xff] %v11299_v12 }
 0x6e9   : > { %14617 = vst [vmem:[#allocation107_spill] sm:$0xff] %v11281_v5  ;;  %v11287_v49 = vpop.permute.xlu0 %3928 }
 0x6ea   : > { %4045 = vperm.xlu0 %7341, %v11285_v62   ;;  %7853 = vpow2.f32 %v3678_v33 }
 0x6eb   : > { %v11306_v14 = vpop.eup %7847 }
 0x6ec   : > { %v11290_v16 = vpop.permute.xlu1 %3895  ;;  %14625 = vst [vmem:[#allocation71_spill] sm:$0xff] %v11306_v14 }
 0x6ed   : > { %14620 = vst [vmem:[#allocation27_spill] sm:$0xff] %v11290_v16  ;;  %v11296_v19 = vpop.permute.xlu0 %4018 }
 0x6ee   : > { %4135 = vperm.xlu0 %7341, %v11294_v9  }
 0x6ef   : > { %v11313_v8 = vpop.eup %7849 }
 0x6f0   : > { %v11303_v62 = vpop.permute.xlu1 %3985  ;;  %14628 = vst [vmem:[#allocation75_spill] sm:$0xff] %v11313_v8 }
 0x6f1   : > { %v11301_v5 = vpop.permute.xlu0 %4108  ;;  %14624 = vst [vmem:[#allocation73_spill] sm:$0xff] %v11303_v62 }
 0x6f2   : > { %4048 = vperm.xlu0 %7341, %v11299_v12  }
 0x6f3   : > { %v11318_v39 = vpop.eup %7851 }
 0x6f4   : > { %v11311_v59 = vpop.permute.xlu1 %4075  ;;  %14630 = vst [vmem:[#allocation64_spill] sm:$0xff] %v11318_v39 }
 0x6f5   : > { %v11308_v22 = vpop.permute.xlu0 %3886  ;;  %14627 = vst [vmem:[#allocation6_spill] sm:$0xff] %v11311_v59 }
 0x6f6   : > { %14626 = vst [vmem:[#allocation48_spill] sm:$0xff] %v11308_v22  ;;  %4138 = vperm.xlu0 %7341, %v11306_v14  }
 0x6f7   : > { %v11325_v33 = vpop.eup %7853 }
 0x6f8   : > { %v11322_v12 = vpop.permute.xlu1 %4165  ;;  %14633 = vst [vmem:[#allocation109_spill] sm:$0xff] %v11325_v33 }
 0x6f9   : > { %v11315_v28 = vpop.permute.xlu0 %3976  ;;  %14632 = vst [vmem:[#allocation63_spill] sm:$0xff] %v11322_v12 }
 0x6fa   : > { %14629 = vst [vmem:[#allocation18_spill] sm:$0xff] %v11315_v28  ;;  %4096 = vperm.xlu0 %7341, %v11313_v8  }
 0x6fc   : > { %v11330_v14 = vpop.permute.xlu1 %3943 }
 0x6fd   : > { %v11320_v9 = vpop.permute.xlu0 %4066  ;;  %14635 = vst [vmem:[#allocation29_spill] sm:$0xff] %v11330_v14 }
 0x6fe   : > { %14631 = vst [vmem:[#allocation57_spill] sm:$0xff] %v11320_v9  ;;  %4186 = vperm.xlu0 %7341, %v11318_v39  }
 0x700   : > { %v11336_v8 = vpop.permute.xlu1 %4033 }
 0x701   : > { %v11327_v62 = vpop.permute.xlu0 %4156  ;;  %14638 = vst [vmem:[#allocation32_spill] sm:$0xff] %v11336_v8 }
 0x702   : > { %14634 = vst [vmem:[#allocation76_spill] sm:$0xff] %v11327_v62  ;;  %4189 = vperm.xlu0 %7341, %v11325_v33  }
 0x704   : > { %v11340_v9 = vpop.permute.xlu1 %4123 }
 0x705   : > { %v11332_v59 = vpop.permute.xlu0 %3934  ;;  %14640 = vst [vmem:[#allocation149_spill] sm:$0xff] %v11340_v9 }
 0x706   : > { %14636 = vst [vmem:[#allocation43_spill] sm:$0xff] %v11332_v59 }
 0x708   : > { %v11346_v22 = vpop.permute.xlu1 %3901 }
 0x709   : > { %v11334_v16 = vpop.permute.xlu0 %4024  ;;  %14643 = vst [vmem:[#allocation22_spill] sm:$0xff] %v11346_v22 }
 0x70a   : > { %14637 = vst [vmem:[#allocation72_spill] sm:$0xff] %v11334_v16 }
 0x70c   : > { %v11350_v33 = vpop.permute.xlu1 %3991 }
 0x70d   : > { %v11338_v28 = vpop.permute.xlu0 %4114  ;;  %14645 = vst [vmem:[#allocation47_spill] sm:$0xff] %v11350_v33 }
 0x70e   : > { %14639 = vst [vmem:[#allocation46_spill] sm:$0xff] %v11338_v28 }
 0x710   : > { %v11356_v16 = vpop.permute.xlu1 %4081 }
 0x711   : > { %v11342_v12 = vpop.permute.xlu0 %3892  ;;  %14647 = vst [vmem:[#allocation77_spill] sm:$0xff] %v11356_v16 }
 0x712   : > { %14641 = vst [vmem:[#allocation23_spill] sm:$0xff] %v11342_v12 }
 0x714   : > { %v11360_v28 = vpop.permute.xlu1 %4171 }
 0x715   : > { %v11344_v39 = vpop.permute.xlu0 %3982  ;;  %14649 = vst [vmem:[#allocation202_spill] sm:$0xff] %v11360_v28  ;;  %v4206_v28 = vrot.slane %v10906_v1, %v10022_v24 }
 0x716   : > { %14642 = vst [vmem:[#allocation62_spill] sm:$0xff] %v11344_v39 }
 0x718   : > { %v11366_v39 = vpop.permute.xlu1 %3949 }
 0x719   : > { %v11348_v62 = vpop.permute.xlu0 %4072  ;;  %14651 = vst [vmem:[#allocation204_spill] sm:$0xff] %v11366_v39 }
 0x71a   : > { %14644 = vst [vmem:[#allocation61_spill] sm:$0xff] %v11348_v62 }
 0x71c   : > { %v11370_v62 = vpop.permute.xlu1 %4039 }
 0x71d   : > { %v11352_v14 = vpop.permute.xlu0 %4162  ;;  %14653 = vst [vmem:[#allocation206_spill] sm:$0xff] %v11370_v62  ;;  %v4216_v62 = vrot.slane %v10934_v26, %v10029_v41  ;;  %v4236_v26 = vrot.slane %v10990_v40, %v10064_v0  ;;  %v4246_v40 = vrot.slane %v11004_v55, %v10076_v18  ;;  %v4256_v55 = vrot.slane %v11032_v6, %v10106_v23 }
 0x71e   : > { %v4443_v6 = vrot.slane %v10970_v10, %v10022_v24 }
 0x721   : > { %v11354_v59 = vpop.permute.xlu0 %3940 }
 0x722   : > { %14646 = vst [vmem:[#allocation74_spill] sm:$0xff] %v11354_v59  ;;  %v4201_v59 = vrot.slane %v10892_v32, %v10011_v53  ;;  %v4221_v32 = vrot.slane %v10948_v3, %v10057_v35 }
 0x725   : > { %v11358_v8 = vpop.permute.xlu0 %4030 }
 0x726   : > { %14648 = vst [vmem:[#allocation201_spill] sm:$0xff] %v11358_v8  ;;  %v11380_v8 = vpop.permute.xlu1 %4129 }
 0x727   : > { %14656 = vst [vmem:[#allocation209_spill] sm:$0xff] %v11380_v8  ;;  %v4226_v8 = vrot.slane %v10962_v56, %v10052_v25 }
 0x729   : > { %v11362_v9 = vpop.permute.xlu0 %4120 }
 0x72d   : > { %v11364_v12 = vpop.permute.xlu0 %3898 }
 0x72e   : > { %14650 = vst [vmem:[#allocation203_spill] sm:$0xff] %v11364_v12  ;;  %v4197_v12 = vrot.slane %v10878_v36, %v10015_v44 }
 0x731   : > { %v11368_v22 = vpop.permute.xlu0 %3988 }
 0x732   : > { %14652 = vst [vmem:[#allocation205_spill] sm:$0xff] %v11368_v22  ;;  %v4211_v22 = vrot.slane %v10920_v52, %v10025_v13  ;;  %v4231_v52 = vrot.slane %v10976_v46, %v10067_v47  ;;  %v4271_v46 = vrot.slane %v10886_v4, %v10168_v54  ;;  %v4364_v4 = vrot.slane %v10942_v43, %v10022_v24 }
 0x733   : > { %v4285_v43 = vrot.slane %v11088_v11, %v10022_v24  ;;  %v14663_v11 = vld [vmem:[#allocation13_spill] sm:$0xff] }
 0x735   : > { %v11372_v33 = vpop.permute.xlu0 %4078 }
 0x736   : > { %14654 = vst [vmem:[#allocation207_spill] sm:$0xff] %v11372_v33  ;;  %v4202_v33 = vsel %vm2587_vm4, %v4201_v59, %v4197_v12  ;;  %v11402_v12 = vpop.permute.xlu1 %3952 }
 0x737   : > { %v4207_v1 = vsel %vm2594_vm5, %v4206_v28, %v4202_v33  ;;  %v4290_v33 = vrot.slane %v10914_v58, %v10025_v13  ;;  %v4359_v58 = vrot.slane %v11116_v31, %v10011_v53 }
 0x738   : > { %v4212_v36 = vsel %vm13909_vm6, %v4211_v22, %v4207_v1  ;;  %v4241_v22 = vrot.slane %v10872_v57, %v10095_v2  ;;  %v4251_v57 = vrot.slane %v11018_v42, %v10125_v45 }
 0x739   : > { %v11376_v16 = vpop.permute.xlu0 %4168  ;;  %v4217_v39 = vsel %vm2608_vm7, %v4216_v62, %v4212_v36  ;;  %v4261_v36 = vrot.slane %v11046_v51, %v10138_v50 }
 0x73a   : > { %14655 = vst [vmem:[#allocation208_spill] sm:$0xff] %v11376_v16  ;;  %v4222_v3 = vsel %vm2615_vm8, %v4221_v32, %v4217_v39  ;;  %v4280_v39 = vrot.slane %v10900_v38, %v10011_v53  ;;  %v4276_v38 = vrot.slane %v11074_v61, %v10015_v44  ;;  %v11434_v1 = vpop.permute.xlu1 %4042  ;;  %v4517_v61 = vrot.slane %v10984_v29, %v10011_v53 }
 0x73b   : > { %v4227_v28 = vsel %vm14657_vm12, %v4226_v8, %v4222_v3  ;;  %v4355_v8 = vrot.slane %v10928_v27, %v10015_v44  ;;  %v4438_v27 = vrot.slane %v10956_v15, %v10011_v53  ;;  %vm14658_vm12 = vcmask 654912   ;;  %v14660_v15 = vld [vmem:[#allocation94_spill] sm:$0xff]  ;;  %v14661_v3 = vld [vmem:[#allocation129_spill] sm:$0xff] }
 0x73c   : > { %v4232_v56 = vsel %vm2629_vm10, %v4231_v52, %v4227_v28  ;;  %v4266_v52 = vrot.slane %v11060_v21, %v10128_v60  ;;  %v4522_v51 = vrot.slane %v14661_v3, %v10022_v24  ;;  %v14664_v21 = vld [vmem:[#allocation65_spill] sm:$0xff]  ;;  %v4513_v3 = vrot.slane %v11158_v20, %v10015_v44 }
 0x73d   : > { %v11391_v16 = vpop.permute.xlu0 %3946  ;;  %v4237_v62 = vsel %vm13910_vm11, %v4236_v26, %v4232_v56  ;;  %v4374_v26 = vrot.slane %v14660_v15, %v10029_v41  ;;  %v4434_v56 = vrot.slane %v14663_v11, %v10015_v44  ;;  %v14666_v11 = vld [vmem:[#allocation111_spill] sm:$0xff]  ;;  %v4448_v20 = vrot.slane %v11184_v34, %v10025_v13 }
 0x73e   : > { %v4242_v42 = vsel %vm14658_vm12, %v4241_v22, %v4237_v62  ;;  %vm14662_vm12 = vcmask 786112   ;;  %v4281_v22 = vsel %vm2587_vm4, %v4280_v39, %v4276_v38  ;;  %v4360_v62 = vsel %vm2587_vm4, %v4359_v58, %v4355_v8  ;;  %v14667_v39 = vld [vmem:[#allocation102_spill] sm:$0xff] }
 0x73f   : > { %v4247_v31 = vsel %vm14659_vm13, %v4246_v40, %v4242_v42  ;;  %v4369_v40 = vrot.slane %v14664_v21, %v10025_v13  ;;  %v4286_v15 = vsel %vm2594_vm5, %v4285_v43, %v4281_v22  ;;  %v4379_v38 = vrot.slane %v14667_v39, %v10057_v35  ;;  %v14672_v39 = vld [vmem:[#allocation34_spill] sm:$0xff] }
 0x740   : > { %v4252_v28 = vsel %vm14662_vm12, %v4251_v57, %v4247_v31  ;;  %v14665_v57 = vld [vmem:[#allocation104_spill] sm:$0xff]  ;;  %v4300_v58 = vrot.slane %v11172_v7, %v10057_v35  ;;  %v4439_v43 = vsel %vm2587_vm4, %v4438_v27, %v4434_v56  ;;  %v4291_v21 = vsel %vm13909_vm6, %v4290_v33, %v4286_v15 }
 0x741   : > { %v11405_v59 = vpop.permute.xlu0 %4036  ;;  %v4257_v29 = vsel %vm2664_vm15, %v4256_v55, %v4252_v28  ;;  %v4295_v31 = vrot.slane %v14665_v57, %v10029_v41  ;;  %v4596_v55 = vrot.slane %v14666_v11, %v10011_v53  ;;  %v4365_v28 = vsel %vm2594_vm5, %v4364_v4, %v4360_v62  ;;  %v14669_v4 = vld [vmem:[#allocation9_spill] sm:$0xff] }
 0x742   : > { %v4262_v42 = vsel %vm2671_vm0, %v4261_v36, %v4257_v29  ;;  %v11477_v36 = vpop.permute.xlu1 %4132  ;;  %v4305_v29 = vrot.slane %v11208_v30, %v10052_v25  ;;  %v4592_v7 = vrot.slane %v11196_v63, %v10015_v44  ;;  %v4527_v56 = vrot.slane %v14669_v4, %v10025_v13  ;;  %v14670_v30 = vld [vmem:[#allocation146_spill] sm:$0xff] }
 0x743   : > { %v4267_v8 = vsel %vm2678_vm1, %v4266_v52, %v4262_v42  ;;  %v4370_v52 = vsel %vm13909_vm6, %v4369_v40, %v4365_v28  ;;  %v14668_v42 = vld [vmem:[#allocation30_spill] sm:$0xff]  ;;  %v4296_v34 = vsel %vm2608_vm7, %v4295_v31, %v4291_v21  ;;  %v4518_v62 = vsel %vm2587_vm4, %v4517_v61, %v4513_v3  ;;  %v14671_v40 = vld [vmem:[#allocation68_spill] sm:$0xff] }
 0x744   : > { %v4453_v27 = vrot.slane %v14668_v42, %v10029_v41  ;;  %v4601_v57 = vrot.slane %v14670_v30, %v10022_v24  ;;  %v11500_v33 = vsel %vm2685_vm2, %v4271_v46, %v4267_v8  ;;  %v4671_v15 = vrot.slane %v14671_v40, %v10015_v44  ;;  %v14674_v46 = vld [vmem:[#allocation54_spill] sm:$0xff]  ;;  %v14678_v40 = vld [vmem:[#allocation117_spill] sm:$0xff] }
 0x745   : > { %v11424_v32 = vpop.permute.xlu0 %4126  ;;  %v4301_v63 = vsel %vm2615_vm8, %v4300_v58, %v4296_v34  ;;  %v4444_v11 = vsel %vm2594_vm5, %v4443_v6, %v4439_v43  ;;  %v4310_v28 = vrot.slane %v14672_v39, %v10067_v47  ;;  %v4375_v31 = vsel %vm2608_vm7, %v4374_v26, %v4370_v52  ;;  %v14675_v4 = vld [vmem:[#allocation26_spill] sm:$0xff]  ;;  %v14681_v39 = vld [vmem:[#allocation7_spill] sm:$0xff] }
 0x746   : > { %v4449_v61 = vsel %vm13909_vm6, %v4448_v20, %v4444_v11  ;;  %vm14673_vm13 = vcmask 458112   ;;  %v4458_v8 = vrot.slane %v14674_v46, %v10057_v35  ;;  %v4523_v42 = vsel %vm2594_vm5, %v4522_v51, %v4518_v62  ;;  %v11518_v43 = vpop.permute.xlu1 %4000  ;;  %v14676_v20 = vld [vmem:[#allocation116_spill] sm:$0xff] }
 0x747   : > { %v4306_v3 = vsel %vm14673_vm13, %v4305_v29, %v4301_v63  ;;  %v4597_v58 = vsel %vm2587_vm4, %v4596_v55, %v4592_v7  ;;  %v4454_v6 = vsel %vm2608_vm7, %v4453_v27, %v4449_v61  ;;  %v4606_v26 = vrot.slane %v14675_v4, %v10025_v13  ;;  %v14677_v29 = vld [vmem:[#allocation52_spill] sm:$0xff]  ;;  %v14680_v63 = vld [vmem:[#allocation103_spill] sm:$0xff]  ;;  %vm14687_vm12 = vmmov %vm14673_vm13 }
 0x748   : > { %v4750_v52 = vrot.slane %v14676_v20, %v10015_v44  ;;  %v4315_v34 = vrot.slane %v14677_v29, %v10064_v0  ;;  %v4602_v30 = vsel %vm2594_vm5, %v4601_v57, %v4597_v58  ;;  %v4463_v51 = vrot.slane %v14678_v40, %v10052_v25  ;;  %v14679_v55 = vld [vmem:[#allocation28_spill] sm:$0xff]  ;;  %v14682_v4 = vld [vmem:[#allocation67_spill] sm:$0xff]  ;;  %vm14690_vm13 = vmmov %vm14687_vm12 }
 0x749   : > { %v11457_v10 = vpop.permute.xlu0 %3904  ;;  %v4611_v7 = vrot.slane %v14679_v55, %v10029_v41  ;;  %v4311_v27 = vsel %vm2629_vm10, %v4310_v28, %v4306_v3  ;;  %v4380_v62 = vsel %vm2615_vm8, %v4379_v38, %v4375_v31  ;;  %v4759_v11 = vrot.slane %v14680_v63, %v10022_v24  ;;  %v14683_v28 = vld [vmem:[#allocation39_spill] sm:$0xff]  ;;  %v14684_v31 = vld [vmem:[#allocation60_spill] sm:$0xff] }
 0x74a   : > { %v4394_v61 = vrot.slane %v14681_v39, %v10064_v0  ;;  %v4459_v46 = vsel %vm2615_vm8, %v4458_v8, %v4454_v6  ;;  %v4528_v57 = vsel %vm13909_vm6, %v4527_v56, %v4523_v42  ;;  %v4542_v20 = vrot.slane %v14682_v4, %v10052_v25  ;;  %v14685_v40 = vld [vmem:[#allocation108_spill] sm:$0xff]  ;;  %v11562_v4 = vpop.permute.xlu1 %4090 }
 0x74b   : > { %v4607_v29 = vsel %vm13909_vm6, %v4606_v26, %v4602_v30  ;;  %v4675_v38 = vrot.slane %v14683_v28, %v10011_v53  ;;  %v4384_v3 = vrot.slane %v14684_v31, %v10052_v25  ;;  %v4690_v55 = vrot.slane %v14685_v40, %v10029_v41  ;;  %v14686_v6 = vld [vmem:[#allocation44_spill] sm:$0xff]  ;;  %v14691_v40 = vld [vmem:[#allocation121_spill] sm:$0xff] }
 0x74c   : > { %v4754_v8 = vrot.slane %v11278_v17, %v10011_v53  ;;  %v4389_v56 = vrot.slane %v11287_v49, %v10067_v47  ;;  %v4316_v42 = vsel %vm13910_vm11, %v4315_v34, %v4311_v27  ;;  %v4325_v26 = vrot.slane %v14686_v6, %v10076_v18  ;;  %v14688_v17 = vld [vmem:[#allocation25_spill] sm:$0xff] }
 0x74d   : > { %v11485_v22 = vpop.permute.xlu0 %3994  ;;  %v4532_v30 = vrot.slane %v11260_v48, %v10029_v41  ;;  %v4680_v63 = vrot.slane %v11269_v37, %v10022_v24  ;;  %v4464_v39 = vsel %vm14687_vm12, %v4463_v51, %v4459_v46  ;;  %v4473_v28 = vrot.slane %v14688_v17, %v10064_v0  ;;  %v14689_v37 = vld [vmem:[#allocation21_spill] sm:$0xff] }
 0x74e   : > { %v4537_v49 = vrot.slane %v11296_v19, %v10057_v35  ;;  %v4685_v34 = vrot.slane %v11301_v5, %v10025_v13  ;;  %v4612_v27 = vsel %vm2608_vm7, %v4611_v7, %v4607_v29  ;;  %v4676_v48 = vsel %vm2587_vm4, %v4675_v38, %v4671_v15  ;;  %v14692_v5 = vld [vmem:[#allocation48_spill] sm:$0xff]  ;;  %v14693_v7 = vld [vmem:[#allocation18_spill] sm:$0xff] }
 0x74f   : > { %v4621_v51 = vrot.slane %v14689_v37, %v10052_v25  ;;  %v4385_v46 = vsel %vm14690_vm13, %v4384_v3, %v4380_v62  ;;  %v4769_v6 = vrot.slane %v14691_v40, %v10029_v41  ;;  %v4755_v17 = vsel %vm2587_vm4, %v4754_v8, %v4750_v52  ;;  %v14694_v38 = vld [vmem:[#allocation16_spill] sm:$0xff]  ;;  %v14695_v3 = vld [vmem:[#allocation55_spill] sm:$0xff] }
 0x750   : > { %v4390_v19 = vsel %vm2629_vm10, %v4389_v56, %v4385_v46  ;;  %v4320_v24 = vrot.slane %v14692_v5, %v10095_v2  ;;  %v4468_v29 = vrot.slane %v14693_v7, %v10067_v47  ;;  %v4533_v15 = vsel %vm2608_vm7, %v4532_v30, %v4528_v57  ;;  %v14696_v56 = vld [vmem:[#allocation57_spill] sm:$0xff]  ;;  %v14697_v5 = vld [vmem:[#allocation76_spill] sm:$0xff]  ;;  %v14698_v57 = vld [vmem:[#allocation107_spill] sm:$0xff] }
 0x751   : > { %v11511_v21 = vpop.permute.xlu0 %4084  ;;  %v4404_v37 = vrot.slane %v14694_v38, %v10076_v18  ;;  %v4681_v62 = vsel %vm2594_vm5, %v4680_v63, %v4676_v48  ;;  %v4552_v40 = vrot.slane %v14695_v3, %v10064_v0  ;;  %v4538_v52 = vsel %vm2615_vm8, %v4537_v49, %v4533_v15  ;;  %v14699_v63 = vld [vmem:[#allocation27_spill] sm:$0xff]  ;;  %v11605_v15 = vpop.permute.xlu1 %4180 }
 0x752   : > { %v4686_v8 = vsel %vm13909_vm6, %v4685_v34, %v4681_v62  ;;  %v4616_v46 = vrot.slane %v14696_v56, %v10057_v35  ;;  %v4764_v7 = vrot.slane %v14697_v5, %v10025_v13  ;;  %v4700_v30 = vrot.slane %v14698_v57, %v10052_v25  ;;  %v14701_v3 = vld [vmem:[#allocation43_spill] sm:$0xff]  ;;  %v14702_v5 = vld [vmem:[#allocation72_spill] sm:$0xff]  ;;  %v14703_v57 = vld [vmem:[#allocation73_spill] sm:$0xff] }
 0x753   : > { %v4335_v48 = vrot.slane %v14699_v63, %v10106_v23  ;;  %v4760_v38 = vsel %vm2594_vm5, %v4759_v11, %v4755_v17  ;;  %v4395_v49 = vsel %vm13910_vm11, %v4394_v61, %v4390_v19  ;;  %vm14700_vm12 = vcmask 654912   ;;  %v14704_v63 = vld [vmem:[#allocation6_spill] sm:$0xff] }
 0x754   : > { %v4321_v34 = vsel %vm14700_vm12, %v4320_v24, %v4316_v42  ;;  %v4469_v62 = vsel %vm2629_vm10, %v4468_v29, %v4464_v39  ;;  %v4399_v56 = vrot.slane %v14701_v3, %v10095_v2  ;;  %v4547_v13 = vrot.slane %v14702_v5, %v10067_v47  ;;  %v14705_v39 = vld [vmem:[#allocation46_spill] sm:$0xff]  ;;  %v14706_v29 = vld [vmem:[#allocation23_spill] sm:$0xff] }
 0x755   : > { %v11539_v58 = vpop.permute.xlu0 %4174  ;;  %v4483_v44 = vrot.slane %v14703_v57, %v10076_v18  ;;  %v4631_v11 = vrot.slane %v14704_v63, %v10064_v0  ;;  %v4543_v61 = vsel %vm14690_vm13, %v4542_v20, %v4538_v52  ;;  %v4691_v17 = vsel %vm2608_vm7, %v4690_v55, %v4686_v8  ;;  %v14707_v57 = vld [vmem:[#allocation63_spill] sm:$0xff]  ;;  %v14708_v63 = vld [vmem:[#allocation29_spill] sm:$0xff] }
 0x756   : > { %v4617_v24 = vsel %vm2615_vm8, %v4616_v46, %v4612_v27  ;;  %v4765_v42 = vsel %vm13909_vm6, %v4764_v7, %v4760_v38  ;;  %v4695_v19 = vrot.slane %v14705_v39, %v10057_v35  ;;  %v4330_v3 = vrot.slane %v14706_v29, %v10125_v45  ;;  %v14711_v46 = vld [vmem:[#allocation62_spill] sm:$0xff]  ;;  %v14712_v38 = vld [vmem:[#allocation61_spill] sm:$0xff]  ;;  %v14713_v29 = vld [vmem:[#allocation32_spill] sm:$0xff] }
 0x757   : > { %v4779_v53 = vrot.slane %v14707_v57, %v10052_v25  ;;  %v4414_v20 = vrot.slane %v14708_v63, %v10106_v23  ;;  %vm14709_vm12 = vcmask 720512   ;;  %v4474_v27 = vsel %vm13910_vm11, %v4473_v28, %v4469_v62  ;;  %v14714_v25 = vld [vmem:[#allocation149_spill] sm:$0xff] }
 0x758   : > { %v4326_v55 = vsel %vm14709_vm12, %v4325_v26, %v4321_v34  ;;  %vm14710_vm13 = vcmask 654912   ;;  %v4548_v8 = vsel %vm2629_vm10, %v4547_v13, %v4543_v61  ;;  %v4478_v7 = vrot.slane %v14711_v46, %v10095_v2  ;;  %v11645_v34 = vpop.permute.xlu1 %4093 }
 0x759   : > { %v11571_v31 = vpop.permute.xlu0 %3997  ;;  %v4400_v52 = vsel %vm14710_vm13, %v4399_v56, %v4395_v49  ;;  %v4626_v39 = vrot.slane %v14712_v38, %v10067_v47  ;;  %v4562_v57 = vrot.slane %v14713_v29, %v10076_v18  ;;  %v4710_v63 = vrot.slane %v14714_v25, %v10064_v0  ;;  %v14717_v56 = vld [vmem:[#allocation74_spill] sm:$0xff]  ;;  %v14722_v29 = vld [vmem:[#allocation77_spill] sm:$0xff] }
 0x75a   : > { %vm14715_vm6 = vcmask 458112   ;;  %v4770_v28 = vsel %vm2608_vm7, %v4769_v6, %v4765_v42  ;;  %v4696_v13 = vsel %vm2615_vm8, %v4695_v19, %v4691_v17  ;;  %vm14716_vm12 = vcmask 786112   ;;  %v14718_v25 = vld [vmem:[#allocation22_spill] sm:$0xff] }
 0x75b   : > { %v4622_v26 = vsel %vm14715_vm6, %v4621_v51, %v4617_v24  ;;  %v4331_v49 = vsel %vm14716_vm12, %v4330_v3, %v4326_v55  ;;  %v4774_v62 = vrot.slane %v11352_v14, %v10057_v35  ;;  %v4409_v61 = vrot.slane %v14717_v56, %v10125_v45  ;;  %v14719_v51 = vld [vmem:[#allocation47_spill] sm:$0xff]  ;;  %v14721_v14 = vld [vmem:[#allocation201_spill] sm:$0xff] }
 0x75c   : > { %v4345_v38 = vrot.slane %v14718_v25, %v10128_v60  ;;  %v4493_v6 = vrot.slane %v14719_v51, %v10106_v23  ;;  %vm14720_vm6 = vcmask 720512   ;;  %v4553_v17 = vsel %vm13910_vm11, %v4552_v40, %v4548_v8  ;;  %v14723_v25 = vld [vmem:[#allocation202_spill] sm:$0xff] }
 0x75d   : > { %v11597_v41 = vpop.permute.xlu0 %4087  ;;  %v4405_v24 = vsel %vm14720_vm6, %v4404_v37, %v4400_v52  ;;  %v4479_v42 = vsel %vm14710_vm13, %v4478_v7, %v4474_v27  ;;  %v4627_v19 = vsel %vm2629_vm10, %v4626_v39, %v4622_v26  ;;  %v4557_v3 = vrot.slane %v14721_v14, %v10095_v2  ;;  %v14725_v27 = vld [vmem:[#allocation204_spill] sm:$0xff]  ;;  %v14727_v39 = vld [vmem:[#allocation203_spill] sm:$0xff]  ;;  %v14728_v14 = vld [vmem:[#allocation206_spill] sm:$0xff] }
 0x75e   : > { %v4705_v55 = vrot.slane %v11362_v9, %v10067_v47  ;;  %v4641_v56 = vrot.slane %v14722_v29, %v10076_v18  ;;  %v4789_v51 = vrot.slane %v14723_v25, %v10064_v0  ;;  %vm14724_vm12 = vcmask 458112   ;;  %v14729_v25 = vld [vmem:[#allocation209_spill] sm:$0xff] }
 0x75f   : > { %v4701_v37 = vsel %vm14724_vm12, %v4700_v30, %v4696_v13  ;;  %v4336_v40 = vsel %vm2664_vm15, %v4335_v48, %v4331_v49  ;;  %v4424_v52 = vrot.slane %v14725_v27, %v10128_v60  ;;  %v4775_v8 = vsel %vm2615_vm8, %v4774_v62, %v4770_v28  ;;  %v11687_v49 = vpop.permute.xlu1 %4183  ;;  %v14733_v27 = vld [vmem:[#allocation207_spill] sm:$0xff] }
 0x760   : > { %vm14726_vm6 = vcmask 786112   ;;  %v4340_v9 = vrot.slane %v14727_v39, %v10138_v50  ;;  %v4572_v29 = vrot.slane %v14728_v14, %v10106_v23  ;;  %v4720_v30 = vrot.slane %v14729_v25, %v10076_v18 }
 0x761   : > { %v11625_v5 = vpop.permute.xlu0 %4177  ;;  %v4410_v7 = vsel %vm14726_vm6, %v4409_v61, %v4405_v24  ;;  %vm14730_vm13 = vcmask 720512   ;;  %v4632_v13 = vsel %vm13910_vm11, %v4631_v11, %v4627_v19  ;;  %vm14731_vm12 = vcmask 654912   ;;  %v14732_v61 = vld [vmem:[#allocation205_spill] sm:$0xff] }
 0x762   : > { %v4484_v48 = vsel %vm14730_vm13, %v4483_v44, %v4479_v42  ;;  %v4558_v28 = vsel %vm14731_vm12, %v4557_v3, %v4553_v17  ;;  %v4706_v62 = vsel %vm2629_vm10, %v4705_v55, %v4701_v37  ;;  %v4488_v24 = vrot.slane %v14732_v61, %v10125_v45  ;;  %v14735_v44 = vld [vmem:[#allocation208_spill] sm:$0xff] }
 0x763   : > { %v4636_v39 = vrot.slane %v14733_v27, %v10095_v2  ;;  %v4429_v14 = vrot.slane %v11402_v12, %v10168_v54  ;;  %vm14734_vm6 = vcmask 458112   ;;  %v4784_v11 = vrot.slane %v14735_v44, %v10067_v47 }
 0x764   : > { %v4780_v25 = vsel %vm14734_vm6, %v4779_v53, %v4775_v8  ;;  %v4415_v42 = vsel %vm2664_vm15, %v4414_v20, %v4410_v7  ;;  %v4577_v17 = vrot.slane %v11434_v1, %v10138_v50  ;;  %v4341_v19 = vsel %vm2671_vm0, %v4340_v9, %v4336_v40 }
 0x765   : > { %v11653_v46 = vpop.permute.xlu0 %4045  ;;  %v4567_v3 = vrot.slane %v11405_v59, %v10125_v45  ;;  %v4715_v55 = vrot.slane %v11424_v32, %v10095_v2  ;;  %v4725_v53 = vrot.slane %v11477_v36, %v10125_v45  ;;  %v4508_v12 = vrot.slane %v11518_v43, %v10168_v54  ;;  %v4142_v43 = vpop.permute.xlu1 %4141 }
 0x766   : > { %v4563_v20 = vsel %vm14730_vm13, %v4562_v57, %v4558_v28  ;;  %v4711_v8 = vsel %vm13910_vm11, %v4710_v63, %v4706_v62  ;;  %vm14736_vm12 = vcmask 786112   ;;  %vm14737_vm6 = vcmask 654912  }
 0x767   : > { %v4489_v1 = vsel %vm14736_vm12, %v4488_v24, %v4484_v48  ;;  %v4637_v40 = vsel %vm14737_vm6, %v4636_v39, %v4632_v13  ;;  %v4419_v59 = vrot.slane %v11391_v16, %v10138_v50  ;;  %v4646_v32 = vrot.slane %v11511_v21, %v10125_v45  ;;  %vm14738_vm13 = vmmov %vm14736_vm12 }
 0x768   : > { %v4656_v36 = vrot.slane %v11562_v4, %v10138_v50  ;;  %v4785_v7 = vsel %vm2629_vm10, %v4784_v11, %v4780_v25  ;;  %v4346_v57 = vsel %vm2678_vm1, %v4345_v38, %v4341_v19  ;;  %v4651_v63 = vrot.slane %v11597_v41, %v10106_v23  ;;  %vm14739_vm12 = vmmov %vm14737_vm6 }
 0x769   : > { %v11679_v26 = vpop.permute.xlu0 %4135  ;;  %v4568_v9 = vsel %vm14738_vm13, %v4567_v3, %v4563_v20  ;;  %v4716_v48 = vsel %vm14739_vm12, %v4715_v55, %v4711_v8  ;;  %v4350_v16 = vrot.slane %v11457_v10, %v10168_v54  ;;  %v4498_v21 = vrot.slane %v11485_v22, %v10138_v50  ;;  %v4145_v25 = vpop.permute.xlu1 %4144 }
 0x76a   : > { %v4804_v4 = vrot.slane %v11605_v15, %v10125_v45  ;;  %v4494_v28 = vsel %vm2664_vm15, %v4493_v6, %v4489_v1  ;;  %vm14740_vm6 = vcmask 720512   ;;  %v4503_v41 = vrot.slane %v11571_v31, %v10128_v60  ;;  %v5057_v45 = vld [vmem:[%s13599_s0 + $0x180] sm:$0xff] }
 0x76b   : > { %v4642_v38 = vsel %vm14740_vm6, %v4641_v56, %v4637_v40  ;;  %v4420_v62 = vsel %vm2671_vm0, %v4419_v59, %v4415_v42  ;;  %v4790_v10 = vsel %vm13910_vm11, %v4789_v51, %v4785_v7  ;;  %v4794_v22 = vrot.slane %v11539_v58, %v10095_v2  ;;  %vm14741_vm12 = vmmov %vm14740_vm6 }
 0x76c   : > { %v4647_v61 = vsel %vm14738_vm13, %v4646_v32, %v4642_v38  ;;  %v4573_v24 = vsel %vm2664_vm15, %v4572_v29, %v4568_v9  ;;  %v4721_v15 = vsel %vm14741_vm12, %v4720_v30, %v4716_v48  ;;  %v4799_v56 = vrot.slane %v11625_v5, %v10076_v18 }
 0x76d   : > { %v4049_v37 = vpop.permute.xlu0 %4048  ;;  %v4652_v6 = vsel %vm2664_vm15, %v4651_v63, %v4647_v61  ;;  %v4351_v31 = vsel %vm2685_vm2, %v4350_v16, %v4346_v57  ;;  %v4499_v27 = vsel %vm2671_vm0, %v4498_v21, %v4494_v28  ;;  %v4582_v39 = vrot.slane %v11653_v46, %v10128_v60  ;;  %v4193_v7 = vpop.permute.xlu1 %4192 }
 0x76e   : > { %v4730_v51 = vrot.slane %v11679_v26, %v10106_v23  ;;  %v4425_v29 = vsel %vm2678_vm1, %v4424_v52, %v4420_v62  ;;  %v4504_v30 = vsel %vm2678_vm1, %v4503_v41, %v4499_v27  ;;  %v4587_v44 = vrot.slane %v4049_v37, %v10168_v54  ;;  %v14749_v27 = vld [vmem:[#allocation4_spill] sm:$0xff] }
 0x76f   : > { %v4661_v11 = vrot.slane %v11645_v34, %v10128_v60  ;;  %vm14742_vm6 = vcmask 654912   ;;  %v4657_v46 = vsel %vm2671_vm0, %v4656_v36, %v4652_v6  ;;  %vm14743_vm13 = vcmask 1041409  }
 0x770   : > { %v4795_v42 = vsel %vm14742_vm6, %v4794_v22, %v4790_v10  ;;  %v4826_v26 = vsel %vm14743_vm13, %v4351_v31, %v11500_v33  ;;  %v4578_v3 = vsel %vm2671_vm0, %v4577_v17, %v4573_v24  ;;  %vm14744_vm11 = vcmask 786112  }
 0x771   : > { %v4139_v13 = vpop.permute.xlu0 %4138  ;;  %v4800_v52 = vsel %vm14741_vm12, %v4799_v56, %v4795_v42  ;;  %v4726_v55 = vsel %vm14744_vm11, %v4725_v53, %v4721_v15  ;;  %v4430_v37 = vsel %vm2685_vm2, %v4429_v14, %v4425_v29  ;;  %v4509_v20 = vsel %vm2685_vm2, %v4508_v12, %v4504_v30  ;;  %v14748_v56 = vld [vmem:[#allocation5_spill] sm:$0xff] }
 0x772   : > { %v4735_v5 = vrot.slane %v4139_v13, %v10138_v50  ;;  %v4583_v34 = vsel %vm2678_vm1, %v4582_v39, %v4578_v3  ;;  %v4731_v8 = vsel %vm2664_vm15, %v4730_v51, %v4726_v55  ;;  %v4740_v40 = vrot.slane %v4142_v43, %v10128_v60 }
 0x773   : > { %v4588_v59 = vsel %vm2685_vm2, %v4587_v44, %v4583_v34  ;;  %v4662_v32 = vsel %vm2678_vm1, %v4661_v11, %v4657_v46  ;;  %vm14745_vm6 = vcmask 1042434   ;;  %v4805_v53 = vsel %vm14744_vm11, %v4804_v4, %v4800_v52  ;;  %v14753_v44 = vld [vmem:[#allocation131_spill] sm:$0xff]  ;;  %v14757_v46 = vld [vmem:[#allocation142_spill] sm:$0xff]  ;;  %v14762_v34 = vld [vmem:[#allocation173_spill] sm:$0xff] }
 0x774   : > { %v4736_v33 = vsel %vm2671_vm0, %v4735_v5, %v4731_v8  ;;  %v4827_v17 = vsel %vm14745_vm6, %v4430_v37, %v4826_v26  ;;  %v4809_v36 = vrot.slane %v11687_v49, %v10106_v23  ;;  %v4745_v48 = vrot.slane %v4145_v25, %v10168_v54  ;;  %v14752_v25 = vld [vmem:[#allocation137_spill] sm:$0xff]  ;;  %v14761_v37 = vld [vmem:[#allocation171_spill] sm:$0xff] }
 0x775   : > { %v4097_v58 = vpop.permute.xlu0 %4096  ;;  %v4828_v43 = vsel %vm3244_vm9, %v4509_v20, %v4827_v17  ;;  %v4741_v63 = vsel %vm2678_vm1, %v4740_v40, %v4736_v33  ;;  %v4824_v4 = vrot.slane %v4193_v7, %v10168_v54  ;;  %vm14746_vm13 = vcmask 1046534   ;;  %v14758_v26 = vld [vmem:[#allocation141_spill] sm:$0xff]  ;;  %v14770_v7 = vld [vmem:[#allocation140_spill] sm:$0xff]  ;;  %v14872_v23 = vld [vmem:[#allocation31_spill] sm:$0xff] }
 0x776   : > { %v4666_v19 = vrot.slane %v4097_v58, %v10168_v54  ;;  %v4829_v9 = vsel %vm3246_vm14, %v4588_v59, %v4828_v43  ;;  %v4810_v16 = vsel %vm2664_vm15, %v4809_v36, %v4805_v53  ;;  %v4746_v28 = vsel %vm2685_vm2, %v4745_v48, %v4741_v63  ;;  %v14751_v58 = vld [vmem:[#allocation177_spill] sm:$0xff]  ;;  %v14768_v53 = vld [vmem:[#allocation132_spill] sm:$0xff] }
 0x777   : > { %vm14747_vm12 = vcmask 1047559   ;;  %v14750_v39 = vsub.s32 3, %v14749_v27  ;;  %v14755_v11 = vsub.s32 5, %v14749_v27  ;;  %v14759_v3 = vsub.s32 4, %v14749_v27 }
 0x778   : > { %v4667_v14 = vsel %vm2685_vm2, %v4666_v19, %v4662_v32  ;;  %v14765_v59 = vsub.s32 6, %v14749_v27  ;;  %v14767_v32 = vld [vmem:[#allocation169_spill] sm:$0xff]  ;;  %vm5905_vm6 = vcmask 130048   ;;  %vm14909_vm11 = vcmask 261312  }
 0x779   : > { %v4187_v1 = vpop.permute.xlu0 %4186  ;;  %v4830_v13 = vsel %vm3248_vm3, %v4667_v14, %v4829_v9  ;;  %v14772_v9 = vld [vmem:[#allocation153_spill] sm:$0xff] }
 0x77a   : > { %v4814_v12 = vrot.slane %v4187_v1, %v10138_v50  ;;  %v4831_v62 = vsel %vm14746_vm13, %v4746_v28, %v4830_v13  ;;  %v14763_v1 = vld [vmem:[#allocation133_spill] sm:$0xff]  ;;  %v14774_v13 = vld [vmem:[#allocation79_spill] sm:$0xff]  ;;  %vm14911_vm13 = vmmov %vm14909_vm11 }
 0x77c   : > { %v4815_v49 = vsel %vm2671_vm0, %v4814_v12, %v4810_v16  ;;  %v14769_v12 = vld [vmem:[#allocation78_spill] sm:$0xff]  ;;  %v14773_v16 = vsub.s32 7, %v14749_v27  ;;  %v14781_v27 = vld [vmem:[#allocation148_spill] sm:$0xff] }
 0x77d   : > { %v4190_v57 = vpop.permute.xlu0 %4189 }
 0x77e   : > { %v4819_v21 = vrot.slane %v4190_v57, %v10128_v60  ;;  %v14771_v57 = vld [vmem:[#allocation178_spill] sm:$0xff] }
 0x780   : > { %v4820_v38 = vsel %vm2678_vm1, %v4819_v21, %v4815_v49  ;;  %v14775_v49 = vld [vmem:[#allocation134_spill] sm:$0xff] }
 0x781   : > { %v4825_v41 = vsel %vm2685_vm2, %v4824_v4, %v4820_v38  ;;  %v14776_v38 = vld [vmem:[#allocation83_spill] sm:$0xff] }
 0x782   : > { %v4832_v61 = vsel %vm14747_vm12, %v4825_v41, %v4831_v62  ;;  %v14777_v62 = vld [vmem:[#allocation161_spill] sm:$0xff]  ;;  %vm14913_vm12 = vcmask 458112  }
 0x783   : > { %4834 = vadd.xlane.f32.xlu0 %v4832_v61 }
 0x80c   : > { %v4835_v10 = vpop.xlane.xlu0 %4834 }
 0x80d   : > { %7855 = vrcp.f32 %v4835_v10 }
 0x81a   : > { %v7856_v22 = vpop.eup %7855 }
 0x81b   : > { %v4837_v24 = vmul.f32 %v7856_v22, %v4835_v10  ;;  %v14778_v10 = vld [vmem:[#allocation159_spill] sm:$0xff] }
 0x81d   : > { %v4838_v15 = vsub.f32 2.0, %v4837_v24  ;;  %v14779_v24 = vld [vmem:[#allocation156_spill] sm:$0xff] }
 0x81f   : > { %v4839_v6 = vmul.f32 %v7856_v22, %v4838_v15 }
 0x821   : > { %v11797_v31 = vrot.slane %v4839_v6, %v14748_v56  ;;  %v11801_v51 = vrot.slane %v4839_v6, %v14750_v39  ;;  %v11808_v5 = vrot.slane %v4839_v6, %v14753_v44  ;;  %v11812_v42 = vrot.slane %v4839_v6, %v14755_v11  ;;  %v14784_v11 = vld [vmem:[#allocation168_spill] sm:$0xff] }
 0x822   : > { %v11820_v55 = vrot.slane %v4839_v6, %v14759_v3  ;;  %v11827_v40 = vrot.slane %v4839_v6, %v14763_v1  ;;  %v11831_v33 = vrot.slane %v4839_v6, %v14765_v59  ;;  %v11847_v21 = vrot.slane %v4839_v6, %v14773_v16  ;;  %v14780_v6 = vld [vmem:[#allocation154_spill] sm:$0xff]  ;;  %v14789_v59 = vld [vmem:[#allocation136_spill] sm:$0xff] }
 0x823   : > { %v4929_v29 = vmul.f32 %v14751_v58, %v11801_v51  ;;  %v4881_v30 = vmul.f32 %v14752_v25, %v11797_v31  ;;  %14754 = vst [vmem:[#allocation94_spill] sm:$0xff] %v11808_v5  ;;  %14756 = vst [vmem:[#allocation129_spill] sm:$0xff] %v11812_v42  ;;  %v4931_v19 = vmul.f32 %v14757_v46, %v11801_v51  ;;  %v14782_v58 = vld [vmem:[#allocation192_spill] sm:$0xff]  ;;  %v14783_v25 = vld [vmem:[#allocation179_spill] sm:$0xff] }
 0x824   : > { %v4882_v52 = vmul.f32 %v14758_v26, %v11797_v31  ;;  %14760 = vst [vmem:[#allocation13_spill] sm:$0xff] %v11820_v55  ;;  %v4962_v20 = vmul.f32 %v14761_v37, %v11812_v42  ;;  %v4897_v8 = vmul.f32 %v14762_v34, %v11808_v5  ;;  %14764 = vst [vmem:[#allocation65_spill] sm:$0xff] %v11827_v40  ;;  %v14787_v37 = vld [vmem:[#allocation138_spill] sm:$0xff] }
 0x825   : > { %5379 = vperm.xlu0 %7341, %v4929_v29   ;;  %5139 = vperm.xlu1 %7342, %v4881_v30   ;;  %14766 = vst [vmem:[#allocation104_spill] sm:$0xff] %v11831_v33  ;;  %v4947_v17 = vmul.f32 %v14767_v32, %v11820_v55  ;;  %v4898_v14 = vmul.f32 %v14768_v53, %v11808_v5  ;;  %v14788_v34 = vld [vmem:[#allocation158_spill] sm:$0xff] }
 0x826   : > { %v4978_v36 = vmul.f32 %v14769_v12, %v11831_v33  ;;  %v4913_v43 = vmul.f32 %v14770_v7, %v11827_v40  ;;  %v4901_v63 = vmul.f32 %v14771_v57, %v11808_v5  ;;  %v4914_v48 = vmul.f32 %v14772_v9, %v11827_v40 }
 0x827   : > { %v4963_v4 = vmul.f32 %v14774_v13, %v11812_v42  ;;  %v4883_v28 = vmul.f32 %v14775_v49, %v11797_v31  ;;  %v4994_v41 = vmul.f32 %v14776_v38, %v11847_v21  ;;  %v4899_v61 = vmul.f32 %v14777_v62, %v11808_v5  ;;  %v14796_v13 = vld [vmem:[#allocation147_spill] sm:$0xff]  ;;  %v14798_v38 = vld [vmem:[#allocation166_spill] sm:$0xff] }
 0x828   : > { %v4948_v22 = vmul.f32 %v14778_v10, %v11820_v55  ;;  %v4930_v15 = vmul.f32 %v14779_v24, %v11801_v51  ;;  %v4886_v56 = vmul.f32 %v14780_v6, %v11797_v31  ;;  %v4915_v39 = vmul.f32 %v14781_v27, %v11827_v40  ;;  %v14797_v49 = vld [vmem:[#allocation143_spill] sm:$0xff]  ;;  %v14800_v10 = vld [vmem:[#allocation97_spill] sm:$0xff]  ;;  %v14801_v24 = vld [vmem:[#allocation164_spill] sm:$0xff] }
 0x829   : > { %5389 = vperm.xlu0 %7341, %v4931_v19   ;;  %5144 = vperm.xlu1 %7342, %v4882_v52   ;;  %v4933_v29 = vmul.f32 %v14782_v58, %v11801_v51  ;;  %v4945_v30 = vmul.f32 %v14783_v25, %v11820_v55  ;;  %v4995_v46 = vmul.f32 %v14784_v11, %v11847_v21  ;;  %v14785_v19 = vld [vmem:[#allocation172_spill] sm:$0xff]  ;;  %v14786_v52 = vld [vmem:[#allocation81_spill] sm:$0xff]  ;;  %v14799_v62 = vld [vmem:[#allocation183_spill] sm:$0xff] }
 0x82a   : > { %v4946_v26 = vmul.f32 %v14785_v19, %v11820_v55  ;;  %v4949_v3 = vmul.f32 %v14786_v52, %v11820_v55  ;;  %v4900_v32 = vmul.f32 %v14789_v59, %v11808_v5  ;;  %v14802_v6 = vld [vmem:[#allocation167_spill] sm:$0xff]  ;;  %v14803_v27 = vld [vmem:[#allocation157_spill] sm:$0xff]  ;;  %v14805_v25 = vld [vmem:[#allocation82_spill] sm:$0xff] }
 0x82b   : > { %v14804_v58 = vld [vmem:[#allocation151_spill] sm:$0xff]  ;;  %v14806_v11 = vld [vmem:[#allocation89_spill] sm:$0xff]  ;;  %v14811_v59 = vld [vmem:[#allocation174_spill] sm:$0xff] }
 0x82c   : > { %v14807_v19 = vld [vmem:[#allocation165_spill] sm:$0xff]  ;;  %v14808_v52 = vld [vmem:[#allocation127_spill] sm:$0xff] }
 0x82d   : > { %5544 = vperm.xlu0 %7341, %v4962_v20   ;;  %5219 = vperm.xlu1 %7342, %v4897_v8   ;;  %v4884_v20 = vmul.f32 %v14787_v37, %v11797_v31  ;;  %v4887_v8 = vmul.f32 %v14788_v34, %v11797_v31  ;;  %v14809_v37 = vld [vmem:[#allocation152_spill] sm:$0xff]  ;;  %v14810_v34 = vld [vmem:[#allocation101_spill] sm:$0xff] }
 0x831   : > { %5469 = vperm.xlu0 %7341, %v4947_v17   ;;  %5224 = vperm.xlu1 %7342, %v4898_v14   ;;  %v14790_v17 = vld [vmem:[#allocation175_spill] sm:$0xff] }
 0x832   : > { %v4934_v53 = vmul.f32 %v14790_v17, %v11801_v51  ;;  %v14791_v14 = vld [vmem:[#allocation155_spill] sm:$0xff] }
 0x833   : > { %v4961_v12 = vmul.f32 %v14791_v14, %v11812_v42  ;;  %v14812_v17 = vld [vmem:[#allocation135_spill] sm:$0xff]  ;;  %v14813_v14 = vld [vmem:[#allocation86_spill] sm:$0xff] }
 0x835   : > { %5624 = vperm.xlu0 %7341, %v4978_v36   ;;  %5299 = vperm.xlu1 %7342, %v4913_v43   ;;  %v14792_v36 = vld [vmem:[#allocation91_spill] sm:$0xff] }
 0x836   : > { %v4996_v7 = vmul.f32 %v14792_v36, %v11847_v21  ;;  %v14793_v43 = vld [vmem:[#allocation163_spill] sm:$0xff]  ;;  %v14814_v36 = vld [vmem:[#allocation93_spill] sm:$0xff] }
 0x837   : > { %v4916_v57 = vmul.f32 %v14793_v43, %v11827_v40  ;;  %v14815_v43 = vld [vmem:[#allocation170_spill] sm:$0xff] }
 0x839   : > { %5239 = vperm.xlu0 %7341, %v4901_v63   ;;  %5304 = vperm.xlu1 %7342, %v4914_v48   ;;  %v14794_v63 = vld [vmem:[#allocation85_spill] sm:$0xff]  ;;  %v14795_v48 = vld [vmem:[#allocation162_spill] sm:$0xff] }
 0x83a   : > { %v4950_v9 = vmul.f32 %v14794_v63, %v11820_v55  ;;  %v4977_v16 = vmul.f32 %v14795_v48, %v11831_v33  ;;  %v14816_v63 = vld [vmem:[#allocation11_spill] sm:$0xff]  ;;  %v14817_v48 = vld [vmem:[#allocation184_spill] sm:$0xff] }
 0x83d   : > { %5549 = vperm.xlu0 %7341, %v4963_v4   ;;  %5149 = vperm.xlu1 %7342, %v4883_v28   ;;  %v4888_v4 = vmul.f32 %v14796_v13, %v11797_v31  ;;  %v4885_v28 = vmul.f32 %v14797_v49, %v11797_v31  ;;  %v14818_v13 = vld [vmem:[#allocation112_spill] sm:$0xff] }
 0x83e   : > { %v14819_v49 = vld [vmem:[#allocation80_spill] sm:$0xff] }
 0x841   : > { %5704 = vperm.xlu0 %7341, %v4994_v41   ;;  %5229 = vperm.xlu1 %7342, %v4899_v61   ;;  %v4935_v41 = vmul.f32 %v14798_v38, %v11801_v51  ;;  %v4932_v61 = vmul.f32 %v14799_v62, %v11801_v51  ;;  %v14820_v38 = vld [vmem:[#allocation160_spill] sm:$0xff] }
 0x842   : > { %v14821_v62 = vld [vmem:[#allocation188_spill] sm:$0xff] }
 0x845   : > { %5474 = vperm.xlu0 %7341, %v4948_v22   ;;  %5384 = vperm.xlu1 %7342, %v4930_v15   ;;  %v4997_v22 = vmul.f32 %v14800_v10, %v11847_v21  ;;  %v4993_v15 = vmul.f32 %v14801_v24, %v11847_v21  ;;  %v14822_v10 = vld [vmem:[#allocation113_spill] sm:$0xff]  ;;  %v14823_v24 = vld [vmem:[#allocation176_spill] sm:$0xff] }
 0x849   : > { %5164 = vperm.xlu0 %7341, %v4886_v56   ;;  %5309 = vperm.xlu1 %7342, %v4915_v39   ;;  %v4951_v56 = vmul.f32 %v14802_v6, %v11820_v55  ;;  %v4917_v39 = vmul.f32 %v14803_v27, %v11827_v40  ;;  %v14824_v6 = vld [vmem:[#allocation51_spill] sm:$0xff] }
 0x84d   : > { %5399 = vperm.xlu0 %7341, %v4933_v29   ;;  %5459 = vperm.xlu1 %7342, %v4945_v30   ;;  %v4889_v29 = vmul.f32 %v14804_v58, %v11797_v31  ;;  %v4979_v30 = vmul.f32 %v14805_v25, %v11831_v33  ;;  %v14825_v58 = vld [vmem:[#allocation90_spill] sm:$0xff]  ;;  %v14826_v25 = vld [vmem:[#allocation128_spill] sm:$0xff] }
 0x851   : > { %5709 = vperm.xlu0 %7341, %v4995_v46   ;;  %5464 = vperm.xlu1 %7342, %v4946_v26   ;;  %v4936_v46 = vmul.f32 %v14806_v11, %v11801_v51  ;;  %v4902_v26 = vmul.f32 %v14807_v19, %v11808_v5  ;;  %v14827_v19 = vld [vmem:[#allocation84_spill] sm:$0xff] }
 0x855   : > { %5479 = vperm.xlu0 %7341, %v4949_v3   ;;  %5154 = vperm.xlu1 %7342, %v4884_v20   ;;  %v4998_v3 = vmul.f32 %v14808_v52, %v11847_v21  ;;  %v4964_v20 = vmul.f32 %v14809_v37, %v11812_v42  ;;  %v14828_v52 = vld [vmem:[#allocation144_spill] sm:$0xff] }
 0x859   : > { %5169 = vperm.xlu0 %7341, %v4887_v8   ;;  %5234 = vperm.xlu1 %7342, %v4900_v32   ;;  %v4952_v8 = vmul.f32 %v14810_v34, %v11820_v55  ;;  %v4918_v32 = vmul.f32 %v14811_v59, %v11827_v40  ;;  %v14830_v34 = vld [vmem:[#allocation98_spill] sm:$0xff]  ;;  %v14831_v59 = vld [vmem:[#allocation8_spill] sm:$0xff] }
 0x85d   : > { %5404 = vperm.xlu0 %7341, %v4934_v53   ;;  %5539 = vperm.xlu1 %7342, %v4961_v12   ;;  %v4890_v53 = vmul.f32 %v14812_v17, %v11797_v31  ;;  %v4980_v12 = vmul.f32 %v14813_v14, %v11831_v33  ;;  %v14832_v14 = vld [vmem:[#allocation180_spill] sm:$0xff] }
 0x861   : > { %5714 = vperm.xlu0 %7341, %v4996_v7   ;;  %5314 = vperm.xlu1 %7342, %v4916_v57   ;;  %v4937_v7 = vmul.f32 %v14814_v36, %v11801_v51  ;;  %v4903_v57 = vmul.f32 %v14815_v43, %v11808_v5  ;;  %v14833_v36 = vld [vmem:[#allocation124_spill] sm:$0xff] }
 0x865   : > { %5484 = vperm.xlu0 %7341, %v4950_v9   ;;  %5619 = vperm.xlu1 %7342, %v4977_v16   ;;  %v4999_v9 = vmul.f32 %v14816_v63, %v11847_v21  ;;  %v4965_v16 = vmul.f32 %v14817_v48, %v11812_v42  ;;  %v14834_v63 = vld [vmem:[#allocation95_spill] sm:$0xff] }
 0x866   : > { %v14835_v48 = vld [vmem:[#allocation115_spill] sm:$0xff] }
 0x869   : > { %5174 = vperm.xlu0 %7341, %v4888_v4   ;;  %5159 = vperm.xlu1 %7342, %v4885_v28   ;;  %v4953_v4 = vmul.f32 %v14818_v13, %v11820_v55  ;;  %v4919_v28 = vmul.f32 %v14819_v49, %v11827_v40  ;;  %v14838_v49 = vld [vmem:[#allocation189_spill] sm:$0xff] }
 0x86d   : > { %5409 = vperm.xlu0 %7341, %v4935_v41   ;;  %5394 = vperm.xlu1 %7342, %v4932_v61   ;;  %v4891_v41 = vmul.f32 %v14820_v38, %v11797_v31  ;;  %v4981_v61 = vmul.f32 %v14821_v62, %v11831_v33  ;;  %v14839_v38 = vld [vmem:[#allocation150_spill] sm:$0xff] }
 0x871   : > { %5719 = vperm.xlu0 %7341, %v4997_v22   ;;  %5699 = vperm.xlu1 %7342, %v4993_v15   ;;  %v4938_v22 = vmul.f32 %v14822_v10, %v11801_v51  ;;  %v4904_v15 = vmul.f32 %v14823_v24, %v11808_v5  ;;  %v14841_v10 = vld [vmem:[#allocation125_spill] sm:$0xff] }
 0x872   : > { %v14842_v24 = vld [vmem:[#allocation17_spill] sm:$0xff] }
 0x875   : > { %5489 = vperm.xlu0 %7341, %v4951_v56   ;;  %5319 = vperm.xlu1 %7342, %v4917_v39   ;;  %v5000_v56 = vmul.f32 %v14824_v6, %v11847_v21 }
 0x879   : > { %5179 = vperm.xlu0 %7341, %v4889_v29   ;;  %5629 = vperm.xlu1 %7342, %v4979_v30   ;;  %v4966_v29 = vmul.f32 %v14825_v58, %v11812_v42  ;;  %v4954_v30 = vmul.f32 %v14826_v25, %v11820_v55  ;;  %v14844_v58 = vld [vmem:[#allocation88_spill] sm:$0xff]  ;;  %v14845_v25 = vld [vmem:[#allocation69_spill] sm:$0xff] }
 0x87d   : > { %5414 = vperm.xlu0 %7341, %v4936_v46   ;;  %5244 = vperm.xlu1 %7342, %v4902_v26   ;;  %v4920_v26 = vmul.f32 %v14827_v19, %v11827_v40 }
 0x881   : > { %5724 = vperm.xlu0 %7341, %v4998_v3   ;;  %5554 = vperm.xlu1 %7342, %v4964_v20   ;;  %v4892_v3 = vmul.f32 %v14828_v52, %v11797_v31  ;;  %v14846_v52 = vld [vmem:[#allocation38_spill] sm:$0xff] }
 0x885   : > { %5494 = vperm.xlu0 %7341, %v4952_v8   ;;  %5324 = vperm.xlu1 %7342, %v4918_v32   ;;  %v4982_v8 = vmul.f32 %v14830_v34, %v11831_v33  ;;  %v4939_v32 = vmul.f32 %v14831_v59, %v11801_v51  ;;  %v14847_v34 = vld [vmem:[#allocation37_spill] sm:$0xff] }
 0x889   : > { %5184 = vperm.xlu0 %7341, %v4890_v53   ;;  %5634 = vperm.xlu1 %7342, %v4980_v12   ;;  %v4905_v12 = vmul.f32 %v14832_v14, %v11808_v5  ;;  %v14849_v14 = vld [vmem:[#allocation92_spill] sm:$0xff] }
 0x88d   : > { %5419 = vperm.xlu0 %7341, %v4937_v7   ;;  %5249 = vperm.xlu1 %7342, %v4903_v57   ;;  %v5001_v7 = vmul.f32 %v14833_v36, %v11847_v21  ;;  %v14850_v36 = vld [vmem:[#allocation191_spill] sm:$0xff] }
 0x891   : > { %5729 = vperm.xlu0 %7341, %v4999_v9   ;;  %5559 = vperm.xlu1 %7342, %v4965_v16   ;;  %v4967_v9 = vmul.f32 %v14834_v63, %v11812_v42  ;;  %v4955_v16 = vmul.f32 %v14835_v48, %v11820_v55  ;;  %v14851_v48 = vld [vmem:[#allocation49_spill] sm:$0xff] }
 0x895   : > { %5499 = vperm.xlu0 %7341, %v4953_v4   ;;  %5329 = vperm.xlu1 %7342, %v4919_v28   ;;  %v4921_v28 = vmul.f32 %v14838_v49, %v11827_v40  ;;  %v14852_v49 = vld [vmem:[#allocation96_spill] sm:$0xff] }
 0x899   : > { %5189 = vperm.xlu0 %7341, %v4891_v41   ;;  %5639 = vperm.xlu1 %7342, %v4981_v61   ;;  %v4893_v41 = vmul.f32 %v14839_v38, %v11797_v31  ;;  %v14853_v38 = vld [vmem:[#allocation87_spill] sm:$0xff] }
 0x89d   : > { %5424 = vperm.xlu0 %7341, %v4938_v22   ;;  %5254 = vperm.xlu1 %7342, %v4904_v15   ;;  %v4983_v22 = vmul.f32 %v14841_v10, %v11831_v33  ;;  %v4940_v15 = vmul.f32 %v14842_v24, %v11801_v51 }
 0x8a0   : > { %v11951_v27 = vpop.permute.xlu0 %5379  ;;  %v11953_v39 = vpop.permute.xlu1 %5139 }
 0x8a1   : > { %5734 = vperm.xlu0 %7341, %v5000_v56   ;;  %5564 = vperm.xlu1 %7342, %v4966_v29   ;;  %v4906_v29 = vmul.f32 %v14844_v58, %v11808_v5 }
 0x8a4   : > { %v11959_v11 = vpop.permute.xlu0 %5389  ;;  %v11961_v46 = vpop.permute.xlu1 %5144 }
 0x8a5   : > { %5504 = vperm.xlu0 %7341, %v4954_v30   ;;  %5334 = vperm.xlu1 %7342, %v4920_v26   ;;  %v5002_v30 = vmul.f32 %v14845_v25, %v11847_v21 }
 0x8a8   : > { %v11967_v37 = vpop.permute.xlu0 %5544  ;;  %v11969_v20 = vpop.permute.xlu1 %5219 }
 0x8a9   : > { %14829 = vst [vmem:[#allocation111_spill] sm:$0xff] %v11967_v37  ;;  %5194 = vperm.xlu0 %7341, %v4892_v3   ;;  %5644 = vperm.xlu1 %7342, %v4982_v8   ;;  %v4968_v3 = vmul.f32 %v14846_v52, %v11812_v42  ;;  %v4956_v8 = vmul.f32 %v14847_v34, %v11820_v55 }
 0x8ac   : > { %v11975_v17 = vpop.permute.xlu0 %5469  ;;  %v11977_v53 = vpop.permute.xlu1 %5224 }
 0x8ad   : > { %5429 = vperm.xlu0 %7341, %v4939_v32   ;;  %5259 = vperm.xlu1 %7342, %v4905_v12   ;;  %v4922_v12 = vmul.f32 %v14849_v14, %v11827_v40 }
 0x8b0   : > { %v11983_v43 = vpop.permute.xlu0 %5624  ;;  %v11985_v57 = vpop.permute.xlu1 %5299 }
 0x8b1   : > { %5739 = vperm.xlu0 %7341, %v5001_v7   ;;  %5569 = vperm.xlu1 %7342, %v4967_v9   ;;  %v4894_v7 = vmul.f32 %v14850_v36, %v11797_v31 }
 0x8b4   : > { %v11991_v13 = vpop.permute.xlu0 %5239  ;;  %v11993_v4 = vpop.permute.xlu1 %5304 }
 0x8b5   : > { %14836 = vst [vmem:[#allocation102_spill] sm:$0xff] %v11991_v13  ;;  %14837 = vst [vmem:[#allocation30_spill] sm:$0xff] %v11993_v4  ;;  %5509 = vperm.xlu0 %7341, %v4955_v16   ;;  %5339 = vperm.xlu1 %7342, %v4921_v28   ;;  %v4984_v16 = vmul.f32 %v14851_v48, %v11831_v33  ;;  %v4941_v28 = vmul.f32 %v14852_v49, %v11801_v51 }
 0x8b8   : > { %v11999_v62 = vpop.permute.xlu0 %5549  ;;  %v12001_v61 = vpop.permute.xlu1 %5149 }
 0x8b9   : > { %14840 = vst [vmem:[#allocation9_spill] sm:$0xff] %v11999_v62  ;;  %5199 = vperm.xlu0 %7341, %v4893_v41   ;;  %5649 = vperm.xlu1 %7342, %v4983_v22   ;;  %v4907_v41 = vmul.f32 %v14853_v38, %v11808_v5  ;;  %v5074_v22 = vld [vmem:[%s13599_s0 + $0x208] sm:$0xff]  ;;  %v14862_v38 = vld [vmem:[#allocation12_spill] sm:$0xff] }
 0x8ba   : > { %v5075_v62 = vld [vmem:[%s13599_s0 + $0x210] sm:$0xff] }
 0x8bc   : > { %v12007_v6 = vpop.permute.xlu0 %5704  ;;  %v12009_v56 = vpop.permute.xlu1 %5229 }
 0x8bd   : > { %14843 = vst [vmem:[#allocation146_spill] sm:$0xff] %v12009_v56  ;;  %5434 = vperm.xlu0 %7341, %v4940_v15   ;;  %5264 = vperm.xlu1 %7342, %v4906_v29   ;;  %v14854_v15 = vld [vmem:[#allocation59_spill] sm:$0xff]  ;;  %v14855_v29 = vld [vmem:[#allocation114_spill] sm:$0xff] }
 0x8be   : > { %v5003_v58 = vmul.f32 %v14854_v15, %v11847_v21  ;;  %v4969_v25 = vmul.f32 %v14855_v29, %v11812_v42  ;;  %v12077_v15 = vmul.f32 %v14862_v38, %v11847_v21  ;;  %v14863_v29 = vld [vmem:[#allocation106_spill] sm:$0xff] }
 0x8bf   : > { %v14867_v38 = vld [vmem:[#allocation58_spill] sm:$0xff] }
 0x8c0   : > { %v12015_v19 = vpop.permute.xlu0 %5474  ;;  %v12017_v26 = vpop.permute.xlu1 %5384  ;;  %v12098_v54 = vmul.f32 %v14867_v38, %v11831_v33 }
 0x8c1   : > { %5744 = vperm.xlu0 %7341, %v5002_v30   ;;  %5574 = vperm.xlu1 %7342, %v4968_v3   ;;  %v14856_v30 = vld [vmem:[#allocation99_spill] sm:$0xff]  ;;  %v14857_v3 = vld [vmem:[#allocation110_spill] sm:$0xff] }
 0x8c2   : > { %v4957_v52 = vmul.f32 %v14856_v30, %v11820_v55  ;;  %v4923_v34 = vmul.f32 %v14857_v3, %v11827_v40  ;;  %v12081_v30 = vmul.f32 %v14863_v29, %v11812_v42  ;;  %v14864_v3 = vld [vmem:[#allocation36_spill] sm:$0xff]  ;;  %v14868_v29 = vld [vmem:[#allocation123_spill] sm:$0xff] }
 0x8c3   : > { %v12102_v60 = vmul.f32 %v14868_v29, %v11801_v51  ;;  %v12122_v29 = vmul.f32 %v14872_v23, %v11820_v55  ;;  %v14876_v23 = vld [vmem:[#allocation118_spill] sm:$0xff] }
 0x8c4   : > { %v12023_v59 = vpop.permute.xlu0 %5164  ;;  %v12025_v32 = vpop.permute.xlu1 %5309 }
 0x8c5   : > { %14848 = vst [vmem:[#allocation68_spill] sm:$0xff] %v12025_v32  ;;  %5514 = vperm.xlu0 %7341, %v4956_v8   ;;  %5344 = vperm.xlu1 %7342, %v4922_v12   ;;  %v14858_v8 = vld [vmem:[#allocation195_spill] sm:$0xff]  ;;  %v14859_v12 = vld [vmem:[#allocation10_spill] sm:$0xff] }
 0x8c6   : > { %v12058_v14 = vmul.f32 %v14858_v8, %v11797_v31  ;;  %v12062_v36 = vmul.f32 %v14859_v12, %v11831_v33  ;;  %v12085_v8 = vmul.f32 %v14864_v3, %v11820_v55  ;;  %v14865_v12 = vld [vmem:[#allocation15_spill] sm:$0xff]  ;;  %v12141_v55 = vmul.f32 %v14876_v23, %v11831_v33  ;;  %v14884_v23 = vld [vmem:[#allocation122_spill] sm:$0xff] }
 0x8c8   : > { %v12031_v63 = vpop.permute.xlu0 %5399  ;;  %v12033_v9 = vpop.permute.xlu1 %5459  ;;  %14877 = vst [vmem:[#allocation54_spill] sm:$0xff] %v12141_v55  ;;  %v12160_v55 = vmul.f32 %v14884_v23, %v11812_v42  ;;  %v5825_v23 = vmul.f32 %v11951_v27, %v5057_v45  ;;  %v5843_v45 = vmul.f32 %v11975_v17, %v5075_v62  ;;  %v5076_v62 = vld [vmem:[%s13599_s0 + $0x218] sm:$0xff] }
 0x8c9   : > { %5204 = vperm.xlu0 %7341, %v4894_v7   ;;  %5654 = vperm.xlu1 %7342, %v4984_v16   ;;  %v14860_v7 = vld [vmem:[#allocation105_spill] sm:$0xff]  ;;  %v14861_v16 = vld [vmem:[#allocation66_spill] sm:$0xff] }
 0x8ca   : > { %v12066_v48 = vmul.f32 %v14860_v7, %v11801_v51  ;;  %v12070_v49 = vmul.f32 %v14861_v16, %v11808_v5  ;;  %v12089_v7 = vmul.f32 %v14865_v12, %v11827_v40  ;;  %v14869_v12 = vld [vmem:[#allocation126_spill] sm:$0xff]  ;;  %14885 = vst [vmem:[#allocation117_spill] sm:$0xff] %v12160_v55  ;;  %v5059_v55 = vld [vmem:[%s13599_s0 + $0x190] sm:$0xff] }
 0x8cb   : > { %v12110_v44 = vmul.f32 %v14869_v12, %v11808_v5  ;;  %v5010_v12 = vld [vmem:[%s13599_s0 + $0x8] sm:$0xff] }
 0x8cc   : > { %v12041_v10 = vpop.permute.xlu0 %5709  ;;  %v12046_v24 = vpop.permute.xlu1 %5464 }
 0x8cd   : > { %5439 = vperm.xlu0 %7341, %v4941_v28   ;;  %v5073_v28 = vld [vmem:[%s13599_s0 + $0x200] sm:$0xff]  ;;  %5269 = vperm.xlu1 %7342, %v4907_v41   ;;  %v5842_v16 = vmul.f32 %v12046_v24, %v5074_v22  ;;  %v14866_v41 = vld [vmem:[#allocation139_spill] sm:$0xff]  ;;  %v14870_v22 = vld [vmem:[#allocation24_spill] sm:$0xff] }
 0x8ce   : > { %v12094_v1 = vmul.f32 %v14866_v41, %v11797_v31  ;;  %v12114_v31 = vmul.f32 %v14870_v22, %v11847_v21  ;;  %v14871_v41 = vld [vmem:[#allocation35_spill] sm:$0xff]  ;;  %v5841_v18 = vmul.f32 %v12033_v9, %v5073_v28  ;;  %v14873_v22 = vld [vmem:[#allocation33_spill] sm:$0xff]  ;;  %v14878_v28 = vld [vmem:[#allocation64_spill] sm:$0xff] }
 0x8cf   : > { %v12118_v38 = vmul.f32 %v14871_v41, %v11812_v42  ;;  %v12133_v2 = vmul.f32 %v14873_v22, %v11827_v40  ;;  %v14874_v41 = vld [vmem:[#allocation120_spill] sm:$0xff]  ;;  %v14880_v22 = vld [vmem:[#allocation70_spill] sm:$0xff] }
 0x8d0   : > { %v12104_v3 = vpop.permute.xlu0 %5479  ;;  %v12106_v50 = vpop.permute.xlu1 %5154  ;;  %v12137_v32 = vmul.f32 %v14874_v41, %v11801_v51  ;;  %v12152_v56 = vmul.f32 %v14880_v22, %v11808_v5  ;;  %v14882_v51 = vld [vmem:[#allocation19_spill] sm:$0xff]  ;;  %v14888_v22 = vld [vmem:[#allocation145_spill] sm:$0xff] }
 0x8d1   : > { %5749 = vperm.xlu0 %7341, %v5003_v58   ;;  %5579 = vperm.xlu1 %7342, %v4969_v25   ;;  %v12148_v58 = vmul.f32 %v14878_v28, %v11847_v21  ;;  %v12156_v41 = vmul.f32 %v14882_v51, %v11831_v33  ;;  %v5009_v25 = vld [vmem:[%s13599_s0] sm:$0xff]  ;;  %v14886_v28 = vld [vmem:[#allocation109_spill] sm:$0xff] }
 0x8d2   : > { %14875 = vst [vmem:[#allocation34_spill] sm:$0xff] %v12137_v32  ;;  %14881 = vst [vmem:[#allocation116_spill] sm:$0xff] %v12152_v56  ;;  %v6055_v32 = vsel %vm5905_vm6, %v5842_v16, 0.0  ;;  %v12172_v56 = vmul.f32 %v14888_v22, %v11827_v40  ;;  %v14890_v51 = vld [vmem:[#allocation53_spill] sm:$0xff]  ;;  %v5778_v16 = vmul.f32 %v11961_v46, %v5010_v12  ;;  %v6054_v12 = vsel %vm5905_vm6, %v5841_v18, 0.0  ;;  %v14900_v18 = vld [vmem:[#allocation130_spill] sm:$0xff] }
 0x8d3   : > { %14879 = vst [vmem:[#allocation26_spill] sm:$0xff] %v12148_v58  ;;  %14883 = vst [vmem:[#allocation52_spill] sm:$0xff] %v12156_v41  ;;  %v12168_v58 = vmul.f32 %v14886_v28, %v11847_v21  ;;  %v12176_v41 = vmul.f32 %v14890_v51, %v11847_v21  ;;  %v5011_v51 = vld [vmem:[%s13599_s0 + $0x10] sm:$0xff] }
 0x8d4   : > { %14889 = vst [vmem:[#allocation103_spill] sm:$0xff] %v12172_v56  ;;  %v12183_v4 = vpop.permute.xlu0 %5169  ;;  %v12185_v28 = vpop.permute.xlu1 %5234  ;;  %v14895_v56 = vld [vmem:[#allocation50_spill] sm:$0xff] }
 0x8d5   : > { %14887 = vst [vmem:[#allocation28_spill] sm:$0xff] %v12168_v58  ;;  %14891 = vst [vmem:[#allocation7_spill] sm:$0xff] %v12176_v41  ;;  %v14893_v58 = vld [vmem:[#allocation40_spill] sm:$0xff]  ;;  %v12193_v21 = vmul.f32 %v14895_v56, %v11808_v5  ;;  %v14897_v41 = vld [vmem:[#allocation181_spill] sm:$0xff]  ;;  %5519 = vperm.xlu0 %7341, %v4957_v52   ;;  %v6056_v5 = vadd.f32 %v6055_v32, %v6054_v12  ;;  %5349 = vperm.xlu1 %7342, %v4923_v34   ;;  %v6017_v34 = vsel %vm5905_vm6, %v5825_v23, 0.0 }
 0x8d6   : > { %14892 = vst [vmem:[#allocation67_spill] sm:$0xff] %v12185_v28  ;;  %v12189_v22 = vmul.f32 %v14893_v58, %v11831_v33  ;;  %v6748_v13 = vrot.slane %v12046_v24, %v14897_v41  ;;  %v14898_v28 = vld [vmem:[#allocation20_spill] sm:$0xff]  ;;  %v5058_v56 = vld [vmem:[%s13599_s0 + $0x188] sm:$0xff]  ;;  %v12215_v24 = vmul.f32 %v14900_v18, %v11827_v40  ;;  %v14902_v52 = vld [vmem:[#allocation45_spill] sm:$0xff]  ;;  %v5907_v18 = vsel %vm5905_vm6, %v5778_v16, 0.0 }
 0x8d7   : > { %14896 = vst [vmem:[#allocation60_spill] sm:$0xff] %v12193_v21  ;;  %v12204_v58 = vmul.f32 %v14898_v28, %v11812_v42  ;;  %v12219_v28 = vmul.f32 %v14902_v52, %v11831_v33  ;;  %v14904_v42 = vld [vmem:[#allocation182_spill] sm:$0xff]  ;;  %v6432_v21 = vrot.slane %v11961_v46, %v14897_v41  ;;  %v5779_v52 = vmul.f32 %v12001_v61, %v5011_v51  ;;  %v14905_v51 = vld [vmem:[#allocation185_spill] sm:$0xff] }
 0x8d8   : > { %14894 = vst [vmem:[#allocation39_spill] sm:$0xff] %v12189_v22  ;;  %v5777_v22 = vmul.f32 %v11953_v39, %v5009_v25  ;;  %14901 = vst [vmem:[#allocation44_spill] sm:$0xff] %v12215_v24  ;;  %v6665_v25 = vrot.slane %v11951_v27, %v14904_v42  ;;  %v6744_v32 = vrot.slane %v12033_v9, %v14904_v42  ;;  %v12233_v33 = vpop.permute.xlu0 %5404  ;;  %v12235_v27 = vpop.permute.xlu1 %5539  ;;  %v6057_v46 = vsel %vm5905_vm6, %v5843_v45, 0.0  ;;  %v5077_v45 = vld [vmem:[%s13599_s0 + $0x220] sm:$0xff] }
 0x8d9   : > { %14899 = vst [vmem:[#allocation108_spill] sm:$0xff] %v12204_v58  ;;  %14903 = vst [vmem:[#allocation25_spill] sm:$0xff] %v12219_v28  ;;  %v5827_v58 = vmul.f32 %v11959_v11, %v5059_v55  ;;  %v6428_v12 = vrot.slane %v11953_v39, %v14904_v42  ;;  %v5090_v55 = vld [vmem:[%s13599_s0 + $0x288] sm:$0xff]  ;;  %v5844_v9 = vmul.f32 %v12015_v19, %v5076_v62  ;;  %5209 = vperm.xlu0 %7341, %v12058_v14  }
 0x8da   : > { %v5826_v23 = vmul.f32 %v12017_v26, %v5058_v56  ;;  %v6749_v39 = vsel %vm2587_vm4, %v6748_v13, %v6744_v32  ;;  %v5906_v16 = vsel %vm5905_vm6, %v5777_v22, 0.0  ;;  %v6753_v28 = vrot.slane %v11975_v17, %v14905_v51  ;;  %5659 = vperm.xlu1 %7342, %v12062_v36   ;;  %v5122_v56 = vld [vmem:[%s13599_s0 + $0x388] sm:$0xff] }
 0x8db   : > { %v6058_v24 = vadd.f32 %v6057_v46, %v6056_v5  ;;  %v6020_v62 = vsel %vm5905_vm6, %v5827_v58, 0.0  ;;  %v5908_v13 = vadd.f32 %v5907_v18, %v5906_v16  ;;  %v6433_v14 = vsel %vm2587_vm4, %v6432_v21, %v6428_v12  ;;  %v5026_v17 = vld [vmem:[%s13599_s0 + $0x88] sm:$0xff] }
 0x8dc   : > { %v6437_v22 = vrot.slane %v12001_v61, %v14905_v51  ;;  %v12262_v5 = vmul.f32 %v11967_v37, %v5090_v55  ;;  %v5909_v36 = vsel %vm5905_vm6, %v5779_v52, 0.0  ;;  %v6669_v58 = vrot.slane %v12017_v26, %v14897_v41  ;;  %v5012_v61 = vld [vmem:[%s13599_s0 + $0x18] sm:$0xff]  ;;  %v12274_v32 = vpop.permute.xlu0 %5714  ;;  %v12276_v12 = vpop.permute.xlu1 %5314  ;;  %v14907_v55 = vld [vmem:[#allocation186_spill] sm:$0xff] }
 0x8dd   : > { %v6754_v21 = vsel %vm2594_vm5, %v6753_v28, %v6749_v39  ;;  %14906 = vst [vmem:[#allocation21_spill] sm:$0xff] %v12276_v12  ;;  %v6059_v18 = vsel %vm5905_vm6, %v5844_v9, 0.0  ;;  %v6758_v46 = vrot.slane %v12015_v19, %v14907_v55  ;;  %v6018_v52 = vsel %vm5905_vm6, %v5826_v23, 0.0  ;;  %5444 = vperm.xlu0 %7341, %v12066_v48   ;;  %v5014_v39 = vld [vmem:[%s13599_s0 + $0x28] sm:$0xff] }
 0x8de   : > { %v5845_v16 = vmul.f32 %v12104_v3, %v5077_v45  ;;  %v5890_v28 = vmul.f32 %v12007_v6, %v5122_v56  ;;  %v6060_v40 = vadd.f32 %v6059_v18, %v6058_v24  ;;  %v14908_v9 = vld [vmem:[#allocation187_spill] sm:$0xff]  ;;  %5274 = vperm.xlu1 %7342, %v12070_v49   ;;  %v12297_v48 = vmul.f32 %v11977_v53, %v5026_v17  ;;  %v5061_v18 = vld [vmem:[%s13599_s0 + $0x1a0] sm:$0xff] }
 0x8df   : > { %v6763_v12 = vrot.slane %v12104_v3, %v14908_v9  ;;  %v5078_v19 = vld [vmem:[%s13599_s0 + $0x228] sm:$0xff]  ;;  %v6438_v23 = vsel %vm2594_vm5, %v6437_v22, %v6433_v14  ;;  %v6759_v45 = vsel %vm14909_vm11, %v6758_v46, %v6754_v21  ;;  %v5780_v56 = vmul.f32 %v12106_v50, %v5012_v61 }
 0x8e0   : > { %v5910_v26 = vadd.f32 %v5909_v36, %v5908_v13  ;;  %v6985_v24 = vrot.slane %v12007_v6, %v14897_v41  ;;  %v6019_v3 = vadd.f32 %v6018_v52, %v6017_v34  ;;  %v6670_v49 = vsel %vm2587_vm4, %v6669_v58, %v6665_v25  ;;  %v5485_v37 = vpop.permute.xlu0 %5484  ;;  %v12308_v17 = vpop.permute.xlu1 %5619  ;;  %v5123_v25 = vld [vmem:[%s13599_s0 + $0x390] sm:$0xff] }
 0x8e1   : > { %v5782_v14 = vmul.f32 %v12023_v59, %v5014_v39  ;;  %v6061_v22 = vsel %vm5905_vm6, %v5845_v16, 0.0  ;;  %v5846_v21 = vmul.f32 %v5485_v37, %v5078_v19  ;;  %v6768_v13 = vrot.slane %v5485_v37, %v10057_v35  ;;  %5754 = vperm.xlu0 %7341, %v12077_v15   ;;  %v5013_v37 = vld [vmem:[%s13599_s0 + $0x20] sm:$0xff]  ;;  %v5015_v52 = vld [vmem:[%s13599_s0 + $0x30] sm:$0xff] }
 0x8e2   : > { %v12315_v34 = vsel %vm5905_vm6, %v5890_v28, 0.0  ;;  %v6062_v36 = vadd.f32 %v6061_v22, %v6060_v40  ;;  %v6764_v58 = vsel %vm2608_vm7, %v6763_v12, %v6759_v45  ;;  %v6442_v61 = vrot.slane %v12106_v50, %v14907_v55  ;;  %5584 = vperm.xlu1 %7342, %v12081_v30   ;;  %v5016_v22 = vld [vmem:[%s13599_s0 + $0x38] sm:$0xff] }
 0x8e3   : > { %v5829_v15 = vmul.f32 %v12031_v63, %v5061_v18  ;;  %v5911_v46 = vsel %vm5905_vm6, %v5780_v56, 0.0  ;;  %v6063_v40 = vsel %vm5905_vm6, %v5846_v21, 0.0  ;;  %v12334_v12 = vsel %vm2615_vm8, %v6768_v13, %v6764_v58 }
 0x8e4   : > { %v6452_v50 = vrot.slane %v12023_v59, %v10057_v35  ;;  %v12338_v30 = vadd.f32 %v6063_v40, %v6062_v36  ;;  %v5175_v16 = vpop.permute.xlu0 %5174  ;;  %v5160_v28 = vpop.permute.xlu1 %5159  ;;  %v6021_v39 = vadd.f32 %v6020_v62, %v6019_v3  ;;  %v14910_v19 = vrot.slane %v11959_v11, %v14905_v51 }
 0x8e5   : > { %v5915_v56 = vsel %vm5905_vm6, %v5782_v14, 0.0  ;;  %v5891_v18 = vmul.f32 %v12041_v10, %v5123_v25  ;;  %v5781_v21 = vmul.f32 %v5160_v28, %v5013_v37  ;;  %v6447_v59 = vrot.slane %v5160_v28, %v14908_v9  ;;  %5524 = vperm.xlu0 %7341, %v12085_v8   ;;  %v5060_v14 = vld [vmem:[%s13599_s0 + $0x198] sm:$0xff] }
 0x8e6   : > { %v6675_v45 = vsel %vm2594_vm5, %v14910_v19, %v6670_v49  ;;  %v6684_v62 = vrot.slane %v12031_v63, %v14908_v9  ;;  %v5912_v3 = vadd.f32 %v5911_v46, %v5910_v26  ;;  %v6443_v11 = vsel %vm14911_vm13, %v6442_v61, %v6438_v23  ;;  %5354 = vperm.xlu1 %7342, %v12089_v7   ;;  %v5062_v63 = vld [vmem:[%s13599_s0 + $0x1a8] sm:$0xff]  ;;  %v14912_v23 = vld [vmem:[#allocation190_spill] sm:$0xff]  ;;  %vm14914_vm13 = vmmov %vm14913_vm12 }
 0x8e7   : > { %v5783_v49 = vmul.f32 %v12183_v4, %v5015_v52  ;;  %v6024_v13 = vsel %vm5905_vm6, %v5829_v15, 0.0  ;;  %v6990_v25 = vrot.slane %v12041_v10, %v14905_v51  ;;  %v5913_v8 = vsel %vm5905_vm6, %v5781_v21, 0.0 }
 0x8e8   : > { %v6448_v26 = vsel %vm2608_vm7, %v6447_v59, %v6443_v11  ;;  %v6457_v7 = vrot.slane %v12183_v4, %v14912_v23  ;;  %v5784_v36 = vmul.f32 %v5175_v16, %v5016_v22  ;;  %v5914_v58 = vadd.f32 %v5913_v8, %v5912_v3  ;;  %v5410_v37 = vpop.permute.xlu0 %5409  ;;  %v5395_v15 = vpop.permute.xlu1 %5394 }
 0x8e9   : > { %v6453_v61 = vsel %vm2615_vm8, %v6452_v50, %v6448_v26  ;;  %v6168_v46 = vsel %vm5905_vm6, %v5891_v18, 0.0  ;;  %v6462_v10 = vrot.slane %v5175_v16, %v10067_v47  ;;  %v5828_v52 = vmul.f32 %v5395_v15, %v5060_v14  ;;  %5214 = vperm.xlu0 %7341, %v12094_v1   ;;  %v5063_v50 = vld [vmem:[%s13599_s0 + $0x1b0] sm:$0xff]  ;;  %v5121_v16 = vld [vmem:[%s13599_s0 + $0x380] sm:$0xff] }
 0x8ea   : > { %v6679_v40 = vrot.slane %v5395_v15, %v14907_v55  ;;  %v5917_v28 = vsel %vm5905_vm6, %v5783_v49, 0.0  ;;  %v5830_v19 = vmul.f32 %v12233_v33, %v5062_v63  ;;  %v5916_v4 = vadd.f32 %v5915_v56, %v5914_v58  ;;  %5664 = vperm.xlu1 %7342, %v12098_v54   ;;  %v5124_v54 = vld [vmem:[%s13599_s0 + $0x398] sm:$0xff] }
 0x8eb   : > { %v6458_v18 = vsel %vm14913_vm12, %v6457_v7, %v6453_v61  ;;  %v6689_v1 = vrot.slane %v12233_v33, %v10057_v35  ;;  %v6022_v22 = vsel %vm5905_vm6, %v5828_v52, 0.0  ;;  %v5919_v59 = vsel %vm5905_vm6, %v5784_v36, 0.0  ;;  %vm14915_vm12 = vmmov %vm14909_vm11 }
 0x8ec   : > { %v6680_v21 = vsel %vm14909_vm11, %v6679_v40, %v6675_v45  ;;  %v12389_v56 = vsel %vm2629_vm10, %v6462_v10, %v6458_v18  ;;  %v6023_v3 = vadd.f32 %v6022_v22, %v6021_v39  ;;  %v5720_v49 = vpop.permute.xlu0 %5719  ;;  %v5700_v14 = vpop.permute.xlu1 %5699  ;;  %v5918_v63 = vadd.f32 %v5917_v28, %v5916_v4  ;;  %v5125_v39 = vld [vmem:[%s13599_s0 + $0x3a0] sm:$0xff]  ;;  %vm14916_vm11 = vmmov %vm14914_vm13 }
 0x8ed   : > { %v6685_v11 = vsel %vm2608_vm7, %v6684_v62, %v6680_v21  ;;  %v5831_v33 = vmul.f32 %v5410_v37, %v5063_v50  ;;  %v6694_v8 = vrot.slane %v5410_v37, %v14912_v23  ;;  %v5889_v26 = vmul.f32 %v5700_v14, %v5121_v16  ;;  %5449 = vperm.xlu0 %7341, %v12102_v60   ;;  %v5079_v62 = vld [vmem:[%s13599_s0 + $0x230] sm:$0xff]  ;;  %v5106_v21 = vld [vmem:[%s13599_s0 + $0x308] sm:$0xff] }
 0x8ee   : > { %v6981_v45 = vrot.slane %v5700_v14, %v14904_v42  ;;  %v6026_v7 = vsel %vm5905_vm6, %v5830_v19, 0.0  ;;  %v6025_v58 = vadd.f32 %v6024_v13, %v6023_v3  ;;  %5279 = vperm.xlu1 %7342, %v12110_v44   ;;  %v5920_v36 = vadd.f32 %v5919_v59, %v5918_v63  ;;  %v5025_v44 = vld [vmem:[%s13599_s0 + $0x80] sm:$0xff] }
 0x8ef   : > { %v6690_v61 = vsel %vm2615_vm8, %v6689_v1, %v6685_v11  ;;  %v5892_v37 = vmul.f32 %v12274_v32, %v5124_v54  ;;  %v6165_v60 = vsel %vm5905_vm6, %v5889_v26, 0.0  ;;  %v6995_v10 = vrot.slane %v12274_v32, %v14907_v55  ;;  %v5017_v32 = vld [vmem:[%s13599_s0 + $0x40] sm:$0xff] }
 0x8f0   : > { %v6986_v13 = vsel %vm2587_vm4, %v6985_v24, %v6981_v45  ;;  %v12415_v15 = vsel %vm14914_vm13, %v6694_v8, %v6690_v61  ;;  %v6167_v52 = vadd.f32 %v12315_v34, %v6165_v60  ;;  %v5490_v28 = vpop.permute.xlu0 %5489  ;;  %v12424_v19 = vpop.permute.xlu1 %5319  ;;  %v6027_v6 = vadd.f32 %v6026_v7, %v6025_v58  ;;  %v5041_v59 = vld [vmem:[%s13599_s0 + $0x100] sm:$0xff]  ;;  %v5027_v58 = vld [vmem:[%s13599_s0 + $0x90] sm:$0xff] }
 0x8f1   : > { %v6991_v40 = vsel %vm2594_vm5, %v6990_v25, %v6986_v13  ;;  %v6028_v24 = vsel %vm5905_vm6, %v5831_v33, 0.0  ;;  %v5893_v4 = vmul.f32 %v5720_v49, %v5125_v39  ;;  %v5847_v50 = vmul.f32 %v5490_v28, %v5079_v62  ;;  %5759 = vperm.xlu0 %7341, %v12114_v31   ;;  %v5042_v33 = vld [vmem:[%s13599_s0 + $0x108] sm:$0xff]  ;;  %v5064_v39 = vld [vmem:[%s13599_s0 + $0x1b8] sm:$0xff]  ;;  %v14918_v60 = vld [vmem:[#allocation102_spill] sm:$0xff] }
 0x8f2   : > { %v6773_v16 = vrot.slane %v5490_v28, %v14912_v23  ;;  %v7000_v18 = vrot.slane %v5720_v49, %v14908_v9  ;;  %v6169_v1 = vadd.f32 %v6168_v46, %v6167_v52  ;;  %5589 = vperm.xlu1 %7342, %v12118_v38   ;;  %v6029_v34 = vadd.f32 %v6028_v24, %v6027_v6  ;;  %v14920_v6 = vld [vmem:[#allocation146_spill] sm:$0xff] }
 0x8f3   : > { %v6996_v25 = vsel %vm14915_vm12, %v6995_v10, %v6991_v40  ;;  %v5793_v22 = vmul.f32 %v11969_v20, %v5025_v44  ;;  %v6170_v31 = vsel %vm5905_vm6, %v5892_v37, 0.0  ;;  %v6065_v54 = vsel %vm5905_vm6, %v5847_v50, 0.0 }
 0x8f4   : > { %v12443_v38 = vsel %vm14916_vm11, %v6773_v16, %v12334_v12  ;;  %v6511_v46 = vrot.slane %v11977_v53, %v14897_v41  ;;  %v12451_v3 = vadd.f32 %v6065_v54, %v12338_v30  ;;  %v5180_v11 = vpop.permute.xlu0 %5179  ;;  %v12453_v49 = vpop.permute.xlu1 %5629  ;;  %v6171_v14 = vadd.f32 %v6170_v31, %v6169_v1  ;;  %v5029_v53 = vld [vmem:[%s13599_s0 + $0xa0] sm:$0xff] }
 0x8f5   : > { %v12456_v63 = vsel %vm2608_vm7, %v7000_v18, %v6996_v25  ;;  %v6507_v12 = vrot.slane %v11969_v20, %v14904_v42  ;;  %v6172_v30 = vsel %vm5905_vm6, %v5893_v4, 0.0  ;;  %v5785_v8 = vmul.f32 %v5180_v11, %v5017_v32  ;;  %5529 = vperm.xlu0 %7341, %v12122_v29   ;;  %v5028_v4 = vld [vmem:[%s13599_s0 + $0x98] sm:$0xff]  ;;  %v14921_v16 = vld [vmem:[#allocation34_spill] sm:$0xff] }
 0x8f6   : > { %v6467_v26 = vrot.slane %v5180_v11, %v10064_v0  ;;  %v12471_v45 = vsel %vm5905_vm6, %v12262_v5, 0.0  ;;  %v5944_v20 = vsel %vm5905_vm6, %v12297_v48, 0.0  ;;  %v5874_v7 = vmul.f32 %v11983_v43, %v5106_v21  ;;  %5359 = vperm.xlu1 %7342, %v12133_v2   ;;  %v14919_v2 = vld [vmem:[#allocation30_spill] sm:$0xff]  ;;  %v5126_v21 = vld [vmem:[%s13599_s0 + $0x3a8] sm:$0xff] }
 0x8f7   : > { %v6173_v29 = vadd.f32 %v6172_v30, %v6171_v14  ;;  %v5943_v62 = vsel %vm5905_vm6, %v5793_v22, 0.0  ;;  %v5809_v5 = vmul.f32 %v11985_v57, %v5041_v59  ;;  %v5921_v61 = vsel %vm5905_vm6, %v5785_v8, 0.0  ;;  %v5089_v25 = vld [vmem:[%s13599_s0 + $0x280] sm:$0xff] }
 0x8f8   : > { %vm14917_vm13 = vcmask 589312   ;;  %v6512_v37 = vsel %vm2587_vm4, %v6511_v46, %v6507_v12  ;;  %v5797_v13 = vmul.f32 %v14918_v60, %v5029_v53  ;;  %v5810_v44 = vmul.f32 %v14919_v2, %v5042_v33  ;;  %v5415_v52 = vpop.permute.xlu0 %5414  ;;  %v12495_v40 = vpop.permute.xlu1 %5244  ;;  %v14922_v22 = vld [vmem:[#allocation54_spill] sm:$0xff]  ;;  %v5043_v46 = vld [vmem:[%s13599_s0 + $0x110] sm:$0xff]  ;;  %v14923_v53 = vld [vmem:[#allocation67_spill] sm:$0xff] }
 0x8f9   : > { %v12488_v48 = vsel %vm14917_vm13, %v6467_v26, %v12389_v56  ;;  %v12493_v10 = vadd.f32 %v5921_v61, %v5920_v36  ;;  %v5945_v28 = vadd.f32 %v5944_v20, %v5943_v62  ;;  %v5795_v24 = vmul.f32 %v14920_v6, %v5027_v58  ;;  %5454 = vperm.xlu0 %7341, %v14921_v16   ;;  %vm14937_vm13 = vmmov %vm14915_vm12 }
 0x8fa   : > { %v5832_v56 = vmul.f32 %v5415_v52, %v5064_v39  ;;  %v6699_v50 = vrot.slane %v5415_v52, %v10067_v47  ;;  %v12504_v18 = vsel %vm5905_vm6, %v5874_v7, 0.0  ;;  %v6906_v36 = vrot.slane %v11983_v43, %v14897_v41  ;;  %5669 = vperm.xlu1 %7342, %v14922_v22   ;;  %v14924_v39 = vld [vmem:[#allocation26_spill] sm:$0xff]  ;;  %v5080_v52 = vld [vmem:[%s13599_s0 + $0x238] sm:$0xff]  ;;  %v5047_v43 = vld [vmem:[%s13599_s0 + $0x130] sm:$0xff] }
 0x8fb   : > { %v6586_v1 = vrot.slane %v11985_v57, %v14904_v42  ;;  %v6590_v32 = vrot.slane %v14919_v2, %v14897_v41  ;;  %v5980_v31 = vsel %vm5905_vm6, %v5809_v5, 0.0  ;;  %v6526_v54 = vrot.slane %v14918_v60, %v14908_v9  ;;  %v5091_v57 = vld [vmem:[%s13599_s0 + $0x290] sm:$0xff]  ;;  %v14925_v5 = vld [vmem:[#allocation9_spill] sm:$0xff]  ;;  %v14935_v60 = vld [vmem:[#allocation111_spill] sm:$0xff] }
 0x8fc   : > { %v6030_v59 = vsel %vm5905_vm6, %v5832_v56, 0.0  ;;  %v12531_v11 = vsel %vm2629_vm10, %v6699_v50, %v12415_v15  ;;  %v12534_v14 = vsel %vm5905_vm6, %v5797_v13, 0.0  ;;  %v5981_v12 = vsel %vm5905_vm6, %v5810_v44, 0.0  ;;  %v5725_v8 = vpop.permute.xlu0 %5724  ;;  %v12540_v26 = vpop.permute.xlu1 %5554  ;;  %v14926_v13 = vld [vmem:[#allocation68_spill] sm:$0xff]  ;;  %v5044_v56 = vld [vmem:[%s13599_s0 + $0x118] sm:$0xff] }
 0x8fd   : > { %v5796_v33 = vmul.f32 %v14923_v53, %v5028_v4  ;;  %v12538_v30 = vadd.f32 %v6030_v59, %v6029_v34  ;;  %v5946_v20 = vsel %vm5905_vm6, %v5795_v24, 0.0  ;;  %v5857_v7 = vmul.f32 %v12235_v27, %v5089_v25  ;;  %5764 = vperm.xlu0 %7341, %v14924_v39   ;;  %v14927_v44 = vld [vmem:[#allocation116_spill] sm:$0xff] }
 0x8fe   : > { %v5894_v58 = vmul.f32 %v5725_v8, %v5126_v21  ;;  %v7005_v15 = vrot.slane %v5725_v8, %v10057_v35  ;;  %v6591_v62 = vsel %vm2587_vm4, %v6590_v32, %v6586_v1  ;;  %v5859_v61 = vmul.f32 %v14925_v5, %v5091_v57  ;;  %5284 = vperm.xlu1 %7342, %v14927_v44   ;;  %v14928_v59 = vld [vmem:[#allocation52_spill] sm:$0xff]  ;;  %v14930_v8 = vld [vmem:[#allocation117_spill] sm:$0xff] }
 0x8ff   : > { %v6516_v34 = vrot.slane %v14920_v6, %v14905_v51  ;;  %v5811_v2 = vmul.f32 %v14926_v13, %v5043_v46  ;;  %v5982_v24 = vadd.f32 %v5981_v12, %v5980_v31  ;;  %v6521_v4 = vrot.slane %v14923_v53, %v14907_v55  ;;  %v14929_v53 = vld [vmem:[#allocation21_spill] sm:$0xff]  ;;  %v5107_v44 = vld [vmem:[%s13599_s0 + $0x310] sm:$0xff] }
 0x900   : > { %v6174_v50 = vsel %vm5905_vm6, %v5894_v58, 0.0  ;;  %v12563_v6 = vsel %vm2615_vm8, %v7005_v15, %v12456_v63  ;;  %v6832_v16 = vrot.slane %v14925_v5, %v14905_v51  ;;  %v5947_v1 = vadd.f32 %v5946_v20, %v5945_v28  ;;  %v5495_v22 = vpop.permute.xlu0 %5494  ;;  %v12570_v21 = vpop.permute.xlu1 %5324  ;;  %v5018_v20 = vld [vmem:[%s13599_s0 + $0x48] sm:$0xff]  ;;  %v5105_v15 = vld [vmem:[%s13599_s0 + $0x300] sm:$0xff] }
 0x901   : > { %v5948_v32 = vsel %vm5905_vm6, %v5796_v33, 0.0  ;;  %v12568_v25 = vadd.f32 %v6174_v50, %v6173_v29  ;;  %v6595_v31 = vrot.slane %v14926_v13, %v14905_v51  ;;  %v6091_v57 = vsel %vm5905_vm6, %v5857_v7, 0.0  ;;  %5689 = vperm.xlu0 %7341, %v14928_v59  }
 0x902   : > { %v5848_v46 = vmul.f32 %v5495_v22, %v5080_v52  ;;  %v6778_v63 = vrot.slane %v5495_v22, %v10067_v47  ;;  %v6094_v12 = vsel %vm5905_vm6, %v5859_v61, 0.0  ;;  %v6517_v28 = vsel %vm2594_vm5, %v6516_v34, %v6512_v37  ;;  %5594 = vperm.xlu1 %7342, %v14930_v8   ;;  %v5045_v37 = vld [vmem:[%s13599_s0 + $0x120] sm:$0xff] }
 0x903   : > { %v5983_v29 = vsel %vm5905_vm6, %v5811_v2, 0.0  ;;  %v5812_v33 = vmul.f32 %v14929_v53, %v5044_v56  ;;  %v5949_v7 = vadd.f32 %v5948_v32, %v5947_v1  ;;  %v6522_v58 = vsel %vm14915_vm12, %v6521_v4, %v6517_v28  ;;  %v14931_v1 = vld [vmem:[#allocation194_spill] sm:$0xff] }
 0x904   : > { %v6067_v39 = vsel %vm5905_vm6, %v5848_v46, 0.0  ;;  %v12595_v61 = vsel %vm2629_vm10, %v6778_v63, %v12443_v38  ;;  %v6093_v34 = vadd.f32 %v12471_v45, %v6091_v57  ;;  %v6823_v13 = vrot.slane %v12235_v27, %v14904_v42  ;;  %v5185_v4 = vpop.permute.xlu0 %5184  ;;  %v12608_v56 = vpop.permute.xlu1 %5634  ;;  %v14932_v27 = vld [vmem:[#allocation28_spill] sm:$0xff]  ;;  %v14933_v63 = vld [vmem:[#allocation103_spill] sm:$0xff] }
 0x905   : > { %v6600_v2 = vrot.slane %v14929_v53, %v14907_v55  ;;  %v12606_v52 = vadd.f32 %v6067_v39, %v12451_v3  ;;  %v5984_v38 = vadd.f32 %v5983_v29, %v5982_v24  ;;  %v6596_v50 = vsel %vm2594_vm5, %v6595_v31, %v6591_v62  ;;  %5769 = vperm.xlu0 %7341, %v14932_v27   ;;  %v5065_v62 = vld [vmem:[%s13599_s0 + $0x1c0] sm:$0xff]  ;;  %v14938_v39 = vld [vmem:[#allocation7_spill] sm:$0xff] }
 0x906   : > { %v5786_v45 = vmul.f32 %v5185_v4, %v5018_v20  ;;  %v6472_v32 = vrot.slane %v5185_v4, %v14931_v1  ;;  %v5985_v22 = vsel %vm5905_vm6, %v5812_v33, 0.0  ;;  %v5873_v57 = vmul.f32 %v12308_v17, %v5105_v15  ;;  %5364 = vperm.xlu1 %7342, %v14933_v63   ;;  %v5030_v15 = vld [vmem:[%s13599_s0 + $0xa8] sm:$0xff] }
 0x907   : > { %v5813_v46 = vmul.f32 %v12424_v19, %v5045_v37  ;;  %v6527_v3 = vsel %vm2608_vm7, %v6526_v54, %v6522_v58  ;;  %v5875_v24 = vmul.f32 %v12453_v49, %v5107_v44  ;;  %v12626_v31 = vadd.f32 %v12534_v14, %v5949_v7  ;;  %v5046_v14 = vld [vmem:[%s13599_s0 + $0x128] sm:$0xff] }
 0x908   : > { %v5923_v59 = vsel %vm5905_vm6, %v5786_v45, 0.0  ;;  %vm14934_vm11 = vcmask 654912   ;;  %v14936_v54 = vrot.slane %v14935_v60, %v14897_v41  ;;  %v6601_v53 = vsel %vm14937_vm13, %v6600_v2, %v6596_v50  ;;  %v5420_v20 = vpop.permute.xlu0 %5419  ;;  %v5031_v60 = vld [vmem:[%s13599_s0 + $0xb0] sm:$0xff] }
 0x909   : > { %v12631_v28 = vsel %vm14934_vm11, %v6472_v32, %v12488_v48  ;;  %v12640_v33 = vadd.f32 %v6094_v12, %v6093_v34  ;;  %v12646_v8 = vadd.f32 %v5923_v59, %v12493_v10  ;;  %v12648_v48 = vpop.permute.xlu1 %5249  ;;  %v5986_v7 = vadd.f32 %v5985_v22, %v5984_v38  ;;  %5774 = vperm.xlu0 %7341, %v14938_v39   ;;  %v5108_v38 = vld [vmem:[%s13599_s0 + $0x318] sm:$0xff]  ;;  %v14941_v59 = vld [vmem:[#allocation60_spill] sm:$0xff] }
 0x90a   : > { %v12637_v29 = vsel %vm2587_vm4, %v14936_v54, %v6823_v13  ;;  %v6902_v58 = vrot.slane %v12308_v17, %v14904_v42  ;;  %v5833_v12 = vmul.f32 %v5420_v20, %v5065_v62  ;;  %v6704_v37 = vrot.slane %v5420_v20, %v10064_v0  ;;  %v14939_v42 = vld [vmem:[#allocation39_spill] sm:$0xff]  ;;  %v5127_v17 = vld [vmem:[%s13599_s0 + $0x3b0] sm:$0xff] }
 0x90b   : > { %v6128_v34 = vsel %vm5905_vm6, %v5873_v57, 0.0  ;;  %v5987_v10 = vsel %vm5905_vm6, %v5813_v46, 0.0  ;;  %v6605_v13 = vrot.slane %v12424_v19, %v14908_v9  ;;  %v6911_v2 = vrot.slane %v12453_v49, %v14905_v51  ;;  %5674 = vperm.xlu1 %7342, %v14939_v42   ;;  %v14943_v42 = vld [vmem:[#allocation108_spill] sm:$0xff] }
 0x90c   : > { %v6131_v44 = vsel %vm5905_vm6, %v5875_v24, 0.0  ;;  %v5814_v4 = vmul.f32 %v12570_v21, %v5046_v14  ;;  %v6032_v50 = vsel %vm5905_vm6, %v5833_v12, 0.0  ;;  %vm14940_vm12 = vcmask 589312   ;;  %v5730_v22 = vpop.permute.xlu0 %5729 }
 0x90d   : > { %v12675_v19 = vsel %vm14940_vm12, %v6704_v37, %v12531_v11  ;;  %v5798_v49 = vmul.f32 %v12495_v40, %v5030_v15  ;;  %v6531_v45 = vrot.slane %v12495_v40, %v10057_v35  ;;  %v6610_v32 = vrot.slane %v12570_v21, %v10057_v35  ;;  %v12685_v57 = vpop.permute.xlu1 %5559  ;;  %v5092_v37 = vld [vmem:[%s13599_s0 + $0x298] sm:$0xff]  ;;  %vm14944_vm11 = vmmov %vm14940_vm12 }
 0x90e   : > { %v12683_v27 = vadd.f32 %v6032_v50, %v12538_v30  ;;  %v6130_v46 = vadd.f32 %v12504_v18, %v6128_v34  ;;  %v6907_v11 = vsel %vm2587_vm4, %v6906_v36, %v6902_v58  ;;  %v5895_v63 = vmul.f32 %v5730_v22, %v5127_v17  ;;  %v5081_v18 = vld [vmem:[%s13599_s0 + $0x240] sm:$0xff]  ;;  %v5019_v17 = vld [vmem:[%s13599_s0 + $0x50] sm:$0xff] }
 0x90f   : > { %v7010_v62 = vrot.slane %v5730_v22, %v14912_v23  ;;  %v5988_v40 = vadd.f32 %v5987_v10, %v5986_v7  ;;  %v6606_v24 = vsel %vm2608_vm7, %v6605_v13, %v6601_v53  ;;  %v6912_v21 = vsel %vm2594_vm5, %v6911_v2, %v6907_v11  ;;  %5289 = vperm.xlu1 %7342, %v14941_v59  }
 0x910   : > { %v5876_v30 = vmul.f32 %v12608_v56, %v5108_v38  ;;  %v6132_v41 = vadd.f32 %v6131_v44, %v6130_v46  ;;  %v5989_v36 = vsel %vm5905_vm6, %v5814_v4, 0.0  ;;  %v6176_v54 = vsel %vm5905_vm6, %v5895_v63, 0.0  ;;  %v5500_v15 = vpop.permute.xlu0 %5499  ;;  %v5109_v44 = vld [vmem:[%s13599_s0 + $0x320] sm:$0xff] }
 0x911   : > { %vm14942_vm4 = vcmask 458112   ;;  %v5952_v14 = vsel %vm5905_vm6, %v5798_v49, 0.0  ;;  %v6532_v20 = vsel %vm2615_vm8, %v6531_v45, %v6527_v3  ;;  %v6611_v7 = vsel %vm2615_vm8, %v6610_v32, %v6606_v24  ;;  %v5330_v12 = vpop.permute.xlu1 %5329 }
 0x912   : > { %v12710_v53 = vsel %vm14942_vm4, %v7010_v62, %v12563_v6  ;;  %v12716_v58 = vadd.f32 %v6176_v54, %v12568_v25  ;;  %v5849_v39 = vmul.f32 %v5500_v15, %v5081_v18  ;;  %v6783_v34 = vrot.slane %v5500_v15, %v10064_v0  ;;  %vm14945_vm13 = vmmov %vm14942_vm4  ;;  %v14946_v62 = vld [vmem:[#allocation193_spill] sm:$0xff] }
 0x913   : > { %v5815_v6 = vmul.f32 %v5330_v12, %v5047_v43  ;;  %v6615_v10 = vrot.slane %v5330_v12, %v14912_v23  ;;  %v5990_v13 = vadd.f32 %v5989_v36, %v5988_v40  ;;  %v6133_v3 = vsel %vm5905_vm6, %v5876_v30, 0.0  ;;  %5599 = vperm.xlu1 %7342, %v14943_v42   ;;  %v14948_v43 = vld [vmem:[#allocation44_spill] sm:$0xff]  ;;  %v5066_v36 = vld [vmem:[%s13599_s0 + $0x1c8] sm:$0xff] }
 0x914   : > { %v6916_v2 = vrot.slane %v12608_v56, %v14907_v55  ;;  %v5799_v25 = vmul.f32 %v12648_v48, %v5031_v60  ;;  %v6069_v4 = vsel %vm5905_vm6, %v5849_v39, 0.0  ;;  %v12737_v38 = vsel %vm14944_vm11, %v6783_v34, %v12595_v61  ;;  %v5190_v46 = vpop.permute.xlu0 %5189  ;;  %v5093_v61 = vld [vmem:[%s13599_s0 + $0x2a0] sm:$0xff]  ;;  %v5032_v60 = vld [vmem:[%s13599_s0 + $0xb8] sm:$0xff]  ;;  %vm14950_vm11 = vmmov %vm14945_vm13 }
 0x915   : > { %v5991_v56 = vsel %vm5905_vm6, %v5815_v6, 0.0  ;;  %v12741_v50 = vsel %vm14945_vm13, %v6615_v10, %v6611_v7  ;;  %v5953_v49 = vadd.f32 %v5952_v14, %v12626_v31  ;;  %v5860_v45 = vmul.f32 %v12540_v26, %v5092_v37  ;;  %v5640_v11 = vpop.permute.xlu1 %5639 }
 0x916   : > { %v12746_v32 = vadd.f32 %v6069_v4, %v12606_v52  ;;  %v12748_v22 = vadd.f32 %v5991_v56, %v5990_v13  ;;  %v5787_v63 = vmul.f32 %v5190_v46, %v5019_v17  ;;  %v6477_v40 = vrot.slane %v5190_v46, %v14946_v62 }
 0x917   : > { %v5877_v24 = vmul.f32 %v5640_v11, %v5109_v44  ;;  %v6921_v30 = vrot.slane %v5640_v11, %v14908_v9  ;;  %v6134_v31 = vadd.f32 %v6133_v3, %v6132_v41  ;;  %vm14947_vm12 = vcmask 261312   ;;  %5369 = vperm.xlu1 %7342, %v14948_v43  }
 0x918   : > { %v6917_v59 = vsel %vm14947_vm12, %v6916_v2, %v6912_v21  ;;  %v5954_v52 = vsel %vm5905_vm6, %v5799_v25, 0.0  ;;  %v6536_v18 = vrot.slane %v12648_v48, %v14912_v23  ;;  %v5925_v54 = vsel %vm5905_vm6, %v5787_v63, 0.0  ;;  %v5425_v37 = vpop.permute.xlu0 %5424  ;;  %v5128_v2 = vld [vmem:[%s13599_s0 + $0x3b8] sm:$0xff] }
 0x919   : > { %vm14949_vm4 = vcmask 720512   ;;  %v6135_v41 = vsel %vm5905_vm6, %v5877_v24, 0.0  ;;  %v12773_v48 = vsel %vm2608_vm7, %v6921_v30, %v6917_v59  ;;  %v6837_v14 = vrot.slane %v12540_v26, %v14907_v55  ;;  %v5255_v39 = vpop.permute.xlu1 %5254 }
 0x91a   : > { %v12769_v21 = vsel %vm14949_vm4, %v6477_v40, %v12631_v28  ;;  %v5861_v7 = vmul.f32 %v12685_v57, %v5093_v61  ;;  %v12779_v15 = vadd.f32 %v5925_v54, %v12646_v8  ;;  %v12781_v12 = vadd.f32 %v6135_v41, %v6134_v31  ;;  %v14951_v8 = vld [vmem:[#allocation25_spill] sm:$0xff]  ;;  %v5082_v31 = vld [vmem:[%s13599_s0 + $0x248] sm:$0xff] }
 0x91b   : > { %v5834_v34 = vmul.f32 %v5425_v37, %v5066_v36  ;;  %v6709_v28 = vrot.slane %v5425_v37, %v14931_v1  ;;  %v5800_v6 = vmul.f32 %v5255_v39, %v5032_v60  ;;  %v6541_v10 = vrot.slane %v5255_v39, %v10067_v47  ;;  %5679 = vperm.xlu1 %7342, %v14951_v8   ;;  %v14955_v36 = vld [vmem:[#allocation129_spill] sm:$0xff]  ;;  %v14956_v60 = vld [vmem:[#allocation56_spill] sm:$0xff] }
 0x91c   : > { %v6096_v13 = vsel %vm5905_vm6, %v5860_v45, 0.0  ;;  %v5955_v3 = vadd.f32 %v5954_v52, %v5953_v49  ;;  %v6537_v55 = vsel %vm14950_vm11, %v6536_v18, %v6532_v20  ;;  %v6842_v26 = vrot.slane %v12685_v57, %v14908_v9  ;;  %v5094_v9 = vld [vmem:[%s13599_s0 + $0x2a8] sm:$0xff]  ;;  %v5735_v56 = vpop.permute.xlu0 %5734  ;;  %v14953_v49 = vld [vmem:[#allocation94_spill] sm:$0xff]  ;;  %v14959_v8 = vld [vmem:[#allocation100_spill] sm:$0xff] }
 0x91d   : > { %v6034_v25 = vsel %vm5905_vm6, %v5834_v34, 0.0  ;;  %vm14952_vm13 = vcmask 654912   ;;  %v5956_v17 = vsel %vm5905_vm6, %v5800_v6, 0.0  ;;  %v12800_v44 = vsel %vm2629_vm10, %v6541_v10, %v6537_v55  ;;  %v5565_v40 = vpop.permute.xlu1 %5564  ;;  %v5110_v6 = vld [vmem:[%s13599_s0 + $0x328] sm:$0xff] }
 0x91e   : > { %v12796_v42 = vsel %vm14952_vm13, %v6709_v28, %v12675_v19  ;;  %v6098_v57 = vsel %vm5905_vm6, %v5861_v7, 0.0  ;;  %v12807_v20 = vadd.f32 %v6034_v25, %v12683_v27  ;;  %v12809_v4 = vadd.f32 %v5956_v17, %v5955_v3  ;;  %v14954_v19 = vld [vmem:[#allocation14_spill] sm:$0xff]  ;;  %v14960_v17 = vld [vmem:[#allocation197_spill] sm:$0xff] }
 0x91f   : > { %v4912_v45 = vmul.f32 %v14954_v19, %v14953_v49  ;;  %v6833_v46 = vsel %vm2594_vm5, %v6832_v16, %v12637_v29  ;;  %v6097_v11 = vadd.f32 %v6096_v13, %v12640_v33  ;;  %v5896_v61 = vmul.f32 %v5735_v56, %v5128_v2  ;;  %v5048_v29 = vld [vmem:[%s13599_s0 + $0x138] sm:$0xff]  ;;  %vm14957_vm5 = vmmov %vm14952_vm13 }
 0x920   : > { %v7015_v63 = vrot.slane %v5735_v56, %v10067_v47  ;;  %v6838_v27 = vsel %vm14947_vm12, %v6837_v14, %v6833_v46  ;;  %v5862_v24 = vmul.f32 %v5565_v40, %v5094_v9  ;;  %v6847_v30 = vrot.slane %v5565_v40, %v10057_v35  ;;  %v5505_v43 = vpop.permute.xlu0 %5504 }
 0x921   : > { %5294 = vperm.xlu1 %7342, %v4912_v45   ;;  %v6099_v59 = vadd.f32 %v6098_v57, %v6097_v11  ;;  %v6843_v51 = vsel %vm2608_vm7, %v6842_v26, %v6838_v27  ;;  %v6178_v5 = vsel %vm5905_vm6, %v5896_v61, 0.0  ;;  %v4974_v54 = vmul.f32 %v14956_v60, %v14955_v36  ;;  %v5335_v7 = vpop.permute.xlu1 %5334  ;;  %v14958_v26 = vld [vmem:[#allocation65_spill] sm:$0xff]  ;;  %v14962_v61 = vld [vmem:[#allocation104_spill] sm:$0xff]  ;;  %v14966_v60 = vld [vmem:[#allocation42_spill] sm:$0xff] }
 0x922   : > { %v12829_v16 = vsel %vm2629_vm10, %v7015_v63, %v12710_v53  ;;  %v12835_v33 = vadd.f32 %v6178_v5, %v12716_v58  ;;  %v6100_v52 = vsel %vm5905_vm6, %v5862_v24, 0.0  ;;  %v12839_v18 = vsel %vm2615_vm8, %v6847_v30, %v6843_v51  ;;  %v5020_v58 = vld [vmem:[%s13599_s0 + $0x58] sm:$0xff]  ;;  %v14963_v63 = vld [vmem:[#allocation71_spill] sm:$0xff] }
 0x923   : > { %v12843_v41 = vadd.f32 %v6100_v52, %v6099_v59  ;;  %v5850_v53 = vmul.f32 %v5505_v43, %v5082_v31  ;;  %v6788_v14 = vrot.slane %v5505_v43, %v14931_v1  ;;  %v5816_v37 = vmul.f32 %v5335_v7, %v5048_v29 }
 0x924   : > { %v6620_v39 = vrot.slane %v5335_v7, %v10067_v47  ;;  %v5195_v55 = vpop.permute.xlu0 %5194  ;;  %v4928_v2 = vmul.f32 %v14959_v8, %v14958_v26  ;;  %vm14961_vm7 = vcmask 786112   ;;  %v4990_v40 = vmul.f32 %v14963_v63, %v14962_v61  ;;  %v14969_v26 = vld [vmem:[#allocation13_spill] sm:$0xff]  ;;  %v14973_v63 = vld [vmem:[#allocation75_spill] sm:$0xff] }
 0x925   : > { %5604 = vperm.xlu1 %7342, %v4974_v54   ;;  %v6071_v34 = vsel %vm5905_vm6, %v5850_v53, 0.0  ;;  %v12853_v28 = vsel %vm14957_vm5, %v6788_v14, %v12737_v38  ;;  %v5993_v13 = vsel %vm5905_vm6, %v5816_v37, 0.0  ;;  %v5788_v25 = vmul.f32 %v5195_v55, %v5020_v58  ;;  %v5645_v57 = vpop.permute.xlu1 %5644  ;;  %v14970_v8 = vld [vmem:[#allocation41_spill] sm:$0xff] }
 0x926   : > { %v12859_v10 = vadd.f32 %v6071_v34, %v12746_v32  ;;  %v12864_v3 = vsel %vm2629_vm10, %v6620_v39, %v12741_v50  ;;  %v12869_v38 = vadd.f32 %v5993_v13, %v12748_v22  ;;  %v6482_v9 = vrot.slane %v5195_v55, %v14960_v17  ;;  %v5067_v50 = vld [vmem:[%s13599_s0 + $0x1d0] sm:$0xff]  ;;  %v5033_v22 = vld [vmem:[%s13599_s0 + $0xc0] sm:$0xff] }
 0x927   : > { %v5878_v56 = vmul.f32 %v5645_v57, %v5110_v6  ;;  %v6926_v32 = vrot.slane %v5645_v57, %v10057_v35  ;;  %v5927_v49 = vsel %vm5905_vm6, %v5788_v25, 0.0  ;;  %v4975_v54 = vmul.f32 %v14966_v60, %v14955_v36  ;;  %v5083_v39 = vld [vmem:[%s13599_s0 + $0x250] sm:$0xff] }
 0x928   : > { %v12879_v19 = vsel %vm14961_vm7, %v6482_v9, %v12769_v21  ;;  %v12885_v45 = vadd.f32 %v5927_v49, %v12779_v15  ;;  %v5430_v11 = vpop.permute.xlu0 %5429  ;;  %vm14968_vm13 = vcmask 458112  }
 0x929   : > { %5374 = vperm.xlu1 %7342, %v4928_v2   ;;  %v6137_v35 = vsel %vm5905_vm6, %v5878_v56, 0.0  ;;  %v12890_v46 = vsel %vm2615_vm8, %v6926_v32, %v12773_v48  ;;  %v5835_v27 = vmul.f32 %v5430_v11, %v5067_v50  ;;  %v6714_v24 = vrot.slane %v5430_v11, %v14946_v62  ;;  %v5260_v30 = vpop.permute.xlu1 %5259  ;;  %v5129_v48 = vld [vmem:[%s13599_s0 + $0x3c0] sm:$0xff]  ;;  %vm14964_vm8 = vmmov %vm14949_vm4 }
 0x92a   : > { %v12895_v21 = vadd.f32 %v6137_v35, %v12781_v12  ;;  %v5801_v31 = vmul.f32 %v5260_v30, %v5033_v22  ;;  %v6546_v15 = vrot.slane %v5260_v30, %v10064_v0  ;;  %v5095_v12 = vld [vmem:[%s13599_s0 + $0x2b0] sm:$0xff]  ;;  %vm14965_vm4 = vcmask 589312   ;;  %vm14971_vm12 = vmmov %vm14964_vm8 }
 0x92b   : > { %v6036_v59 = vsel %vm5905_vm6, %v5835_v27, 0.0  ;;  %v12905_v51 = vsel %vm14964_vm8, %v6714_v24, %v12796_v42  ;;  %vm14967_vm11 = vmmov %vm14965_vm4  ;;  %v4960_v2 = vmul.f32 %v14970_v8, %v14969_v26  ;;  %v14974_v24 = vld [vmem:[#allocation196_spill] sm:$0xff]  ;;  %vm14977_vm8 = vcmask 786112  }
 0x92c   : > { %v12911_v5 = vadd.f32 %v6036_v59, %v12807_v20  ;;  %v5958_v29 = vsel %vm5905_vm6, %v5801_v31, 0.0  ;;  %v12916_v52 = vsel %vm14965_vm4, %v6546_v15, %v12800_v44  ;;  %v5740_v43 = vpop.permute.xlu0 %5739  ;;  %vm14972_vm5 = vmmov %vm14965_vm4  ;;  %vm14978_vm4 = vcmask 654912  }
 0x92d   : > { %5684 = vperm.xlu1 %7342, %v4990_v40   ;;  %v5959_v42 = vadd.f32 %v5958_v29, %v12809_v4  ;;  %v5897_v53 = vmul.f32 %v5740_v43, %v5129_v48  ;;  %v7020_v14 = vrot.slane %v5740_v43, %v10064_v0  ;;  %v5570_v7 = vpop.permute.xlu1 %5569  ;;  %v5049_v4 = vld [vmem:[%s13599_s0 + $0x140] sm:$0xff]  ;;  %v4976_v40 = vmul.f32 %v14973_v63, %v14955_v36  ;;  %v5034_v36 = vld [vmem:[%s13599_s0 + $0xc8] sm:$0xff]  ;;  %vm14975_vm7 = vmmov %vm14968_vm13 }
 0x92e   : > { %v5863_v37 = vmul.f32 %v5570_v7, %v5095_v12  ;;  %v6852_v20 = vrot.slane %v5570_v7, %v14912_v23  ;;  %v14976_v43 = vld [vmem:[#allocation119_spill] sm:$0xff] }
 0x92f   : > { %v6180_v44 = vsel %vm5905_vm6, %v5897_v53, 0.0  ;;  %v7021_v58 = vsel %vm14967_vm11, %v7020_v14, %v12829_v16  ;;  %v4992_v60 = vmul.f32 %v14976_v43, %v14962_v61  ;;  %vm14979_vm11 = vmmov %vm14978_vm4 }
 0x930   : > { %v12933_v34 = vadd.f32 %v6180_v44, %v12835_v33  ;;  %v6102_v6 = vsel %vm5905_vm6, %v5863_v37, 0.0  ;;  %v6853_v13 = vsel %vm14968_vm13, %v6852_v20, %v12839_v18  ;;  %v5510_v55 = vpop.permute.xlu0 %5509  ;;  %v5021_v33 = vld [vmem:[%s13599_s0 + $0x60] sm:$0xff]  ;;  %vm14980_vm13 = vmmov %vm14978_vm4 }
 0x931   : > { %5609 = vperm.xlu1 %7342, %v4975_v54   ;;  %v6103_v25 = vadd.f32 %v6102_v6, %v12843_v41  ;;  %v5851_v9 = vmul.f32 %v5510_v55, %v5083_v39  ;;  %v6793_v16 = vrot.slane %v5510_v55, %v14946_v62  ;;  %v5340_v57 = vpop.permute.xlu1 %5339  ;;  %v5111_v41 = vld [vmem:[%s13599_s0 + $0x330] sm:$0xff] }
 0x932   : > { %v5817_v56 = vmul.f32 %v5340_v57, %v5049_v4  ;;  %v6625_v32 = vrot.slane %v5340_v57, %v10064_v0 }
 0x933   : > { %v6073_v18 = vsel %vm5905_vm6, %v5851_v9, 0.0  ;;  %v12949_v50 = vsel %vm14971_vm12, %v6793_v16, %v12853_v28  ;;  %vm7906_vm12 = vmmov 0  }
 0x934   : > { %v12955_v49 = vadd.f32 %v6073_v18, %v12859_v10  ;;  %v5995_v22 = vsel %vm5905_vm6, %v5817_v56, 0.0  ;;  %v6626_v35 = vsel %vm14972_vm5, %v6625_v32, %v12864_v3  ;;  %v5200_v11 = vpop.permute.xlu0 %5199  ;;  %v5068_v10 = vld [vmem:[%s13599_s0 + $0x1d8] sm:$0xff]  ;;  %vm14983_vm5 = vcmask 261120  }
 0x935   : > { %5534 = vperm.xlu1 %7342, %v4960_v2   ;;  %v5996_v27 = vadd.f32 %v5995_v22, %v12869_v38  ;;  %v5789_v28 = vmul.f32 %v5200_v11, %v5021_v33  ;;  %v6487_v30 = vrot.slane %v5200_v11, %v14974_v24  ;;  %v5650_v31 = vpop.permute.xlu1 %5649 }
 0x936   : > { %v5879_v15 = vmul.f32 %v5650_v31, %v5111_v41  ;;  %v6931_v48 = vrot.slane %v5650_v31, %v14912_v23 }
 0x937   : > { %v5929_v3 = vsel %vm5905_vm6, %v5789_v28, 0.0  ;;  %v12971_v59 = vsel %vm2664_vm15, %v6487_v30, %v12879_v19  ;;  %v5035_v28 = vld [vmem:[%s13599_s0 + $0xd0] sm:$0xff] }
 0x938   : > { %v12977_v38 = vadd.f32 %v5929_v3, %v12885_v45  ;;  %v6139_v23 = vsel %vm5905_vm6, %v5879_v15, 0.0  ;;  %v6932_v12 = vsel %vm14975_vm7, %v6931_v48, %v12890_v46  ;;  %v5435_v29 = vpop.permute.xlu0 %5434  ;;  %v5096_v46 = vld [vmem:[%s13599_s0 + $0x2b8] sm:$0xff]  ;;  %v680_v3 = vld [vmem:[%s13605_s6 + $0x10] sm:$0xff]  ;;  %vm14984_vm7 = vcmask 589312  }
 0x939   : > { %5614 = vperm.xlu1 %7342, %v4976_v40   ;;  %v6140_v54 = vadd.f32 %v6139_v23, %v12895_v21  ;;  %v5836_v19 = vmul.f32 %v5435_v29, %v5068_v10  ;;  %v6719_v53 = vrot.slane %v5435_v29, %v14960_v17  ;;  %v5265_v14 = vpop.permute.xlu1 %5264  ;;  %v14981_v40 = vmov 0.0   ;;  %v677_v29 = vld [vmem:[#allocation3] sm:$0xff] }
 0x93a   : > { %v5802_v7 = vmul.f32 %v5265_v14, %v5034_v36  ;;  %v6551_v37 = vrot.slane %v5265_v14, %v14931_v1  ;;  %7284 = vmatprep.mubr.msk.f32.mxu1 %vm7906_vm12, %v14981_v40  ;;  %7291 = vmatprep.mubr.msk.f32.mxu0 %vm7906_vm12, %v14981_v40  ;;  %v7874_v14 = vld [vmem:[#allocation2] sm:$0xff] }
 0x93b   : > { %v6038_v45 = vsel %vm5905_vm6, %v5836_v19, 0.0  ;;  %v12990_v20 = vsel %vm14977_vm8, %v6719_v53, %v12905_v51  ;;  %6305 = vrot.lane.b32.xlu0 %v677_v29, %s7907_s26 }
 0x93c   : > { %v12996_v61 = vadd.f32 %v6038_v45, %v12911_v5  ;;  %v5960_v21 = vsel %vm5905_vm6, %v5802_v7, 0.0  ;;  %v6552_v39 = vsel %vm14978_vm4, %v6551_v37, %v12916_v52  ;;  %v13001_v44 = vpop.permute.xlu0 %5744  ;;  %v5050_v5 = vld [vmem:[%s13599_s0 + $0x148] sm:$0xff]  ;;  %v5051_v45 = vld [vmem:[%s13599_s0 + $0x150] sm:$0xff]  ;;  %vm14986_vm4 = vmmov %vm14984_vm7 }
 0x93d   : > { %5694 = vperm.xlu1 %7342, %v4992_v60   ;;  %v5961_v4 = vadd.f32 %v5960_v21, %v5959_v42  ;;  %v7025_v6 = vrot.slane %v13001_v44, %v14931_v1  ;;  %v5575_v51 = vpop.permute.xlu1 %5574 }
 0x93e   : > { %v5864_v55 = vmul.f32 %v5575_v51, %v5096_v46  ;;  %v6857_v26 = vrot.slane %v5575_v51, %v10067_v47 }
 0x93f   : > { %v13007_v8 = vsel %vm14979_vm11, %v7025_v6, %v7021_v58  ;;  %v5112_v58 = vld [vmem:[%s13599_s0 + $0x338] sm:$0xff]  ;;  %vm14987_vm11 = vcmask 786112  }
 0x940   : > { %v6104_v2 = vsel %vm5905_vm6, %v5864_v55, 0.0  ;;  %v6858_v52 = vsel %vm2629_vm10, %v6857_v26, %v6853_v13  ;;  %v13014_v9 = vpop.permute.xlu0 %5514  ;;  %v689_v13 = vld [vmem:[%s13605_s6 + $0x58] sm:$0xff]  ;;  %v5113_v26 = vld [vmem:[%s13599_s0 + $0x340] sm:$0xff] }
 0x941   : > { %v6105_v42 = vadd.f32 %v6104_v2, %v6103_v25  ;;  %v5345_v16 = vpop.permute.xlu1 %5344  ;;  %v686_v25 = vld [vmem:[%s13605_s6 + $0x40] sm:$0xff]  ;;  %7277 = vmatpush3.msra.mxu1 %v689_v13 }
 0x942   : > { %v5818_v57 = vmul.f32 %v5345_v16, %v5050_v5  ;;  %v6630_v56 = vrot.slane %v5345_v16, %v14931_v1  ;;  %7278 = vmatprep.subr.mxu1 %v14981_v40 }
 0x943   : > { %7279 = vmatpush3.msra.mxu1 %v686_v25 }
 0x944   : > { %v5997_v32 = vsel %vm5905_vm6, %v5818_v57, 0.0  ;;  %v6631_v33 = vsel %vm14980_vm13, %v6630_v56, %v6626_v35  ;;  %v13022_v18 = vpop.permute.xlu0 %5204  ;;  %v6221_v35 = vld [vmem:[%s13609_s10 + $0x8] sm:$0xff]  ;;  %7280 = vmatprep.subr.mxu1 %v14981_v40 }
 0x945   : > { %v5998_v41 = vadd.f32 %v5997_v32, %v5996_v27  ;;  %v5655_v22 = vpop.permute.xlu1 %5654  ;;  %v6220_v27 = vld [vmem:[%s13609_s10] sm:$0xff]  ;;  %7288 = vmatpush3.msra.mxu0 %v6221_v35 }
 0x946   : > { %v5880_v11 = vmul.f32 %v5655_v22, %v5112_v58  ;;  %v6936_v63 = vrot.slane %v5655_v22, %v10067_v47  ;;  %v683_v47 = vld [vmem:[%s13605_s6 + $0x28] sm:$0xff]  ;;  %7289 = vmatprep.subr.mxu0 %v14981_v40 }
 0x947   : > { %7290 = vmatpush3.msra.mxu0 %v6220_v27  ;;  %7281 = vmatpush3.msra.mxu1 %v683_v47 }
 0x948   : > { %v6141_v30 = vsel %vm5905_vm6, %v5880_v11, 0.0  ;;  %v6937_v31 = vsel %vm2629_vm10, %v6936_v63, %v6932_v12  ;;  %v13048_v15 = vpop.permute.xlu0 %5439  ;;  %v5097_v12 = vld [vmem:[%s13599_s0 + $0x2c0] sm:$0xff]  ;;  %7282 = vmatprep.subr.mxu1 %v14981_v40  ;;  %vm14982_vm10 = vcmask 720512  }
 0x949   : > { %v6142_v48 = vadd.f32 %v6141_v30, %v6140_v54  ;;  %v5270_v10 = vpop.permute.xlu1 %5269  ;;  %7283 = vmatpush3.msra.mxu1 %v680_v3  ;;  %vm14985_vm8 = vmmov %vm14982_vm10 }
 0x94a   : > { %v5803_v36 = vmul.f32 %v5270_v10, %v5035_v28  ;;  %v6556_v23 = vrot.slane %v5270_v10, %v14946_v62  ;;  %7285 = vmatmul.mubr.msk.f32.vlgmr.msra.gmra.mxu1 %vm14983_vm5, %v7874_v14  ;;  %7294 = vmatprep.subr.mxu1 %v14981_v40  ;;  %vm14991_vm5 = vmmov %vm14985_vm8 }
 0x94b   : > { %7302 = vmatprep.mubr.msk.f32.mxu1 %vm7906_vm12, %v14981_v40  ;;  %vm14988_vm12 = vmmov %vm14987_vm11 }
 0x94c   : > { %v5962_v43 = vsel %vm5905_vm6, %v5803_v36, 0.0  ;;  %v6557_v60 = vsel %vm14982_vm10, %v6556_v23, %v6552_v39  ;;  %v13064_v54 = vpop.permute.xlu0 %5749  ;;  %vm14989_vm10 = vmmov %vm14980_vm13 }
 0x94d   : > { %v5963_v19 = vadd.f32 %v5962_v43, %v5961_v4  ;;  %v5580_v53 = vpop.permute.xlu1 %5579  ;;  %v5114_v43 = vld [vmem:[%s13599_s0 + $0x348] sm:$0xff] }
 0x94e   : > { %v5865_v7 = vmul.f32 %v5580_v53, %v5097_v12  ;;  %v6862_v37 = vrot.slane %v5580_v53, %v10064_v0 }
 0x950   : > { %v6106_v46 = vsel %vm5905_vm6, %v5865_v7, 0.0  ;;  %v6863_v21 = vsel %vm14984_vm7, %v6862_v37, %v6858_v52  ;;  %v13077_v39 = vpop.permute.xlu0 %5519  ;;  %vm14993_vm7 = vmmov %vm14987_vm11 }
 0x951   : > { %v6107_v4 = vadd.f32 %v6106_v46, %v6105_v42  ;;  %v5350_v6 = vpop.permute.xlu1 %5349  ;;  %v5036_v42 = vld [vmem:[%s13599_s0 + $0xd8] sm:$0xff] }
 0x952   : > { %v5819_v51 = vmul.f32 %v5350_v6, %v5051_v45  ;;  %v6635_v55 = vrot.slane %v5350_v6, %v14946_v62  ;;  %v5037_v45 = vld [vmem:[%s13599_s0 + $0xe0] sm:$0xff] }
 0x953   : > { %v13134_v6 = vld [vmem:[%s13606_s7] sm:$0x7] }
 0x954   : > { %v5999_v5 = vsel %vm5905_vm6, %v5819_v51, 0.0  ;;  %v6636_v2 = vsel %vm14985_vm8, %v6635_v55, %v6631_v33  ;;  %v13085_v56 = vpop.permute.xlu0 %5209  ;;  %v14990_v51 = vld [vmem:[#allocation131_spill] sm:$0xff]  ;;  %vm14995_vm8 = vmmov %vm14991_vm5 }
 0x955   : > { %v6000_v16 = vadd.f32 %v5999_v5, %v5998_v41  ;;  %v5660_v57 = vpop.permute.xlu1 %5659  ;;  %v5098_v41 = vld [vmem:[%s13599_s0 + $0x2c8] sm:$0xff]  ;;  %v699_v55 = vrot.slane %v13134_v6, %v14990_v51  ;;  %v779_v5 = vpop.f32.mrf.mxu0 }
 0x956   : > { %v5881_v52 = vmul.f32 %v5660_v57, %v5113_v26  ;;  %v6941_v58 = vrot.slane %v5660_v57, %v10064_v0 }
 0x958   : > { %v6143_v32 = vsel %vm5905_vm6, %v5881_v52, 0.0  ;;  %v6942_v22 = vsel %vm14986_vm4, %v6941_v58, %v6937_v31  ;;  %v13097_v63 = vpop.permute.xlu0 %5444  ;;  %v5052_v31 = vld [vmem:[%s13599_s0 + $0x158] sm:$0xff]  ;;  %v780_v58 = vadd.f32 %v779_v5, %v699_v55  ;;  %v5085_v5 = vld [vmem:[%s13599_s0 + $0x260] sm:$0xff]  ;;  %vm14997_vm4 = vmmov %vm14993_vm7 }
 0x959   : > { %v6144_v13 = vadd.f32 %v6143_v32, %v6142_v48  ;;  %v5275_v25 = vpop.permute.xlu1 %5274 }
 0x95a   : > { %v5804_v11 = vmul.f32 %v5275_v25, %v5036_v42  ;;  %v6561_v33 = vrot.slane %v5275_v25, %v14960_v17  ;;  %v5022_v25 = vld [vmem:[%s13599_s0 + $0x68] sm:$0xff] }
 0x95c   : > { %v5964_v0 = vsel %vm5905_vm6, %v5804_v11, 0.0  ;;  %v6562_v35 = vsel %vm14987_vm11, %v6561_v33, %v6557_v60  ;;  %v13109_v23 = vpop.permute.xlu0 %5754  ;;  %v7243_v33 = vmul.f32 -1.442695, %v780_v58  ;;  %vm14998_vm11 = vmmov %vm14991_vm5 }
 0x95d   : > { %v5965_v27 = vadd.f32 %v5964_v0, %v5963_v19  ;;  %v5585_v28 = vpop.permute.xlu1 %5584  ;;  %v5023_v0 = vld [vmem:[%s13599_s0 + $0x70] sm:$0xff] }
 0x95e   : > { %v5866_v47 = vmul.f32 %v5585_v28, %v5098_v41  ;;  %v6867_v30 = vrot.slane %v5585_v28, %v14931_v1  ;;  %7857 = vpow2.f32 %v7243_v33 }
 0x960   : > { %v6108_v48 = vsel %vm5905_vm6, %v5866_v47, 0.0  ;;  %v6868_v10 = vsel %vm14980_vm13, %v6867_v30, %v6863_v21  ;;  %v13125_v46 = vpop.permute.xlu0 %5524  ;;  %v5791_v47 = vmul.f32 %v13085_v56, %v5023_v0  ;;  %vm14999_vm13 = vcmask 1041409  }
 0x961   : > { %v13107_v3 = vadd.f32 %v6108_v48, %v6107_v4  ;;  %v5355_v36 = vpop.permute.xlu1 %5354 }
 0x962   : > { %v5820_v12 = vmul.f32 %v5355_v36, %v5052_v31  ;;  %v6640_v29 = vrot.slane %v5355_v36, %v14960_v17 }
 0x964   : > { %v6001_v60 = vsel %vm5905_vm6, %v5820_v12, 0.0  ;;  %v13117_v19 = vsel %vm14988_vm12, %v6640_v29, %v6636_v2  ;;  %vm15000_vm12 = vmmov %vm14997_vm4 }
 0x965   : > { %v13119_v53 = vadd.f32 %v6001_v60, %v6000_v16  ;;  %v5665_v14 = vpop.permute.xlu1 %5664  ;;  %v5130_v60 = vld [vmem:[%s13599_s0 + $0x3c8] sm:$0xff] }
 0x966   : > { %v5882_v7 = vmul.f32 %v5665_v14, %v5114_v43  ;;  %v6946_v37 = vrot.slane %v5665_v14, %v14931_v1 }
 0x968   : > { %v6145_v21 = vsel %vm5905_vm6, %v5882_v7, 0.0  ;;  %v13129_v4 = vsel %vm14989_vm10, %v6946_v37, %v6942_v22  ;;  %v13149_v22 = vpop.permute.xlu0 %5214  ;;  %v5084_v7 = vld [vmem:[%s13599_s0 + $0x258] sm:$0xff]  ;;  %vm15001_vm10 = vcmask 1042434  }
 0x969   : > { %v13138_v1 = vadd.f32 %v6145_v21, %v6144_v13  ;;  %v5280_v26 = vpop.permute.xlu1 %5279  ;;  %v5898_v21 = vmul.f32 %v13001_v44, %v5130_v60  ;;  %v5852_v51 = vmul.f32 %v13014_v9, %v5084_v7 }
 0x96a   : > { %v5805_v2 = vmul.f32 %v5280_v26, %v5037_v45  ;;  %v6566_v16 = vrot.slane %v5280_v26, %v14974_v24  ;;  %v5131_v26 = vld [vmem:[%s13599_s0 + $0x3d0] sm:$0xff] }
 0x96b   : > { %v6182_v58 = vsel %vm5905_vm6, %v5898_v21, 0.0  ;;  %v6075_v33 = vsel %vm5905_vm6, %v5852_v51, 0.0  ;;  %v5899_v0 = vmul.f32 %v13064_v54, %v5131_v26  ;;  %v5072_v51 = vld [vmem:[%s13599_s0 + $0x1f8] sm:$0xff] }
 0x96c   : > { %v5966_v57 = vsel %vm5905_vm6, %v5805_v2, 0.0  ;;  %v13143_v52 = vsel %vm2664_vm15, %v6566_v16, %v6562_v35  ;;  %v5790_v35 = vmul.f32 %v13022_v18, %v5022_v25  ;;  %v13168_v28 = vpop.permute.xlu0 %5449  ;;  %v7858_v16 = vpop.eup %7857  ;;  %v5070_v25 = vld [vmem:[%s13599_s0 + $0x1e8] sm:$0xff] }
 0x96d   : > { %v13145_v42 = vadd.f32 %v5966_v57, %v5965_v27  ;;  %v13147_v32 = vpop.permute.xlu1 %5589  ;;  %v5024_v27 = vld [vmem:[%s13599_s0 + $0x78] sm:$0xff]  ;;  %v5838_v60 = vmul.f32 %v13097_v63, %v5070_v25  ;;  %v6184_v26 = vsel %vm5905_vm6, %v5899_v0, 0.0 }
 0x96e   : > { %v6872_v13 = vrot.slane %v13147_v32, %v14946_v62  ;;  %v5931_v31 = vsel %vm5905_vm6, %v5790_v35, 0.0  ;;  %v5792_v48 = vmul.f32 %v13149_v22, %v5024_v27  ;;  %v5853_v35 = vmul.f32 %v13077_v39, %v5085_v5  ;;  %v14994_v5 = vld [vmem:[#allocation198_spill] sm:$0xff] }
 0x96f   : > { %v5932_v12 = vadd.f32 %v5931_v31, %v12977_v38  ;;  %v5069_v38 = vld [vmem:[%s13599_s0 + $0x1e0] sm:$0xff]  ;;  %v13215_v27 = vadd.f32 1.0, %v7858_v16 }
 0x970   : > { %v13157_v11 = vsel %vm14991_vm5, %v6872_v13, %v6868_v10  ;;  %v5933_v10 = vsel %vm5905_vm6, %v5791_v47, 0.0  ;;  %v13179_v29 = vpop.permute.xlu0 %5759  ;;  %v5935_v43 = vsel %vm5905_vm6, %v5792_v48, 0.0  ;;  %v5837_v44 = vmul.f32 %v13048_v15, %v5069_v38  ;;  %v14992_v47 = vld [vmem:[#allocation199_spill] sm:$0xff]  ;;  %vm15002_vm5 = vmmov %vm14997_vm4 }
 0x971   : > { %v13159_v41 = vpop.permute.xlu1 %5359  ;;  %v5934_v14 = vadd.f32 %v5933_v10, %v5932_v12  ;;  %v6798_v13 = vrot.slane %v13014_v9, %v14960_v17  ;;  %v6492_v31 = vrot.slane %v13022_v18, %v14992_v47  ;;  %v6724_v48 = vrot.slane %v13048_v15, %v14974_v24  ;;  %v5071_v9 = vld [vmem:[%s13599_s0 + $0x1f0] sm:$0xff] }
 0x972   : > { %v6183_v12 = vadd.f32 %v6182_v58, %v12933_v34  ;;  %v6076_v15 = vadd.f32 %v6075_v33, %v12955_v49  ;;  %v7030_v38 = vrot.slane %v13064_v54, %v14946_v62  ;;  %v6803_v34 = vrot.slane %v13077_v39, %v14974_v24 }
 0x973   : > { %v5936_v45 = vadd.f32 %v5935_v43, %v5934_v14  ;;  %v6040_v43 = vsel %vm5905_vm6, %v5837_v44, 0.0  ;;  %v5132_v14 = vld [vmem:[%s13599_s0 + $0x3d8] sm:$0xff]  ;;  %v6799_v21 = vsel %vm14993_vm7, %v6798_v13, %v12949_v50  ;;  %v6497_v49 = vrot.slane %v13085_v56, %v14994_v5  ;;  %vm15003_vm7 = vmmov %vm14999_vm13 }
 0x974   : > { %v13195_v55 = vpop.permute.xlu0 %5529  ;;  %v5839_v16 = vmul.f32 %v13168_v28, %v5071_v9  ;;  %v6493_v50 = vsel %vm2671_vm0, %v6492_v31, %v12971_v59  ;;  %v6041_v54 = vadd.f32 %v6040_v43, %v12996_v61  ;;  %v6725_v39 = vsel %vm2664_vm15, %v6724_v48, %v12990_v20  ;;  %v5133_v59 = vld [vmem:[%s13599_s0 + $0x3e0] sm:$0xff]  ;;  %v5099_v31 = vld [vmem:[%s13599_s0 + $0x2d0] sm:$0xff] }
 0x975   : > { %v13171_v30 = vpop.permute.xlu1 %5669  ;;  %v5937_v57 = vrot.slane %v5936_v45, 4  ;;  %v5900_v44 = vmul.f32 %v13109_v23, %v5132_v14  ;;  %v6042_v56 = vsel %vm5905_vm6, %v5838_v60, 0.0  ;;  %v6729_v13 = vrot.slane %v13097_v63, %v14992_v47 }
 0x976   : > { %v6185_v61 = vadd.f32 %v6184_v26, %v6183_v12  ;;  %v7031_v33 = vsel %vm14995_vm8, %v7030_v38, %v13007_v8  ;;  %v6498_v63 = vsel %vm2678_vm1, %v6497_v49, %v6493_v50  ;;  %v7035_v48 = vrot.slane %v13109_v23, %v14960_v17  ;;  %v5053_v26 = vld [vmem:[%s13599_s0 + $0x160] sm:$0xff] }
 0x977   : > { %v5938_v18 = vadd.f32 %v5937_v57, %v5936_v45  ;;  %v6077_v45 = vsel %vm5905_vm6, %v5853_v35, 0.0  ;;  %v5086_v57 = vld [vmem:[%s13599_s0 + $0x268] sm:$0xff]  ;;  %v6804_v35 = vsel %vm2664_vm15, %v6803_v34, %v6799_v21  ;;  %v6044_v43 = vsel %vm5905_vm6, %v5839_v16, 0.0  ;;  %v5087_v21 = vld [vmem:[%s13599_s0 + $0x270] sm:$0xff] }
 0x978   : > { %v13232_v7 = vpop.permute.xlu0 %5454  ;;  %v6078_v0 = vadd.f32 %v6077_v45, %v6076_v15  ;;  %v5854_v9 = vmul.f32 %v13125_v46, %v5086_v57  ;;  %v6043_v60 = vadd.f32 %v6042_v56, %v6041_v54  ;;  %v6186_v8 = vsel %vm5905_vm6, %v5900_v44, 0.0 }
 0x979   : > { %v13176_v36 = vpop.permute.xlu1 %5284  ;;  %v5939_v25 = vrot.slane %v5938_v18, 2  ;;  %v5840_v20 = vmul.f32 %v13232_v7, %v5072_v51  ;;  %v6808_v14 = vrot.slane %v13125_v46, %v14992_v47  ;;  %v5901_v15 = vmul.f32 %v13179_v29, %v5133_v59  ;;  %v14996_v46 = vld [vmem:[#allocation200_spill] sm:$0xff] }
 0x97a   : > { %v6730_v23 = vsel %vm2671_vm0, %v6729_v13, %v6725_v39  ;;  %v5867_v51 = vmul.f32 %v13147_v32, %v5099_v31  ;;  %v6502_v49 = vrot.slane %v13149_v22, %v14996_v46  ;;  %v6045_v16 = vadd.f32 %v6044_v43, %v6043_v60  ;;  %v5038_v32 = vld [vmem:[%s13599_s0 + $0xe8] sm:$0xff] }
 0x97b   : > { %v5940_v34 = vadd.f32 %v5939_v25, %v5938_v18  ;;  %v6046_v45 = vsel %vm5905_vm6, %v5840_v20, 0.0  ;;  %v6734_v50 = vrot.slane %v13168_v28, %v14994_v5  ;;  %v7040_v54 = vrot.slane %v13179_v29, %v14974_v24  ;;  %v5039_v29 = vld [vmem:[%s13599_s0 + $0xf0] sm:$0xff] }
 0x97c   : > { %v13278_v12 = vpop.permute.xlu0 %5764  ;;  %v6187_v18 = vadd.f32 %v6186_v8, %v6185_v61  ;;  %v7036_v39 = vsel %vm14997_vm4, %v7035_v48, %v7031_v33  ;;  %v6079_v44 = vsel %vm5905_vm6, %v5854_v9, 0.0  ;;  %v5855_v57 = vmul.f32 %v13195_v55, %v5087_v21  ;;  %v5115_v33 = vld [vmem:[%s13599_s0 + $0x350] sm:$0xff] }
 0x97d   : > { %v13188_v37 = vpop.permute.xlu1 %5594  ;;  %v6809_v22 = vsel %vm2671_vm0, %v6808_v14, %v6804_v35  ;;  %v6188_v56 = vsel %vm5905_vm6, %v5901_v15, 0.0  ;;  %v5821_v28 = vmul.f32 %v13159_v41, %v5053_v26  ;;  %v6047_v13 = vadd.f32 %v6046_v45, %v6045_v16 }
 0x97e   : > { %v5941_v59 = vrot.slane %v5940_v34, 1  ;;  %v6110_v20 = vsel %vm5905_vm6, %v5867_v51, 0.0  ;;  %v6813_v61 = vrot.slane %v13195_v55, %v14994_v5  ;;  %v5806_v35 = vmul.f32 %v13176_v36, %v5038_v32 }
 0x97f   : > { %v6080_v48 = vadd.f32 %v6079_v44, %v6078_v0  ;;  %v6503_v9 = vsel %vm2685_vm2, %v6502_v49, %v6498_v63  ;;  %v6735_v43 = vsel %vm2678_vm1, %v6734_v50, %v6730_v23  ;;  %v7041_v60 = vsel %vm2664_vm15, %v7040_v54, %v7036_v39  ;;  %v5134_v23 = vld [vmem:[%s13599_s0 + $0x3e8] sm:$0xff] }
 0x980   : > { %v13322_v31 = vpop.permute.xlu0 %5689  ;;  %v6189_v8 = vadd.f32 %v6188_v56, %v6187_v18  ;;  %v6081_v14 = vsel %vm5905_vm6, %v5855_v57, 0.0  ;;  %v6645_v55 = vrot.slane %v13159_v41, %v14974_v24  ;;  %v13332_v21 = vadd.f32 %v6110_v20, %v13107_v3  ;;  %v5040_v18 = vld [vmem:[%s13599_s0 + $0xf8] sm:$0xff] }
 0x981   : > { %v13203_v2 = vpop.permute.xlu1 %5364  ;;  %v6003_v51 = vsel %vm5905_vm6, %v5821_v28, 0.0  ;;  %v6048_v0 = vrot.slane %v6047_v13, 4  ;;  %v5883_v63 = vmul.f32 %v13171_v30, %v5115_v33  ;;  %v13341_v45 = vadd.f32 %v5941_v59, %v5940_v34  ;;  %v5054_v34 = vld [vmem:[%s13599_s0 + $0x168] sm:$0xff]  ;;  %v5135_v33 = vld [vmem:[%s13599_s0 + $0x3f0] sm:$0xff] }
 0x982   : > { %v13344_v41 = vsel %vm2678_vm1, %v6813_v61, %v6809_v22  ;;  %v5968_v49 = vsel %vm5905_vm6, %v5806_v35, 0.0  ;;  %v6571_v3 = vrot.slane %v13176_v36, %v14992_v47  ;;  %v13349_v16 = vadd.f32 %v6081_v14, %v6080_v48 }
 0x983   : > { %v6739_v50 = vrot.slane %v13232_v7, %v14996_v46  ;;  %v6951_v54 = vrot.slane %v13171_v30, %v14946_v62  ;;  %v6004_v36 = vadd.f32 %v6003_v51, %v13119_v53  ;;  %v6646_v39 = vsel %vm2664_vm15, %v6645_v55, %v13117_v19  ;;  %v5055_v53 = vld [vmem:[%s13599_s0 + $0x170] sm:$0xff] }
 0x984   : > { %v5902_v7 = vmul.f32 %v13278_v12, %v5134_v23  ;;  %v13367_v44 = vpop.permute.xlu0 %5769  ;;  %v6049_v30 = vadd.f32 %v6048_v0, %v6047_v13  ;;  %v6147_v57 = vsel %vm5905_vm6, %v5883_v63, 0.0  ;;  %v5969_v22 = vadd.f32 %v5968_v49, %v13145_v42  ;;  %v5100_v42 = vld [vmem:[%s13599_s0 + $0x2d8] sm:$0xff]  ;;  %v5119_v55 = vld [vmem:[%s13599_s0 + $0x370] sm:$0xff] }
 0x985   : > { %v6572_v19 = vsel %vm2671_vm0, %v6571_v3, %v13143_v52  ;;  %v5822_v28 = vmul.f32 %v13203_v2, %v5054_v34  ;;  %v6740_v59 = vsel %vm2685_vm2, %v6739_v50, %v6735_v43  ;;  %v13398_v14 = vadd.f32 %v6147_v57, %v13138_v1  ;;  %v5136_v3 = vld [vmem:[%s13599_s0 + $0x3f8] sm:$0xff] }
 0x986   : > { %v13224_v10 = vpop.permute.xlu1 %5674  ;;  %v6190_v52 = vsel %vm5905_vm6, %v5902_v7, 0.0  ;;  %v6050_v43 = vrot.slane %v6049_v30, 2  ;;  %v5868_v23 = vmul.f32 %v13188_v37, %v5100_v42  ;;  %v6650_v1 = vrot.slane %v13203_v2, %v14992_v47 }
 0x987   : > { %v6005_v49 = vsel %vm5905_vm6, %v5822_v28, 0.0  ;;  %v6971_v2 = vrot.slane %v13322_v31, %v14994_v5  ;;  %v6877_v7 = vrot.slane %v13188_v37, %v14960_v17  ;;  %7859 = vrcp.f32 %v13215_v27 }
 0x988   : > { %v13416_v50 = vpop.permute.xlu0 %5774  ;;  %v6006_v57 = vadd.f32 %v6005_v49, %v6004_v36  ;;  %v5101_v36 = vld [vmem:[%s13599_s0 + $0x2e0] sm:$0xff] }
 0x98a   : > { %v13258_v58 = vpop.permute.xlu1 %5289 }
 0x98b   : > { %v5807_v15 = vmul.f32 %v13258_v58, %v5039_v29  ;;  %v6576_v32 = vrot.slane %v13258_v58, %v14994_v5  ;;  %v7045_v58 = vrot.slane %v13278_v12, %v14992_v47  ;;  %v13384_v12 = vsel %vm14998_vm11, %v6951_v54, %v13129_v4 }
 0x98c   : > { %v6191_v54 = vadd.f32 %v6190_v52, %v6189_v8 }
 0x98d   : > { %v5970_v62 = vsel %vm5905_vm6, %v5807_v15, 0.0  ;;  %v6577_v61 = vsel %vm2678_vm1, %v6576_v32, %v6572_v19  ;;  %v13407_v63 = vsel %vm2671_vm0, %v7045_v58, %v7041_v60  ;;  %v5056_v32 = vld [vmem:[%s13599_s0 + $0x178] sm:$0xff]  ;;  %v6651_v19 = vsel %vm2671_vm0, %v6650_v1, %v6646_v39 }
 0x98e   : > { %v13287_v38 = vpop.permute.xlu1 %5599  ;;  %v5971_v20 = vadd.f32 %v5970_v62, %v5969_v22  ;;  %v6051_v62 = vadd.f32 %v6050_v43, %v6049_v30  ;;  %v5116_v58 = vld [vmem:[%s13599_s0 + $0x358] sm:$0xff] }
 0x992   : > { %v13313_v25 = vpop.permute.xlu1 %5369 }
 0x993   : > { %v5823_v35 = vmul.f32 %v13313_v25, %v5055_v53  ;;  %v6655_v60 = vrot.slane %v13313_v25, %v14994_v5  ;;  %v5904_v25 = vmul.f32 %v13416_v50, %v5136_v3  ;;  %v6956_v3 = vrot.slane %v13224_v10, %v14960_v17 }
 0x994   : > { %v6882_v17 = vrot.slane %v13287_v38, %v14974_v24 }
 0x995   : > { %v6007_v8 = vsel %vm5905_vm6, %v5823_v35, 0.0  ;;  %v5117_v35 = vld [vmem:[%s13599_s0 + $0x360] sm:$0xff] }
 0x996   : > { %v13339_v26 = vpop.permute.xlu1 %5679  ;;  %v6008_v30 = vadd.f32 %v6007_v8, %v6006_v57  ;;  %v5103_v57 = vld [vmem:[%s13599_s0 + $0x2f0] sm:$0xff] }
 0x99c   : > { %v5295_v56 = vpop.permute.xlu1 %5294 }
 0x99d   : > { %v5808_v29 = vmul.f32 %v5295_v56, %v5040_v18  ;;  %v6581_v13 = vrot.slane %v5295_v56, %v14996_v46  ;;  %v13425_v18 = vmul.f32 %v13322_v31, %v5119_v55  ;;  %v6112_v56 = vsel %vm5905_vm6, %v5868_v23, 0.0 }
 0x99e   : > { %v5869_v23 = vmul.f32 %v13287_v38, %v5101_v36  ;;  %v6113_v1 = vadd.f32 %v6112_v56, %v13332_v21  ;;  %v5118_v21 = vld [vmem:[%s13599_s0 + $0x368] sm:$0xff]  ;;  %v6957_v38 = vsel %vm15002_vm5, %v6956_v3, %v13384_v12 }
 0x99f   : > { %v5972_v48 = vsel %vm5905_vm6, %v5808_v29, 0.0  ;;  %v6582_v4 = vsel %vm2685_vm2, %v6581_v13, %v6577_v61  ;;  %v6656_v13 = vsel %vm2678_vm1, %v6655_v60, %v6651_v19  ;;  %v5884_v61 = vmul.f32 %v13224_v10, %v5116_v58  ;;  %v5102_v60 = vld [vmem:[%s13599_s0 + $0x2e8] sm:$0xff] }
 0x9a0   : > { %v5973_v15 = vadd.f32 %v5972_v48, %v5971_v20  ;;  %v7057_v51 = vsel %vm14999_vm13, %v6582_v4, %v6503_v9  ;;  %v13404_v0 = vpop.permute.xlu1 %5604  ;;  %v5903_v9 = vmul.f32 %v13367_v44, %v5135_v33  ;;  %v6878_v20 = vsel %vm15000_vm12, %v6877_v7, %v13157_v11 }
 0x9a1   : > { %v6194_v33 = vsel %vm5905_vm6, %v5904_v25, 0.0  ;;  %v6961_v10 = vrot.slane %v13339_v26, %v14974_v24  ;;  %v5870_v56 = vmul.f32 %v13404_v0, %v5102_v60  ;;  %v6883_v12 = vsel %vm2664_vm15, %v6882_v17, %v6878_v20  ;;  %v5104_v20 = vld [vmem:[%s13599_s0 + $0x2f8] sm:$0xff] }
 0x9a2   : > { %v5974_v34 = vrot.slane %v5973_v15, 4  ;;  %v6192_v37 = vsel %vm5905_vm6, %v5903_v9, 0.0 }
 0x9a3   : > { %v6193_v11 = vadd.f32 %v6192_v37, %v6191_v54  ;;  %v6149_v54 = vsel %vm5905_vm6, %v5884_v61, 0.0  ;;  %v6887_v61 = vrot.slane %v13404_v0, %v14992_v47 }
 0x9a4   : > { %v5975_v22 = vadd.f32 %v5974_v34, %v5973_v15  ;;  %v5375_v53 = vpop.permute.xlu1 %5374  ;;  %v6052_v15 = vrot.slane %v6051_v62, 1 }
 0x9a5   : > { %v5824_v28 = vmul.f32 %v5375_v53, %v5056_v32  ;;  %v6660_v29 = vrot.slane %v5375_v53, %v14996_v46  ;;  %v13466_v32 = vadd.f32 %v6194_v33, %v6193_v11  ;;  %v6114_v53 = vsel %vm5905_vm6, %v5869_v23, 0.0 }
 0x9a6   : > { %v5976_v42 = vrot.slane %v5975_v22, 2  ;;  %v6053_v58 = vadd.f32 %v6052_v15, %v6051_v62  ;;  %v5088_v62 = vld [vmem:[%s13599_s0 + $0x278] sm:$0xff]  ;;  %v6115_v36 = vadd.f32 %v6114_v53, %v6113_v1  ;;  %v6888_v60 = vsel %vm2671_vm0, %v6887_v61, %v6883_v12 }
 0x9a7   : > { %v6009_v39 = vsel %vm5905_vm6, %v5824_v28, 0.0  ;;  %v6661_v52 = vsel %vm2685_vm2, %v6660_v29, %v6656_v13  ;;  %v6196_v28 = vrot.slane %v13466_v32, 4 }
 0x9a8   : > { %v5977_v48 = vadd.f32 %v5976_v42, %v5975_v22  ;;  %v6010_v4 = vadd.f32 %v6009_v39, %v6008_v30  ;;  %v7058_v43 = vsel %vm15001_vm10, %v6661_v52, %v7057_v51  ;;  %v13454_v55 = vpop.permute.xlu1 %5684  ;;  %v7050_v51 = vrot.slane %v13367_v44, %v14994_v5 }
 0x9a9   : > { %v7059_v49 = vsel %vm3244_vm9, %v6740_v59, %v7058_v43  ;;  %v5885_v59 = vmul.f32 %v13339_v26, %v5117_v35  ;;  %v7055_v22 = vrot.slane %v13416_v50, %v14996_v46  ;;  %v5886_v19 = vmul.f32 %v13454_v55, %v5118_v21 }
 0x9aa   : > { %v5978_v9 = vrot.slane %v5977_v48, 1  ;;  %v6011_v34 = vrot.slane %v6010_v4, 4  ;;  %v6150_v50 = vadd.f32 %v6149_v54, %v13398_v14  ;;  %v6962_v30 = vsel %vm2664_vm15, %v6961_v10, %v6957_v38  ;;  %vm15004_vm15 = vmmov %vm15001_vm10 }
 0x9ab   : > { %v6151_v29 = vsel %vm5905_vm6, %v5885_v59, 0.0  ;;  %v6116_v42 = vsel %vm5905_vm6, %v5870_v56, 0.0  ;;  %v6153_v35 = vsel %vm5905_vm6, %v5886_v19, 0.0  ;;  %v7051_v38 = vsel %vm2678_vm1, %v7050_v51, %v13407_v63 }
 0x9ac   : > { %v5979_v7 = vadd.f32 %v5978_v9, %v5977_v48  ;;  %v6012_v8 = vadd.f32 %v6011_v34, %v6010_v4  ;;  %v5610_v25 = vpop.permute.xlu1 %5609  ;;  %v6152_v33 = vadd.f32 %v6151_v29, %v6150_v50  ;;  %v6966_v4 = vrot.slane %v13454_v55, %v14992_v47 }
 0x9ad   : > { %v5871_v37 = vmul.f32 %v5610_v25, %v5103_v57  ;;  %v6892_v48 = vrot.slane %v5610_v25, %v14994_v5  ;;  %v6117_v11 = vadd.f32 %v6116_v42, %v6115_v36  ;;  %v7056_v29 = vsel %vm2685_vm2, %v7055_v22, %v7051_v38 }
 0x9ae   : > { %v6210_v24 = vsel %vm15003_vm7, %v5979_v7, %v13341_v45  ;;  %v6013_v26 = vrot.slane %v6012_v8, 2  ;;  %v6154_v34 = vadd.f32 %v6153_v35, %v6152_v33 }
 0x9af   : > { %v6118_v43 = vsel %vm5905_vm6, %v5871_v37, 0.0  ;;  %v6893_v21 = vsel %vm2678_vm1, %v6892_v48, %v6888_v60 }
 0x9b0   : > { %v6014_v45 = vadd.f32 %v6013_v26, %v6012_v8  ;;  %v5535_v13 = vpop.permute.xlu1 %5534  ;;  %v6119_v59 = vadd.f32 %v6118_v43, %v6117_v11  ;;  %v6155_v8 = vsel %vm5905_vm6, %v13425_v18, 0.0 }
 0x9b1   : > { %v5856_v39 = vmul.f32 %v5535_v13, %v5088_v62  ;;  %v6818_v52 = vrot.slane %v5535_v13, %v14996_v46  ;;  %v6156_v18 = vadd.f32 %v6155_v8, %v6154_v34 }
 0x9b2   : > { %v6015_v14 = vrot.slane %v6014_v45, 1 }
 0x9b3   : > { %v6083_v0 = vsel %vm5905_vm6, %v5856_v39, 0.0  ;;  %v6819_v15 = vsel %vm2685_vm2, %v6818_v52, %v13344_v41  ;;  %v5120_v41 = vld [vmem:[%s13599_s0 + $0x378] sm:$0xff] }
 0x9b4   : > { %v6016_v23 = vadd.f32 %v6015_v14, %v6014_v45  ;;  %v6084_v1 = vadd.f32 %v6083_v0, %v13349_v16  ;;  %v7060_v3 = vsel %vm3246_vm14, %v6819_v15, %v7059_v49  ;;  %v5615_v9 = vpop.permute.xlu1 %5614  ;;  %v6967_v16 = vsel %vm2671_vm0, %v6966_v4, %v6962_v30  ;;  %v7860_v4 = vpop.eup %7859 }
 0x9b5   : > { %v5872_v54 = vmul.f32 %v5615_v9, %v5104_v20  ;;  %v6897_v47 = vrot.slane %v5615_v9, %v14996_v46  ;;  %v6972_v50 = vsel %vm2678_vm1, %v6971_v2, %v6967_v16  ;;  %vm15006_vm0 = vcmask 1047559  }
 0x9b6   : > { %v6211_v55 = vsel %vm15004_vm15, %v6016_v23, %v6210_v24  ;;  %v6085_v17 = vrot.slane %v6084_v1, 4  ;;  %v15009_v23 = vld [vmem:[#allocation133_spill] sm:$0xff] }
 0x9b7   : > { %v6212_v49 = vsel %vm3244_vm9, %v6053_v58, %v6211_v55  ;;  %v6120_v10 = vsel %vm5905_vm6, %v5872_v54, 0.0  ;;  %v6898_v7 = vsel %vm2685_vm2, %v6897_v47, %v6893_v21  ;;  %v6197_v58 = vadd.f32 %v6196_v28, %v13466_v32 }
 0x9b8   : > { %v6086_v57 = vadd.f32 %v6085_v17, %v6084_v1  ;;  %v6121_v25 = vadd.f32 %v6120_v10, %v6119_v59  ;;  %v7061_v53 = vsel %vm3248_vm3, %v6898_v7, %v7060_v3  ;;  %v5695_v56 = vpop.permute.xlu1 %5694  ;;  %vm15005_vm9 = vcmask 1046534   ;;  %v6219_v3 = vld [vmem:[%s565_s21] sm:$0xff] }
 0x9b9   : > { %v5888_v24 = vmul.f32 %v5695_v56, %v5120_v41  ;;  %v6976_v26 = vrot.slane %v5695_v56, %v14996_v46  ;;  %v6198_v37 = vrot.slane %v6197_v58, 2  ;;  %vm15007_vm1 = vmmov %vm15005_vm9  ;;  %v703_v1 = vrot.slane %v13134_v6, %v15009_v23  ;;  %v6335_v56 = vld [vmem:[%s13610_s11] sm:$0xff] }
 0x9ba   : > { %v6087_v19 = vrot.slane %v6086_v57, 2  ;;  %v6122_v62 = vrot.slane %v6121_v25, 4 }
 0x9bb   : > { %v6157_v44 = vsel %vm5905_vm6, %v5888_v24, 0.0  ;;  %v6977_v63 = vsel %vm2685_vm2, %v6976_v26, %v6972_v50  ;;  %v6199_v45 = vadd.f32 %v6198_v37, %v6197_v58  ;;  %vm15008_vm2 = vmmov %vm15006_vm0 }
 0x9bc   : > { %v6088_v51 = vadd.f32 %v6087_v19, %v6086_v57  ;;  %v6123_v32 = vadd.f32 %v6122_v62, %v6121_v25  ;;  %v6158_v28 = vadd.f32 %v6157_v44, %v6156_v18  ;;  %v7062_v46 = vsel %vm15005_vm9, %v6977_v63, %v7061_v53  ;;  %v6338_v57 = vld [vmem:[%s13610_s11 + $0x18] sm:$0xff]  ;;  %v6337_v25 = vld [vmem:[%s13610_s11 + $0x10] sm:$0xff]  ;;  %v6336_v53 = vld [vmem:[%s13610_s11 + $0x8] sm:$0xff] }
 0x9bd   : > { %v7063_v36 = vsel %vm15006_vm0, %v7056_v29, %v7062_v46  ;;  %v6200_v27 = vrot.slane %v6199_v45, 1  ;;  %7295 = vmatpush3.msra.mxu1 %v6338_v57 }
 0x9be   : > { %v6089_v12 = vrot.slane %v6088_v51, 1  ;;  %v6124_v5 = vrot.slane %v6123_v32, 2  ;;  %v6159_v31 = vrot.slane %v6158_v28, 4  ;;  %7065 = vst [vmem:[%s579_s27] sm:$0xff] %v7063_v36  ;;  %7296 = vmatprep.subr.mxu1 %v14981_v40 }
 0x9bf   : > { %v6201_v48 = vadd.f32 %v6200_v27, %v6199_v45  ;;  %7297 = vmatpush3.msra.mxu1 %v6337_v25 }
 0x9c0   : > { %v6090_v2 = vadd.f32 %v6089_v12, %v6088_v51  ;;  %v6125_v22 = vadd.f32 %v6124_v5, %v6123_v32  ;;  %v6160_v30 = vadd.f32 %v6159_v31, %v6158_v28  ;;  %7298 = vmatprep.subr.mxu1 %v14981_v40 }
 0x9c1   : > { %7299 = vmatpush3.msra.mxu1 %v6336_v53 }
 0x9c2   : > { %v6213_v13 = vsel %vm3246_vm14, %v6090_v2, %v6212_v49  ;;  %v6126_v42 = vrot.slane %v6125_v22, 1  ;;  %v6161_v61 = vrot.slane %v6160_v30, 2  ;;  %v6306_v49 = vpop.permute.xlu0 %6305  ;;  %7300 = vmatprep.subr.mxu1 %v14981_v40  ;;  %v7248_v40 = vld [vmem:[%s13611_s12] ss:$0 sm:$0xff] }
 0x9c3   : > { %7301 = vmatpush3.msra.mxu1 %v6335_v56 }
 0x9c4   : > { %v6127_v39 = vadd.f32 %v6126_v42, %v6125_v22  ;;  %v6162_v52 = vadd.f32 %v6161_v61, %v6160_v30 }
 0x9c6   : > { %v6214_v33 = vsel %vm3248_vm3, %v6127_v39, %v6213_v13  ;;  %v6163_v14 = vrot.slane %v6162_v52, 1  ;;  %vm15010_vm3 = vcmask 261120  }
 0x9c7   : > { %vm15011_vm14 = vmmov %vm15010_vm3 }
 0x9c8   : > { %v6164_v35 = vadd.f32 %v6163_v14, %v6162_v52 }
 0x9ca   : > { %v6215_v20 = vsel %vm15007_vm1, %v6164_v35, %v6214_v33 }
 0x9cb   : > { %v6216_v43 = vsel %vm15008_vm2, %v6201_v48, %v6215_v20 }
 0x9cc   : > { %v6218_v0 = vmul.f32 %v7860_v4, %v6216_v43 }
 0x9ce   : > { %7292 = vmatmul.mubr.msk.f32.vlgmr.msra.gmra.mxu0 %vm5905_vm6, %v6218_v0  ;;  %vm15012_vm6 = vmmov %vm15010_vm3 }
 0xa0a   : > { %v848_v15 = vpop.f32.mrf.mxu1 }
 0xa0b   : > { %v849_v9 = vadd.f32 %v848_v15, %v703_v1 }
 0xa0c   : > { %v7286_v11 = vpop.f32.mrf.mxu1 }
 0xa8e   : > { %v6291_v60 = vpop.f32.mrf.mxu0 }
 0xa8f   : > { %v6295_v34 = vadd.f32 %v6291_v60, %v6219_v3 }
 0xa90   : > { %v7293_v54 = vpop.f32.mrf.mxu0 }
 0xa91   : > { %v6296_v47 = vadd.f32 %v6295_v34, %v849_v9 }
 0xa93   : > { %7861 = vtanh.f32 %v6296_v47  ;;  %v7247_v59 = vmul.f32 -1.442695, %v6296_v47 }
 0xa95   : > { %7863 = vpow2.f32 %v7247_v59 }
 0xaa0   : > { %v7862_v55 = vpop.eup %7861 }
 0xaa1   : > { %6310 = vrot.lane.b32.xlu1 %v7862_v55, %s7908_s25 }
 0xaa2   : > { %v7864_v21 = vpop.eup %7863 }
 0xaa3   : > { %v6300_v17 = vadd.f32 1.0, %v7864_v21 }
 0xaa5   : > { %7865 = vrcp.f32 %v6300_v17 }
 0xab2   : > { %v7866_v6 = vpop.eup %7865 }
 0xab3   : > { %v6308_v10 = vmul.f32 %v7866_v6, %v6306_v49 }
 0xb13   : > { %v6311_v41 = vpop.permute.xlu1 %6310 }
 0xb14   : > { %v6313_v16 = vmul.f32 %v7866_v6, %v6311_v41 }
 0xb16   : > { %6315 = vrot.lane.b32.xlu1 %v6313_v16, %s7907_s26 }
 0xb88   : > { %v6316_v7 = vpop.permute.xlu1 %6315 }
 0xb89   : > { %v6318_v8 = vadd.f32 %v6316_v7, %v6308_v10 }
 0xb8b   : > { %7867 = vtanh.f32 %v6318_v8 }
 0xb98   : > { %v7868_v38 = vpop.eup %7867 }
 0xb99   : > { %6321 = vrot.lane.b32.xlu0 %v7868_v38, %s7908_s25 }
 0xb9d   : > { %6331 = vrot.lane.b32.xlu0 %v6318_v8, %s7909_s29 }
 0xc0b   : > { %v6322_v58 = vpop.permute.xlu0 %6321 }
 0xc0c   : > { %v6324_v24 = vmul.f32 %v7866_v6, %v6322_v58 }
 0xc0e   : > { %6326 = vrot.lane.b32.xlu1 %v6324_v24, %s7907_s26 }
 0xc0f   : > { %v6332_v26 = vpop.permute.xlu0 %6331 }
 0xc10   : > { %6334 = vst.msk [vmem:[#allocation3] sm:$0xff] %vm15010_vm3, %v6332_v26 }
 0xc80   : > { %v6327_v19 = vpop.permute.xlu1 %6326 }
 0xc81   : > { %6329 = vst.msk [vmem:[#allocation2] sm:$0xff] %vm15011_vm14, %v6327_v19  ;;  %7303 = vmatmul.mubr.msk.f32.vlgmr.msra.gmra.mxu1 %vm15012_vm6, %v6327_v19 }
 0xd41   : > { %v6414_v62 = vpop.f32.mrf.mxu1 }
 0xd42   : > { %v6415_v18 = vadd.f32 %v7248_v40, %v6414_v62 }
 0xd43   : > { %v7304_v50 = vpop.f32.mrf.mxu1 }
 0xd44   : > { %v7250_v29 = vmul.f32 -1.442695, %v6415_v18 }
 0xd46   : > { %7869 = vpow2.f32 %v7250_v29 }
 0xd53   : > { %v7870_v44 = vpop.eup %7869 }
 0xd54   : > { %v6421_v63 = vadd.f32 1.0, %v7870_v44 }
 0xd56   : > { %7871 = vrcp.f32 %v6421_v63 }
 0xd63   : > { %v7872_v51 = vpop.eup %7871 }
 0xd64   : > { %6424 = vst [vmem:[%s572_s24] sm:$0xff] %v7872_v51 }
 0xd65 PF: > { %s25_s15 = sadd.s32 1, %s7898_s15   ;;  %s15013_s29 = smov %s7894_s30 }
 0xd66   : > { %p22_p6 = scmp.ge.s32.totalorder %s25_s15, 10   ;;  %s15014_s30 = smov %s15016_s16 }
 0xd68   :  { %24 = sbr.rel (!%p22_p6) target bundleno = 2 (0x2), region = 127 }

</bundles_post_ra>
